<compile_context>
chip_gen: v5e
topology: v5e:2x2
jax: 0.10.0
libtpu: 0.0.40
codegen_flags: <defaults>
</compile_context>

<pallas_src>
import math

import jax
import jax.numpy as jnp
from jax.experimental import pallas as pl
from jax.experimental.pallas import tpu as pltpu


def _round_up(x, m):
    return ((x + m - 1) // m) * m


def _ffn_kernel(x_ref, w1_ref, b1_ref, w2_ref, b2_ref, o_ref, acc_ref):
    """One (row-tile, d_ff-chunk) step of y = relu(x @ W1 + b1) @ W2 + b2."""
    f = pl.program_id(1)

    @pl.when(f == 0)
    def _():
        acc_ref[...] = jnp.zeros_like(acc_ref)

    # fc1 on the MXU (bf16 operands, f32 accumulate), bias + ReLU in f32.
    h = jnp.dot(x_ref[...], w1_ref[...], preferred_element_type=jnp.float32)
    h = jnp.maximum(h + b1_ref[...], 0.0)

    # fc2 partial product for this d_ff chunk, accumulated in f32 VMEM scratch.
    acc_ref[...] += jnp.dot(h.astype(w2_ref.dtype), w2_ref[...],
                            preferred_element_type=jnp.float32)

    @pl.when(f == pl.num_programs(1) - 1)
    def _():
        o_ref[...] = (acc_ref[...] + b2_ref[...]).astype(o_ref.dtype)


def position_wise_feed_forward(x, w1, b1, w2, b2, *, tm=256, tff=512,
                               compute_dtype=jnp.bfloat16,
                               weight_resident_budget=28 * 1024 * 1024):
    """x: (B, S, d_model); w1: (d_model, d_ff); w2: (d_ff, d_model).

    Weights are stored pre-transposed as (in_features, out_features), so the
    kernel computes plain x @ W (+ b), matching PyTorch nn.Linear semantics.
    """
    B, S, d_model = x.shape
    d_ff = w1.shape[1]
    out_dtype = x.dtype
    M = B * S

    cbytes = jnp.dtype(compute_dtype).itemsize
    obytes = jnp.dtype(out_dtype).itemsize
    pack = 8 * (4 // cbytes)  # sublane packing: 8 for f32, 16 for bf16

    # --- Row tiling: big tiles for the MXU, shrink for tiny inputs, pad M. ---
    tm = max(pack, min(tm, _round_up(M, pack)))
    Mp = _round_up(M, tm)

    # --- d_ff tiling: keep weights resident when they comfortably fit VMEM,
    #     otherwise stream tff-wide chunks and accumulate. -------------------
    dffp = _round_up(d_ff, 128)
    weight_bytes_db = 2 * (2 * d_model * dffp) * cbytes  # W1+W2, double-buffered
    if weight_bytes_db <= weight_resident_budget:
        tff = dffp
    else:
        tff = min(dffp, _round_up(tff, 128))
        dffp = _round_up(dffp, tff)
    n_f = dffp // tff

    # --- Prepare (padded, casted) operands. ---------------------------------
    x2d = x.reshape(M, d_model).astype(compute_dtype)
    if Mp != M:
        x2d = jnp.pad(x2d, ((0, Mp - M), (0, 0)))
    w1c = w1.astype(compute_dtype)
    w2c = w2.astype(compute_dtype)
    b1f = b1.astype(jnp.float32)
    if dffp != d_ff:
        w1c = jnp.pad(w1c, ((0, 0), (0, dffp - d_ff)))
        w2c = jnp.pad(w2c, ((0, dffp - d_ff), (0, 0)))
        b1f = jnp.pad(b1f, ((0, dffp - d_ff),))
    b1_2d = b1f.reshape(1, dffp)
    b2_2d = b2.astype(jnp.float32).reshape(1, d_model)

    # --- BlockSpecs (streamed weights get an extra pipeline buffer). --------
    if n_f > 1:
        w1_spec = pl.BlockSpec((d_model, tff), lambda i, f: (0, f),
                               pipeline_mode=pl.Buffered(3))
        w2_spec = pl.BlockSpec((tff, d_model), lambda i, f: (f, 0),
                               pipeline_mode=pl.Buffered(3))
        n_wbuf = 3
    else:
        w1_spec = pl.BlockSpec((d_model, tff), lambda i, f: (0, f))
        w2_spec = pl.BlockSpec((tff, d_model), lambda i, f: (f, 0))
        n_wbuf = 2

    # --- VMEM budget + cost estimate. ---------------------------------------
    vmem_est = (2 * tm * d_model * cbytes               # x tiles
                + 2 * tm * d_model * obytes             # out tiles
                + n_wbuf * 2 * d_model * tff * cbytes   # W1 + W2 tiles
                + 2 * (tff + d_model) * 4               # biases
                + tm * d_model * 4)                     # f32 accumulator
    vmem_limit = int(min(64 * 1024 * 1024,
                         max(32 * 1024 * 1024, 2 * vmem_est)))

    cost = pl.CostEstimate(
        flops=4 * M * d_model * d_ff,                   # two matmuls: 2*M*K*N each
        transcendentals=0,
        bytes_accessed=(x2d.size * cbytes + w1c.size * cbytes
                        + w2c.size * cbytes + b1_2d.size * 4 + b2_2d.size * 4
                        + Mp * d_model * obytes))

    out2d = pl.pallas_call(
        _ffn_kernel,
        out_shape=jax.ShapeDtypeStruct((Mp, d_model), out_dtype),
        grid_spec=pltpu.PrefetchScalarGridSpec(
            num_scalar_prefetch=0,
            grid=(Mp // tm, n_f),
            in_specs=[
                pl.BlockSpec((tm, d_model), lambda i, f: (i, 0)),   # x rows
                w1_spec,                                            # W1 chunk
                pl.BlockSpec((1, tff), lambda i, f: (0, f)),        # b1 chunk
                w2_spec,                                            # W2 chunk
                pl.BlockSpec((1, d_model), lambda i, f: (0, 0)),    # b2
            ],
            out_specs=pl.BlockSpec((tm, d_model), lambda i, f: (i, 0)),
            scratch_shapes=[pltpu.VMEM((tm, d_model), jnp.float32)],
        ),
        compiler_params=pltpu.CompilerParams(
            dimension_semantics=("parallel", "arbitrary"),
            vmem_limit_bytes=vmem_limit,
        ),
        cost_estimate=cost,
    )(x2d, w1c, b1_2d, w2c, b2_2d)

    return out2d[:M].reshape(B, S, d_model)


def init_params(key, d_model, d_ff, dtype=jnp.float32):
    """Deterministic init matching nn.Linear's U(-1/sqrt(fan_in), 1/sqrt(fan_in))."""
    k1, k2, k3, k4 = jax.random.split(key, 4)
    bound1 = 1.0 / math.sqrt(d_model)
    bound2 = 1.0 / math.sqrt(d_ff)
    # stored as (in, out) == W^T relative to PyTorch's (out, in)
    w1 = jax.random.uniform(k1, (d_model, d_ff), dtype, -bound1, bound1)
    b1 = jax.random.uniform(k2, (d_ff,), dtype, -bound1, bound1)
    w2 = jax.random.uniform(k3, (d_ff, d_model), dtype, -bound2, bound2)
    b2 = jax.random.uniform(k4, (d_model,), dtype, -bound2, bound2)
    return w1, b1, w2, b2


def _reference_bf16(x, w1, b1, w2, b2):
    """f32 reference using the same bf16 operand quantization as the kernel."""
    B, S, d_model = x.shape
    xb = x.astype(jnp.bfloat16).astype(jnp.float32).reshape(-1, d_model)
    w1b = w1.astype(jnp.bfloat16).astype(jnp.float32)
    w2b = w2.astype(jnp.bfloat16).astype(jnp.float32)
    h = jnp.maximum(xb @ w1b + b1, 0.0)
    h = h.astype(jnp.bfloat16).astype(jnp.float32)
    return (h @ w2b + b2).reshape(B, S, d_model)


if __name__ == "__main__":
    # Small shapes, module defaults for features: d_model=512, d_ff=2048.
    # S=9 deliberately exercises the row-padding path.
    B, S = 2, 9
    d_model, d_ff = 512, 2048

    key = jax.random.PRNGKey(0)
    kx, kp = jax.random.split(key)
    x = jax.random.normal(kx, (B, S, d_model), jnp.float32)
    w1, b1, w2, b2 = init_params(kp, d_model, d_ff)

    ref = _reference_bf16(x, w1, b1, w2, b2)

    # Path 1: weights small enough to stay resident (single d_ff step).
    out = position_wise_feed_forward(x, w1, b1, w2, b2)
    out = jax.block_until_ready(out)
    assert out.shape == (B, S, d_model)
    assert jnp.allclose(out, ref, atol=1e-2, rtol=1e-2)

    # Path 2: force the streamed / accumulated d_ff-tiled path (tff=512, 4 steps).
    out_stream = position_wise_feed_forward(
        x, w1, b1, w2, b2, tff=512, weight_resident_budget=0)
    out_stream = jax.block_until_ready(out_stream)
    assert jnp.allclose(out_stream, ref, atol=1e-2, rtol=1e-2)

    print("KERNEL_OK")
</pallas_src>

<mosaic_0001>
module attributes {stable_mosaic.version = 11 : i64} {
  func.func @_ffn_kernel(%arg0: i32, %arg1: i32, %arg2: memref<32x512xbf16, #tpu.memory_space<vmem>>, %arg3: memref<512x2048xbf16, #tpu.memory_space<vmem>>, %arg4: memref<1x2048xf32, #tpu.memory_space<vmem>>, %arg5: memref<2048x512xbf16, #tpu.memory_space<vmem>>, %arg6: memref<1x512xf32, #tpu.memory_space<vmem>>, %arg7: memref<32x512xf32, #tpu.memory_space<vmem>>, %arg8: memref<32x512xf32, #tpu.memory_space<vmem>>) attributes {dimension_semantics = [#tpu.dimension_semantics<parallel>, #tpu.dimension_semantics<arbitrary>], iteration_bounds = array<i64: 1, 1>, scalar_prefetch = 0 : i64, scratch_operands = 1 : i64, tpu.core_type = #tpu.core_type<tc>, window_params = [{transform_indices = @transform_0, window_bounds = array<i64: 32, 512>}, {transform_indices = @transform_1, window_bounds = array<i64: 512, 2048>}, {transform_indices = @transform_2, window_bounds = array<i64: 1, 2048>}, {transform_indices = @transform_3, window_bounds = array<i64: 2048, 512>}, {pipeline_mode = #tpu.pipeline_mode<synchronous>, transform_indices = @transform_4, window_bounds = array<i64: 1, 512>}, {transform_indices = @transform_5, window_bounds = array<i64: 32, 512>}]} {
    %c0_i32 = arith.constant 0 : i32
    %0 = arith.cmpi eq, %arg1, %c0_i32 : i32
    %1 = arith.extui %0 : i1 to i32
    %c0_i32_0 = arith.constant 0 : i32
    %2 = arith.cmpi ne, %1, %c0_i32_0 : i32
    scf.if %2 {
      %cst_16 = arith.constant 0.000000e+00 : f32
      %20 = vector.broadcast %cst_16 : f32 to vector<32x512xf32>
      %c0_17 = arith.constant 0 : index
      %c0_18 = arith.constant 0 : index
      %21 = vector.load %arg8[%c0_17, %c0_18] : memref<32x512xf32, #tpu.memory_space<vmem>>, vector<32x512xf32>
      tpu.vector_store %arg8[%c0_17, %c0_18], %20 {strides = array<i32>} : memref<32x512xf32, #tpu.memory_space<vmem>>, vector<32x512xf32>,
    } else {
    }
    %c0 = arith.constant 0 : index
    %c0_1 = arith.constant 0 : index
    %3 = vector.load %arg2[%c0, %c0_1] : memref<32x512xbf16, #tpu.memory_space<vmem>>, vector<32x512xbf16>
    %c0_2 = arith.constant 0 : index
    %c0_3 = arith.constant 0 : index
    %4 = vector.load %arg3[%c0_2, %c0_3] : memref<512x2048xbf16, #tpu.memory_space<vmem>>, vector<512x2048xbf16>
    %cst = arith.constant dense<0.000000e+00> : vector<32x2048xf32>
    %5 = tpu.matmul %3, %4, %cst {dimension_numbers = #tpu.dot_dimension_numbers<[1], [0], [0], [1], [0, 0, 1, 1], [], []>} : vector<32x512xbf16>, vector<512x2048xbf16>, vector<32x2048xf32> -> vector<32x2048xf32>
    %c0_4 = arith.constant 0 : index
    %c0_5 = arith.constant 0 : index
    %6 = vector.load %arg4[%c0_4, %c0_5] : memref<1x2048xf32, #tpu.memory_space<vmem>>, vector<1x2048xf32>
    %7 = vector.broadcast %6 : vector<1x2048xf32> to vector<32x2048xf32>
    %8 = arith.addf %5, %7 : vector<32x2048xf32>
    %cst_6 = arith.constant 0.000000e+00 : f32
    %9 = vector.broadcast %cst_6 : f32 to vector<32x2048xf32>
    %10 = arith.maximumf %8, %9 : vector<32x2048xf32>
    %c0_7 = arith.constant 0 : index
    %c0_8 = arith.constant 0 : index
    %11 = vector.load %arg8[%c0_7, %c0_8] : memref<32x512xf32, #tpu.memory_space<vmem>>, vector<32x512xf32>
    %12 = arith.truncf %10 : vector<32x2048xf32> to vector<32x2048xbf16>
    %c0_9 = arith.constant 0 : index
    %c0_10 = arith.constant 0 : index
    %13 = vector.load %arg5[%c0_9, %c0_10] : memref<2048x512xbf16, #tpu.memory_space<vmem>>, vector<2048x512xbf16>
    %cst_11 = arith.constant dense<0.000000e+00> : vector<32x512xf32>
    %14 = tpu.matmul %12, %13, %cst_11 {dimension_numbers = #tpu.dot_dimension_numbers<[1], [0], [0], [1], [0, 0, 1, 1], [], []>} : vector<32x2048xbf16>, vector<2048x512xbf16>, vector<32x512xf32> -> vector<32x512xf32>
    %15 = arith.addf %11, %14 : vector<32x512xf32>
    %c0_12 = arith.constant 0 : index
    %c0_13 = arith.constant 0 : index
    %16 = vector.load %arg8[%c0_12, %c0_13] : memref<32x512xf32, #tpu.memory_space<vmem>>, vector<32x512xf32>
    tpu.vector_store %arg8[%c0_12, %c0_13], %15 {strides = array<i32>} : memref<32x512xf32, #tpu.memory_space<vmem>>, vector<32x512xf32>,
    %c0_i32_14 = arith.constant 0 : i32
    %17 = arith.cmpi eq, %arg1, %c0_i32_14 : i32
    %18 = arith.extui %17 : i1 to i32
    %c0_i32_15 = arith.constant 0 : i32
    %19 = arith.cmpi ne, %18, %c0_i32_15 : i32
    scf.if %19 {
      %c0_16 = arith.constant 0 : index
      %c0_17 = arith.constant 0 : index
      %20 = vector.load %arg8[%c0_16, %c0_17] : memref<32x512xf32, #tpu.memory_space<vmem>>, vector<32x512xf32>
      %c0_18 = arith.constant 0 : index
      %c0_19 = arith.constant 0 : index
      %21 = vector.load %arg6[%c0_18, %c0_19] : memref<1x512xf32, #tpu.memory_space<vmem>>, vector<1x512xf32>
      %22 = vector.broadcast %21 : vector<1x512xf32> to vector<32x512xf32>
      %23 = arith.addf %20, %22 : vector<32x512xf32>
      %c0_20 = arith.constant 0 : index
      %c0_21 = arith.constant 0 : index
      %24 = vector.load %arg7[%c0_20, %c0_21] : memref<32x512xf32, #tpu.memory_space<vmem>>, vector<32x512xf32>
      tpu.vector_store %arg7[%c0_20, %c0_21], %23 {strides = array<i32>} : memref<32x512xf32, #tpu.memory_space<vmem>>, vector<32x512xf32>,
    } else {
    }
    return
  }
  func.func @transform_0(%arg0: i32, %arg1: i32) -> (i32, i32) {
    %c0_i32 = arith.constant 0 : i32
    %c0_i32_0 = arith.constant 0 : i32
    return %arg0, %c0_i32 : i32, i32
  }
  func.func @transform_1(%arg0: i32, %arg1: i32) -> (i32, i32) {
    %c0_i32 = arith.constant 0 : i32
    %c0_i32_0 = arith.constant 0 : i32
    return %c0_i32, %arg1 : i32, i32
  }
  func.func @transform_2(%arg0: i32, %arg1: i32) -> (i32, i32) {
    %c0_i32 = arith.constant 0 : i32
    %c0_i32_0 = arith.constant 0 : i32
    return %c0_i32, %arg1 : i32, i32
  }
  func.func @transform_3(%arg0: i32, %arg1: i32) -> (i32, i32) {
    %c0_i32 = arith.constant 0 : i32
    %c0_i32_0 = arith.constant 0 : i32
    return %arg1, %c0_i32 : i32, i32
  }
  func.func @transform_4(%arg0: i32, %arg1: i32) -> (i32, i32) {
    %c0_i32 = arith.constant 0 : i32
    %c0_i32_0 = arith.constant 0 : i32
    %c0_i32_1 = arith.constant 0 : i32
    return %c0_i32, %c0_i32_0 : i32, i32
  }
  func.func @transform_5(%arg0: i32, %arg1: i32) -> (i32, i32) {
    %c0_i32 = arith.constant 0 : i32
    %c0_i32_0 = arith.constant 0 : i32
    return %arg0, %c0_i32 : i32, i32
  }
}

</mosaic_0001>

<bundles_post_ra>
// kernel: tpu_custom_call.1
= control target key start
LH: loop header
LB: loop body
LE: loop exit
PB: predicated region body
PF: predicated region fallthrough
CT: control target
= control target key end

     0   :  { %10 = vsyncpa [#allocation4], 0  ;;  %s15389_s0 = inlined_call_operand.hbm [shape: bf16[32,512], index: 0, kind: input, shape index: {}]   ;;  %s15390_s1 = inlined_call_operand.hbm [shape: bf16[512,2048], index: 1, kind: input, shape index: {}]   ;;  %s15391_s2 = inlined_call_operand.hbm [shape: f32[1,2048], index: 2, kind: input, shape index: {}]   ;;  %s15392_s3 = inlined_call_operand.hbm [shape: bf16[2048,512], index: 3, kind: input, shape index: {}]   ;;  %s15393_s4 = inlined_call_operand.hbm [shape: f32[1,512], index: 4, kind: input, shape index: {}]   ;;  %s15394_s5 = inlined_call_operand.hbm [shape: f32[32,512], index: 5, kind: output, shape index: {}]  }
   0x1   :  { %11 = vsyncpa [#allocation7], 0 }
   0x2   :  { %12 = vsyncpa [#allocation10], 0  ;;  %s31_s20 = sshll.u32 %s15390_s1, 4  ;;  %s32_s20 = int_to_ptr.hbm [resolvable:$true] %s31_s20 }
   0x3   :  { %13 = vsyncpa [#allocation5], 0  ;;  %s14331_s21 = smov [#allocation6]   ;;  %s14332_s23 = smov 1024  }
   0x4   :  { %s33_s22 = sshll.u32 %s14331_s21, 4  ;;  %s14333_s24 = smov 64   ;;  %s34_s22 = int_to_ptr.vmem [resolvable:$true] %s33_s22 }
   0x5   :  { %39 = dma.hbm_to_vmem [thread:$0]  %s32_s20, 65536, %s34_s22, [#allocation7], %s14332_s23, %s14332_s23, %s14333_s24  }
   0x6   :  { %s55_s27 = sshll.u32 %s15392_s3, 4  ;;  %s14334_s28 = smov [#allocation9]   ;;  %s56_s27 = int_to_ptr.hbm [resolvable:$true] %s55_s27 }
   0x7   :  { %s57_s29 = sshll.u32 %s14334_s28, 4  ;;  %s18_s7 = sshll.u32 %s15389_s0, 4  ;;  %s58_s29 = int_to_ptr.vmem [resolvable:$true] %s57_s29  ;;  %s19_s7 = int_to_ptr.hbm [resolvable:$true] %s18_s7 }
   0x8   :  { %s14335_s1 = smov 256   ;;  %s14336_s8 = smov 16  }
   0x9   :  { %63 = dma.hbm_to_vmem [thread:$0]  %s56_s27, 65536, %s58_s29, [#allocation10], %s14335_s1, %s14335_s1, %s14336_s8  }
   0xa   :  { %s45_s11 = sshll.u32 %s15391_s2, 4  ;;  %s14337_s12 = smov [#allocation3]   ;;  %s46_s11 = int_to_ptr.hbm [resolvable:$true] %s45_s11 }
   0xb   :  { %s20_s13 = sshll.u32 %s14337_s12, 4  ;;  %s14338_s3 = smov [#allocation8]   ;;  %s21_s13 = int_to_ptr.vmem [resolvable:$true] %s20_s13 }
   0xc   :  { %26 = dma.hbm_to_vmem [thread:$0]  %s19_s7, 1024, %s21_s13, [#allocation4], %s14335_s1, %s14335_s1, %s14336_s8  }
   0xd   :  { %s47_s14 = sshll.u32 %s14338_s3, 4  ;;  %s69_s0 = sshll.u32 %s15393_s4, 4  ;;  %s48_s14 = int_to_ptr.vmem [resolvable:$true] %s47_s14  ;;  %s70_s0 = int_to_ptr.hbm [resolvable:$true] %s69_s0 }
   0xe   :  { %50 = dma.hbm_to_vmem [thread:$0]  %s46_s11, 256, %s48_s14, [#allocation7]  }
   0xf   :  { %s14339_s17 = smov [#allocation11]  }
  0x10   :  { %s71_s18 = sshll.u32 %s14339_s17, 4  ;;  %s72_s18 = int_to_ptr.vmem [resolvable:$true] %s71_s18 }
  0x11   :  { %74 = dma.hbm_to_vmem [thread:$0]  %s70_s0, 64, %s72_s18, [#allocation10]  }
  0x12   :  { %14323 = dma.done.wait [#allocation4], 1024  }
  0x13   :  { %14324 = vsyncadd [#allocation4], 4294966272 }
  0x14   :  { %14325 = dma.done.wait [#allocation7], 65792  }
  0x15   :  { %14326 = vsyncadd [#allocation7], 4294901504 }
  0x16   :  { %14327 = dma.done.wait [#allocation10], 65600  }
  0x17   :  { %14328 = vsyncadd [#allocation10], 4294901696  ;;  %v9483_v0 = vld [vmem:[#allocation6 + $0x380] sm:$0xf]  ;;  %s14340_s2 = smov [#allocation12]   ;;  %s8986_s21 = sshll.u32 %s15394_s5, 4  ;;  %s8987_s21 = int_to_ptr.hbm [resolvable:$true] %s8986_s21 }
  0x18   :  { %v13257_v1 = vld [vmem:[#allocation6 + $0x3bc] sm:$0xf0]  ;;  %s8984_s4 = sshll.u32 %s14340_s2, 4  ;;  %s14341_s22 = smov 512   ;;  %s8985_s4 = int_to_ptr.vmem [resolvable:$true] %s8984_s4 }
  0x19   :  { %v9995_v2 = vld [vmem:[#allocation6 + $0x780] sm:$0xf]  ;;  %v9484_v3 = vor.u32 %v13257_v1, %v9483_v0  ;;  %s14342_s23 = smov 32  }
  0x1a   :  { %v13385_v4 = vld [vmem:[#allocation6 + $0x7bc] sm:$0xf0] }
  0x1b   :  { %v10507_v5 = vld [vmem:[#allocation6 + $0xb80] sm:$0xf]  ;;  %v9996_v7 = vor.u32 %v13385_v4, %v9995_v2  ;;  %3271 = vmatpush.bf16.msra.mxu0 %v9484_v3 }
  0x1c   :  { %v13513_v6 = vld [vmem:[#allocation6 + $0xbbc] sm:$0xf0] }
  0x1d   :  { %v10508_v8 = vor.u32 %v13513_v6, %v10507_v5  ;;  %v11019_v9 = vld [vmem:[#allocation6 + $0xf80] sm:$0xf]  ;;  %3290 = vmatpush.bf16.msra.mxu1 %v9996_v7 }
  0x1e   :  { %v13641_v10 = vld [vmem:[#allocation6 + $0xfbc] sm:$0xf0] }
  0x1f   :  { %v9419_v11 = vld [vmem:[#allocation6 + $0x300] sm:$0xf]  ;;  %v11020_v12 = vor.u32 %v13641_v10, %v11019_v9  ;;  %3309 = vmatpush.bf16.msra.mxu2 %v10508_v8 }
  0x20   :  { %v13241_v13 = vld [vmem:[#allocation6 + $0x33c] sm:$0xf0] }
  0x21   :  { %v9931_v14 = vld [vmem:[#allocation6 + $0x700] sm:$0xf]  ;;  %v9420_v16 = vor.u32 %v13241_v13, %v9419_v11  ;;  %3328 = vmatpush.bf16.msra.mxu3 %v11020_v12 }
  0x22   :  { %v13369_v15 = vld [vmem:[#allocation6 + $0x73c] sm:$0xf0] }
  0x23   :  { %v9932_v17 = vor.u32 %v13369_v15, %v9931_v14  ;;  %v10443_v18 = vld [vmem:[#allocation6 + $0xb00] sm:$0xf]  ;;  %3272 = vmatpush.bf16.msra.mxu0 %v9420_v16 }
  0x24   :  { %v13497_v19 = vld [vmem:[#allocation6 + $0xb3c] sm:$0xf0] }
  0x25   :  { %v10955_v20 = vld [vmem:[#allocation6 + $0xf00] sm:$0xf]  ;;  %v10444_v21 = vor.u32 %v13497_v19, %v10443_v18  ;;  %3291 = vmatpush.bf16.msra.mxu1 %v9932_v17 }
  0x26   :  { %v13625_v22 = vld [vmem:[#allocation6 + $0xf3c] sm:$0xf0] }
  0x27   :  { %v9355_v23 = vld [vmem:[#allocation6 + $0x280] sm:$0xf]  ;;  %v10956_v25 = vor.u32 %v13625_v22, %v10955_v20  ;;  %3310 = vmatpush.bf16.msra.mxu2 %v10444_v21 }
  0x28   :  { %v13225_v24 = vld [vmem:[#allocation6 + $0x2bc] sm:$0xf0] }
  0x29   :  { %v9867_v26 = vld [vmem:[#allocation6 + $0x680] sm:$0xf]  ;;  %v9356_v29 = vor.u32 %v13225_v24, %v9355_v23  ;;  %3329 = vmatpush.bf16.msra.mxu3 %v10956_v25 }
  0x2a   :  { %v13353_v27 = vld [vmem:[#allocation6 + $0x6bc] sm:$0xf0] }
  0x2b   :  { %v10379_v28 = vld [vmem:[#allocation6 + $0xa80] sm:$0xf]  ;;  %v9868_v33 = vor.u32 %v13353_v27, %v9867_v26  ;;  %3273 = vmatpush.bf16.msra.mxu0 %v9356_v29  ;;  %v13131_v29 = vld [vmem:[#allocation3 + $0xc] sm:$0xf0] }
  0x2c   :  { %v13481_v30 = vld [vmem:[#allocation6 + $0xabc] sm:$0xf0] }
  0x2d   :  { %v10891_v31 = vld [vmem:[#allocation6 + $0xe80] sm:$0xf]  ;;  %v10380_v34 = vor.u32 %v13481_v30, %v10379_v28  ;;  %3292 = vmatpush.bf16.msra.mxu1 %v9868_v33  ;;  %v13129_v30 = vld [vmem:[#allocation3 + $0x4] sm:$0xf] }
  0x2e   :  { %v13609_v32 = vld [vmem:[#allocation6 + $0xebc] sm:$0xf0]  ;;  %v10509_v33 = vld [vmem:[#allocation6 + $0xbc0] sm:$0xf0] }
  0x2f   :  { %v9291_v35 = vld [vmem:[#allocation6 + $0x200] sm:$0xf]  ;;  %v10892_v38 = vor.u32 %v13609_v32, %v10891_v31  ;;  %3311 = vmatpush.bf16.msra.mxu2 %v10380_v34  ;;  %v9005_v31 = vld [vmem:[#allocation3 + $0x10] sm:$0xf0]  ;;  %v13505_v32 = vld [vmem:[#allocation6 + $0xb84] sm:$0xf] }
  0x30   :  { %v13209_v36 = vld [vmem:[#allocation6 + $0x23c] sm:$0xf0] }
  0x31   :  { %v9803_v37 = vld [vmem:[#allocation6 + $0x600] sm:$0xf]  ;;  %v9292_v44 = vor.u32 %v13209_v36, %v9291_v35  ;;  %3330 = vmatpush.bf16.msra.mxu3 %v10892_v38  ;;  %v9011_v35 = vld [vmem:[#allocation3 + $0x8] sm:$0xf]  ;;  %v13377_v36 = vld [vmem:[#allocation6 + $0x784] sm:$0xf] }
  0x32   :  { %v13337_v39 = vld [vmem:[#allocation6 + $0x63c] sm:$0xf0] }
  0x33   :  { %v10315_v40 = vld [vmem:[#allocation6 + $0xa00] sm:$0xf]  ;;  %v9804_v45 = vor.u32 %v13337_v39, %v9803_v37  ;;  %3274 = vmatpush.bf16.msra.mxu0 %v9292_v44  ;;  %v9997_v37 = vld [vmem:[#allocation6 + $0x7c0] sm:$0xf0]  ;;  %v10512_v44 = vor.u32 %v13505_v32, %v10509_v33  ;;  %v9027_v32 = vld [vmem:[#allocation3 + $0x28] sm:$0xf] }
  0x34   :  { %v13465_v41 = vld [vmem:[#allocation6 + $0xa3c] sm:$0xf0]  ;;  %v13313_v33 = vld [vmem:[#allocation6 + $0x584] sm:$0xf] }
  0x35   :  { %v10827_v42 = vld [vmem:[#allocation6 + $0xe00] sm:$0xf]  ;;  %v10316_v46 = vor.u32 %v13465_v41, %v10315_v40  ;;  %3293 = vmatpush.bf16.msra.mxu1 %v9804_v45  ;;  %v13132_v40 = vld [vmem:[#allocation3 + $0x14] sm:$0xf0]  ;;  %v13130_v41 = vld [vmem:[#allocation3 + $0xc] sm:$0xf] }
  0x36   :  { %v13593_v43 = vld [vmem:[#allocation6 + $0xe3c] sm:$0xf0]  ;;  %v13249_v45 = vld [vmem:[#allocation6 + $0x384] sm:$0xf] }
  0x37   :  { %v9227_v47 = vld [vmem:[#allocation6 + $0x180] sm:$0xf]  ;;  %v10828_v50 = vor.u32 %v13593_v43, %v10827_v42  ;;  %3312 = vmatpush.bf16.msra.mxu2 %v10316_v46  ;;  %v9013_v42 = vld [vmem:[#allocation3 + $0x18] sm:$0xf0]  ;;  %v9485_v46 = vld [vmem:[#allocation6 + $0x3c0] sm:$0xf0] }
  0x38   :  { %v13193_v48 = vld [vmem:[#allocation6 + $0x1bc] sm:$0xf0] }
  0x39   :  { %v9739_v49 = vld [vmem:[#allocation6 + $0x580] sm:$0xf]  ;;  %v9228_v56 = vor.u32 %v13193_v48, %v9227_v47  ;;  %3331 = vmatpush.bf16.msra.mxu3 %v10828_v50  ;;  %v13633_v47 = vld [vmem:[#allocation6 + $0xf84] sm:$0xf] }
  0x3a   :  { %v13321_v51 = vld [vmem:[#allocation6 + $0x5bc] sm:$0xf0]  ;;  %v11021_v50 = vld [vmem:[#allocation6 + $0xfc0] sm:$0xf0] }
  0x3b   :  { %v10251_v52 = vld [vmem:[#allocation6 + $0x980] sm:$0xf]  ;;  %v9740_v57 = vor.u32 %v13321_v51, %v9739_v49  ;;  %3275 = vmatpush.bf16.msra.mxu0 %v9228_v56  ;;  %v10000_v49 = vor.u32 %v13377_v36, %v9997_v37  ;;  %v13489_v51 = vld [vmem:[#allocation6 + $0xb04] sm:$0xf]  ;;  %v13136_v36 = vld [vmem:[#allocation3 + $0x34] sm:$0xf0] }
  0x3c   :  { %v13449_v53 = vld [vmem:[#allocation6 + $0x9bc] sm:$0xf0]  ;;  %v9933_v56 = vld [vmem:[#allocation6 + $0x740] sm:$0xf0]  ;;  %v13134_v37 = vld [vmem:[#allocation3 + $0x2c] sm:$0xf] }
  0x3d   :  { %v10763_v54 = vld [vmem:[#allocation6 + $0xd80] sm:$0xf]  ;;  %v10252_v58 = vor.u32 %v13449_v53, %v10251_v52  ;;  %3294 = vmatpush.bf16.msra.mxu1 %v9740_v57  ;;  %v10445_v52 = vld [vmem:[#allocation6 + $0xb40] sm:$0xf0]  ;;  %v14390_v53 = vor.u32 %v13129_v30, %v9005_v31  ;;  %v14394_v57 = vor.u32 %v13130_v41, %v9013_v42 }
  0x3e   :  { %v13577_v55 = vld [vmem:[#allocation6 + $0xdbc] sm:$0xf0]  ;;  %v13441_v30 = vld [vmem:[#allocation6 + $0x984] sm:$0xf] }
  0x3f   :  { %v9163_v59 = vld [vmem:[#allocation6 + $0x100] sm:$0xf]  ;;  %v10764_v62 = vor.u32 %v13577_v55, %v10763_v54  ;;  %3313 = vmatpush.bf16.msra.mxu2 %v10252_v58  ;;  %v14392_v54 = vor.u32 %v13132_v40, %v9011_v35  ;;  %v13361_v55 = vld [vmem:[#allocation6 + $0x704] sm:$0xf]  ;;  %v9488_v58 = vor.u32 %v13249_v45, %v9485_v46 }
  0x40   :  { %v13177_v60 = vld [vmem:[#allocation6 + $0x13c] sm:$0xf0]  ;;  %v10253_v31 = vld [vmem:[#allocation6 + $0x9c0] sm:$0xf0] }
  0x41   :  { %v9675_v61 = vld [vmem:[#allocation6 + $0x500] sm:$0xf]  ;;  %v9164_v4 = vor.u32 %v13177_v60, %v9163_v59  ;;  %3332 = vmatpush.bf16.msra.mxu3 %v10764_v62  ;;  %v11024_v59 = vor.u32 %v13633_v47, %v11021_v50  ;;  %v10448_v60 = vor.u32 %v13489_v51, %v10445_v52  ;;  %v9421_v62 = vld [vmem:[#allocation6 + $0x340] sm:$0xf0]  ;;  %v10256_v40 = vor.u32 %v13441_v30, %v10253_v31  ;;  %v9491_v31 = vld [vmem:[#allocation6 + $0x388] sm:$0xf] }
  0x42   :  { %v13305_v63 = vld [vmem:[#allocation6 + $0x53c] sm:$0xf0]  ;;  %v13185_v41 = vld [vmem:[#allocation6 + $0x184] sm:$0xf]  ;;  %v14404_v51 = vor.u32 %v13136_v36, %v9027_v32  ;;  %v13258_v32 = vld [vmem:[#allocation6 + $0x3c4] sm:$0xf0] }
  0x43   :  { %v10187_v0 = vld [vmem:[#allocation6 + $0x900] sm:$0xf]  ;;  %v9676_v5 = vor.u32 %v13305_v63, %v9675_v61  ;;  %3276 = vmatpush.bf16.msra.mxu0 %v9164_v4  ;;  %v13233_v61 = vld [vmem:[#allocation6 + $0x304] sm:$0xf]  ;;  %v10451_v36 = vld [vmem:[#allocation6 + $0xb08] sm:$0xf] }
  0x44   :  { %v13433_v1 = vld [vmem:[#allocation6 + $0x93c] sm:$0xf0]  ;;  %v13617_v63 = vld [vmem:[#allocation6 + $0xf04] sm:$0xf] }
  0x45   :  { %v10699_v2 = vld [vmem:[#allocation6 + $0xd00] sm:$0xf]  ;;  %v10188_v6 = vor.u32 %v13433_v1, %v10187_v0  ;;  %3295 = vmatpush.bf16.msra.mxu1 %v9676_v5  ;;  %v9936_v0 = vor.u32 %v13361_v55, %v9933_v56  ;;  %v10957_v1 = vld [vmem:[#allocation6 + $0xf40] sm:$0xf0] }
  0x46   :  { %v13561_v3 = vld [vmem:[#allocation6 + $0xd3c] sm:$0xf0]  ;;  %v13345_v4 = vld [vmem:[#allocation6 + $0x684] sm:$0xf] }
  0x47   :  { %v9099_v7 = vld [vmem:[#allocation6 + $0x80] sm:$0xf]  ;;  %v10700_v10 = vor.u32 %v13561_v3, %v10699_v2  ;;  %3314 = vmatpush.bf16.msra.mxu2 %v10188_v6  ;;  %v13473_v2 = vld [vmem:[#allocation6 + $0xa84] sm:$0xf]  ;;  %v9424_v6 = vor.u32 %v13233_v61, %v9421_v62 }
  0x48   :  { %v13161_v8 = vld [vmem:[#allocation6 + $0xbc] sm:$0xf0]  ;;  %v10381_v3 = vld [vmem:[#allocation6 + $0xac0] sm:$0xf0] }
  0x49   :  { %v9611_v9 = vld [vmem:[#allocation6 + $0x480] sm:$0xf]  ;;  %v9100_v17 = vor.u32 %v13161_v8, %v9099_v7  ;;  %3333 = vmatpush.bf16.msra.mxu3 %v10700_v10  ;;  %v9869_v5 = vld [vmem:[#allocation6 + $0x6c0] sm:$0xf0]  ;;  %v10960_v7 = vor.u32 %v13617_v63, %v10957_v1  ;;  %v10384_v8 = vor.u32 %v13473_v2, %v10381_v3 }
  0x4a   :  { %v13289_v11 = vld [vmem:[#allocation6 + $0x4bc] sm:$0xf0]  ;;  %v9357_v10 = vld [vmem:[#allocation6 + $0x2c0] sm:$0xf0] }
  0x4b   :  { %v10123_v12 = vld [vmem:[#allocation6 + $0x880] sm:$0xf]  ;;  %v9612_v21 = vor.u32 %v13289_v11, %v9611_v9  ;;  %3277 = vmatpush.bf16.msra.mxu0 %v9100_v17  ;;  %v13217_v9 = vld [vmem:[#allocation6 + $0x284] sm:$0xf] }
  0x4c   :  { %v13417_v13 = vld [vmem:[#allocation6 + $0x8bc] sm:$0xf0]  ;;  %v13601_v11 = vld [vmem:[#allocation6 + $0xe84] sm:$0xf] }
  0x4d   :  { %v10635_v14 = vld [vmem:[#allocation6 + $0xc80] sm:$0xf]  ;;  %v10124_v22 = vor.u32 %v13417_v13, %v10123_v12  ;;  %3296 = vmatpush.bf16.msra.mxu1 %v9612_v21  ;;  %v9872_v12 = vor.u32 %v13345_v4, %v9869_v5  ;;  %v10893_v13 = vld [vmem:[#allocation6 + $0xec0] sm:$0xf0] }
  0x4e   :  { %v13545_v15 = vld [vmem:[#allocation6 + $0xcbc] sm:$0xf0]  ;;  %v9805_v17 = vld [vmem:[#allocation6 + $0x640] sm:$0xf0] }
  0x4f   :  { %v9035_v16 = vld [vmem:[#allocation6] sm:$0xf]  ;;  %v10636_v26 = vor.u32 %v13545_v15, %v10635_v14  ;;  %3315 = vmatpush.bf16.msra.mxu2 %v10124_v22  ;;  %v13457_v14 = vld [vmem:[#allocation6 + $0xa04] sm:$0xf]  ;;  %v10896_v22 = vor.u32 %v13601_v11, %v10893_v13 }
  0x50   :  { %v13145_v18 = vld [vmem:[#allocation6 + $0x3c] sm:$0xf0]  ;;  %v10317_v15 = vld [vmem:[#allocation6 + $0xa40] sm:$0xf0] }
  0x51   :  { %v9547_v19 = vld [vmem:[#allocation6 + $0x400] sm:$0xf]  ;;  %v9036_v34 = vor.u32 %v13145_v18, %v9035_v16  ;;  %3334 = vmatpush.bf16.msra.mxu3 %v10636_v26  ;;  %v13329_v16 = vld [vmem:[#allocation6 + $0x604] sm:$0xf]  ;;  %v9360_v18 = vor.u32 %v13217_v9, %v9357_v10  ;;  %v13135_v26 = vld [vmem:[#allocation3 + $0x2c] sm:$0xf0] }
  0x52   :  { %v13273_v20 = vld [vmem:[#allocation6 + $0x43c] sm:$0xf0]  ;;  %v13585_v21 = vld [vmem:[#allocation6 + $0xe04] sm:$0xf] }
  0x53   :  { %v10059_v23 = vld [vmem:[#allocation6 + $0x800] sm:$0xf]  ;;  %v9548_v38 = vor.u32 %v13273_v20, %v9547_v19  ;;  %3278 = vmatpush.bf16.msra.mxu0 %v9036_v34  ;;  %v13201_v19 = vld [vmem:[#allocation6 + $0x204] sm:$0xf] }
  0x54   :  { %v13401_v24 = vld [vmem:[#allocation6 + $0x83c] sm:$0xf0]  ;;  %v9293_v20 = vld [vmem:[#allocation6 + $0x240] sm:$0xf0] }
  0x55   :  { %v10571_v25 = vld [vmem:[#allocation6 + $0xc00] sm:$0xf]  ;;  %v10060_v39 = vor.u32 %v13401_v24, %v10059_v23  ;;  %3297 = vmatpush.bf16.msra.mxu1 %v9548_v38  ;;  %v10320_v23 = vor.u32 %v13457_v14, %v10317_v15  ;;  %v10829_v24 = vld [vmem:[#allocation6 + $0xe40] sm:$0xf0]  ;;  %v9296_v35 = vor.u32 %v13201_v19, %v9293_v20  ;;  %v9029_v38 = vld [vmem:[#allocation3 + $0x38] sm:$0xf0] }
  0x56   :  { %v13529_v27 = vld [vmem:[#allocation6 + $0xc3c] sm:$0xf0]  ;;  %v9741_v34 = vld [vmem:[#allocation6 + $0x5c0] sm:$0xf0]  ;;  %v14406_v56 = vor.u32 %v13134_v37, %v9029_v38  ;;  %v13514_v19 = vld [vmem:[#allocation6 + $0xbc4] sm:$0xf0] }
  0x57   :  { %v9003_v28 = vld [vmem:[#allocation3] sm:$0xf]  ;;  %v10572_v43 = vor.u32 %v13529_v27, %v10571_v25  ;;  %3316 = vmatpush.bf16.msra.mxu2 %v10060_v39  ;;  %3347 = vmatpush.bf16.msrb.mxu0 %v9488_v58  ;;  %v9808_v27 = vor.u32 %v13329_v16, %v9805_v17  ;;  %v10832_v39 = vor.u32 %v13585_v21, %v10829_v24  ;;  %v9229_v42 = vld [vmem:[#allocation6 + $0x1c0] sm:$0xf0]  ;;  %v13498_v37 = vld [vmem:[#allocation6 + $0xb44] sm:$0xf0] }
  0x58   :  { %v14388_v48 = vor.u32 %v13131_v29, %v9003_v28  ;;  %3298 = vmatmul.bf16.vlgmr.msra.gmra.mxu1 %v14390_v53  ;;  %v9019_v25 = vld [vmem:[#allocation3 + $0x20] sm:$0xf]  ;;  %v13133_v28 = vld [vmem:[#allocation3 + $0x24] sm:$0xf]  ;;  %v9021_v29 = vld [vmem:[#allocation3 + $0x30] sm:$0xf0]  ;;  %v9744_v45 = vor.u32 %v13313_v33, %v9741_v34  ;;  %v9232_v58 = vor.u32 %v13185_v41, %v9229_v42 }
  0x59   :  { %3335 = vmatpush.bf16.msra.mxu3 %v10572_v43  ;;  %3366 = vmatpush.bf16.msrb.mxu1 %v10000_v49  ;;  %v13569_v43 = vld [vmem:[#allocation6 + $0xd84] sm:$0xf]  ;;  %v14402_v50 = vor.u32 %v13133_v28, %v9021_v29  ;;  %v11027_v33 = vld [vmem:[#allocation6 + $0xf88] sm:$0xf] }
  0x5a   :  { %3279 = vmatmul.bf16.vlgmr.msra.gmra.mxu0 %v14388_v48  ;;  %3317 = vmatmul.bf16.vlgmr.msra.gmra.mxu2 %v14392_v54  ;;  %v10765_v46 = vld [vmem:[#allocation6 + $0xdc0] sm:$0xf0]  ;;  %v9427_v41 = vld [vmem:[#allocation6 + $0x308] sm:$0xf] }
  0x5b   :  { %3385 = vmatpush.bf16.msrb.mxu2 %v10512_v44  ;;  %3348 = vmatpush.bf16.msrb.mxu0 %v9424_v6  ;;  %v14400_v44 = vor.u32 %v13135_v26, %v9019_v25  ;;  %v13425_v47 = vld [vmem:[#allocation6 + $0x904] sm:$0xf]  ;;  %v13242_v42 = vld [vmem:[#allocation6 + $0x344] sm:$0xf0] }
  0x5c   :  { %3336 = vmatmul.bf16.vlgmr.msra.gmra.mxu3 %v14394_v57  ;;  %v10189_v49 = vld [vmem:[#allocation6 + $0x940] sm:$0xf0] }
  0x5d   :  { %3404 = vmatpush.bf16.msrb.mxu3 %v11024_v59  ;;  %3367 = vmatpush.bf16.msrb.mxu1 %v9936_v0  ;;  %v13297_v52 = vld [vmem:[#allocation6 + $0x504] sm:$0xf]  ;;  %v10768_v59 = vor.u32 %v13569_v43, %v10765_v46  ;;  %v9939_v46 = vld [vmem:[#allocation6 + $0x708] sm:$0xf] }
  0x5e   :  { %v9677_v55 = vld [vmem:[#allocation6 + $0x540] sm:$0xf0] }
  0x5f   :  { %3386 = vmatpush.bf16.msrb.mxu2 %v10448_v60  ;;  %3349 = vmatpush.bf16.msrb.mxu0 %v9360_v18  ;;  %v10192_v60 = vor.u32 %v13425_v47, %v10189_v49  ;;  %v13169_v61 = vld [vmem:[#allocation6 + $0x104] sm:$0xf]  ;;  %v9680_v0 = vor.u32 %v13297_v52, %v9677_v55  ;;  %v10515_v18 = vld [vmem:[#allocation6 + $0xb88] sm:$0xf] }
  0x60   :  { %v9165_v62 = vld [vmem:[#allocation6 + $0x140] sm:$0xf0]  ;;  %v10516_v30 = vor.u32 %v13514_v19, %v10515_v18  ;;  %v13370_v47 = vld [vmem:[#allocation6 + $0x744] sm:$0xf0] }
  0x61   :  { %3405 = vmatpush.bf16.msrb.mxu3 %v10960_v7  ;;  %3368 = vmatpush.bf16.msrb.mxu1 %v9872_v12  ;;  %v13553_v63 = vld [vmem:[#allocation6 + $0xd04] sm:$0xf]  ;;  %v9168_v6 = vor.u32 %v13169_v61, %v9165_v62  ;;  %v10963_v49 = vld [vmem:[#allocation6 + $0xf08] sm:$0xf] }
  0x62   :  { %v10701_v1 = vld [vmem:[#allocation6 + $0xd40] sm:$0xf0]  ;;  %v13626_v52 = vld [vmem:[#allocation6 + $0xf44] sm:$0xf0] }
  0x63   :  { %3387 = vmatpush.bf16.msrb.mxu2 %v10384_v8  ;;  %3350 = vmatpush.bf16.msrb.mxu0 %v9296_v35  ;;  %v13409_v2 = vld [vmem:[#allocation6 + $0x884] sm:$0xf]  ;;  %v10704_v8 = vor.u32 %v13553_v63, %v10701_v1  ;;  %v13642_v35 = vld [vmem:[#allocation6 + $0xfc4] sm:$0xf0]  ;;  %v10964_v63 = vor.u32 %v13626_v52, %v10963_v49 }
  0x64   :  { %v10125_v3 = vld [vmem:[#allocation6 + $0x8c0] sm:$0xf0]  ;;  %v11028_v43 = vor.u32 %v13642_v35, %v11027_v33  ;;  %v10387_v55 = vld [vmem:[#allocation6 + $0xa88] sm:$0xf] }
  0x65   :  { %3406 = vmatpush.bf16.msrb.mxu3 %v10896_v22  ;;  %3369 = vmatpush.bf16.msrb.mxu1 %v9808_v27  ;;  %v13281_v4 = vld [vmem:[#allocation6 + $0x484] sm:$0xf]  ;;  %v10128_v9 = vor.u32 %v13409_v2, %v10125_v3  ;;  %v10003_v22 = vld [vmem:[#allocation6 + $0x788] sm:$0xf] }
  0x66   :  { %v9613_v5 = vld [vmem:[#allocation6 + $0x4c0] sm:$0xf0]  ;;  %v9363_v61 = vld [vmem:[#allocation6 + $0x288] sm:$0xf] }
  0x67   :  { %3388 = vmatpush.bf16.msrb.mxu2 %v10320_v23  ;;  %3351 = vmatpush.bf16.msrb.mxu0 %v9232_v58  ;;  %v13153_v7 = vld [vmem:[#allocation6 + $0x84] sm:$0xf]  ;;  %v9616_v13 = vor.u32 %v13281_v4, %v9613_v5  ;;  %v13386_v23 = vld [vmem:[#allocation6 + $0x7c4] sm:$0xf0] }
  0x68   :  { %3303 = vmatmul.bf16.gmra.mxu1 %v14402_v50  ;;  %v9101_v10 = vld [vmem:[#allocation6 + $0xc0] sm:$0xf0]  ;;  %v10004_v34 = vor.u32 %v13386_v23, %v10003_v22  ;;  %v13482_v58 = vld [vmem:[#allocation6 + $0xac4] sm:$0xf0] }
  0x69   :  { %3407 = vmatpush.bf16.msrb.mxu3 %v10832_v39  ;;  %3370 = vmatpush.bf16.msrb.mxu1 %v9744_v45  ;;  %v13537_v11 = vld [vmem:[#allocation6 + $0xc84] sm:$0xf]  ;;  %v9104_v20 = vor.u32 %v13153_v7, %v9101_v10  ;;  %v10452_v45 = vor.u32 %v13498_v37, %v10451_v36  ;;  %v13226_v62 = vld [vmem:[#allocation6 + $0x2c4] sm:$0xf0] }
  0x6a   :  { %3284 = vmatmul.bf16.gmra.mxu0 %v14400_v44  ;;  %3322 = vmatmul.bf16.gmra.mxu2 %v14404_v51  ;;  %v10637_v12 = vld [vmem:[#allocation6 + $0xcc0] sm:$0xf0]  ;;  %v9875_v1 = vld [vmem:[#allocation6 + $0x688] sm:$0xf]  ;;  %v9364_v7 = vor.u32 %v13226_v62, %v9363_v61 }
  0x6b   :  { %3389 = vmatpush.bf16.msrb.mxu2 %v10256_v40  ;;  %v13393_v14 = vld [vmem:[#allocation6 + $0x804] sm:$0xf]  ;;  %3352 = vmatpush.bf16.msrb.mxu0 %v9168_v6  ;;  %v10640_v24 = vor.u32 %v13537_v11, %v10637_v12  ;;  %v9492_v40 = vor.u32 %v13258_v32, %v9491_v31  ;;  %v13354_v2 = vld [vmem:[#allocation6 + $0x6c4] sm:$0xf0] }
  0x6c   :  { %3341 = vmatmul.bf16.gmra.mxu3 %v14406_v56  ;;  %v10061_v15 = vld [vmem:[#allocation6 + $0x840] sm:$0xf0]  ;;  %v10899_v3 = vld [vmem:[#allocation6 + $0xe88] sm:$0xf] }
  0x6d   :  { %3408 = vmatpush.bf16.msrb.mxu3 %v10768_v59  ;;  %3371 = vmatpush.bf16.msrb.mxu1 %v9680_v0  ;;  %v13265_v16 = vld [vmem:[#allocation6 + $0x404] sm:$0xf]  ;;  %v10064_v25 = vor.u32 %v13393_v14, %v10061_v15  ;;  %v9428_v59 = vor.u32 %v13242_v42, %v9427_v41  ;;  %v10388_v0 = vor.u32 %v13482_v58, %v10387_v55  ;;  %v13610_v4 = vld [vmem:[#allocation6 + $0xec4] sm:$0xf0] }
  0x6e   :  { %v9549_v17 = vld [vmem:[#allocation6 + $0x440] sm:$0xf0]  ;;  %v10323_v5 = vld [vmem:[#allocation6 + $0xa08] sm:$0xf]  ;;  %v10900_v11 = vor.u32 %v13610_v4, %v10899_v3 }
  0x6f   :  { %3390 = vmatpush.bf16.msrb.mxu2 %v10192_v60  ;;  %v13137_v21 = vld [vmem:[#allocation6 + $0x4] sm:$0xf]  ;;  %v9552_v29 = vor.u32 %v13265_v16, %v9549_v17  ;;  %3353 = vmatpush.bf16.msrb.mxu0 %v9104_v20  ;;  %v9940_v60 = vor.u32 %v13370_v47, %v9939_v46  ;;  %v13466_v6 = vld [vmem:[#allocation6 + $0xa44] sm:$0xf0] }
  0x70   :  { %v9037_v26 = vld [vmem:[#allocation6 + $0x40] sm:$0xf0]  ;;  %v13210_v10 = vld [vmem:[#allocation6 + $0x244] sm:$0xf0]  ;;  %v10324_v12 = vor.u32 %v13466_v6, %v10323_v5 }
  0x71   :  { %3409 = vmatpush.bf16.msrb.mxu3 %v10704_v8  ;;  %v13521_v27 = vld [vmem:[#allocation6 + $0xc04] sm:$0xf]  ;;  %3372 = vmatpush.bf16.msrb.mxu1 %v9616_v13  ;;  %v9040_v38 = vor.u32 %v13137_v21, %v9037_v26  ;;  %v9876_v8 = vor.u32 %v13354_v2, %v9875_v1  ;;  %v9811_v13 = vld [vmem:[#allocation6 + $0x608] sm:$0xf] }
  0x72   :  { %v10573_v28 = vld [vmem:[#allocation6 + $0xc40] sm:$0xf0]  ;;  %v13338_v14 = vld [vmem:[#allocation6 + $0x644] sm:$0xf0] }
  0x73   :  { %3391 = vmatpush.bf16.msrb.mxu2 %v10128_v9  ;;  %v10576_v39 = vor.u32 %v13521_v27, %v10573_v28  ;;  %3354 = vmatpush.bf16.msrb.mxu0 %v9040_v38  ;;  %v9299_v9 = vld [vmem:[#allocation6 + $0x208] sm:$0xf]  ;;  %v9812_v20 = vor.u32 %v13338_v14, %v9811_v13  ;;  %v9493_v13 = vld [vmem:[#allocation6 + $0x3c8] sm:$0xf0] }
  0x74   :  { %v10835_v15 = vld [vmem:[#allocation6 + $0xe08] sm:$0xf]  ;;  %v9300_v19 = vor.u32 %v13210_v10, %v9299_v9  ;;  %v13378_v14 = vld [vmem:[#allocation6 + $0x78c] sm:$0xf] }
  0x75   :  { %3410 = vmatpush.bf16.msrb.mxu3 %v10640_v24  ;;  %3373 = vmatpush.bf16.msrb.mxu1 %v9552_v29  ;;  %v13594_v16 = vld [vmem:[#allocation6 + $0xe44] sm:$0xf0] }
  0x76   :  { %v10259_v17 = vld [vmem:[#allocation6 + $0x988] sm:$0xf]  ;;  %v10836_v23 = vor.u32 %v13594_v16, %v10835_v15  ;;  %v10005_v15 = vld [vmem:[#allocation6 + $0x7c8] sm:$0xf0] }
  0x77   :  { %3392 = vmatpush.bf16.msrb.mxu2 %v10064_v25  ;;  %3423 = vmatpush.bf16.msra.mxu0 %v9492_v40  ;;  %v13450_v18 = vld [vmem:[#allocation6 + $0x9c4] sm:$0xf0]  ;;  %v13634_v16 = vld [vmem:[#allocation6 + $0xf8c] sm:$0xf] }
  0x78   :  { %3374 = vmatmul.bf16.vlgmr.msrb.gmra.mxu1 %v14390_v53  ;;  %v9235_v21 = vld [vmem:[#allocation6 + $0x188] sm:$0xf]  ;;  %v10260_v24 = vor.u32 %v13450_v18, %v10259_v17  ;;  %v11029_v17 = vld [vmem:[#allocation6 + $0xfc8] sm:$0xf0] }
  0x79   :  { %3442 = vmatpush.bf16.msra.mxu1 %v10004_v34  ;;  %3411 = vmatpush.bf16.msrb.mxu3 %v10576_v39  ;;  %v13194_v22 = vld [vmem:[#allocation6 + $0x1c4] sm:$0xf0] }
  0x7a   :  { %3355 = vmatmul.bf16.vlgmr.msrb.gmra.mxu0 %v14388_v48  ;;  %3393 = vmatmul.bf16.vlgmr.msrb.gmra.mxu2 %v14392_v54  ;;  %v9747_v25 = vld [vmem:[#allocation6 + $0x588] sm:$0xf]  ;;  %v9236_v31 = vor.u32 %v13194_v22, %v9235_v21  ;;  %v10453_v21 = vld [vmem:[#allocation6 + $0xb48] sm:$0xf0] }
  0x7b   :  { %3461 = vmatpush.bf16.msra.mxu2 %v10516_v30  ;;  %3424 = vmatpush.bf16.msra.mxu0 %v9428_v59  ;;  %v13322_v26 = vld [vmem:[#allocation6 + $0x5c4] sm:$0xf0] }
  0x7c   :  { %3412 = vmatmul.bf16.vlgmr.msrb.gmra.mxu3 %v14394_v57  ;;  %v10771_v27 = vld [vmem:[#allocation6 + $0xd88] sm:$0xf]  ;;  %v9748_v32 = vor.u32 %v13322_v26, %v9747_v25  ;;  %v11032_v25 = vor.u32 %v13634_v16, %v11029_v17  ;;  %v13234_v26 = vld [vmem:[#allocation6 + $0x30c] sm:$0xf] }
  0x7d   :  { %3480 = vmatpush.bf16.msra.mxu3 %v11028_v43  ;;  %3443 = vmatpush.bf16.msra.mxu1 %v9940_v60  ;;  %v13578_v28 = vld [vmem:[#allocation6 + $0xdc4] sm:$0xf0]  ;;  %v13170_v16 = vld [vmem:[#allocation6 + $0x10c] sm:$0xf] }
  0x7e   :  { %v10195_v29 = vld [vmem:[#allocation6 + $0x908] sm:$0xf]  ;;  %v10772_v35 = vor.u32 %v13578_v28, %v10771_v27  ;;  %v9429_v27 = vld [vmem:[#allocation6 + $0x348] sm:$0xf0] }
  0x7f   :  { %3462 = vmatpush.bf16.msra.mxu2 %v10452_v45  ;;  %3425 = vmatpush.bf16.msra.mxu0 %v9364_v7  ;;  %v13434_v30 = vld [vmem:[#allocation6 + $0x944] sm:$0xf0]  ;;  %v9173_v17 = vld [vmem:[#allocation6 + $0x148] sm:$0xf0] }
  0x80   :  { %v9171_v33 = vld [vmem:[#allocation6 + $0x108] sm:$0xf]  ;;  %v10196_v36 = vor.u32 %v13434_v30, %v10195_v29  ;;  %v13362_v29 = vld [vmem:[#allocation6 + $0x70c] sm:$0xf] }
  0x81   :  { %3481 = vmatpush.bf16.msra.mxu3 %v10964_v63  ;;  %3444 = vmatpush.bf16.msra.mxu1 %v9876_v8  ;;  %v13178_v34 = vld [vmem:[#allocation6 + $0x144] sm:$0xf0]  ;;  %v13506_v63 = vld [vmem:[#allocation6 + $0xb8c] sm:$0xf] }
  0x82   :  { %v9683_v37 = vld [vmem:[#allocation6 + $0x508] sm:$0xf]  ;;  %v9172_v43 = vor.u32 %v13178_v34, %v9171_v33  ;;  %v9941_v30 = vld [vmem:[#allocation6 + $0x748] sm:$0xf0] }
  0x83   :  { %3463 = vmatpush.bf16.msra.mxu2 %v10388_v0  ;;  %3426 = vmatpush.bf16.msra.mxu0 %v9300_v19  ;;  %v13306_v38 = vld [vmem:[#allocation6 + $0x544] sm:$0xf0]  ;;  %v10517_v0 = vld [vmem:[#allocation6 + $0xbc8] sm:$0xf0] }
  0x84   :  { %v10707_v39 = vld [vmem:[#allocation6 + $0xd08] sm:$0xf]  ;;  %v9684_v45 = vor.u32 %v13306_v38, %v9683_v37  ;;  %v10965_v33 = vld [vmem:[#allocation6 + $0xf48] sm:$0xf0]  ;;  %v9944_v38 = vor.u32 %v13362_v29, %v9941_v30 }
  0x85   :  { %3482 = vmatpush.bf16.msra.mxu3 %v10900_v11  ;;  %3445 = vmatpush.bf16.msra.mxu1 %v9812_v20  ;;  %v13562_v40 = vld [vmem:[#allocation6 + $0xd44] sm:$0xf0]  ;;  %v10520_v11 = vor.u32 %v13506_v63, %v10517_v0  ;;  %v13490_v20 = vld [vmem:[#allocation6 + $0xb0c] sm:$0xf] }
  0x86   :  { %v10131_v41 = vld [vmem:[#allocation6 + $0x888] sm:$0xf]  ;;  %v10708_v49 = vor.u32 %v13562_v40, %v10707_v39  ;;  %v10456_v28 = vor.u32 %v13490_v20, %v10453_v21  ;;  %v13474_v34 = vld [vmem:[#allocation6 + $0xa8c] sm:$0xf] }
  0x87   :  { %3464 = vmatpush.bf16.msra.mxu2 %v10324_v12  ;;  %v13418_v42 = vld [vmem:[#allocation6 + $0x8c4] sm:$0xf0]  ;;  %3427 = vmatpush.bf16.msra.mxu0 %v9236_v31  ;;  %v13250_v12 = vld [vmem:[#allocation6 + $0x38c] sm:$0xf]  ;;  %v9432_v31 = vor.u32 %v13234_v26, %v9429_v27 }
  0x88   :  { %v9107_v46 = vld [vmem:[#allocation6 + $0x88] sm:$0xf]  ;;  %v10132_v52 = vor.u32 %v13418_v42, %v10131_v41  ;;  %3379 = vmatmul.bf16.gmra.mxu1 %v14402_v50  ;;  %v9365_v37 = vld [vmem:[#allocation6 + $0x2c8] sm:$0xf0] }
  0x89   :  { %3483 = vmatpush.bf16.msra.mxu3 %v10836_v23  ;;  %3446 = vmatpush.bf16.msra.mxu1 %v9748_v32  ;;  %v13162_v47 = vld [vmem:[#allocation6 + $0xc4] sm:$0xf0]  ;;  %v9496_v23 = vor.u32 %v13250_v12, %v9493_v13  ;;  %v13618_v32 = vld [vmem:[#allocation6 + $0xf0c] sm:$0xf] }
  0x8a   :  { %v9619_v55 = vld [vmem:[#allocation6 + $0x488] sm:$0xf]  ;;  %3360 = vmatmul.bf16.gmra.mxu0 %v14400_v44  ;;  %3398 = vmatmul.bf16.gmra.mxu2 %v14404_v51  ;;  %v9108_v1 = vor.u32 %v13162_v47, %v9107_v46  ;;  %v10968_v39 = vor.u32 %v13618_v32, %v10965_v33  ;;  %v13346_v40 = vld [vmem:[#allocation6 + $0x68c] sm:$0xf] }
  0x8b   :  { %3465 = vmatpush.bf16.msra.mxu2 %v10260_v24  ;;  %v13290_v58 = vld [vmem:[#allocation6 + $0x4c4] sm:$0xf0]  ;;  %3428 = vmatpush.bf16.msra.mxu0 %v9172_v43  ;;  %v10008_v24 = vor.u32 %v13378_v14, %v10005_v15  ;;  %v9877_v41 = vld [vmem:[#allocation6 + $0x6c8] sm:$0xf0] }
  0x8c   :  { %v10643_v59 = vld [vmem:[#allocation6 + $0xc88] sm:$0xf]  ;;  %3417 = vmatmul.bf16.gmra.mxu3 %v14406_v56  ;;  %v9620_v2 = vor.u32 %v13290_v58, %v9619_v55  ;;  %v10901_v46 = vld [vmem:[#allocation6 + $0xec8] sm:$0xf0]  ;;  %v9880_v58 = vor.u32 %v13346_v40, %v9877_v41 }
  0x8d   :  { %3484 = vmatpush.bf16.msra.mxu3 %v10772_v35  ;;  %v13546_v60 = vld [vmem:[#allocation6 + $0xcc4] sm:$0xf0]  ;;  %3447 = vmatpush.bf16.msra.mxu1 %v9684_v45  ;;  %v10389_v35 = vld [vmem:[#allocation6 + $0xac8] sm:$0xf0] }
  0x8e   :  { %v10067_v61 = vld [vmem:[#allocation6 + $0x808] sm:$0xf]  ;;  %v10644_v6 = vor.u32 %v13546_v60, %v10643_v59  ;;  %v10392_v42 = vor.u32 %v13474_v34, %v10389_v35  ;;  %v13602_v45 = vld [vmem:[#allocation6 + $0xe8c] sm:$0xf] }
  0x8f   :  { %3466 = vmatpush.bf16.msra.mxu2 %v10196_v36  ;;  %v13402_v62 = vld [vmem:[#allocation6 + $0x844] sm:$0xf0]  ;;  %3429 = vmatpush.bf16.msra.mxu0 %v9108_v1  ;;  %v13218_v36 = vld [vmem:[#allocation6 + $0x28c] sm:$0xf]  ;;  %v10904_v59 = vor.u32 %v13602_v45, %v10901_v46  ;;  %v9499_v45 = vld [vmem:[#allocation6 + $0x390] sm:$0xf] }
  0x90   :  { %v9043_v3 = vld [vmem:[#allocation6 + $0x8] sm:$0xf]  ;;  %v10068_v7 = vor.u32 %v13402_v62, %v10067_v61  ;;  %v9368_v43 = vor.u32 %v13218_v36, %v9365_v37  ;;  %v13458_v47 = vld [vmem:[#allocation6 + $0xa0c] sm:$0xf]  ;;  %v13259_v46 = vld [vmem:[#allocation6 + $0x3cc] sm:$0xf0] }
  0x91   :  { %v13146_v4 = vld [vmem:[#allocation6 + $0x44] sm:$0xf0]  ;;  %3485 = vmatpush.bf16.msra.mxu3 %v10708_v49  ;;  %3448 = vmatpush.bf16.msra.mxu1 %v9620_v2  ;;  %v10325_v49 = vld [vmem:[#allocation6 + $0xa48] sm:$0xf0] }
  0x92   :  { %v9555_v5 = vld [vmem:[#allocation6 + $0x408] sm:$0xf]  ;;  %v9044_v18 = vor.u32 %v13146_v4, %v9043_v3  ;;  %v9301_v55 = vld [vmem:[#allocation6 + $0x248] sm:$0xf0]  ;;  %v10328_v62 = vor.u32 %v13458_v47, %v10325_v49 }
  0x93   :  { %3467 = vmatpush.bf16.msra.mxu2 %v10132_v52  ;;  %v13274_v8 = vld [vmem:[#allocation6 + $0x444] sm:$0xf0]  ;;  %v13202_v52 = vld [vmem:[#allocation6 + $0x20c] sm:$0xf] }
  0x94   :  { %v10579_v9 = vld [vmem:[#allocation6 + $0xc08] sm:$0xf]  ;;  %v9556_v19 = vor.u32 %v13274_v8, %v9555_v5  ;;  %3430 = vmatpush.bf16.msra.mxu0 %v9044_v18  ;;  %v13330_v60 = vld [vmem:[#allocation6 + $0x60c] sm:$0xf]  ;;  %v9304_v63 = vor.u32 %v13202_v52, %v9301_v55 }
  0x95   :  { %v13530_v10 = vld [vmem:[#allocation6 + $0xc44] sm:$0xf0]  ;;  %3486 = vmatpush.bf16.msra.mxu3 %v10644_v6  ;;  %v9813_v61 = vld [vmem:[#allocation6 + $0x648] sm:$0xf0] }
  0x96   :  { %v10580_v22 = vor.u32 %v13530_v10, %v10579_v9  ;;  %3449 = vmatpush.bf16.msra.mxu1 %v9556_v19  ;;  %v13586_v0 = vld [vmem:[#allocation6 + $0xe0c] sm:$0xf]  ;;  %v9816_v6 = vor.u32 %v13330_v60, %v9813_v61 }
  0x97   :  { %3468 = vmatpush.bf16.msra.mxu2 %v10068_v7  ;;  %v10837_v1 = vld [vmem:[#allocation6 + $0xe48] sm:$0xf0] }
  0x98   :  { %3499 = vmatpush.bf16.msrb.mxu0 %v9496_v23  ;;  %v13442_v2 = vld [vmem:[#allocation6 + $0x98c] sm:$0xf]  ;;  %v10840_v7 = vor.u32 %v13586_v0, %v10837_v1  ;;  %v9176_v23 = vor.u32 %v13170_v16, %v9173_v17  ;;  %v9500_v1 = vor.u32 %v13259_v46, %v9499_v45  ;;  %v10971_v16 = vld [vmem:[#allocation6 + $0xf10] sm:$0xf] }
  0x99   :  { %3487 = vmatpush.bf16.msra.mxu3 %v10580_v22  ;;  %3450 = vmatmul.bf16.vlgmr.msra.gmra.mxu1 %v14390_v53  ;;  %v10261_v3 = vld [vmem:[#allocation6 + $0x9c8] sm:$0xf0]  ;;  %v13627_v17 = vld [vmem:[#allocation6 + $0xf4c] sm:$0xf0] }
  0x9a   :  { %3518 = vmatpush.bf16.msrb.mxu1 %v10008_v24  ;;  %3431 = vmatmul.bf16.vlgmr.msra.gmra.mxu0 %v14388_v48  ;;  %v13186_v4 = vld [vmem:[#allocation6 + $0x18c] sm:$0xf]  ;;  %v10264_v10 = vor.u32 %v13442_v2, %v10261_v3  ;;  %v11035_v2 = vld [vmem:[#allocation6 + $0xf90] sm:$0xf] }
  0x9b   :  { %3537 = vmatpush.bf16.msrb.mxu2 %v10520_v11  ;;  %v9237_v5 = vld [vmem:[#allocation6 + $0x1c8] sm:$0xf0]  ;;  %v13643_v3 = vld [vmem:[#allocation6 + $0xfcc] sm:$0xf0] }
  0x9c   :  { %3500 = vmatpush.bf16.msrb.mxu0 %v9432_v31  ;;  %3469 = vmatmul.bf16.vlgmr.msra.gmra.mxu2 %v14392_v54  ;;  %v13314_v8 = vld [vmem:[#allocation6 + $0x58c] sm:$0xf]  ;;  %v9240_v11 = vor.u32 %v13186_v4, %v9237_v5  ;;  %v10459_v4 = vld [vmem:[#allocation6 + $0xb10] sm:$0xf] }
  0x9d   :  { %3556 = vmatpush.bf16.msrb.mxu3 %v11032_v25  ;;  %v9749_v9 = vld [vmem:[#allocation6 + $0x5c8] sm:$0xf0]  ;;  %v13499_v5 = vld [vmem:[#allocation6 + $0xb4c] sm:$0xf0] }
  0x9e   :  { %3488 = vmatmul.bf16.vlgmr.msra.gmra.mxu3 %v14394_v57  ;;  %3519 = vmatpush.bf16.msrb.mxu1 %v9944_v38  ;;  %v13570_v12 = vld [vmem:[#allocation6 + $0xd8c] sm:$0xf]  ;;  %v9752_v18 = vor.u32 %v13314_v8, %v9749_v9 }
  0x9f   :  { %3538 = vmatpush.bf16.msrb.mxu2 %v10456_v28  ;;  %v10773_v13 = vld [vmem:[#allocation6 + $0xdc8] sm:$0xf0] }
  0xa0   :  { %3501 = vmatpush.bf16.msrb.mxu0 %v9368_v43  ;;  %v13426_v14 = vld [vmem:[#allocation6 + $0x90c] sm:$0xf]  ;;  %v10776_v19 = vor.u32 %v13570_v12, %v10773_v13  ;;  %v13515_v43 = vld [vmem:[#allocation6 + $0xbcc] sm:$0xf0]  ;;  %v10460_v13 = vor.u32 %v13499_v5, %v10459_v4 }
  0xa1   :  { %3557 = vmatpush.bf16.msrb.mxu3 %v10968_v39  ;;  %v10197_v15 = vld [vmem:[#allocation6 + $0x948] sm:$0xf0]  ;;  %v9947_v12 = vld [vmem:[#allocation6 + $0x710] sm:$0xf] }
  0xa2   :  { %3520 = vmatpush.bf16.msrb.mxu1 %v9880_v58  ;;  %v13298_v20 = vld [vmem:[#allocation6 + $0x50c] sm:$0xf]  ;;  %v10200_v22 = vor.u32 %v13426_v14, %v10197_v15  ;;  %v13371_v15 = vld [vmem:[#allocation6 + $0x74c] sm:$0xf0] }
  0xa3   :  { %3539 = vmatpush.bf16.msrb.mxu2 %v10392_v42  ;;  %v9685_v21 = vld [vmem:[#allocation6 + $0x548] sm:$0xf0]  ;;  %v10523_v42 = vld [vmem:[#allocation6 + $0xb90] sm:$0xf] }
  0xa4   :  { %3502 = vmatpush.bf16.msrb.mxu0 %v9304_v63  ;;  %v13554_v24 = vld [vmem:[#allocation6 + $0xd0c] sm:$0xf]  ;;  %v9688_v30 = vor.u32 %v13298_v20, %v9685_v21  ;;  %v13387_v63 = vld [vmem:[#allocation6 + $0x7cc] sm:$0xf0]  ;;  %v10524_v0 = vor.u32 %v13515_v43, %v10523_v42  ;;  %v9948_v20 = vor.u32 %v13371_v15, %v9947_v12  ;;  %v10972_v21 = vor.u32 %v13627_v17, %v10971_v16 }
  0xa5   :  { %3558 = vmatpush.bf16.msrb.mxu3 %v10904_v59  ;;  %v10709_v25 = vld [vmem:[#allocation6 + $0xd48] sm:$0xf0]  ;;  %v10267_v42 = vld [vmem:[#allocation6 + $0x990] sm:$0xf] }
  0xa6   :  { %3521 = vmatpush.bf16.msrb.mxu1 %v9816_v6  ;;  %v13410_v26 = vld [vmem:[#allocation6 + $0x88c] sm:$0xf]  ;;  %v10712_v31 = vor.u32 %v13554_v24, %v10709_v25  ;;  %v9435_v6 = vld [vmem:[#allocation6 + $0x310] sm:$0xf] }
  0xa7   :  { %3540 = vmatpush.bf16.msrb.mxu2 %v10328_v62  ;;  %v10133_v27 = vld [vmem:[#allocation6 + $0x8c8] sm:$0xf0]  ;;  %v10011_v62 = vld [vmem:[#allocation6 + $0x790] sm:$0xf] }
  0xa8   :  { %3503 = vmatpush.bf16.msrb.mxu0 %v9240_v11  ;;  %v13154_v28 = vld [vmem:[#allocation6 + $0x8c] sm:$0xf]  ;;  %v10136_v35 = vor.u32 %v13410_v26, %v10133_v27  ;;  %v11036_v11 = vor.u32 %v13643_v3, %v11035_v2  ;;  %v9883_v24 = vld [vmem:[#allocation6 + $0x690] sm:$0xf] }
  0xa9   :  { %3559 = vmatpush.bf16.msrb.mxu3 %v10840_v7  ;;  %v9109_v29 = vld [vmem:[#allocation6 + $0xc8] sm:$0xf0]  ;;  %3455 = vmatmul.bf16.gmra.mxu1 %v14402_v50  ;;  %v13243_v7 = vld [vmem:[#allocation6 + $0x34c] sm:$0xf0] }
  0xaa   :  { %3522 = vmatpush.bf16.msrb.mxu1 %v9752_v18  ;;  %v13282_v32 = vld [vmem:[#allocation6 + $0x48c] sm:$0xf]  ;;  %v9112_v36 = vor.u32 %v13154_v28, %v9109_v29  ;;  %3436 = vmatmul.bf16.gmra.mxu0 %v14400_v44  ;;  %v9436_v14 = vor.u32 %v13243_v7, %v9435_v6  ;;  %v10395_v18 = vld [vmem:[#allocation6 + $0xa90] sm:$0xf] }
  0xab   :  { %3541 = vmatpush.bf16.msrb.mxu2 %v10264_v10  ;;  %v9621_v33 = vld [vmem:[#allocation6 + $0x4c8] sm:$0xf0]  ;;  %v10012_v10 = vor.u32 %v13387_v63, %v10011_v62  ;;  %v13355_v25 = vld [vmem:[#allocation6 + $0x6cc] sm:$0xf0] }
  0xac   :  { %v13538_v34 = vld [vmem:[#allocation6 + $0xc8c] sm:$0xf]  ;;  %3504 = vmatpush.bf16.msrb.mxu0 %v9176_v23  ;;  %3474 = vmatmul.bf16.gmra.mxu2 %v14404_v51  ;;  %v9624_v47 = vor.u32 %v13282_v32, %v9621_v33  ;;  %v13227_v23 = vld [vmem:[#allocation6 + $0x2cc] sm:$0xf0]  ;;  %v9884_v32 = vor.u32 %v13355_v25, %v9883_v24 }
  0xad   :  { %3560 = vmatpush.bf16.msrb.mxu3 %v10776_v19  ;;  %v10645_v37 = vld [vmem:[#allocation6 + $0xcc8] sm:$0xf0]  ;;  %v13483_v19 = vld [vmem:[#allocation6 + $0xacc] sm:$0xf0] }
  0xae   :  { %v13394_v38 = vld [vmem:[#allocation6 + $0x80c] sm:$0xf]  ;;  %3493 = vmatmul.bf16.gmra.mxu3 %v14406_v56  ;;  %3523 = vmatpush.bf16.msrb.mxu1 %v9688_v30  ;;  %v10648_v49 = vor.u32 %v13538_v34, %v10645_v37  ;;  %v10907_v26 = vld [vmem:[#allocation6 + $0xe90] sm:$0xf]  ;;  %v10396_v28 = vor.u32 %v13483_v19, %v10395_v18 }
  0xaf   :  { %3542 = vmatpush.bf16.msrb.mxu2 %v10200_v22  ;;  %v10069_v39 = vld [vmem:[#allocation6 + $0x848] sm:$0xf0]  ;;  %v9371_v22 = vld [vmem:[#allocation6 + $0x290] sm:$0xf] }
  0xb0   :  { %v13138_v40 = vld [vmem:[#allocation6 + $0xc] sm:$0xf]  ;;  %3505 = vmatpush.bf16.msrb.mxu0 %v9112_v36  ;;  %v10072_v59 = vor.u32 %v13394_v38, %v10069_v39  ;;  %v13611_v27 = vld [vmem:[#allocation6 + $0xecc] sm:$0xf0]  ;;  %v9372_v29 = vor.u32 %v13227_v23, %v9371_v22 }
  0xb1   :  { %v9045_v41 = vld [vmem:[#allocation6 + $0x48] sm:$0xf0]  ;;  %3561 = vmatpush.bf16.msrb.mxu3 %v10712_v31  ;;  %v10331_v30 = vld [vmem:[#allocation6 + $0xa10] sm:$0xf]  ;;  %v10908_v33 = vor.u32 %v13611_v27, %v10907_v26 }
  0xb2   :  { %v13266_v52 = vld [vmem:[#allocation6 + $0x40c] sm:$0xf]  ;;  %v9048_v60 = vor.u32 %v13138_v40, %v9045_v41  ;;  %3524 = vmatpush.bf16.msrb.mxu1 %v9624_v47  ;;  %v13467_v31 = vld [vmem:[#allocation6 + $0xa4c] sm:$0xf0] }
  0xb3   :  { %v9557_v55 = vld [vmem:[#allocation6 + $0x448] sm:$0xf0]  ;;  %3543 = vmatpush.bf16.msrb.mxu2 %v10136_v35  ;;  %v9307_v34 = vld [vmem:[#allocation6 + $0x210] sm:$0xf]  ;;  %v10332_v40 = vor.u32 %v13467_v31, %v10331_v30 }
  0xb4   :  { %v13522_v58 = vld [vmem:[#allocation6 + $0xc0c] sm:$0xf]  ;;  %v9560_v8 = vor.u32 %v13266_v52, %v9557_v55  ;;  %3506 = vmatpush.bf16.msrb.mxu0 %v9048_v60  ;;  %v13211_v35 = vld [vmem:[#allocation6 + $0x24c] sm:$0xf0] }
  0xb5   :  { %v10581_v61 = vld [vmem:[#allocation6 + $0xc48] sm:$0xf0]  ;;  %3562 = vmatpush.bf16.msrb.mxu3 %v10648_v49  ;;  %v9819_v36 = vld [vmem:[#allocation6 + $0x610] sm:$0xf]  ;;  %v9308_v41 = vor.u32 %v13211_v35, %v9307_v34  ;;  %v13251_v34 = vld [vmem:[#allocation6 + $0x394] sm:$0xf] }
  0xb6   :  { %v10584_v9 = vor.u32 %v13522_v58, %v10581_v61  ;;  %3525 = vmatpush.bf16.msrb.mxu1 %v9560_v8  ;;  %v13339_v37 = vld [vmem:[#allocation6 + $0x64c] sm:$0xf0]  ;;  %v9501_v35 = vld [vmem:[#allocation6 + $0x3d0] sm:$0xf0] }
  0xb7   :  { %3544 = vmatpush.bf16.msrb.mxu2 %v10072_v59  ;;  %v10843_v38 = vld [vmem:[#allocation6 + $0xe10] sm:$0xf]  ;;  %v9820_v45 = vor.u32 %v13339_v37, %v9819_v36  ;;  %v13379_v36 = vld [vmem:[#allocation6 + $0x794] sm:$0xf] }
  0xb8   :  { %3575 = vmatpush.bf16.msra.mxu0 %v9500_v1  ;;  %v13595_v39 = vld [vmem:[#allocation6 + $0xe4c] sm:$0xf0] }
  0xb9   :  { %3563 = vmatpush.bf16.msrb.mxu3 %v10584_v9  ;;  %3526 = vmatmul.bf16.vlgmr.msrb.gmra.mxu1 %v14390_v53  ;;  %v13451_v43 = vld [vmem:[#allocation6 + $0x9cc] sm:$0xf0]  ;;  %v10844_v46 = vor.u32 %v13595_v39, %v10843_v38  ;;  %v10013_v39 = vld [vmem:[#allocation6 + $0x7d0] sm:$0xf0] }
  0xba   :  { %3594 = vmatpush.bf16.msra.mxu1 %v10012_v10  ;;  %3507 = vmatmul.bf16.vlgmr.msrb.gmra.mxu0 %v14388_v48  ;;  %v9243_v47 = vld [vmem:[#allocation6 + $0x190] sm:$0xf]  ;;  %v10268_v60 = vor.u32 %v13451_v43, %v10267_v42 }
  0xbb   :  { %3613 = vmatpush.bf16.msra.mxu2 %v10524_v0  ;;  %v13195_v49 = vld [vmem:[#allocation6 + $0x1cc] sm:$0xf0] }
  0xbc   :  { %3576 = vmatpush.bf16.msra.mxu0 %v9436_v14  ;;  %3545 = vmatmul.bf16.vlgmr.msrb.gmra.mxu2 %v14392_v54  ;;  %v9755_v52 = vld [vmem:[#allocation6 + $0x590] sm:$0xf]  ;;  %v9244_v61 = vor.u32 %v13195_v49, %v9243_v47  ;;  %v9504_v47 = vor.u32 %v13251_v34, %v9501_v35  ;;  %v13491_v49 = vld [vmem:[#allocation6 + $0xb14] sm:$0xf] }
  0xbd   :  { %3632 = vmatpush.bf16.msra.mxu3 %v11036_v11  ;;  %v13323_v55 = vld [vmem:[#allocation6 + $0x5cc] sm:$0xf0] }
  0xbe   :  { %3595 = vmatpush.bf16.msra.mxu1 %v9948_v20  ;;  %3564 = vmatmul.bf16.vlgmr.msrb.gmra.mxu3 %v14394_v57  ;;  %v10779_v58 = vld [vmem:[#allocation6 + $0xd90] sm:$0xf]  ;;  %v9756_v0 = vor.u32 %v13323_v55, %v9755_v52  ;;  %v10461_v52 = vld [vmem:[#allocation6 + $0xb50] sm:$0xf0]  ;;  %v10016_v55 = vor.u32 %v13379_v36, %v10013_v39 }
  0xbf   :  { %3614 = vmatpush.bf16.msra.mxu2 %v10460_v13  ;;  %v13579_v59 = vld [vmem:[#allocation6 + $0xdcc] sm:$0xf0]  ;;  %v13315_v39 = vld [vmem:[#allocation6 + $0x594] sm:$0xf] }
  0xc0   :  { %3577 = vmatpush.bf16.msra.mxu0 %v9372_v29  ;;  %v10203_v62 = vld [vmem:[#allocation6 + $0x910] sm:$0xf]  ;;  %v10780_v1 = vor.u32 %v13579_v59, %v10779_v58  ;;  %v13235_v59 = vld [vmem:[#allocation6 + $0x314] sm:$0xf] }
  0xc1   :  { %3633 = vmatpush.bf16.msra.mxu3 %v10972_v21  ;;  %v13435_v63 = vld [vmem:[#allocation6 + $0x94c] sm:$0xf0] }
  0xc2   :  { %3596 = vmatpush.bf16.msra.mxu1 %v9884_v32  ;;  %v9179_v2 = vld [vmem:[#allocation6 + $0x110] sm:$0xf]  ;;  %v10204_v8 = vor.u32 %v13435_v63, %v10203_v62  ;;  %v13507_v32 = vld [vmem:[#allocation6 + $0xb94] sm:$0xf] }
  0xc3   :  { %3615 = vmatpush.bf16.msra.mxu2 %v10396_v28  ;;  %v13179_v3 = vld [vmem:[#allocation6 + $0x14c] sm:$0xf0]  ;;  %v9949_v62 = vld [vmem:[#allocation6 + $0x750] sm:$0xf0] }
  0xc4   :  { %3578 = vmatpush.bf16.msra.mxu0 %v9308_v41  ;;  %v9691_v4 = vld [vmem:[#allocation6 + $0x510] sm:$0xf]  ;;  %v9180_v9 = vor.u32 %v13179_v3, %v9179_v2  ;;  %v11037_v41 = vld [vmem:[#allocation6 + $0xfd0] sm:$0xf0] }
  0xc5   :  { %3634 = vmatpush.bf16.msra.mxu3 %v10908_v33  ;;  %v13307_v5 = vld [vmem:[#allocation6 + $0x54c] sm:$0xf0]  ;;  %v10525_v33 = vld [vmem:[#allocation6 + $0xbd0] sm:$0xf0] }
  0xc6   :  { %3597 = vmatpush.bf16.msra.mxu1 %v9820_v45  ;;  %v10715_v6 = vld [vmem:[#allocation6 + $0xd10] sm:$0xf]  ;;  %v9692_v12 = vor.u32 %v13307_v5, %v9691_v4  ;;  %v14436_v45 = vld [vmem:[#allocation8] sm:$0xff]  ;;  %v13619_v63 = vld [vmem:[#allocation6 + $0xf14] sm:$0xf] }
  0xc7   :  { %3616 = vmatpush.bf16.msra.mxu2 %v10332_v40  ;;  %v13563_v7 = vld [vmem:[#allocation6 + $0xd4c] sm:$0xf0]  ;;  %v13635_v40 = vld [vmem:[#allocation6 + $0xf94] sm:$0xf]  ;;  %v14439_v3 = vperm.slane %v14436_v45, 0 }
  0xc8   :  { %3579 = vmatpush.bf16.msra.mxu0 %v9244_v61  ;;  %v10139_v10 = vld [vmem:[#allocation6 + $0x890] sm:$0xf]  ;;  %v10716_v13 = vor.u32 %v13563_v7, %v10715_v6  ;;  %v11040_v58 = vor.u32 %v13635_v40, %v11037_v41  ;;  %v13363_v61 = vld [vmem:[#allocation6 + $0x714] sm:$0xf] }
  0xc9   :  { %3635 = vmatpush.bf16.msra.mxu3 %v10844_v46  ;;  %v13419_v11 = vld [vmem:[#allocation6 + $0x8cc] sm:$0xf0]  ;;  %3531 = vmatmul.bf16.gmra.mxu1 %v14402_v50  ;;  %v10528_v46 = vor.u32 %v13507_v32, %v10525_v33  ;;  %v9952_v4 = vor.u32 %v13363_v61, %v9949_v62  ;;  %v13475_v6 = vld [vmem:[#allocation6 + $0xa94] sm:$0xf] }
  0xca   :  { %3598 = vmatpush.bf16.msra.mxu1 %v9756_v0  ;;  %v9115_v14 = vld [vmem:[#allocation6 + $0x90] sm:$0xf]  ;;  %v10140_v21 = vor.u32 %v13419_v11, %v10139_v10  ;;  %3512 = vmatmul.bf16.gmra.mxu0 %v14400_v44  ;;  %v10973_v0 = vld [vmem:[#allocation6 + $0xf50] sm:$0xf0] }
  0xcb   :  { %3617 = vmatpush.bf16.msra.mxu2 %v10268_v60  ;;  %v13163_v15 = vld [vmem:[#allocation6 + $0xcc] sm:$0xf0]  ;;  %v9437_v60 = vld [vmem:[#allocation6 + $0x350] sm:$0xf0]  ;;  %v10976_v5 = vor.u32 %v13619_v63, %v10973_v0 }
  0xcc   :  { %v9627_v16 = vld [vmem:[#allocation6 + $0x490] sm:$0xf]  ;;  %3580 = vmatpush.bf16.msra.mxu0 %v9180_v9  ;;  %v9116_v22 = vor.u32 %v13163_v15, %v9115_v14  ;;  %3550 = vmatmul.bf16.gmra.mxu2 %v14404_v51  ;;  %v9440_v2 = vor.u32 %v13235_v59, %v9437_v60  ;;  %v10397_v7 = vld [vmem:[#allocation6 + $0xad0] sm:$0xf0] }
  0xcd   :  { %3636 = vmatpush.bf16.msra.mxu3 %v10780_v1  ;;  %v13291_v17 = vld [vmem:[#allocation6 + $0x4cc] sm:$0xf0]  ;;  %v10464_v1 = vor.u32 %v13491_v49, %v10461_v52  ;;  %v9373_v9 = vld [vmem:[#allocation6 + $0x2d0] sm:$0xf0] }
  0xce   :  { %v10651_v18 = vld [vmem:[#allocation6 + $0xc90] sm:$0xf]  ;;  %3599 = vmatpush.bf16.msra.mxu1 %v9692_v12  ;;  %v9628_v26 = vor.u32 %v13291_v17, %v9627_v16  ;;  %3569 = vmatmul.bf16.gmra.mxu3 %v14406_v56  ;;  %v13347_v10 = vld [vmem:[#allocation6 + $0x694] sm:$0xf]  ;;  %v10400_v17 = vor.u32 %v13475_v6, %v10397_v7 }
  0xcf   :  { %v13547_v19 = vld [vmem:[#allocation6 + $0xccc] sm:$0xf0]  ;;  %3618 = vmatpush.bf16.msra.mxu2 %v10204_v8  ;;  %v13219_v8 = vld [vmem:[#allocation6 + $0x294] sm:$0xf] }
  0xd0   :  { %v10075_v20 = vld [vmem:[#allocation6 + $0x810] sm:$0xf]  ;;  %v10652_v27 = vor.u32 %v13547_v19, %v10651_v18  ;;  %3581 = vmatpush.bf16.msra.mxu0 %v9116_v22  ;;  %v9885_v12 = vld [vmem:[#allocation6 + $0x6d0] sm:$0xf0]  ;;  %v9376_v18 = vor.u32 %v13219_v8, %v9373_v9 }
  0xd1   :  { %v13403_v23 = vld [vmem:[#allocation6 + $0x84c] sm:$0xf0]  ;;  %3637 = vmatpush.bf16.msra.mxu3 %v10716_v13  ;;  %v13603_v13 = vld [vmem:[#allocation6 + $0xe94] sm:$0xf]  ;;  %v9888_v22 = vor.u32 %v13347_v10, %v9885_v12 }
  0xd2   :  { %v9051_v24 = vld [vmem:[#allocation6 + $0x10] sm:$0xf]  ;;  %v10076_v37 = vor.u32 %v13403_v23, %v10075_v20  ;;  %3600 = vmatpush.bf16.msra.mxu1 %v9628_v26  ;;  %v10909_v14 = vld [vmem:[#allocation6 + $0xed0] sm:$0xf0] }
  0xd3   :  { %v13147_v25 = vld [vmem:[#allocation6 + $0x4c] sm:$0xf0]  ;;  %3619 = vmatpush.bf16.msra.mxu2 %v10140_v21  ;;  %v13459_v19 = vld [vmem:[#allocation6 + $0xa14] sm:$0xf]  ;;  %v10912_v23 = vor.u32 %v13603_v13, %v10909_v14 }
  0xd4   :  { %v9563_v28 = vld [vmem:[#allocation6 + $0x410] sm:$0xf]  ;;  %v9052_v38 = vor.u32 %v13147_v25, %v9051_v24  ;;  %v10333_v20 = vld [vmem:[#allocation6 + $0xa50] sm:$0xf0] }
  0xd5   :  { %v13275_v29 = vld [vmem:[#allocation6 + $0x44c] sm:$0xf0]  ;;  %3638 = vmatpush.bf16.msra.mxu3 %v10652_v27  ;;  %v3299_v16 = vpop.f32.mrf.mxu1  ;;  %v13203_v24 = vld [vmem:[#allocation6 + $0x214] sm:$0xf] }
  0xd6   :  { %v10587_v30 = vld [vmem:[#allocation6 + $0xc10] sm:$0xf]  ;;  %v9564_v42 = vor.u32 %v13275_v29, %v9563_v28  ;;  %3582 = vmatpush.bf16.msra.mxu0 %v9052_v38  ;;  %v9309_v25 = vld [vmem:[#allocation6 + $0x250] sm:$0xf0] }
  0xd7   :  { %v13531_v31 = vld [vmem:[#allocation6 + $0xc4c] sm:$0xf0]  ;;  %3620 = vmatpush.bf16.msra.mxu2 %v10076_v37  ;;  %v3280_v11 = vpop.f32.mrf.mxu0  ;;  %v13331_v26 = vld [vmem:[#allocation6 + $0x614] sm:$0xf] }
  0xd8   :  { %v10588_v43 = vor.u32 %v13531_v31, %v10587_v30  ;;  %3601 = vmatpush.bf16.msra.mxu1 %v9564_v42  ;;  %v3281_v15 = vadd.f32 %v3280_v11, %v14439_v3  ;;  %v9821_v27 = vld [vmem:[#allocation6 + $0x650] sm:$0xf0]  ;;  %v10336_v30 = vor.u32 %v13459_v19, %v10333_v20  ;;  %v9312_v31 = vor.u32 %v13203_v24, %v9309_v25 }
  0xd9   :  { %v13587_v28 = vld [vmem:[#allocation6 + $0xe14] sm:$0xf]  ;;  %v9824_v35 = vor.u32 %v13331_v26, %v9821_v27 }
  0xda   :  { %3639 = vmatpush.bf16.msra.mxu3 %v10588_v43  ;;  %3651 = vmatpush.bf16.msrb.mxu0 %v9504_v47  ;;  %v3300_v21 = vadd.f32 %v3299_v16, %v3281_v15  ;;  %v10845_v29 = vld [vmem:[#allocation6 + $0xe50] sm:$0xf0] }
  0xdb   :  { %3689 = vmatpush.bf16.msrb.mxu2 %v10528_v46  ;;  %3583 = vmatmul.bf16.vlgmr.msra.gmra.mxu0 %v14388_v48  ;;  %v13443_v32 = vld [vmem:[#allocation6 + $0x994] sm:$0xf]  ;;  %v10848_v36 = vor.u32 %v13587_v28, %v10845_v29 }
  0xdc   :  { %3670 = vmatpush.bf16.msrb.mxu1 %v10016_v55  ;;  %3621 = vmatmul.bf16.vlgmr.msra.gmra.mxu2 %v14392_v54  ;;  %v10269_v33 = vld [vmem:[#allocation6 + $0x9d0] sm:$0xf0] }
  0xdd   :  { %3602 = vmatmul.bf16.vlgmr.msra.gmra.mxu1 %v14390_v53  ;;  %v3318_v34 = vpop.f32.mrf.mxu2  ;;  %v13187_v37 = vld [vmem:[#allocation6 + $0x194] sm:$0xf]  ;;  %v3301_v52 = vpop.f32.mrf.mxu1 }
  0xde   :  { %3708 = vmatpush.bf16.msrb.mxu3 %v11040_v58  ;;  %3652 = vmatpush.bf16.msrb.mxu0 %v9440_v2  ;;  %v9245_v38 = vld [vmem:[#allocation6 + $0x1d0] sm:$0xf0]  ;;  %v3319_v40 = vadd.f32 %v3318_v34, %v3300_v21  ;;  %v10272_v58 = vor.u32 %v13443_v32, %v10269_v33 }
  0xdf   :  { %3690 = vmatpush.bf16.msrb.mxu2 %v10464_v1  ;;  %3640 = vmatmul.bf16.vlgmr.msra.gmra.mxu3 %v14394_v57  ;;  %v3337_v41 = vpop.f32.mrf.mxu3  ;;  %v3282_v42 = vpop.f32.mrf.mxu0  ;;  %v9757_v43 = vld [vmem:[#allocation6 + $0x5d0] sm:$0xf0]  ;;  %v9248_v59 = vor.u32 %v13187_v37, %v9245_v38 }
  0xe0   :  { %3671 = vmatpush.bf16.msrb.mxu1 %v9952_v4  ;;  %v13571_v46 = vld [vmem:[#allocation6 + $0xd94] sm:$0xf]  ;;  %v3283_v49 = vadd.f32 %v3282_v42, %v14439_v3  ;;  %v14447_v55 = vadd.f32 %v3337_v41, %v3319_v40  ;;  %v9760_v63 = vor.u32 %v13315_v39, %v9757_v43  ;;  %v10531_v42 = vld [vmem:[#allocation6 + $0xb98] sm:$0xf] }
  0xe1   :  { %v10781_v47 = vld [vmem:[#allocation6 + $0xdd0] sm:$0xf0]  ;;  %v13516_v43 = vld [vmem:[#allocation6 + $0xbd4] sm:$0xf0] }
  0xe2   :  { %3709 = vmatpush.bf16.msrb.mxu3 %v10976_v5  ;;  %3653 = vmatpush.bf16.msrb.mxu0 %v9376_v18  ;;  %v13427_v60 = vld [vmem:[#allocation6 + $0x914] sm:$0xf]  ;;  %v3302_v62 = vadd.f32 %v3301_v52, %v3283_v49  ;;  %v10784_v0 = vor.u32 %v13571_v46, %v10781_v47  ;;  %v4487_v40 = vmax.f32 %v14447_v55, 0.0  ;;  %v9507_v46 = vld [vmem:[#allocation6 + $0x398] sm:$0xf] }
  0xe3   :  { %3691 = vmatpush.bf16.msrb.mxu2 %v10400_v17  ;;  %v10205_v61 = vld [vmem:[#allocation6 + $0x950] sm:$0xf0]  ;;  %v13260_v47 = vld [vmem:[#allocation6 + $0x3d4] sm:$0xf0] }
  0xe4   :  { %3672 = vmatpush.bf16.msrb.mxu1 %v9888_v22  ;;  %v13171_v1 = vld [vmem:[#allocation6 + $0x114] sm:$0xf]  ;;  %v10208_v8 = vor.u32 %v13427_v60, %v10205_v61  ;;  %v10019_v49 = vld [vmem:[#allocation6 + $0x798] sm:$0xf] }
  0xe5   :  { %v9181_v2 = vld [vmem:[#allocation6 + $0x150] sm:$0xf0]  ;;  %v3320_v12 = vpop.f32.mrf.mxu2  ;;  %v3304_v25 = vpop.f32.mrf.mxu1  ;;  %v11043_v60 = vld [vmem:[#allocation6 + $0xf98] sm:$0xf] }
  0xe6   :  { %3710 = vmatpush.bf16.msrb.mxu3 %v10912_v23  ;;  %3654 = vmatpush.bf16.msrb.mxu0 %v9312_v31  ;;  %v13299_v4 = vld [vmem:[#allocation6 + $0x514] sm:$0xf]  ;;  %v9184_v9 = vor.u32 %v13171_v1, %v9181_v2  ;;  %v3321_v18 = vadd.f32 %v3320_v12, %v3302_v62  ;;  %v13644_v61 = vld [vmem:[#allocation6 + $0xfd4] sm:$0xf0] }
  0xe7   :  { %3692 = vmatpush.bf16.msrb.mxu2 %v10336_v30  ;;  %v9693_v5 = vld [vmem:[#allocation6 + $0x550] sm:$0xf0]  ;;  %v3339_v19 = vpop.f32.mrf.mxu3  ;;  %v3285_v20 = vpop.f32.mrf.mxu0  ;;  %v11044_v12 = vor.u32 %v13644_v61, %v11043_v60 }
  0xe8   :  { %3673 = vmatpush.bf16.msrb.mxu1 %v9824_v35  ;;  %v13555_v6 = vld [vmem:[#allocation6 + $0xd14] sm:$0xf]  ;;  %v9696_v13 = vor.u32 %v13299_v4, %v9693_v5  ;;  %v3286_v24 = vadd.f32 %v3285_v20, %v14439_v3  ;;  %v3340_v28 = vadd.f32 %v3339_v19, %v3321_v18  ;;  %v10532_v5 = vor.u32 %v13516_v43, %v10531_v42  ;;  %v10979_v18 = vld [vmem:[#allocation6 + $0xf18] sm:$0xf] }
  0xe9   :  { %v10717_v7 = vld [vmem:[#allocation6 + $0xd50] sm:$0xf0]  ;;  %v13628_v19 = vld [vmem:[#allocation6 + $0xf54] sm:$0xf0] }
  0xea   :  { %3711 = vmatpush.bf16.msrb.mxu3 %v10848_v36  ;;  %3655 = vmatpush.bf16.msrb.mxu0 %v9248_v59  ;;  %v13411_v10 = vld [vmem:[#allocation6 + $0x894] sm:$0xf]  ;;  %v10720_v14 = vor.u32 %v13555_v6, %v10717_v7  ;;  %v3305_v34 = vadd.f32 %v3304_v25, %v3286_v24  ;;  %v4503_v41 = vmax.f32 %v3340_v28, 0.0  ;;  %v13388_v59 = vld [vmem:[#allocation6 + $0x7d4] sm:$0xf0]  ;;  %v9508_v6 = vor.u32 %v13260_v47, %v9507_v46 }
  0xeb   :  { %3693 = vmatpush.bf16.msrb.mxu2 %v10272_v58  ;;  %v10141_v11 = vld [vmem:[#allocation6 + $0x8d0] sm:$0xf0]  ;;  %3588 = vmatmul.bf16.gmra.mxu0 %v14400_v44  ;;  %v10467_v7 = vld [vmem:[#allocation6 + $0xb18] sm:$0xf]  ;;  %v14459_v24 = vperm.slane %v14436_v45, 1 }
  0xec   :  { %3674 = vmatpush.bf16.msrb.mxu1 %v9760_v63  ;;  %v13155_v15 = vld [vmem:[#allocation6 + $0x94] sm:$0xf]  ;;  %v10144_v29 = vor.u32 %v13411_v10, %v10141_v11  ;;  %3626 = vmatmul.bf16.gmra.mxu2 %v14404_v51  ;;  %v14455_v52 = vpack.c.bf16 %v4503_v41, %v4487_v40  ;;  %v10020_v11 = vor.u32 %v13388_v59, %v10019_v49  ;;  %v10403_v25 = vld [vmem:[#allocation6 + $0xa98] sm:$0xf] }
  0xed   :  { %v9117_v16 = vld [vmem:[#allocation6 + $0xd0] sm:$0xf0]  ;;  %3607 = vmatmul.bf16.gmra.mxu1 %v14402_v50  ;;  %v3323_v62 = vpop.f32.mrf.mxu2  ;;  %v3306_v10 = vpop.f32.mrf.mxu1  ;;  %v9379_v28 = vld [vmem:[#allocation6 + $0x298] sm:$0xf] }
  0xee   :  { %3712 = vmatpush.bf16.msrb.mxu3 %v10784_v0  ;;  %v13283_v17 = vld [vmem:[#allocation6 + $0x494] sm:$0xf]  ;;  %3656 = vmatpush.bf16.msrb.mxu0 %v9184_v9  ;;  %v9120_v30 = vor.u32 %v13155_v15, %v9117_v16  ;;  %15449 = vst [vmem:[#allocation17_spill] sm:$0xff] %v14455_v52  ;;  %v3324_v1 = vadd.f32 %v3323_v62, %v3305_v34  ;;  %v9955_v15 = vld [vmem:[#allocation6 + $0x718] sm:$0xf] }
  0xef   :  { %v9629_v21 = vld [vmem:[#allocation6 + $0x4d0] sm:$0xf0]  ;;  %3694 = vmatpush.bf16.msrb.mxu2 %v10208_v8  ;;  %3645 = vmatmul.bf16.gmra.mxu3 %v14406_v56  ;;  %v3342_v2 = vpop.f32.mrf.mxu3  ;;  %v3287_v4 = vpop.f32.mrf.mxu0  ;;  %v13500_v8 = vld [vmem:[#allocation6 + $0xb54] sm:$0xf0] }
  0xf0   :  { %v13539_v22 = vld [vmem:[#allocation6 + $0xc94] sm:$0xf]  ;;  %3675 = vmatpush.bf16.msrb.mxu1 %v9696_v13  ;;  %v9632_v35 = vor.u32 %v13283_v17, %v9629_v21  ;;  %v3288_v9 = vadd.f32 %v3287_v4, %v14439_v3  ;;  %v9443_v13 = vld [vmem:[#allocation6 + $0x318] sm:$0xf]  ;;  %v3343_v16 = vadd.f32 %v3342_v2, %v3324_v1  ;;  %v10468_v21 = vor.u32 %v13500_v8, %v10467_v7 }
  0xf1   :  { %v10653_v23 = vld [vmem:[#allocation6 + $0xcd0] sm:$0xf0]  ;;  %v13372_v17 = vld [vmem:[#allocation6 + $0x754] sm:$0xf0] }
  0xf2   :  { %v13395_v26 = vld [vmem:[#allocation6 + $0x814] sm:$0xf]  ;;  %3713 = vmatpush.bf16.msrb.mxu3 %v10720_v14  ;;  %v10656_v36 = vor.u32 %v13539_v22, %v10653_v23  ;;  %3657 = vmatpush.bf16.msrb.mxu0 %v9120_v30  ;;  %v13244_v14 = vld [vmem:[#allocation6 + $0x354] sm:$0xf0]  ;;  %v3307_v20 = vadd.f32 %v3306_v10, %v3288_v9  ;;  %v9956_v3 = vor.u32 %v13372_v17, %v9955_v15  ;;  %v4519_v60 = vmax.f32 %v3343_v16, 0.0 }
  0xf3   :  { %v10077_v27 = vld [vmem:[#allocation6 + $0x850] sm:$0xf0]  ;;  %3695 = vmatpush.bf16.msrb.mxu2 %v10144_v29  ;;  %v9444_v22 = vor.u32 %v13244_v14, %v9443_v13  ;;  %v10980_v23 = vor.u32 %v13628_v19, %v10979_v18  ;;  %v13228_v29 = vld [vmem:[#allocation6 + $0x2d4] sm:$0xf0] }
  0xf4   :  { %v13139_v31 = vld [vmem:[#allocation6 + $0x14] sm:$0xf]  ;;  %v10080_v58 = vor.u32 %v13395_v26, %v10077_v27  ;;  %3676 = vmatpush.bf16.msrb.mxu1 %v9632_v35  ;;  %v13484_v26 = vld [vmem:[#allocation6 + $0xad4] sm:$0xf0]  ;;  %v9380_v41 = vor.u32 %v13228_v29, %v9379_v28 }
  0xf5   :  { %v9053_v32 = vld [vmem:[#allocation6 + $0x50] sm:$0xf0]  ;;  %v3325_v27 = vpop.f32.mrf.mxu2  ;;  %v9891_v30 = vld [vmem:[#allocation6 + $0x698] sm:$0xf]  ;;  %v10404_v40 = vor.u32 %v13484_v26, %v10403_v25 }
  0xf6   :  { %v13267_v33 = vld [vmem:[#allocation6 + $0x414] sm:$0xf]  ;;  %v9056_v55 = vor.u32 %v13139_v31, %v9053_v32  ;;  %3714 = vmatpush.bf16.msrb.mxu3 %v10656_v36  ;;  %v3326_v31 = vadd.f32 %v3325_v27, %v3307_v20  ;;  %v10915_v34 = vld [vmem:[#allocation6 + $0xe98] sm:$0xf] }
  0xf7   :  { %v9565_v37 = vld [vmem:[#allocation6 + $0x450] sm:$0xf0]  ;;  %3696 = vmatpush.bf16.msrb.mxu2 %v10080_v58  ;;  %v3344_v32 = vpop.f32.mrf.mxu3  ;;  %v13612_v35 = vld [vmem:[#allocation6 + $0xed4] sm:$0xf0]  ;;  %v3356_v36 = vpop.f32.mrf.mxu0 }
  0xf8   :  { %v13523_v38 = vld [vmem:[#allocation6 + $0xc14] sm:$0xf]  ;;  %v9568_v63 = vor.u32 %v13267_v33, %v9565_v37  ;;  %3658 = vmatpush.bf16.msrb.mxu0 %v9056_v55  ;;  %v13356_v33 = vld [vmem:[#allocation6 + $0x6d4] sm:$0xf0]  ;;  %v3375_v37 = vpop.f32.mrf.mxu1  ;;  %v10916_v49 = vor.u32 %v13612_v35, %v10915_v34 }
  0xf9   :  { %v10589_v39 = vld [vmem:[#allocation6 + $0xc50] sm:$0xf0]  ;;  %v10339_v42 = vld [vmem:[#allocation6 + $0xa18] sm:$0xf]  ;;  %v9892_v47 = vor.u32 %v13356_v33, %v9891_v30 }
  0xfa   :  { %v10592_v0 = vor.u32 %v13523_v38, %v10589_v39  ;;  %3677 = vmatpush.bf16.msrb.mxu1 %v9568_v63  ;;  %v3345_v38 = vadd.f32 %v3344_v32, %v3326_v31  ;;  %v3357_v39 = vadd.f32 %v3356_v36, %v14459_v24  ;;  %v13468_v43 = vld [vmem:[#allocation6 + $0xa54] sm:$0xf0] }
  0xfb   :  { %3765 = vmatpush.bf16.msra.mxu2 %v10532_v5  ;;  %v9315_v46 = vld [vmem:[#allocation6 + $0x218] sm:$0xf]  ;;  %3659 = vmatmul.bf16.vlgmr.msrb.gmra.mxu0 %v14388_v48  ;;  %v10340_v2 = vor.u32 %v13468_v43, %v10339_v42 }
  0xfc   :  { %3715 = vmatpush.bf16.msrb.mxu3 %v10592_v0  ;;  %3727 = vmatpush.bf16.msra.mxu0 %v9508_v6  ;;  %v13212_v58 = vld [vmem:[#allocation6 + $0x254] sm:$0xf0]  ;;  %v4535_v61 = vmax.f32 %v3345_v38, 0.0  ;;  %v3376_v62 = vadd.f32 %v3375_v37, %v3357_v39 }
  0xfd   :  { %v9827_v55 = vld [vmem:[#allocation6 + $0x618] sm:$0xf]  ;;  %3678 = vmatmul.bf16.vlgmr.msrb.gmra.mxu1 %v14390_v53  ;;  %3697 = vmatmul.bf16.vlgmr.msrb.gmra.mxu2 %v14392_v54  ;;  %v9316_v4 = vor.u32 %v13212_v58, %v9315_v46 }
  0xfe   :  { %3746 = vmatpush.bf16.msra.mxu1 %v10020_v11  ;;  %v13340_v59 = vld [vmem:[#allocation6 + $0x654] sm:$0xf0]  ;;  %v14466_v1 = vpack.c.bf16 %v4535_v61, %v4519_v60 }
  0xff   :  { %3766 = vmatpush.bf16.msra.mxu2 %v10468_v21  ;;  %v10851_v63 = vld [vmem:[#allocation6 + $0xe18] sm:$0xf]  ;;  %3716 = vmatmul.bf16.vlgmr.msrb.gmra.mxu3 %v14394_v57  ;;  %v9828_v7 = vor.u32 %v13340_v59, %v9827_v55  ;;  %v3413_v13 = vpop.f32.mrf.mxu3  ;;  %v3358_v18 = vpop.f32.mrf.mxu0 }
 0x100   :  { %3784 = vmatpush.bf16.msra.mxu3 %v11044_v12  ;;  %3728 = vmatpush.bf16.msra.mxu0 %v9444_v22  ;;  %v13596_v0 = vld [vmem:[#allocation6 + $0xe54] sm:$0xf0]  ;;  %15450 = vst [vmem:[#allocation18_spill] sm:$0xff] %v14466_v1  ;;  %v3394_v12 = vpop.f32.mrf.mxu2  ;;  %v3377_v19 = vpop.f32.mrf.mxu1  ;;  %v3359_v20 = vadd.f32 %v3358_v18, %v14459_v24 }
 0x101   :  { %v10275_v5 = vld [vmem:[#allocation6 + $0x998] sm:$0xf]  ;;  %v10852_v8 = vor.u32 %v13596_v0, %v10851_v63  ;;  %v3395_v17 = vadd.f32 %v3394_v12, %v3376_v62 }
 0x102   :  { %3747 = vmatpush.bf16.msra.mxu1 %v9956_v3  ;;  %v13452_v6 = vld [vmem:[#allocation6 + $0x9d4] sm:$0xf0]  ;;  %v3378_v31 = vadd.f32 %v3377_v19, %v3359_v20  ;;  %v9509_v20 = vld [vmem:[#allocation6 + $0x3d8] sm:$0xf0] }
 0x103   :  { %3767 = vmatpush.bf16.msra.mxu2 %v10404_v40  ;;  %v9251_v9 = vld [vmem:[#allocation6 + $0x198] sm:$0xf]  ;;  %v10276_v21 = vor.u32 %v13452_v6, %v10275_v5  ;;  %v14469_v25 = vadd.f32 %v3413_v13, %v3395_v17  ;;  %v13252_v17 = vld [vmem:[#allocation6 + $0x39c] sm:$0xf] }
 0x104   :  { %3785 = vmatpush.bf16.msra.mxu3 %v10980_v23  ;;  %3729 = vmatpush.bf16.msra.mxu0 %v9380_v41  ;;  %v13196_v10 = vld [vmem:[#allocation6 + $0x1d4] sm:$0xf0] }
 0x105   :  { %v9763_v11 = vld [vmem:[#allocation6 + $0x598] sm:$0xf]  ;;  %v9252_v22 = vor.u32 %v13196_v10, %v9251_v9  ;;  %v4488_v18 = vmax.f32 %v14469_v25, 0.0 }
 0x106   :  { %3748 = vmatpush.bf16.msra.mxu1 %v9892_v47  ;;  %v13324_v14 = vld [vmem:[#allocation6 + $0x5d4] sm:$0xf0] }
 0x107   :  { %v10787_v15 = vld [vmem:[#allocation6 + $0xd98] sm:$0xf]  ;;  %3768 = vmatpush.bf16.msra.mxu2 %v10340_v2  ;;  %v9764_v26 = vor.u32 %v13324_v14, %v9763_v11  ;;  %v3415_v47 = vpop.f32.mrf.mxu3  ;;  %v3361_v60 = vpop.f32.mrf.mxu0 }
 0x108   :  { %3786 = vmatpush.bf16.msra.mxu3 %v10916_v49  ;;  %v13580_v16 = vld [vmem:[#allocation6 + $0xdd4] sm:$0xf0]  ;;  %3730 = vmatpush.bf16.msra.mxu0 %v9316_v4  ;;  %v3396_v46 = vpop.f32.mrf.mxu2  ;;  %v3380_v61 = vpop.f32.mrf.mxu1  ;;  %v3362_v0 = vadd.f32 %v3361_v60, %v14459_v24 }
 0x109   :  { %v10211_v3 = vld [vmem:[#allocation6 + $0x918] sm:$0xf]  ;;  %v10788_v27 = vor.u32 %v13580_v16, %v10787_v15  ;;  %v3397_v59 = vadd.f32 %v3396_v46, %v3378_v31  ;;  %v13508_v15 = vld [vmem:[#allocation6 + $0xb9c] sm:$0xf] }
 0x10a   :  { %v13436_v23 = vld [vmem:[#allocation6 + $0x954] sm:$0xf0]  ;;  %3749 = vmatpush.bf16.msra.mxu1 %v9828_v7  ;;  %v3381_v14 = vadd.f32 %v3380_v61, %v3362_v0  ;;  %v10533_v16 = vld [vmem:[#allocation6 + $0xbd8] sm:$0xf0]  ;;  %v14481_v0 = vperm.slane %v14436_v45, 2 }
 0x10b   :  { %v9187_v28 = vld [vmem:[#allocation6 + $0x118] sm:$0xf]  ;;  %3769 = vmatpush.bf16.msra.mxu2 %v10276_v21  ;;  %v10212_v35 = vor.u32 %v13436_v23, %v10211_v3  ;;  %3664 = vmatmul.bf16.gmra.mxu0 %v14400_v44  ;;  %v13380_v21 = vld [vmem:[#allocation6 + $0x79c] sm:$0xf] }
 0x10c   :  { %3787 = vmatpush.bf16.msra.mxu3 %v10852_v8  ;;  %v13180_v29 = vld [vmem:[#allocation6 + $0x154] sm:$0xf0]  ;;  %3731 = vmatpush.bf16.msra.mxu0 %v9252_v22  ;;  %v3416_v8 = vadd.f32 %v3415_v47, %v3397_v59  ;;  %v10021_v23 = vld [vmem:[#allocation6 + $0x7d8] sm:$0xf0] }
 0x10d   :  { %v9699_v30 = vld [vmem:[#allocation6 + $0x518] sm:$0xf]  ;;  %v9188_v36 = vor.u32 %v13180_v29, %v9187_v28  ;;  %3683 = vmatmul.bf16.gmra.mxu1 %v14402_v50  ;;  %3702 = vmatmul.bf16.gmra.mxu2 %v14404_v51  ;;  %v9957_v47 = vld [vmem:[#allocation6 + $0x758] sm:$0xf0] }
 0x10e   :  { %v13308_v32 = vld [vmem:[#allocation6 + $0x554] sm:$0xf0]  ;;  %3750 = vmatpush.bf16.msra.mxu1 %v9764_v26  ;;  %v4504_v19 = vmax.f32 %v3416_v8, 0.0  ;;  %v13636_v26 = vld [vmem:[#allocation6 + $0xf9c] sm:$0xf] }
 0x10f   :  { %v10723_v33 = vld [vmem:[#allocation6 + $0xd18] sm:$0xf]  ;;  %v9700_v39 = vor.u32 %v13308_v32, %v9699_v30  ;;  %3770 = vmatpush.bf16.msra.mxu2 %v10212_v35  ;;  %3721 = vmatmul.bf16.gmra.mxu3 %v14406_v56  ;;  %v3418_v31 = vpop.f32.mrf.mxu3  ;;  %v10536_v32 = vor.u32 %v13508_v15, %v10533_v16  ;;  %v10469_v35 = vld [vmem:[#allocation6 + $0xb58] sm:$0xf0] }
 0x110   :  { %v13564_v34 = vld [vmem:[#allocation6 + $0xd54] sm:$0xf0]  ;;  %3788 = vmatpush.bf16.msra.mxu3 %v10788_v27  ;;  %3732 = vmatpush.bf16.msra.mxu0 %v9188_v36  ;;  %v11045_v27 = vld [vmem:[#allocation6 + $0xfd8] sm:$0xf0]  ;;  %v14477_v28 = vpack.c.bf16 %v4504_v19, %v4488_v18  ;;  %v3399_v30 = vpop.f32.mrf.mxu2 }
 0x111   :  { %v10147_v37 = vld [vmem:[#allocation6 + $0x898] sm:$0xf]  ;;  %v10724_v40 = vor.u32 %v13564_v34, %v10723_v33  ;;  %v9512_v33 = vor.u32 %v13252_v17, %v9509_v20  ;;  %v13492_v34 = vld [vmem:[#allocation6 + $0xb1c] sm:$0xf]  ;;  %v3400_v36 = vadd.f32 %v3399_v30, %v3381_v14 }
 0x112   :  { %v13420_v38 = vld [vmem:[#allocation6 + $0x8d4] sm:$0xf0]  ;;  %3751 = vmatpush.bf16.msra.mxu1 %v9700_v39  ;;  %15451 = vst [vmem:[#allocation19_spill] sm:$0xff] %v14477_v28  ;;  %v10024_v39 = vor.u32 %v13380_v21, %v10021_v23  ;;  %v10472_v60 = vor.u32 %v13492_v34, %v10469_v35  ;;  %v13460_v17 = vld [vmem:[#allocation6 + $0xa1c] sm:$0xf] }
 0x113   :  { %v9123_v41 = vld [vmem:[#allocation6 + $0x98] sm:$0xf]  ;;  %v10148_v2 = vor.u32 %v13420_v38, %v10147_v37  ;;  %v3363_v37 = vpop.f32.mrf.mxu0  ;;  %v3382_v38 = vpop.f32.mrf.mxu1  ;;  %v10341_v18 = vld [vmem:[#allocation6 + $0xa58] sm:$0xf0] }
 0x114   :  { %v13164_v42 = vld [vmem:[#allocation6 + $0xd4] sm:$0xf0]  ;;  %3789 = vmatpush.bf16.msra.mxu3 %v10724_v40  ;;  %v11048_v40 = vor.u32 %v13636_v26, %v11045_v27  ;;  %v3364_v46 = vadd.f32 %v3363_v37, %v14459_v24  ;;  %v13476_v24 = vld [vmem:[#allocation6 + $0xa9c] sm:$0xf] }
 0x115   :  { %v9635_v43 = vld [vmem:[#allocation6 + $0x498] sm:$0xf]  ;;  %v9124_v4 = vor.u32 %v13164_v42, %v9123_v41  ;;  %3771 = vmatpush.bf16.msra.mxu2 %v10148_v2  ;;  %v13236_v41 = vld [vmem:[#allocation6 + $0x31c] sm:$0xf] }
 0x116   :  { %v13292_v49 = vld [vmem:[#allocation6 + $0x4d4] sm:$0xf0]  ;;  %v9445_v42 = vld [vmem:[#allocation6 + $0x358] sm:$0xf0]  ;;  %v3383_v59 = vadd.f32 %v3382_v38, %v3364_v46 }
 0x117   :  { %v10659_v58 = vld [vmem:[#allocation6 + $0xc98] sm:$0xf]  ;;  %v9636_v9 = vor.u32 %v13292_v49, %v9635_v43  ;;  %3733 = vmatpush.bf16.msra.mxu0 %v9124_v4  ;;  %v13364_v43 = vld [vmem:[#allocation6 + $0x71c] sm:$0xf]  ;;  %v9448_v61 = vor.u32 %v13236_v41, %v9445_v42  ;;  %v3420_v8 = vpop.f32.mrf.mxu3 }
 0x118   :  { %v13548_v55 = vld [vmem:[#allocation6 + $0xcd4] sm:$0xf0]  ;;  %v13620_v49 = vld [vmem:[#allocation6 + $0xf1c] sm:$0xf] }
 0x119   :  { %v10083_v62 = vld [vmem:[#allocation6 + $0x818] sm:$0xf]  ;;  %v10660_v10 = vor.u32 %v13548_v55, %v10659_v58  ;;  %3752 = vmatpush.bf16.msra.mxu1 %v9636_v9  ;;  %v10981_v58 = vld [vmem:[#allocation6 + $0xf58] sm:$0xf0]  ;;  %v3419_v55 = vadd.f32 %v3418_v31, %v3400_v36 }
 0x11a   :  { %v13404_v63 = vld [vmem:[#allocation6 + $0x854] sm:$0xf0]  ;;  %v10405_v2 = vld [vmem:[#allocation6 + $0xad8] sm:$0xf0] }
 0x11b   :  { %v9059_v5 = vld [vmem:[#allocation6 + $0x18] sm:$0xf]  ;;  %v10084_v22 = vor.u32 %v13404_v63, %v10083_v62  ;;  %3790 = vmatpush.bf16.msra.mxu3 %v10660_v10  ;;  %v9960_v62 = vor.u32 %v13364_v43, %v9957_v47  ;;  %v10984_v63 = vor.u32 %v13620_v49, %v10981_v58  ;;  %v13220_v4 = vld [vmem:[#allocation6 + $0x29c] sm:$0xf]  ;;  %v3451_v14 = vpop.f32.mrf.mxu1  ;;  %v10408_v15 = vor.u32 %v13476_v24, %v10405_v2 }
 0x11c   :  { %v13148_v6 = vld [vmem:[#allocation6 + $0x54] sm:$0xf0]  ;;  %v9893_v9 = vld [vmem:[#allocation6 + $0x6d8] sm:$0xf0]  ;;  %v4520_v30 = vmax.f32 %v3419_v55, 0.0 }
 0x11d   :  { %v9571_v7 = vld [vmem:[#allocation6 + $0x418] sm:$0xf]  ;;  %v9060_v3 = vor.u32 %v13148_v6, %v9059_v5  ;;  %3772 = vmatpush.bf16.msra.mxu2 %v10084_v22  ;;  %v9381_v5 = vld [vmem:[#allocation6 + $0x2d8] sm:$0xf0] }
 0x11e   :  { %v13276_v11 = vld [vmem:[#allocation6 + $0x454] sm:$0xf0]  ;;  %v13348_v6 = vld [vmem:[#allocation6 + $0x69c] sm:$0xf]  ;;  %v9384_v16 = vor.u32 %v13220_v4, %v9381_v5 }
 0x11f   :  { %v10595_v12 = vld [vmem:[#allocation6 + $0xc18] sm:$0xf]  ;;  %v9572_v29 = vor.u32 %v13276_v11, %v9571_v7  ;;  %3734 = vmatpush.bf16.msra.mxu0 %v9060_v3  ;;  %v3401_v7 = vpop.f32.mrf.mxu2  ;;  %v13604_v10 = vld [vmem:[#allocation6 + $0xe9c] sm:$0xf]  ;;  %v9896_v20 = vor.u32 %v13348_v6, %v9893_v9 }
 0x120   :  { %v13532_v13 = vld [vmem:[#allocation6 + $0xc54] sm:$0xf0]  ;;  %v10917_v11 = vld [vmem:[#allocation6 + $0xed8] sm:$0xf0]  ;;  %3773 = vmatmul.bf16.vlgmr.msra.gmra.mxu2 %v14392_v54 }
 0x121   :  { %v10596_v25 = vor.u32 %v13532_v13, %v10595_v12  ;;  %3753 = vmatpush.bf16.msra.mxu1 %v9572_v29  ;;  %3841 = vmatpush.bf16.msrb.mxu2 %v10536_v32  ;;  %v3402_v12 = vadd.f32 %v3401_v7, %v3383_v59  ;;  %v3432_v13 = vpop.f32.mrf.mxu0  ;;  %v10920_v21 = vor.u32 %v13604_v10, %v10917_v11  ;;  %v13204_v22 = vld [vmem:[#allocation6 + $0x21c] sm:$0xf]  ;;  %v3489_v43 = vpop.f32.mrf.mxu3 }
 0x122   :  { %v3433_v45 = vadd.f32 %v3432_v13, %v14481_v0  ;;  %v9317_v3 = vld [vmem:[#allocation6 + $0x258] sm:$0xf0]  ;;  %3735 = vmatmul.bf16.vlgmr.msra.gmra.mxu0 %v14388_v48  ;;  %v10344_v32 = vor.u32 %v13460_v17, %v10341_v18 }
 0x123   :  { %3791 = vmatpush.bf16.msra.mxu3 %v10596_v25  ;;  %3803 = vmatpush.bf16.msrb.mxu0 %v9512_v33  ;;  %v3421_v19 = vadd.f32 %v3420_v8, %v3402_v12  ;;  %v13332_v23 = vld [vmem:[#allocation6 + $0x61c] sm:$0xf]  ;;  %v9320_v33 = vor.u32 %v13204_v22, %v9317_v3  ;;  %v3453_v59 = vpop.f32.mrf.mxu1 }
 0x124   :  { %v3452_v26 = vadd.f32 %v3451_v14, %v3433_v45  ;;  %3754 = vmatmul.bf16.vlgmr.msra.gmra.mxu1 %v14390_v53  ;;  %v9829_v27 = vld [vmem:[#allocation6 + $0x658] sm:$0xf0] }
 0x125   :  { %3822 = vmatpush.bf16.msrb.mxu1 %v10024_v39  ;;  %3842 = vmatpush.bf16.msrb.mxu2 %v10472_v60  ;;  %v13588_v29 = vld [vmem:[#allocation6 + $0xe1c] sm:$0xf]  ;;  %v4536_v31 = vmax.f32 %v3421_v19, 0.0  ;;  %v9832_v37 = vor.u32 %v13332_v23, %v9829_v27 }
 0x126   :  { %v10853_v25 = vld [vmem:[#allocation6 + $0xe58] sm:$0xf0]  ;;  %3792 = vmatmul.bf16.vlgmr.msra.gmra.mxu3 %v14394_v57 }
 0x127   :  { %3860 = vmatpush.bf16.msrb.mxu3 %v11048_v40  ;;  %3804 = vmatpush.bf16.msrb.mxu0 %v9448_v61  ;;  %v13444_v34 = vld [vmem:[#allocation6 + $0x99c] sm:$0xf]  ;;  %v14488_v36 = vpack.c.bf16 %v4536_v31, %v4520_v30  ;;  %v10856_v38 = vor.u32 %v13588_v29, %v10853_v25  ;;  %v3470_v42 = vpop.f32.mrf.mxu2 }
 0x128   :  { %v10277_v35 = vld [vmem:[#allocation6 + $0x9d8] sm:$0xf0]  ;;  %v3471_v58 = vadd.f32 %v3470_v42, %v3452_v26 }
 0x129   :  { %3823 = vmatpush.bf16.msrb.mxu1 %v9960_v62  ;;  %3843 = vmatpush.bf16.msrb.mxu2 %v10408_v15  ;;  %15452 = vst [vmem:[#allocation20_spill] sm:$0xff] %v14488_v36  ;;  %v13188_v39 = vld [vmem:[#allocation6 + $0x19c] sm:$0xf]  ;;  %v3434_v55 = vpop.f32.mrf.mxu0  ;;  %v10280_v61 = vor.u32 %v13444_v34, %v10277_v35  ;;  %v3491_v22 = vpop.f32.mrf.mxu3 }
 0x12a   :  { %v9253_v40 = vld [vmem:[#allocation6 + $0x1d8] sm:$0xf0]  ;;  %v3435_v60 = vadd.f32 %v3434_v55, %v14481_v0  ;;  %v14491_v2 = vadd.f32 %v3489_v43, %v3471_v58  ;;  %v13517_v58 = vld [vmem:[#allocation6 + $0xbdc] sm:$0xf0] }
 0x12b   :  { %3861 = vmatpush.bf16.msrb.mxu3 %v10984_v63  ;;  %3805 = vmatpush.bf16.msrb.mxu0 %v9384_v16  ;;  %v13316_v41 = vld [vmem:[#allocation6 + $0x59c] sm:$0xf]  ;;  %v9256_v62 = vor.u32 %v13188_v39, %v9253_v40  ;;  %v3456_v25 = vpop.f32.mrf.mxu1  ;;  %v9515_v55 = vld [vmem:[#allocation6 + $0x3a0] sm:$0xf] }
 0x12c   :  { %v9765_v46 = vld [vmem:[#allocation6 + $0x5d8] sm:$0xf0]  ;;  %v3454_v9 = vadd.f32 %v3453_v59, %v3435_v60  ;;  %v4489_v59 = vmax.f32 %v14491_v2, 0.0 }
 0x12d   :  { %3824 = vmatpush.bf16.msrb.mxu1 %v9896_v20  ;;  %v13572_v47 = vld [vmem:[#allocation6 + $0xd9c] sm:$0xf]  ;;  %3844 = vmatpush.bf16.msrb.mxu2 %v10344_v32  ;;  %v9768_v4 = vor.u32 %v13316_v41, %v9765_v46 }
 0x12e   :  { %v10789_v49 = vld [vmem:[#allocation6 + $0xdd8] sm:$0xf0] }
 0x12f   :  { %3862 = vmatpush.bf16.msrb.mxu3 %v10920_v21  ;;  %3806 = vmatpush.bf16.msrb.mxu0 %v9320_v33  ;;  %v13428_v63 = vld [vmem:[#allocation6 + $0x91c] sm:$0xf]  ;;  %v10792_v5 = vor.u32 %v13572_v47, %v10789_v49  ;;  %v3472_v21 = vpop.f32.mrf.mxu2  ;;  %v10539_v49 = vld [vmem:[#allocation6 + $0xba0] sm:$0xf] }
 0x130   :  { %v10213_v24 = vld [vmem:[#allocation6 + $0x958] sm:$0xf0]  ;;  %v3473_v27 = vadd.f32 %v3472_v21, %v3454_v9  ;;  %3778 = vmatmul.bf16.gmra.mxu2 %v14404_v51  ;;  %v9963_v21 = vld [vmem:[#allocation6 + $0x720] sm:$0xf] }
 0x131   :  { %3825 = vmatpush.bf16.msrb.mxu1 %v9832_v37  ;;  %v13172_v6 = vld [vmem:[#allocation6 + $0x11c] sm:$0xf]  ;;  %3845 = vmatpush.bf16.msrb.mxu2 %v10280_v61  ;;  %v10216_v13 = vor.u32 %v13428_v63, %v10213_v24  ;;  %v3437_v29 = vpop.f32.mrf.mxu0  ;;  %v13261_v61 = vld [vmem:[#allocation6 + $0x3dc] sm:$0xf0] }
 0x132   :  { %v9189_v7 = vld [vmem:[#allocation6 + $0x158] sm:$0xf0]  ;;  %v3438_v32 = vadd.f32 %v3437_v29, %v14481_v0  ;;  %v3492_v39 = vadd.f32 %v3491_v22, %v3473_v27  ;;  %3740 = vmatmul.bf16.gmra.mxu0 %v14400_v44 }
 0x133   :  { %3863 = vmatpush.bf16.msrb.mxu3 %v10856_v38  ;;  %v13300_v8 = vld [vmem:[#allocation6 + $0x51c] sm:$0xf]  ;;  %3807 = vmatpush.bf16.msrb.mxu0 %v9256_v62  ;;  %v9192_v14 = vor.u32 %v13172_v6, %v9189_v7  ;;  %v10027_v62 = vld [vmem:[#allocation6 + $0x7a0] sm:$0xf] }
 0x134   :  { %v9701_v10 = vld [vmem:[#allocation6 + $0x558] sm:$0xf0]  ;;  %v3457_v47 = vadd.f32 %v3456_v25, %v3438_v32  ;;  %3759 = vmatmul.bf16.gmra.mxu1 %v14402_v50  ;;  %v4505_v60 = vmax.f32 %v3492_v39, 0.0  ;;  %v13645_v6 = vld [vmem:[#allocation6 + $0xfdc] sm:$0xf0] }
 0x135   :  { %v13556_v11 = vld [vmem:[#allocation6 + $0xd1c] sm:$0xf]  ;;  %3826 = vmatpush.bf16.msrb.mxu1 %v9768_v4  ;;  %v9704_v16 = vor.u32 %v13300_v8, %v9701_v10  ;;  %3846 = vmatpush.bf16.msrb.mxu2 %v10216_v13  ;;  %v13389_v4 = vld [vmem:[#allocation6 + $0x7dc] sm:$0xf0]  ;;  %v3494_v10 = vpop.f32.mrf.mxu3 }
 0x136   :  { %v10725_v12 = vld [vmem:[#allocation6 + $0xd58] sm:$0xf0]  ;;  %3797 = vmatmul.bf16.gmra.mxu3 %v14406_v56  ;;  %v14499_v7 = vpack.c.bf16 %v4505_v60, %v4489_v59  ;;  %v10475_v13 = vld [vmem:[#allocation6 + $0xb20] sm:$0xf] }
 0x137   :  { %v13412_v45 = vld [vmem:[#allocation6 + $0x89c] sm:$0xf]  ;;  %3864 = vmatpush.bf16.msrb.mxu3 %v10792_v5  ;;  %v10728_v17 = vor.u32 %v13556_v11, %v10725_v12  ;;  %3808 = vmatpush.bf16.msrb.mxu0 %v9192_v14  ;;  %v11051_v5 = vld [vmem:[#allocation6 + $0xfa0] sm:$0xf]  ;;  %v3475_v9 = vpop.f32.mrf.mxu2  ;;  %v10540_v11 = vor.u32 %v13517_v58, %v10539_v49  ;;  %v9516_v12 = vor.u32 %v13261_v61, %v9515_v55 }
 0x138   :  { %v10149_v15 = vld [vmem:[#allocation6 + $0x8d8] sm:$0xf0]  ;;  %15453 = vst [vmem:[#allocation21_spill] sm:$0xff] %v14499_v7  ;;  %v13501_v14 = vld [vmem:[#allocation6 + $0xb5c] sm:$0xf0] }
 0x139   :  { %v13156_v18 = vld [vmem:[#allocation6 + $0x9c] sm:$0xf]  ;;  %v10152_v33 = vor.u32 %v13412_v45, %v10149_v15  ;;  %3827 = vmatpush.bf16.msrb.mxu1 %v9704_v16  ;;  %v3476_v45 = vadd.f32 %v3475_v9, %v3457_v47  ;;  %v3439_v15 = vpop.f32.mrf.mxu0  ;;  %v3458_v16 = vpop.f32.mrf.mxu1  ;;  %v10476_v25 = vor.u32 %v13501_v14, %v10475_v13  ;;  %v9899_v39 = vld [vmem:[#allocation6 + $0x6a0] sm:$0xf] }
 0x13a   :  { %v9125_v19 = vld [vmem:[#allocation6 + $0xd8] sm:$0xf0]  ;;  %v3440_v22 = vadd.f32 %v3439_v15, %v14481_v0  ;;  %v10347_v61 = vld [vmem:[#allocation6 + $0xa20] sm:$0xf] }
 0x13b   :  { %v13284_v20 = vld [vmem:[#allocation6 + $0x49c] sm:$0xf]  ;;  %v9128_v34 = vor.u32 %v13156_v18, %v9125_v19  ;;  %3865 = vmatpush.bf16.msrb.mxu3 %v10728_v17  ;;  %3847 = vmatpush.bf16.msrb.mxu2 %v10152_v33  ;;  %v10028_v17 = vor.u32 %v13389_v4, %v10027_v62  ;;  %v11052_v18 = vor.u32 %v13645_v6, %v11051_v5  ;;  %v9451_v19 = vld [vmem:[#allocation6 + $0x320] sm:$0xf] }
 0x13c   :  { %v9637_v3 = vld [vmem:[#allocation6 + $0x4d8] sm:$0xf0]  ;;  %v3495_v27 = vadd.f32 %v3494_v10, %v3476_v45  ;;  %v3459_v29 = vadd.f32 %v3458_v16, %v3440_v22  ;;  %v14502_v33 = vld [vmem:[#allocation8] sm:$0xff] }
 0x13d   :  { %v13540_v23 = vld [vmem:[#allocation6 + $0xc9c] sm:$0xf]  ;;  %v9640_v40 = vor.u32 %v13284_v20, %v9637_v3  ;;  %3809 = vmatpush.bf16.msrb.mxu0 %v9128_v34  ;;  %v13245_v20 = vld [vmem:[#allocation6 + $0x35c] sm:$0xf0]  ;;  %v14505_v0 = vperm.slane %v14502_v33, 3 }
 0x13e   :  { %v10661_v26 = vld [vmem:[#allocation6 + $0xcd8] sm:$0xf0]  ;;  %v13373_v3 = vld [vmem:[#allocation6 + $0x75c] sm:$0xf0] }
 0x13f   :  { %v13396_v30 = vld [vmem:[#allocation6 + $0x81c] sm:$0xf]  ;;  %v10664_v41 = vor.u32 %v13540_v23, %v10661_v26  ;;  %3828 = vmatpush.bf16.msrb.mxu1 %v9640_v40  ;;  %v10987_v23 = vld [vmem:[#allocation6 + $0xf20] sm:$0xf]  ;;  %v3477_v40 = vpop.f32.mrf.mxu2 }
 0x140   :  { %v10085_v31 = vld [vmem:[#allocation6 + $0x858] sm:$0xf0]  ;;  %v13629_v26 = vld [vmem:[#allocation6 + $0xf5c] sm:$0xf0]  ;;  %v3478_v47 = vadd.f32 %v3477_v40, %v3459_v29 }
 0x141   :  { %v13140_v35 = vld [vmem:[#allocation6 + $0x1c] sm:$0xf]  ;;  %v10088_v63 = vor.u32 %v13396_v30, %v10085_v31  ;;  %3866 = vmatpush.bf16.msrb.mxu3 %v10664_v41  ;;  %v9452_v30 = vor.u32 %v13245_v20, %v9451_v19  ;;  %v9964_v31 = vor.u32 %v13373_v3, %v9963_v21  ;;  %v10988_v32 = vor.u32 %v13629_v26, %v10987_v23  ;;  %v10411_v34 = vld [vmem:[#allocation6 + $0xaa0] sm:$0xf]  ;;  %v3496_v41 = vpop.f32.mrf.mxu3  ;;  %v3508_v49 = vpop.f32.mrf.mxu0 }
 0x142   :  { %v9061_v37 = vld [vmem:[#allocation6 + $0x58] sm:$0xf0]  ;;  %v3527_v58 = vpop.f32.mrf.mxu1  ;;  %v3509_v55 = vadd.f32 %v3508_v49, %v14505_v0  ;;  %v13469_v62 = vld [vmem:[#allocation6 + $0xa5c] sm:$0xf0] }
 0x143   :  { %v13268_v38 = vld [vmem:[#allocation6 + $0x41c] sm:$0xf]  ;;  %v9064_v24 = vor.u32 %v13140_v35, %v9061_v37  ;;  %3848 = vmatpush.bf16.msrb.mxu2 %v10088_v63  ;;  %v13485_v35 = vld [vmem:[#allocation6 + $0xadc] sm:$0xf0]  ;;  %v3497_v63 = vadd.f32 %v3496_v41, %v3478_v47  ;;  %v10348_v14 = vor.u32 %v13469_v62, %v10347_v61 }
 0x144   :  { %v9573_v42 = vld [vmem:[#allocation6 + $0x458] sm:$0xf0]  ;;  %v9387_v37 = vld [vmem:[#allocation6 + $0x2a0] sm:$0xf]  ;;  %v10412_v59 = vor.u32 %v13485_v35, %v10411_v34 }
 0x145   :  { %v13524_v43 = vld [vmem:[#allocation6 + $0xc1c] sm:$0xf]  ;;  %v9576_v8 = vor.u32 %v13268_v38, %v9573_v42  ;;  %3810 = vmatpush.bf16.msrb.mxu0 %v9064_v24  ;;  %v13229_v38 = vld [vmem:[#allocation6 + $0x2dc] sm:$0xf0]  ;;  %v4537_v13 = vmax.f32 %v3497_v63, 0.0 }
 0x146   :  { %v10597_v46 = vld [vmem:[#allocation6 + $0xc58] sm:$0xf0]  ;;  %v13357_v42 = vld [vmem:[#allocation6 + $0x6dc] sm:$0xf0]  ;;  %v9388_v60 = vor.u32 %v13229_v38, %v9387_v37  ;;  %3849 = vmatmul.bf16.vlgmr.msrb.gmra.mxu2 %v14392_v54 }
 0x147   :  { %v10600_v2 = vor.u32 %v13524_v43, %v10597_v46  ;;  %3829 = vmatpush.bf16.msrb.mxu1 %v9576_v8  ;;  %3917 = vmatpush.bf16.msra.mxu2 %v10540_v11  ;;  %v10923_v43 = vld [vmem:[#allocation6 + $0xea0] sm:$0xf]  ;;  %v9900_v24 = vor.u32 %v13357_v42, %v9899_v39  ;;  %v3546_v3 = vpop.f32.mrf.mxu2 }
 0x148   :  { %v13613_v46 = vld [vmem:[#allocation6 + $0xedc] sm:$0xf0]  ;;  %3811 = vmatmul.bf16.vlgmr.msrb.gmra.mxu0 %v14388_v48 }
 0x149   :  { %3867 = vmatpush.bf16.msrb.mxu3 %v10600_v2  ;;  %3879 = vmatpush.bf16.msra.mxu0 %v9516_v12  ;;  %v10924_v4 = vor.u32 %v13613_v46, %v10923_v43  ;;  %v9323_v5 = vld [vmem:[#allocation6 + $0x220] sm:$0xf]  ;;  %v3528_v2 = vadd.f32 %v3527_v58, %v3509_v55  ;;  %v4521_v12 = vmax.f32 %v3495_v27, 0.0  ;;  %v3565_v23 = vpop.f32.mrf.mxu3 }
 0x14a   :  { %v13213_v6 = vld [vmem:[#allocation6 + $0x25c] sm:$0xf0]  ;;  %3830 = vmatmul.bf16.vlgmr.msrb.gmra.mxu1 %v14390_v53 }
 0x14b   :  { %3898 = vmatpush.bf16.msra.mxu1 %v10028_v17  ;;  %3918 = vmatpush.bf16.msra.mxu2 %v10476_v25  ;;  %v9835_v8 = vld [vmem:[#allocation6 + $0x620] sm:$0xf]  ;;  %v9324_v45 = vor.u32 %v13213_v6, %v9323_v5  ;;  %v14512_v17 = vpack.c.bf16 %v4537_v13, %v4521_v12  ;;  %v3547_v25 = vadd.f32 %v3546_v3, %v3528_v2 }
 0x14c   :  { %v13341_v9 = vld [vmem:[#allocation6 + $0x65c] sm:$0xf0]  ;;  %3868 = vmatmul.bf16.vlgmr.msrb.gmra.mxu3 %v14394_v57 }
 0x14d   :  { %3936 = vmatpush.bf16.msra.mxu3 %v11052_v18  ;;  %3880 = vmatpush.bf16.msra.mxu0 %v9452_v30  ;;  %v10859_v10 = vld [vmem:[#allocation6 + $0xe20] sm:$0xf]  ;;  %15454 = vst [vmem:[#allocation22_spill] sm:$0xff] %v14512_v17  ;;  %v9836_v18 = vor.u32 %v13341_v9, %v9835_v8  ;;  %v3510_v30 = vpop.f32.mrf.mxu0  ;;  %v14515_v39 = vadd.f32 %v3565_v23, %v3547_v25 }
 0x14e   :  { %v13597_v11 = vld [vmem:[#allocation6 + $0xe5c] sm:$0xf0] }
 0x14f   :  { %3899 = vmatpush.bf16.msra.mxu1 %v9964_v31  ;;  %3919 = vmatpush.bf16.msra.mxu2 %v10412_v59  ;;  %v10283_v15 = vld [vmem:[#allocation6 + $0x9a0] sm:$0xf]  ;;  %v10860_v19 = vor.u32 %v13597_v11, %v10859_v10  ;;  %v3529_v31 = vpop.f32.mrf.mxu1  ;;  %v3548_v8 = vpop.f32.mrf.mxu2 }
 0x150   :  { %v13453_v16 = vld [vmem:[#allocation6 + $0x9dc] sm:$0xf0] }
 0x151   :  { %3937 = vmatpush.bf16.msra.mxu3 %v10988_v32  ;;  %3881 = vmatpush.bf16.msra.mxu0 %v9388_v60  ;;  %v9259_v20 = vld [vmem:[#allocation6 + $0x1a0] sm:$0xf]  ;;  %v3511_v32 = vadd.f32 %v3510_v30, %v14505_v0  ;;  %v10284_v34 = vor.u32 %v13453_v16, %v10283_v15  ;;  %v3567_v2 = vpop.f32.mrf.mxu3 }
 0x152   :  { %v13197_v21 = vld [vmem:[#allocation6 + $0x1dc] sm:$0xf0] }
 0x153   :  { %3900 = vmatpush.bf16.msra.mxu1 %v9900_v24  ;;  %v9771_v22 = vld [vmem:[#allocation6 + $0x5a0] sm:$0xf]  ;;  %3920 = vmatpush.bf16.msra.mxu2 %v10348_v14  ;;  %v9260_v35 = vor.u32 %v13197_v21, %v9259_v20  ;;  %v3530_v47 = vadd.f32 %v3529_v31, %v3511_v32  ;;  %v13509_v31 = vld [vmem:[#allocation6 + $0xba4] sm:$0xf] }
 0x154   :  { %v13325_v26 = vld [vmem:[#allocation6 + $0x5dc] sm:$0xf0]  ;;  %v10541_v32 = vld [vmem:[#allocation6 + $0xbe0] sm:$0xf0] }
 0x155   :  { %3938 = vmatpush.bf16.msra.mxu3 %v10924_v4  ;;  %v10795_v27 = vld [vmem:[#allocation6 + $0xda0] sm:$0xf]  ;;  %3882 = vmatpush.bf16.msra.mxu0 %v9324_v45  ;;  %v9772_v40 = vor.u32 %v13325_v26, %v9771_v22  ;;  %v3549_v12 = vadd.f32 %v3548_v8, %v3530_v47  ;;  %v3513_v13 = vpop.f32.mrf.mxu0  ;;  %v11053_v47 = vld [vmem:[#allocation6 + $0xfe0] sm:$0xf0] }
 0x156   :  { %v13581_v29 = vld [vmem:[#allocation6 + $0xddc] sm:$0xf0]  ;;  %v3514_v16 = vadd.f32 %v3513_v13, %v14505_v0  ;;  %3854 = vmatmul.bf16.gmra.mxu2 %v14404_v51  ;;  %v13621_v13 = vld [vmem:[#allocation6 + $0xf24] sm:$0xf] }
 0x157   :  { %v10219_v37 = vld [vmem:[#allocation6 + $0x920] sm:$0xf]  ;;  %3901 = vmatpush.bf16.msra.mxu1 %v9836_v18  ;;  %v10796_v41 = vor.u32 %v13581_v29, %v10795_v27  ;;  %3921 = vmatpush.bf16.msra.mxu2 %v10284_v34  ;;  %v3532_v14 = vpop.f32.mrf.mxu1  ;;  %v3568_v3 = vadd.f32 %v3567_v2, %v3549_v12  ;;  %v13253_v34 = vld [vmem:[#allocation6 + $0x3a4] sm:$0xf] }
 0x158   :  { %v13437_v38 = vld [vmem:[#allocation6 + $0x95c] sm:$0xf0]  ;;  %v3533_v30 = vadd.f32 %v3532_v14, %v3514_v16  ;;  %3816 = vmatmul.bf16.gmra.mxu0 %v14400_v44  ;;  %v13237_v2 = vld [vmem:[#allocation6 + $0x324] sm:$0xf] }
 0x159   :  { %3939 = vmatpush.bf16.msra.mxu3 %v10860_v19  ;;  %v9195_v42 = vld [vmem:[#allocation6 + $0x120] sm:$0xf]  ;;  %3883 = vmatpush.bf16.msra.mxu0 %v9260_v35  ;;  %v10220_v59 = vor.u32 %v13437_v38, %v10219_v37  ;;  %v4490_v35 = vmax.f32 %v14515_v39, 0.0  ;;  %v4506_v37 = vmax.f32 %v3568_v3, 0.0  ;;  %v9517_v38 = vld [vmem:[#allocation6 + $0x3e0] sm:$0xf0] }
 0x15a   :  { %v13181_v43 = vld [vmem:[#allocation6 + $0x15c] sm:$0xf0]  ;;  %3835 = vmatmul.bf16.gmra.mxu1 %v14402_v50  ;;  %v9965_v12 = vld [vmem:[#allocation6 + $0x760] sm:$0xf0] }
 0x15b   :  { %v9707_v46 = vld [vmem:[#allocation6 + $0x520] sm:$0xf]  ;;  %v9196_v60 = vor.u32 %v13181_v43, %v9195_v42  ;;  %3902 = vmatpush.bf16.msra.mxu1 %v9772_v40  ;;  %3922 = vmatpush.bf16.msra.mxu2 %v10220_v59  ;;  %v13381_v40 = vld [vmem:[#allocation6 + $0x7a4] sm:$0xf]  ;;  %v3570_v59 = vpop.f32.mrf.mxu3 }
 0x15c   :  { %v13309_v49 = vld [vmem:[#allocation6 + $0x55c] sm:$0xf0]  ;;  %3873 = vmatmul.bf16.gmra.mxu3 %v14406_v56  ;;  %v10029_v43 = vld [vmem:[#allocation6 + $0x7e0] sm:$0xf0] }
 0x15d   :  { %v10731_v58 = vld [vmem:[#allocation6 + $0xd20] sm:$0xf]  ;;  %3940 = vmatpush.bf16.msra.mxu3 %v10796_v41  ;;  %v9708_v63 = vor.u32 %v13309_v49, %v9707_v46  ;;  %3884 = vmatpush.bf16.msra.mxu0 %v9196_v60  ;;  %v13637_v46 = vld [vmem:[#allocation6 + $0xfa4] sm:$0xf]  ;;  %v14523_v49 = vpack.c.bf16 %v4506_v37, %v4490_v35  ;;  %v10544_v60 = vor.u32 %v13509_v31, %v10541_v32 }
 0x15e   :  { %v13565_v55 = vld [vmem:[#allocation6 + $0xd5c] sm:$0xf0]  ;;  %v11056_v8 = vor.u32 %v13637_v46, %v11053_v47  ;;  %v10989_v14 = vld [vmem:[#allocation6 + $0xf60] sm:$0xf0] }
 0x15f   :  { %v10155_v61 = vld [vmem:[#allocation6 + $0x8a0] sm:$0xf]  ;;  %v10732_v24 = vor.u32 %v13565_v55, %v10731_v58  ;;  %3903 = vmatpush.bf16.msra.mxu1 %v9708_v63  ;;  %15455 = vst [vmem:[#allocation23_spill] sm:$0xff] %v14523_v49  ;;  %v3551_v55 = vpop.f32.mrf.mxu2  ;;  %v10477_v63 = vld [vmem:[#allocation6 + $0xb60] sm:$0xf0] }
 0x160   :  { %v13421_v62 = vld [vmem:[#allocation6 + $0x8dc] sm:$0xf0]  ;;  %v13221_v3 = vld [vmem:[#allocation6 + $0x2a4] sm:$0xf] }
 0x161   :  { %v9131_v4 = vld [vmem:[#allocation6 + $0xa0] sm:$0xf]  ;;  %v10156_v18 = vor.u32 %v13421_v62, %v10155_v61  ;;  %3941 = vmatpush.bf16.msra.mxu3 %v10732_v24  ;;  %v9520_v61 = vor.u32 %v13253_v34, %v9517_v38  ;;  %v13493_v62 = vld [vmem:[#allocation6 + $0xb24] sm:$0xf]  ;;  %v3552_v24 = vadd.f32 %v3551_v55, %v3533_v30 }
 0x162   :  { %v13165_v5 = vld [vmem:[#allocation6 + $0xdc] sm:$0xf0]  ;;  %v10480_v16 = vor.u32 %v13493_v62, %v10477_v63  ;;  %v13605_v30 = vld [vmem:[#allocation6 + $0xea4] sm:$0xf] }
 0x163   :  { %v9643_v6 = vld [vmem:[#allocation6 + $0x4a0] sm:$0xf]  ;;  %v9132_v19 = vor.u32 %v13165_v5, %v9131_v4  ;;  %3923 = vmatpush.bf16.msra.mxu2 %v10156_v18  ;;  %v3515_v4 = vpop.f32.mrf.mxu0  ;;  %v3534_v5 = vpop.f32.mrf.mxu1  ;;  %v10925_v31 = vld [vmem:[#allocation6 + $0xee0] sm:$0xf0] }
 0x164   :  { %v13293_v9 = vld [vmem:[#allocation6 + $0x4dc] sm:$0xf0]  ;;  %v10928_v47 = vor.u32 %v13605_v30, %v10925_v31  ;;  %v13333_v55 = vld [vmem:[#allocation6 + $0x624] sm:$0xf] }
 0x165   :  { %v10667_v10 = vld [vmem:[#allocation6 + $0xca0] sm:$0xf]  ;;  %v9644_v23 = vor.u32 %v13293_v9, %v9643_v6  ;;  %3885 = vmatpush.bf16.msra.mxu0 %v9132_v19  ;;  %v10032_v6 = vor.u32 %v13381_v40, %v10029_v43  ;;  %v9453_v9 = vld [vmem:[#allocation6 + $0x360] sm:$0xf0] }
 0x166   :  { %v13549_v11 = vld [vmem:[#allocation6 + $0xcdc] sm:$0xf0]  ;;  %v9456_v18 = vor.u32 %v13237_v2, %v9453_v9  ;;  %v10861_v62 = vld [vmem:[#allocation6 + $0xe60] sm:$0xf0] }
 0x167   :  { %v10091_v45 = vld [vmem:[#allocation6 + $0x820] sm:$0xf]  ;;  %v10668_v26 = vor.u32 %v13549_v11, %v10667_v10  ;;  %3904 = vmatpush.bf16.msra.mxu1 %v9644_v23  ;;  %v13365_v10 = vld [vmem:[#allocation6 + $0x724] sm:$0xf]  ;;  %v3516_v11 = vadd.f32 %v3515_v4, %v14505_v0 }
 0x168   :  { %v13405_v15 = vld [vmem:[#allocation6 + $0x85c] sm:$0xf0]  ;;  %v9968_v19 = vor.u32 %v13365_v10, %v9965_v12  ;;  %v13477_v0 = vld [vmem:[#allocation6 + $0xaa4] sm:$0xf] }
 0x169   :  { %v9067_v20 = vld [vmem:[#allocation6 + $0x20] sm:$0xf]  ;;  %v10092_v41 = vor.u32 %v13405_v15, %v10091_v45  ;;  %3942 = vmatpush.bf16.msra.mxu3 %v10668_v26  ;;  %v3571_v45 = vadd.f32 %v3570_v59, %v3552_v24  ;;  %v3535_v15 = vadd.f32 %v3534_v5, %v3516_v11  ;;  %v9389_v23 = vld [vmem:[#allocation6 + $0x2e0] sm:$0xf0] }
 0x16a   :  { %v13149_v21 = vld [vmem:[#allocation6 + $0x5c] sm:$0xf0]  ;;  %v13349_v26 = vld [vmem:[#allocation6 + $0x6a4] sm:$0xf]  ;;  %v9392_v40 = vor.u32 %v13221_v3, %v9389_v23 }
 0x16b   :  { %v9579_v22 = vld [vmem:[#allocation6 + $0x420] sm:$0xf]  ;;  %v9068_v42 = vor.u32 %v13149_v21, %v9067_v20  ;;  %3924 = vmatpush.bf16.msra.mxu2 %v10092_v41  ;;  %v10992_v20 = vor.u32 %v13621_v13, %v10989_v14  ;;  %v14527_v21 = vperm.slane %v14502_v33, 4  ;;  %v3584_v34 = vpop.f32.mrf.mxu0  ;;  %v3603_v35 = vpop.f32.mrf.mxu1  ;;  %v13461_v41 = vld [vmem:[#allocation6 + $0xa24] sm:$0xf]  ;;  %v4522_v63 = vmax.f32 %v3571_v45, 0.0 }
 0x16c   :  { %v13277_v27 = vld [vmem:[#allocation6 + $0x45c] sm:$0xf0]  ;;  %v13189_v11 = vld [vmem:[#allocation6 + $0x1a4] sm:$0xf] }
 0x16d   :  { %v10603_v29 = vld [vmem:[#allocation6 + $0xc20] sm:$0xf]  ;;  %v9580_v58 = vor.u32 %v13277_v27, %v9579_v22  ;;  %3886 = vmatpush.bf16.msra.mxu0 %v9068_v42  ;;  %v10413_v22 = vld [vmem:[#allocation6 + $0xae0] sm:$0xf0]  ;;  %v3553_v27 = vpop.f32.mrf.mxu2  ;;  %v3585_v37 = vadd.f32 %v3584_v34, %v14527_v21 }
 0x16e   :  { %v13533_v25 = vld [vmem:[#allocation6 + $0xc5c] sm:$0xf0]  ;;  %v3554_v32 = vadd.f32 %v3553_v27, %v3535_v15  ;;  %v10416_v38 = vor.u32 %v13477_v0, %v10413_v22  ;;  %v10349_v42 = vld [vmem:[#allocation6 + $0xa60] sm:$0xf0]  ;;  %3925 = vmatmul.bf16.vlgmr.msra.gmra.mxu2 %v14392_v54 }
 0x16f   :  { %v10604_v39 = vor.u32 %v13533_v25, %v10603_v29  ;;  %3905 = vmatpush.bf16.msra.mxu1 %v9580_v58  ;;  %3993 = vmatpush.bf16.msrb.mxu2 %v10544_v60  ;;  %v3572_v29 = vpop.f32.mrf.mxu3  ;;  %v9901_v25 = vld [vmem:[#allocation6 + $0x6e0] sm:$0xf0]  ;;  %v3604_v59 = vadd.f32 %v3603_v35, %v3585_v37  ;;  %v10352_v4 = vor.u32 %v13461_v41, %v10349_v42 }
 0x170   :  { %v3573_v43 = vadd.f32 %v3572_v29, %v3554_v32  ;;  %v9904_v46 = vor.u32 %v13349_v26, %v9901_v25  ;;  %v13205_v58 = vld [vmem:[#allocation6 + $0x224] sm:$0xf]  ;;  %3887 = vmatmul.bf16.vlgmr.msra.gmra.mxu0 %v14388_v48 }
 0x171   :  { %3943 = vmatpush.bf16.msra.mxu3 %v10604_v39  ;;  %3955 = vmatpush.bf16.msrb.mxu0 %v9520_v61  ;;  %v9325_v39 = vld [vmem:[#allocation6 + $0x260] sm:$0xf0] }
 0x172   :  { %3906 = vmatmul.bf16.vlgmr.msra.gmra.mxu1 %v14390_v53  ;;  %v9837_v60 = vld [vmem:[#allocation6 + $0x660] sm:$0xf0]  ;;  %v4538_v24 = vmax.f32 %v3573_v43, 0.0  ;;  %v9328_v5 = vor.u32 %v13205_v58, %v9325_v39 }
 0x173   :  { %3974 = vmatpush.bf16.msrb.mxu1 %v10032_v6  ;;  %3994 = vmatpush.bf16.msrb.mxu2 %v10480_v16  ;;  %v13589_v61 = vld [vmem:[#allocation6 + $0xe24] sm:$0xf]  ;;  %v9840_v9 = vor.u32 %v13333_v55, %v9837_v60  ;;  %v3605_v0 = vpop.f32.mrf.mxu1 }
 0x174   :  { %3944 = vmatmul.bf16.vlgmr.msra.gmra.mxu3 %v14394_v57  ;;  %v13445_v6 = vld [vmem:[#allocation6 + $0x9a4] sm:$0xf]  ;;  %v14534_v2 = vpack.c.bf16 %v4538_v24, %v4522_v63  ;;  %v10864_v10 = vor.u32 %v13589_v61, %v10861_v62 }
 0x175   :  { %4012 = vmatpush.bf16.msrb.mxu3 %v11056_v8  ;;  %3956 = vmatpush.bf16.msrb.mxu0 %v9456_v18  ;;  %v10285_v8 = vld [vmem:[#allocation6 + $0x9e0] sm:$0xf0]  ;;  %v3622_v14 = vpop.f32.mrf.mxu2 }
 0x176   :  { %15456 = vst [vmem:[#allocation24_spill] sm:$0xff] %v14534_v2  ;;  %v9261_v12 = vld [vmem:[#allocation6 + $0x1e0] sm:$0xf0]  ;;  %v10288_v3 = vor.u32 %v13445_v6, %v10285_v8 }
 0x177   :  { %3975 = vmatpush.bf16.msrb.mxu1 %v9968_v19  ;;  %3995 = vmatpush.bf16.msrb.mxu2 %v10416_v38  ;;  %v13317_v13 = vld [vmem:[#allocation6 + $0x5a4] sm:$0xf]  ;;  %v3641_v45 = vpop.f32.mrf.mxu3  ;;  %v3623_v19 = vadd.f32 %v3622_v14, %v3604_v59  ;;  %v9264_v23 = vor.u32 %v13189_v11, %v9261_v12 }
 0x178   :  { %v9773_v15 = vld [vmem:[#allocation6 + $0x5e0] sm:$0xf0] }
 0x179   :  { %4013 = vmatpush.bf16.msrb.mxu3 %v10992_v20  ;;  %3957 = vmatpush.bf16.msrb.mxu0 %v9392_v40  ;;  %v13573_v16 = vld [vmem:[#allocation6 + $0xda4] sm:$0xf]  ;;  %v3586_v20 = vpop.f32.mrf.mxu0  ;;  %v14537_v29 = vadd.f32 %v3641_v45, %v3623_v19  ;;  %v9776_v25 = vor.u32 %v13317_v13, %v9773_v15 }
 0x17a   :  { %v10797_v18 = vld [vmem:[#allocation6 + $0xde0] sm:$0xf0]  ;;  %v3587_v22 = vadd.f32 %v3586_v20, %v14527_v21 }
 0x17b   :  { %3976 = vmatpush.bf16.msrb.mxu1 %v9904_v46  ;;  %3996 = vmatpush.bf16.msrb.mxu2 %v10352_v4  ;;  %v13429_v26 = vld [vmem:[#allocation6 + $0x924] sm:$0xf]  ;;  %v10800_v30 = vor.u32 %v13573_v16, %v10797_v18  ;;  %v3608_v6 = vpop.f32.mrf.mxu1 }
 0x17c   :  { %v10221_v27 = vld [vmem:[#allocation6 + $0x960] sm:$0xf0]  ;;  %v3606_v35 = vadd.f32 %v3605_v0, %v3587_v22 }
 0x17d   :  { %4014 = vmatpush.bf16.msrb.mxu3 %v10928_v47  ;;  %3958 = vmatpush.bf16.msrb.mxu0 %v9328_v5  ;;  %v13173_v31 = vld [vmem:[#allocation6 + $0x124] sm:$0xf]  ;;  %v10224_v41 = vor.u32 %v13429_v26, %v10221_v27  ;;  %v3624_v60 = vpop.f32.mrf.mxu2  ;;  %v9523_v26 = vld [vmem:[#allocation6 + $0x3a8] sm:$0xf]  ;;  %v4491_v27 = vmax.f32 %v14537_v29, 0.0 }
 0x17e   :  { %v9197_v32 = vld [vmem:[#allocation6 + $0x160] sm:$0xf0]  ;;  %v3625_v4 = vadd.f32 %v3624_v60, %v3606_v35  ;;  %3930 = vmatmul.bf16.gmra.mxu2 %v14404_v51  ;;  %v13390_v35 = vld [vmem:[#allocation6 + $0x7e4] sm:$0xf0] }
 0x17f   :  { %3977 = vmatpush.bf16.msrb.mxu1 %v9840_v9  ;;  %v13301_v34 = vld [vmem:[#allocation6 + $0x524] sm:$0xf]  ;;  %3997 = vmatpush.bf16.msrb.mxu2 %v10288_v3  ;;  %v9200_v42 = vor.u32 %v13173_v31, %v9197_v32  ;;  %v3643_v61 = vpop.f32.mrf.mxu3  ;;  %v10547_v3 = vld [vmem:[#allocation6 + $0xba8] sm:$0xf] }
 0x180   :  { %v9709_v37 = vld [vmem:[#allocation6 + $0x560] sm:$0xf0]  ;;  %v3644_v15 = vadd.f32 %v3643_v61, %v3625_v4  ;;  %3892 = vmatmul.bf16.gmra.mxu0 %v14400_v44  ;;  %v10035_v31 = vld [vmem:[#allocation6 + $0x7a8] sm:$0xf] }
 0x181   :  { %4015 = vmatpush.bf16.msrb.mxu3 %v10864_v10  ;;  %v13557_v38 = vld [vmem:[#allocation6 + $0xd24] sm:$0xf]  ;;  %3959 = vmatpush.bf16.msrb.mxu0 %v9264_v23  ;;  %v9712_v47 = vor.u32 %v13301_v34, %v9709_v37  ;;  %v3589_v5 = vpop.f32.mrf.mxu0  ;;  %v13518_v23 = vld [vmem:[#allocation6 + $0xbe4] sm:$0xf0]  ;;  %v10036_v61 = vor.u32 %v13390_v35, %v10035_v31 }
 0x182   :  { %v10733_v40 = vld [vmem:[#allocation6 + $0xd60] sm:$0xf0]  ;;  %v3590_v10 = vadd.f32 %v3589_v5, %v14527_v21  ;;  %3911 = vmatmul.bf16.gmra.mxu1 %v14402_v50  ;;  %v11059_v37 = vld [vmem:[#allocation6 + $0xfa8] sm:$0xf] }
 0x183   :  { %v13413_v43 = vld [vmem:[#allocation6 + $0x8a4] sm:$0xf]  ;;  %3978 = vmatpush.bf16.msrb.mxu1 %v9776_v25  ;;  %v10736_v58 = vor.u32 %v13557_v38, %v10733_v40  ;;  %3998 = vmatpush.bf16.msrb.mxu2 %v10224_v41  ;;  %v4507_v25 = vmax.f32 %v3644_v15, 0.0  ;;  %v13646_v38 = vld [vmem:[#allocation6 + $0xfe4] sm:$0xf0]  ;;  %v3610_v60 = vpop.f32.mrf.mxu1  ;;  %v14549_v15 = vperm.slane %v14502_v33, 5 }
 0x184   :  { %v10157_v46 = vld [vmem:[#allocation6 + $0x8e0] sm:$0xf0]  ;;  %v3609_v22 = vadd.f32 %v3608_v6, %v3590_v10  ;;  %3949 = vmatmul.bf16.gmra.mxu3 %v14406_v56  ;;  %v9971_v4 = vld [vmem:[#allocation6 + $0x728] sm:$0xf] }
 0x185   :  { %4016 = vmatpush.bf16.msrb.mxu3 %v10800_v30  ;;  %v13157_v39 = vld [vmem:[#allocation6 + $0xa4] sm:$0xf]  ;;  %3960 = vmatpush.bf16.msrb.mxu0 %v9200_v42  ;;  %v10160_v11 = vor.u32 %v13413_v43, %v10157_v46  ;;  %v13262_v30 = vld [vmem:[#allocation6 + $0x3e4] sm:$0xf0]  ;;  %v14545_v40 = vpack.c.bf16 %v4507_v25, %v4491_v27  ;;  %v3627_v42 = vpop.f32.mrf.mxu2  ;;  %v10548_v46 = vor.u32 %v13518_v23, %v10547_v3 }
 0x186   :  { %v9133_v55 = vld [vmem:[#allocation6 + $0xe0] sm:$0xf0]  ;;  %v13374_v6 = vld [vmem:[#allocation6 + $0x764] sm:$0xf0] }
 0x187   :  { %v13285_v59 = vld [vmem:[#allocation6 + $0x4a4] sm:$0xf]  ;;  %v9136_v12 = vor.u32 %v13157_v39, %v9133_v55  ;;  %3979 = vmatpush.bf16.msrb.mxu1 %v9712_v47  ;;  %3999 = vmatpush.bf16.msrb.mxu2 %v10160_v11  ;;  %15457 = vst [vmem:[#allocation25_spill] sm:$0xff] %v14545_v40  ;;  %v3646_v43 = vpop.f32.mrf.mxu3  ;;  %v9524_v47 = vor.u32 %v13262_v30, %v9523_v26  ;;  %v13502_v39 = vld [vmem:[#allocation6 + $0xb64] sm:$0xf0] }
 0x188   :  { %v9645_v62 = vld [vmem:[#allocation6 + $0x4e0] sm:$0xf0]  ;;  %v3628_v55 = vadd.f32 %v3627_v42, %v3609_v22  ;;  %v13358_v3 = vld [vmem:[#allocation6 + $0x6e4] sm:$0xf0] }
 0x189   :  { %v13541_v63 = vld [vmem:[#allocation6 + $0xca4] sm:$0xf]  ;;  %4017 = vmatpush.bf16.msrb.mxu3 %v10736_v58  ;;  %v9648_v16 = vor.u32 %v13285_v59, %v9645_v62  ;;  %3961 = vmatpush.bf16.msrb.mxu0 %v9136_v12  ;;  %v10483_v58 = vld [vmem:[#allocation6 + $0xb28] sm:$0xf]  ;;  %v3591_v59 = vpop.f32.mrf.mxu0  ;;  %v11060_v62 = vor.u32 %v13646_v38, %v11059_v37 }
 0x18a   :  { %v10669_v24 = vld [vmem:[#allocation6 + $0xce0] sm:$0xf0]  ;;  %v3592_v5 = vadd.f32 %v3591_v59, %v14527_v21  ;;  %v3647_v10 = vadd.f32 %v3646_v43, %v3628_v55  ;;  %v10484_v12 = vor.u32 %v13502_v39, %v10483_v58  ;;  %v10419_v21 = vld [vmem:[#allocation6 + $0xaa8] sm:$0xf] }
 0x18b   :  { %v13397_v8 = vld [vmem:[#allocation6 + $0x824] sm:$0xf]  ;;  %v10672_v18 = vor.u32 %v13541_v63, %v10669_v24  ;;  %3980 = vmatpush.bf16.msrb.mxu1 %v9648_v16  ;;  %v9459_v63 = vld [vmem:[#allocation6 + $0x328] sm:$0xf]  ;;  %v3679_v30 = vpop.f32.mrf.mxu1 }
 0x18c   :  { %v10093_v9 = vld [vmem:[#allocation6 + $0x860] sm:$0xf0]  ;;  %v13246_v24 = vld [vmem:[#allocation6 + $0x364] sm:$0xf0]  ;;  %v3611_v11 = vadd.f32 %v3610_v60, %v3592_v5  ;;  %v4523_v55 = vmax.f32 %v3647_v10, 0.0 }
 0x18d   :  { %v13141_v13 = vld [vmem:[#allocation6 + $0x24] sm:$0xf]  ;;  %v10096_v32 = vor.u32 %v13397_v8, %v10093_v9  ;;  %4018 = vmatpush.bf16.msrb.mxu3 %v10672_v18  ;;  %v10995_v8 = vld [vmem:[#allocation6 + $0xf28] sm:$0xf] }
 0x18e   :  { %v9069_v14 = vld [vmem:[#allocation6 + $0x60] sm:$0xf0]  ;;  %v13630_v9 = vld [vmem:[#allocation6 + $0xf64] sm:$0xf0] }
 0x18f   :  { %v13269_v45 = vld [vmem:[#allocation6 + $0x424] sm:$0xf]  ;;  %v9072_v34 = vor.u32 %v13141_v13, %v9069_v14  ;;  %4000 = vmatpush.bf16.msrb.mxu2 %v10096_v32  ;;  %v9460_v13 = vor.u32 %v13246_v24, %v9459_v63  ;;  %v9972_v14 = vor.u32 %v13374_v6, %v9971_v4  ;;  %v13486_v16 = vld [vmem:[#allocation6 + $0xae4] sm:$0xf0]  ;;  %v3648_v22 = vpop.f32.mrf.mxu3 }
 0x190   :  { %v9581_v19 = vld [vmem:[#allocation6 + $0x460] sm:$0xf0]  ;;  %v9395_v18 = vld [vmem:[#allocation6 + $0x2a8] sm:$0xf]  ;;  %v10420_v31 = vor.u32 %v13486_v16, %v10419_v21 }
 0x191   :  { %v13525_v20 = vld [vmem:[#allocation6 + $0xc24] sm:$0xf]  ;;  %v9584_v41 = vor.u32 %v13269_v45, %v9581_v19  ;;  %3962 = vmatpush.bf16.msrb.mxu0 %v9072_v34  ;;  %v10996_v45 = vor.u32 %v13630_v9, %v10995_v8  ;;  %v13230_v19 = vld [vmem:[#allocation6 + $0x2e4] sm:$0xf0]  ;;  %v3660_v25 = vpop.f32.mrf.mxu0 }
 0x192   :  { %v10605_v0 = vld [vmem:[#allocation6 + $0xc60] sm:$0xf0]  ;;  %v10931_v23 = vld [vmem:[#allocation6 + $0xea8] sm:$0xf]  ;;  %v3661_v33 = vadd.f32 %v3660_v25, %v14549_v15  ;;  %v9396_v32 = vor.u32 %v13230_v19, %v9395_v18  ;;  %4001 = vmatmul.bf16.vlgmr.msrb.gmra.mxu2 %v14392_v54 }
 0x193   :  { %v10608_v29 = vor.u32 %v13525_v20, %v10605_v0  ;;  %3981 = vmatpush.bf16.msrb.mxu1 %v9584_v41  ;;  %4069 = vmatpush.bf16.msra.mxu2 %v10548_v46  ;;  %v9907_v20 = vld [vmem:[#allocation6 + $0x6a8] sm:$0xf]  ;;  %v3629_v0 = vpop.f32.mrf.mxu2  ;;  %v3681_v16 = vpop.f32.mrf.mxu1 }
 0x194   :  { %v13614_v26 = vld [vmem:[#allocation6 + $0xee4] sm:$0xf0]  ;;  %v3630_v27 = vadd.f32 %v3629_v0, %v3611_v11  ;;  %v9908_v38 = vor.u32 %v13358_v3, %v9907_v20  ;;  %v3680_v46 = vadd.f32 %v3679_v30, %v3661_v33  ;;  %3963 = vmatmul.bf16.vlgmr.msrb.gmra.mxu0 %v14388_v48 }
 0x195   :  { %4019 = vmatpush.bf16.msrb.mxu3 %v10608_v29  ;;  %4031 = vmatpush.bf16.msra.mxu0 %v9524_v47  ;;  %v10355_v34 = vld [vmem:[#allocation6 + $0xa28] sm:$0xf]  ;;  %v10932_v41 = vor.u32 %v13614_v26, %v10931_v23 }
 0x196   :  { %v13470_v35 = vld [vmem:[#allocation6 + $0xa64] sm:$0xf0]  ;;  %v3649_v37 = vadd.f32 %v3648_v22, %v3630_v27  ;;  %3982 = vmatmul.bf16.vlgmr.msrb.gmra.mxu1 %v14390_v53 }
 0x197   :  { %4050 = vmatpush.bf16.msra.mxu1 %v10036_v61  ;;  %4070 = vmatpush.bf16.msra.mxu2 %v10484_v12  ;;  %v9331_v29 = vld [vmem:[#allocation6 + $0x228] sm:$0xf]  ;;  %v10356_v60 = vor.u32 %v13470_v35, %v10355_v34  ;;  %v3717_v11 = vpop.f32.mrf.mxu3 }
 0x198   :  { %v13214_v42 = vld [vmem:[#allocation6 + $0x264] sm:$0xf0]  ;;  %v4539_v59 = vmax.f32 %v3649_v37, 0.0  ;;  %4020 = vmatmul.bf16.vlgmr.msrb.gmra.mxu3 %v14394_v57 }
 0x199   :  { %4088 = vmatpush.bf16.msra.mxu3 %v11060_v62  ;;  %4032 = vmatpush.bf16.msra.mxu0 %v9460_v13  ;;  %v9843_v43 = vld [vmem:[#allocation6 + $0x628] sm:$0xf]  ;;  %v9332_v61 = vor.u32 %v13214_v42, %v9331_v29  ;;  %v3662_v21 = vpop.f32.mrf.mxu0 }
 0x19a   :  { %v13342_v47 = vld [vmem:[#allocation6 + $0x664] sm:$0xf0]  ;;  %v14556_v24 = vpack.c.bf16 %v4539_v59, %v4523_v55  ;;  %v3663_v18 = vadd.f32 %v3662_v21, %v14549_v15 }
 0x19b   :  { %4051 = vmatpush.bf16.msra.mxu1 %v9972_v14  ;;  %v10867_v58 = vld [vmem:[#allocation6 + $0xe28] sm:$0xf]  ;;  %4071 = vmatpush.bf16.msra.mxu2 %v10420_v31  ;;  %v9844_v4 = vor.u32 %v13342_v47, %v9843_v43  ;;  %v3698_v10 = vpop.f32.mrf.mxu2 }
 0x19c   :  { %v13598_v39 = vld [vmem:[#allocation6 + $0xe64] sm:$0xf0]  ;;  %15458 = vst [vmem:[#allocation26_spill] sm:$0xff] %v14556_v24  ;;  %v3682_v33 = vadd.f32 %v3681_v16, %v3663_v18 }
 0x19d   :  { %4089 = vmatpush.bf16.msra.mxu3 %v10996_v45  ;;  %4033 = vmatpush.bf16.msra.mxu0 %v9396_v32  ;;  %v10291_v62 = vld [vmem:[#allocation6 + $0x9a8] sm:$0xf]  ;;  %v10868_v5 = vor.u32 %v13598_v39, %v10867_v58  ;;  %v3699_v45 = vadd.f32 %v3698_v10, %v3680_v46 }
 0x19e   :  { %v13454_v63 = vld [vmem:[#allocation6 + $0x9e4] sm:$0xf0] }
 0x19f   :  { %4052 = vmatpush.bf16.msra.mxu1 %v9908_v38  ;;  %v9267_v6 = vld [vmem:[#allocation6 + $0x1a8] sm:$0xf]  ;;  %4072 = vmatpush.bf16.msra.mxu2 %v10356_v60  ;;  %v10292_v19 = vor.u32 %v13454_v63, %v10291_v62  ;;  %v14559_v3 = vadd.f32 %v3717_v11, %v3699_v45  ;;  %v3719_v39 = vpop.f32.mrf.mxu3  ;;  %v3684_v63 = vpop.f32.mrf.mxu1 }
 0x1a0   :  { %v13198_v8 = vld [vmem:[#allocation6 + $0x1e4] sm:$0xf0] }
 0x1a1   :  { %4090 = vmatpush.bf16.msra.mxu3 %v10932_v41  ;;  %v9779_v9 = vld [vmem:[#allocation6 + $0x5a8] sm:$0xf]  ;;  %4034 = vmatpush.bf16.msra.mxu0 %v9332_v61  ;;  %v9268_v20 = vor.u32 %v13198_v8, %v9267_v6  ;;  %v3665_v62 = vpop.f32.mrf.mxu0 }
 0x1a2   :  { %v13326_v12 = vld [vmem:[#allocation6 + $0x5e4] sm:$0xf0]  ;;  %v3666_v6 = vadd.f32 %v3665_v62, %v14549_v15  ;;  %4006 = vmatmul.bf16.gmra.mxu2 %v14404_v51  ;;  %v13366_v62 = vld [vmem:[#allocation6 + $0x72c] sm:$0xf] }
 0x1a3   :  { %v10803_v13 = vld [vmem:[#allocation6 + $0xda8] sm:$0xf]  ;;  %4053 = vmatpush.bf16.msra.mxu1 %v9844_v4  ;;  %v9780_v23 = vor.u32 %v13326_v12, %v9779_v9  ;;  %4073 = vmatpush.bf16.msra.mxu2 %v10292_v19  ;;  %v3700_v58 = vpop.f32.mrf.mxu2 }
 0x1a4   :  { %v13582_v14 = vld [vmem:[#allocation6 + $0xde4] sm:$0xf0]  ;;  %v3701_v61 = vadd.f32 %v3700_v58, %v3682_v33  ;;  %v3685_v19 = vadd.f32 %v3684_v63, %v3666_v6  ;;  %3968 = vmatmul.bf16.gmra.mxu0 %v14400_v44  ;;  %v10997_v6 = vld [vmem:[#allocation6 + $0xf68] sm:$0xf0] }
 0x1a5   :  { %v10227_v0 = vld [vmem:[#allocation6 + $0x928] sm:$0xf]  ;;  %4091 = vmatpush.bf16.msra.mxu3 %v10868_v5  ;;  %v10804_v26 = vor.u32 %v13582_v14, %v10803_v13  ;;  %4035 = vmatpush.bf16.msra.mxu0 %v9268_v20  ;;  %v13510_v20 = vld [vmem:[#allocation6 + $0xbac] sm:$0xf] }
 0x1a6   :  { %v13438_v22 = vld [vmem:[#allocation6 + $0x964] sm:$0xf0]  ;;  %v3720_v13 = vadd.f32 %v3719_v39, %v3701_v61  ;;  %3987 = vmatmul.bf16.gmra.mxu1 %v14402_v50  ;;  %v9461_v61 = vld [vmem:[#allocation6 + $0x368] sm:$0xf0] }
 0x1a7   :  { %v9203_v27 = vld [vmem:[#allocation6 + $0x128] sm:$0xf]  ;;  %v10228_v35 = vor.u32 %v13438_v22, %v10227_v0  ;;  %4054 = vmatpush.bf16.msra.mxu1 %v9780_v23  ;;  %v10549_v0 = vld [vmem:[#allocation6 + $0xbe8] sm:$0xf0]  ;;  %v4492_v23 = vmax.f32 %v14559_v3, 0.0  ;;  %v3686_v39 = vpop.f32.mrf.mxu1 }
 0x1a8   :  { %v13182_v25 = vld [vmem:[#allocation6 + $0x164] sm:$0xf0]  ;;  %v13254_v22 = vld [vmem:[#allocation6 + $0x3ac] sm:$0xf]  ;;  %4025 = vmatmul.bf16.gmra.mxu3 %v14406_v56 }
 0x1a9   :  { %v9715_v30 = vld [vmem:[#allocation6 + $0x528] sm:$0xf]  ;;  %v9204_v37 = vor.u32 %v13182_v25, %v9203_v27  ;;  %4092 = vmatpush.bf16.msra.mxu3 %v10804_v26  ;;  %4074 = vmatpush.bf16.msra.mxu2 %v10228_v35  ;;  %v4508_v26 = vmax.f32 %v3720_v13, 0.0  ;;  %v9525_v27 = vld [vmem:[#allocation6 + $0x3e8] sm:$0xf0]  ;;  %v3667_v58 = vpop.f32.mrf.mxu0 }
 0x1aa   :  { %v13310_v31 = vld [vmem:[#allocation6 + $0x564] sm:$0xf0]  ;;  %v13382_v25 = vld [vmem:[#allocation6 + $0x7ac] sm:$0xf]  ;;  %v3668_v63 = vadd.f32 %v3667_v58, %v14549_v15 }
 0x1ab   :  { %v10739_v32 = vld [vmem:[#allocation6 + $0xd28] sm:$0xf]  ;;  %v9716_v29 = vor.u32 %v13310_v31, %v9715_v30  ;;  %4036 = vmatpush.bf16.msra.mxu0 %v9204_v37  ;;  %v10037_v31 = vld [vmem:[#allocation6 + $0x7e8] sm:$0xf0]  ;;  %v14567_v35 = vpack.c.bf16 %v4508_v26, %v4492_v23 }
 0x1ac   :  { %v13566_v34 = vld [vmem:[#allocation6 + $0xd64] sm:$0xf0]  ;;  %v13606_v23 = vld [vmem:[#allocation6 + $0xeac] sm:$0xf] }
 0x1ad   :  { %v10163_v38 = vld [vmem:[#allocation6 + $0x8a8] sm:$0xf]  ;;  %v10740_v42 = vor.u32 %v13566_v34, %v10739_v32  ;;  %4055 = vmatpush.bf16.msra.mxu1 %v9716_v29  ;;  %v13638_v32 = vld [vmem:[#allocation6 + $0xfac] sm:$0xf]  ;;  %15459 = vst [vmem:[#allocation27_spill] sm:$0xff] %v14567_v35  ;;  %v10552_v29 = vor.u32 %v13510_v20, %v10549_v0 }
 0x1ae   :  { %v13422_v41 = vld [vmem:[#allocation6 + $0x8e4] sm:$0xf0]  ;;  %v11061_v34 = vld [vmem:[#allocation6 + $0xfe8] sm:$0xf0] }
 0x1af   :  { %v9139_v43 = vld [vmem:[#allocation6 + $0xa8] sm:$0xf]  ;;  %v10164_v8 = vor.u32 %v13422_v41, %v10163_v38  ;;  %4093 = vmatpush.bf16.msra.mxu3 %v10740_v42  ;;  %v3703_v38 = vpop.f32.mrf.mxu2  ;;  %v3722_v41 = vpop.f32.mrf.mxu3  ;;  %v9528_v42 = vor.u32 %v13254_v22, %v9525_v27  ;;  %v9909_v22 = vld [vmem:[#allocation6 + $0x6e8] sm:$0xf0] }
 0x1b0   :  { %v13166_v46 = vld [vmem:[#allocation6 + $0xe4] sm:$0xf0]  ;;  %v10933_v26 = vld [vmem:[#allocation6 + $0xee8] sm:$0xf0] }
 0x1b1   :  { %v9651_v47 = vld [vmem:[#allocation6 + $0x4a8] sm:$0xf]  ;;  %v9140_v9 = vor.u32 %v13166_v46, %v9139_v43  ;;  %4075 = vmatpush.bf16.msra.mxu2 %v10164_v8  ;;  %v13494_v43 = vld [vmem:[#allocation6 + $0xb2c] sm:$0xf] }
 0x1b2   :  { %v13294_v55 = vld [vmem:[#allocation6 + $0x4e4] sm:$0xf0]  ;;  %v10485_v46 = vld [vmem:[#allocation6 + $0xb68] sm:$0xf0] }
 0x1b3   :  { %v10675_v59 = vld [vmem:[#allocation6 + $0xca8] sm:$0xf]  ;;  %v9652_v14 = vor.u32 %v13294_v55, %v9651_v47  ;;  %4037 = vmatpush.bf16.msra.mxu0 %v9140_v9  ;;  %v3704_v47 = vadd.f32 %v3703_v38, %v3685_v19  ;;  %v10040_v55 = vor.u32 %v13382_v25, %v10037_v31  ;;  %v3687_v9 = vadd.f32 %v3686_v39, %v3668_v63  ;;  %v13350_v19 = vld [vmem:[#allocation6 + $0x6ac] sm:$0xf]  ;;  %v3736_v25 = vpop.f32.mrf.mxu0 }
 0x1b4   :  { %v13550_v60 = vld [vmem:[#allocation6 + $0xce4] sm:$0xf0]  ;;  %v9912_v38 = vor.u32 %v13350_v19, %v9909_v22  ;;  %v13590_v58 = vld [vmem:[#allocation6 + $0xe2c] sm:$0xf] }
 0x1b5   :  { %v10099_v4 = vld [vmem:[#allocation6 + $0x828] sm:$0xf]  ;;  %v10676_v45 = vor.u32 %v13550_v60, %v10675_v59  ;;  %4056 = vmatpush.bf16.msra.mxu1 %v9652_v14  ;;  %v11064_v59 = vor.u32 %v13638_v32, %v11061_v34  ;;  %v13238_v60 = vld [vmem:[#allocation6 + $0x32c] sm:$0xf]  ;;  %v3723_v8 = vadd.f32 %v3722_v41, %v3704_v47  ;;  %v14570_v14 = vld [vmem:[#allocation8] sm:$0xff]  ;;  %v10936_v41 = vor.u32 %v13606_v23, %v10933_v26 }
 0x1b6   :  { %v13406_v5 = vld [vmem:[#allocation6 + $0x864] sm:$0xf0]  ;;  %v14573_v15 = vperm.slane %v14570_v14, 6  ;;  %v13462_v34 = vld [vmem:[#allocation6 + $0xa2c] sm:$0xf] }
 0x1b7   :  { %v9075_v10 = vld [vmem:[#allocation6 + $0x28] sm:$0xf]  ;;  %v10100_v30 = vor.u32 %v13406_v5, %v10099_v4  ;;  %4094 = vmatpush.bf16.msra.mxu3 %v10676_v45  ;;  %v9973_v4 = vld [vmem:[#allocation6 + $0x768] sm:$0xf0]  ;;  %v3705_v20 = vpop.f32.mrf.mxu2  ;;  %v3724_v0 = vpop.f32.mrf.mxu3 }
 0x1b8   :  { %v13150_v11 = vld [vmem:[#allocation6 + $0x64] sm:$0xf0]  ;;  %v13622_v5 = vld [vmem:[#allocation6 + $0xf2c] sm:$0xf]  ;;  %v3706_v27 = vadd.f32 %v3705_v20, %v3687_v9 }
 0x1b9   :  { %v9587_v12 = vld [vmem:[#allocation6 + $0x428] sm:$0xf]  ;;  %v9076_v33 = vor.u32 %v13150_v11, %v9075_v10  ;;  %4076 = vmatpush.bf16.msra.mxu2 %v10100_v30  ;;  %v10488_v10 = vor.u32 %v13494_v43, %v10485_v46  ;;  %v9464_v11 = vor.u32 %v13238_v60, %v9461_v61  ;;  %v11000_v13 = vor.u32 %v13622_v5, %v10997_v6  ;;  %v13478_v45 = vld [vmem:[#allocation6 + $0xaac] sm:$0xf]  ;;  %v3755_v30 = vpop.f32.mrf.mxu1 }
 0x1ba   :  { %v13278_v21 = vld [vmem:[#allocation6 + $0x464] sm:$0xf0]  ;;  %v13334_v43 = vld [vmem:[#allocation6 + $0x62c] sm:$0xf] }
 0x1bb   :  { %v10611_v16 = vld [vmem:[#allocation6 + $0xc28] sm:$0xf]  ;;  %v9588_v37 = vor.u32 %v13278_v21, %v9587_v12  ;;  %4038 = vmatpush.bf16.msra.mxu0 %v9076_v33  ;;  %v9976_v12 = vor.u32 %v13366_v62, %v9973_v4  ;;  %v10421_v21 = vld [vmem:[#allocation6 + $0xae8] sm:$0xf0]  ;;  %v3737_v33 = vadd.f32 %v3736_v25, %v14573_v15 }
 0x1bc   :  { %v13534_v18 = vld [vmem:[#allocation6 + $0xc64] sm:$0xf0]  ;;  %v10424_v31 = vor.u32 %v13478_v45, %v10421_v21  ;;  %v9845_v47 = vld [vmem:[#allocation6 + $0x668] sm:$0xf0]  ;;  %4077 = vmatmul.bf16.vlgmr.msra.gmra.mxu2 %v14392_v54 }
 0x1bd   :  { %v10612_v3 = vor.u32 %v13534_v18, %v10611_v16  ;;  %4057 = vmatpush.bf16.msra.mxu1 %v9588_v37  ;;  %4145 = vmatpush.bf16.msrb.mxu2 %v10552_v29  ;;  %v13222_v16 = vld [vmem:[#allocation6 + $0x2ac] sm:$0xf]  ;;  %v3756_v46 = vadd.f32 %v3755_v30, %v3737_v33  ;;  %v9848_v5 = vor.u32 %v13334_v43, %v9845_v47 }
 0x1be   :  { %v9397_v18 = vld [vmem:[#allocation6 + $0x2e8] sm:$0xf0]  ;;  %4039 = vmatmul.bf16.vlgmr.msra.gmra.mxu0 %v14388_v48 }
 0x1bf   :  { %4095 = vmatpush.bf16.msra.mxu3 %v10612_v3  ;;  %4107 = vmatpush.bf16.msrb.mxu0 %v9528_v42  ;;  %v9400_v32 = vor.u32 %v13222_v16, %v9397_v18  ;;  %v10357_v37 = vld [vmem:[#allocation6 + $0xa68] sm:$0xf0]  ;;  %v3725_v3 = vadd.f32 %v3724_v0, %v3706_v27  ;;  %v3738_v18 = vpop.f32.mrf.mxu0 }
 0x1c0   :  { %v13206_v29 = vld [vmem:[#allocation6 + $0x22c] sm:$0xf]  ;;  %4058 = vmatmul.bf16.vlgmr.msra.gmra.mxu1 %v14390_v53  ;;  %v10360_v60 = vor.u32 %v13462_v34, %v10357_v37  ;;  %v3739_v20 = vadd.f32 %v3738_v18, %v14573_v15 }
 0x1c1   :  { %4126 = vmatpush.bf16.msrb.mxu1 %v10040_v55  ;;  %4146 = vmatpush.bf16.msrb.mxu2 %v10488_v10  ;;  %v9333_v42 = vld [vmem:[#allocation6 + $0x268] sm:$0xf0]  ;;  %v4524_v55 = vmax.f32 %v3723_v8, 0.0  ;;  %v3757_v19 = vpop.f32.mrf.mxu1 }
 0x1c2   :  { %v10869_v39 = vld [vmem:[#allocation6 + $0xe68] sm:$0xf0]  ;;  %4096 = vmatmul.bf16.vlgmr.msra.gmra.mxu3 %v14394_v57  ;;  %v9336_v61 = vor.u32 %v13206_v29, %v9333_v42  ;;  %v3758_v34 = vadd.f32 %v3757_v19, %v3739_v20 }
 0x1c3   :  { %4164 = vmatpush.bf16.msrb.mxu3 %v11064_v59  ;;  %4108 = vmatpush.bf16.msrb.mxu0 %v9464_v11  ;;  %v4540_v59 = vmax.f32 %v3725_v3, 0.0  ;;  %v13446_v62 = vld [vmem:[#allocation6 + $0x9ac] sm:$0xf]  ;;  %v10872_v6 = vor.u32 %v13590_v58, %v10869_v39  ;;  %v3774_v11 = vpop.f32.mrf.mxu2 }
 0x1c4   :  { %v10293_v63 = vld [vmem:[#allocation6 + $0x9e8] sm:$0xf0]  ;;  %v3775_v16 = vadd.f32 %v3774_v11, %v3756_v46 }
 0x1c5   :  { %4127 = vmatpush.bf16.msrb.mxu1 %v9976_v12  ;;  %4147 = vmatpush.bf16.msrb.mxu2 %v10424_v31  ;;  %v14580_v4 = vpack.c.bf16 %v4540_v59, %v4524_v55  ;;  %v13190_v9 = vld [vmem:[#allocation6 + $0x1ac] sm:$0xf]  ;;  %v3793_v12 = vpop.f32.mrf.mxu3  ;;  %v10296_v0 = vor.u32 %v13446_v62, %v10293_v63 }
 0x1c6   :  { %v9269_v10 = vld [vmem:[#allocation6 + $0x1e8] sm:$0xf0]  ;;  %v14583_v27 = vadd.f32 %v3793_v12, %v3775_v16 }
 0x1c7   :  { %4165 = vmatpush.bf16.msrb.mxu3 %v11000_v13  ;;  %4109 = vmatpush.bf16.msrb.mxu0 %v9400_v32  ;;  %15460 = vst [vmem:[#allocation28_spill] sm:$0xff] %v14580_v4  ;;  %v13318_v8 = vld [vmem:[#allocation6 + $0x5ac] sm:$0xf]  ;;  %v9272_v22 = vor.u32 %v13190_v9, %v9269_v10 }
 0x1c8   :  { %v9781_v13 = vld [vmem:[#allocation6 + $0x5e8] sm:$0xf0] }
 0x1c9   :  { %4128 = vmatpush.bf16.msrb.mxu1 %v9912_v38  ;;  %v13574_v45 = vld [vmem:[#allocation6 + $0xdac] sm:$0xf]  ;;  %4148 = vmatpush.bf16.msrb.mxu2 %v10360_v60  ;;  %v9784_v25 = vor.u32 %v13318_v8, %v9781_v13  ;;  %v3760_v9 = vpop.f32.mrf.mxu1 }
 0x1ca   :  { %v10805_v21 = vld [vmem:[#allocation6 + $0xde8] sm:$0xf0] }
 0x1cb   :  { %4166 = vmatpush.bf16.msrb.mxu3 %v10936_v41  ;;  %4110 = vmatpush.bf16.msrb.mxu0 %v9336_v61  ;;  %v13430_v23 = vld [vmem:[#allocation6 + $0x92c] sm:$0xf]  ;;  %v10808_v30 = vor.u32 %v13574_v45, %v10805_v21  ;;  %v3776_v59 = vpop.f32.mrf.mxu2 }
 0x1cc   :  { %v10229_v26 = vld [vmem:[#allocation6 + $0x968] sm:$0xf0]  ;;  %4082 = vmatmul.bf16.gmra.mxu2 %v14404_v51 }
 0x1cd   :  { %4129 = vmatpush.bf16.msrb.mxu1 %v9848_v5  ;;  %v13174_v33 = vld [vmem:[#allocation6 + $0x12c] sm:$0xf]  ;;  %4149 = vmatpush.bf16.msrb.mxu2 %v10296_v0  ;;  %v10232_v41 = vor.u32 %v13430_v23, %v10229_v26  ;;  %v3795_v60 = vpop.f32.mrf.mxu3  ;;  %v3777_v5 = vadd.f32 %v3776_v59, %v3758_v34  ;;  %v13263_v34 = vld [vmem:[#allocation6 + $0x3ec] sm:$0xf0] }
 0x1ce   :  { %v9205_v31 = vld [vmem:[#allocation6 + $0x168] sm:$0xf0]  ;;  %4044 = vmatmul.bf16.gmra.mxu0 %v14400_v44  ;;  %v10491_v59 = vld [vmem:[#allocation6 + $0xb30] sm:$0xf] }
 0x1cf   :  { %4167 = vmatpush.bf16.msrb.mxu3 %v10872_v6  ;;  %v13302_v32 = vld [vmem:[#allocation6 + $0x52c] sm:$0xf]  ;;  %4111 = vmatpush.bf16.msrb.mxu0 %v9272_v22  ;;  %v9208_v29 = vor.u32 %v13174_v33, %v9205_v31  ;;  %v3741_v6 = vpop.f32.mrf.mxu0  ;;  %v3796_v18 = vadd.f32 %v3795_v60, %v3777_v5  ;;  %v9531_v33 = vld [vmem:[#allocation6 + $0x3b0] sm:$0xf]  ;;  %v4493_v31 = vmax.f32 %v14583_v27, 0.0 }
 0x1d0   :  { %v9717_v37 = vld [vmem:[#allocation6 + $0x568] sm:$0xf0]  ;;  %v3742_v11 = vadd.f32 %v3741_v6, %v14573_v15  ;;  %4063 = vmatmul.bf16.gmra.mxu1 %v14402_v50  ;;  %v13503_v60 = vld [vmem:[#allocation6 + $0xb6c] sm:$0xf0] }
 0x1d1   :  { %v13558_v3 = vld [vmem:[#allocation6 + $0xd2c] sm:$0xf]  ;;  %4130 = vmatpush.bf16.msrb.mxu1 %v9784_v25  ;;  %v9720_v46 = vor.u32 %v13302_v32, %v9717_v37  ;;  %4150 = vmatpush.bf16.msrb.mxu2 %v10232_v41  ;;  %v10555_v25 = vld [vmem:[#allocation6 + $0xbb0] sm:$0xf]  ;;  %v4509_v32 = vmax.f32 %v3796_v18, 0.0  ;;  %v10492_v18 = vor.u32 %v13503_v60, %v10491_v59 }
 0x1d2   :  { %v10741_v38 = vld [vmem:[#allocation6 + $0xd68] sm:$0xf0]  ;;  %v3761_v26 = vadd.f32 %v3760_v9, %v3742_v11  ;;  %4101 = vmatmul.bf16.gmra.mxu3 %v14406_v56  ;;  %v10043_v37 = vld [vmem:[#allocation6 + $0x7b0] sm:$0xf] }
 0x1d3   :  { %v13414_v42 = vld [vmem:[#allocation6 + $0x8ac] sm:$0xf]  ;;  %4168 = vmatpush.bf16.msrb.mxu3 %v10808_v30  ;;  %v10744_v47 = vor.u32 %v13558_v3, %v10741_v38  ;;  %4112 = vmatpush.bf16.msrb.mxu0 %v9208_v29  ;;  %v13519_v30 = vld [vmem:[#allocation6 + $0xbec] sm:$0xf0] }
 0x1d4   :  { %v10165_v43 = vld [vmem:[#allocation6 + $0x8e8] sm:$0xf0]  ;;  %v13391_v41 = vld [vmem:[#allocation6 + $0x7ec] sm:$0xf0] }
 0x1d5   :  { %v13158_v58 = vld [vmem:[#allocation6 + $0xac] sm:$0xf]  ;;  %v10168_v12 = vor.u32 %v13414_v42, %v10165_v43  ;;  %4131 = vmatpush.bf16.msrb.mxu1 %v9720_v46  ;;  %v11067_v29 = vld [vmem:[#allocation6 + $0xfb0] sm:$0xf]  ;;  %v14591_v43 = vpack.c.bf16 %v4509_v32, %v4493_v31  ;;  %v10044_v5 = vor.u32 %v13391_v41, %v10043_v37 }
 0x1d6   :  { %v9141_v39 = vld [vmem:[#allocation6 + $0xe8] sm:$0xf0]  ;;  %v13647_v42 = vld [vmem:[#allocation6 + $0xfec] sm:$0xf0] }
 0x1d7   :  { %v13286_v55 = vld [vmem:[#allocation6 + $0x4ac] sm:$0xf]  ;;  %v9144_v13 = vor.u32 %v13158_v58, %v9141_v39  ;;  %4169 = vmatpush.bf16.msrb.mxu3 %v10744_v47  ;;  %4151 = vmatpush.bf16.msrb.mxu2 %v10168_v12  ;;  %15461 = vst [vmem:[#allocation29_spill] sm:$0xff] %v14591_v43  ;;  %v3779_v47 = vpop.f32.mrf.mxu2  ;;  %v3798_v58 = vpop.f32.mrf.mxu3  ;;  %v10556_v39 = vor.u32 %v13519_v30, %v10555_v25  ;;  %v9467_v9 = vld [vmem:[#allocation6 + $0x330] sm:$0xf] }
 0x1d8   :  { %v9653_v61 = vld [vmem:[#allocation6 + $0x4e8] sm:$0xf0]  ;;  %v11068_v6 = vor.u32 %v13647_v42, %v11067_v29  ;;  %v13375_v12 = vld [vmem:[#allocation6 + $0x76c] sm:$0xf0] }
 0x1d9   :  { %v13542_v62 = vld [vmem:[#allocation6 + $0xcac] sm:$0xf]  ;;  %v9656_v19 = vor.u32 %v13286_v55, %v9653_v61  ;;  %4113 = vmatpush.bf16.msrb.mxu0 %v9144_v13  ;;  %v9532_v55 = vor.u32 %v13263_v34, %v9531_v33  ;;  %v3780_v61 = vadd.f32 %v3779_v47, %v3761_v26  ;;  %v11003_v13 = vld [vmem:[#allocation6 + $0xf30] sm:$0xf] }
 0x1da   :  { %v10677_v63 = vld [vmem:[#allocation6 + $0xce8] sm:$0xf0]  ;;  %v9403_v26 = vld [vmem:[#allocation6 + $0x2b0] sm:$0xf] }
 0x1db   :  { %v13398_v10 = vld [vmem:[#allocation6 + $0x82c] sm:$0xf]  ;;  %v10680_v20 = vor.u32 %v13542_v62, %v10677_v63  ;;  %4132 = vmatpush.bf16.msrb.mxu1 %v9656_v19  ;;  %v3743_v62 = vpop.f32.mrf.mxu0  ;;  %v3762_v63 = vpop.f32.mrf.mxu1  ;;  %v13231_v25 = vld [vmem:[#allocation6 + $0x2ec] sm:$0xf0] }
 0x1dc   :  { %v10101_v8 = vld [vmem:[#allocation6 + $0x868] sm:$0xf0]  ;;  %v3744_v11 = vadd.f32 %v3743_v62, %v14573_v15  ;;  %v10427_v15 = vld [vmem:[#allocation6 + $0xab0] sm:$0xf]  ;;  %v9404_v42 = vor.u32 %v13231_v25, %v9403_v26 }
 0x1dd   :  { %v13142_v45 = vld [vmem:[#allocation6 + $0x2c] sm:$0xf]  ;;  %v10104_v3 = vor.u32 %v13398_v10, %v10101_v8  ;;  %4170 = vmatpush.bf16.msrb.mxu3 %v10680_v20  ;;  %v13247_v10 = vld [vmem:[#allocation6 + $0x36c] sm:$0xf0] }
 0x1de   :  { %v9077_v21 = vld [vmem:[#allocation6 + $0x68] sm:$0xf0]  ;;  %v9979_v8 = vld [vmem:[#allocation6 + $0x730] sm:$0xf]  ;;  %v9468_v19 = vor.u32 %v13247_v10, %v9467_v9 }
 0x1df   :  { %v13270_v16 = vld [vmem:[#allocation6 + $0x42c] sm:$0xf]  ;;  %v9080_v38 = vor.u32 %v13142_v45, %v9077_v21  ;;  %4152 = vmatpush.bf16.msrb.mxu2 %v10104_v3  ;;  %v13631_v45 = vld [vmem:[#allocation6 + $0xf6c] sm:$0xf0]  ;;  %v3799_v21 = vadd.f32 %v3798_v58, %v3780_v61  ;;  %v9980_v20 = vor.u32 %v13375_v12, %v9979_v8  ;;  %v3781_v33 = vpop.f32.mrf.mxu2  ;;  %v3800_v31 = vpop.f32.mrf.mxu3 }
 0x1e0   :  { %v9589_v0 = vld [vmem:[#allocation6 + $0x468] sm:$0xf0]  ;;  %v9915_v30 = vld [vmem:[#allocation6 + $0x6b0] sm:$0xf] }
 0x1e1   :  { %v13526_v22 = vld [vmem:[#allocation6 + $0xc2c] sm:$0xf]  ;;  %v9592_v46 = vor.u32 %v13270_v16, %v9589_v0  ;;  %4114 = vmatpush.bf16.msrb.mxu0 %v9080_v38  ;;  %v3763_v16 = vadd.f32 %v3762_v63, %v3744_v11  ;;  %v11004_v0 = vor.u32 %v13631_v45, %v11003_v13  ;;  %v13359_v32 = vld [vmem:[#allocation6 + $0x6ec] sm:$0xf0] }
 0x1e2   :  { %v10613_v23 = vld [vmem:[#allocation6 + $0xc68] sm:$0xf0]  ;;  %v10939_v34 = vld [vmem:[#allocation6 + $0xeb0] sm:$0xf]  ;;  %v9916_v58 = vor.u32 %v13359_v32, %v9915_v30  ;;  %4153 = vmatmul.bf16.vlgmr.msrb.gmra.mxu2 %v14392_v54 }
 0x1e3   :  { %v10616_v27 = vor.u32 %v13526_v22, %v10613_v23  ;;  %4133 = vmatpush.bf16.msrb.mxu1 %v9592_v46  ;;  %4221 = vmatpush.bf16.msra.mxu2 %v10556_v39  ;;  %v14595_v22 = vperm.slane %v14570_v14, 7  ;;  %v13487_v23 = vld [vmem:[#allocation6 + $0xaec] sm:$0xf0]  ;;  %v3782_v3 = vadd.f32 %v3781_v33, %v3763_v16  ;;  %v3812_v38 = vpop.f32.mrf.mxu0  ;;  %v3831_v41 = vpop.f32.mrf.mxu1 }
 0x1e4   :  { %v13615_v37 = vld [vmem:[#allocation6 + $0xeec] sm:$0xf0]  ;;  %v10428_v29 = vor.u32 %v13487_v23, %v10427_v15  ;;  %4115 = vmatmul.bf16.vlgmr.msrb.gmra.mxu0 %v14388_v48 }
 0x1e5   :  { %4171 = vmatpush.bf16.msrb.mxu3 %v10616_v27  ;;  %4183 = vmatpush.bf16.msra.mxu0 %v9532_v55  ;;  %v3813_v14 = vadd.f32 %v3812_v38, %v14595_v22  ;;  %v10363_v46 = vld [vmem:[#allocation6 + $0xa30] sm:$0xf]  ;;  %v3801_v47 = vadd.f32 %v3800_v31, %v3782_v3  ;;  %v10940_v39 = vor.u32 %v13615_v37, %v10939_v34 }
 0x1e6   :  { %v13471_v27 = vld [vmem:[#allocation6 + $0xa6c] sm:$0xf0]  ;;  %4134 = vmatmul.bf16.vlgmr.msrb.gmra.mxu1 %v14390_v53 }
 0x1e7   :  { %4202 = vmatpush.bf16.msra.mxu1 %v10044_v5  ;;  %4222 = vmatpush.bf16.msra.mxu2 %v10492_v18  ;;  %v9339_v55 = vld [vmem:[#allocation6 + $0x230] sm:$0xf]  ;;  %v3832_v61 = vadd.f32 %v3831_v41, %v3813_v14  ;;  %v4541_v9 = vmax.f32 %v3801_v47, 0.0  ;;  %v10364_v10 = vor.u32 %v13471_v27, %v10363_v46 }
 0x1e8   :  { %v13215_v59 = vld [vmem:[#allocation6 + $0x26c] sm:$0xf0]  ;;  %4172 = vmatmul.bf16.vlgmr.msrb.gmra.mxu3 %v14394_v57 }
 0x1e9   :  { %4240 = vmatpush.bf16.msra.mxu3 %v11068_v6  ;;  %4184 = vmatpush.bf16.msra.mxu0 %v9468_v19  ;;  %v9851_v60 = vld [vmem:[#allocation6 + $0x630] sm:$0xf]  ;;  %v4525_v6 = vmax.f32 %v3799_v21, 0.0  ;;  %v9340_v8 = vor.u32 %v13215_v59, %v9339_v55 }
 0x1ea   :  { %v13343_v62 = vld [vmem:[#allocation6 + $0x66c] sm:$0xf0] }
 0x1eb   :  { %4203 = vmatpush.bf16.msra.mxu1 %v9980_v20  ;;  %v10875_v63 = vld [vmem:[#allocation6 + $0xe30] sm:$0xf]  ;;  %4223 = vmatpush.bf16.msra.mxu2 %v10428_v29  ;;  %v14602_v13 = vpack.c.bf16 %v4541_v9, %v4525_v6  ;;  %v9852_v45 = vor.u32 %v13343_v62, %v9851_v60  ;;  %v3850_v20 = vpop.f32.mrf.mxu2  ;;  %v3814_v30 = vpop.f32.mrf.mxu0 }
 0x1ec   :  { %v13599_v5 = vld [vmem:[#allocation6 + $0xe6c] sm:$0xf0]  ;;  %v3851_v25 = vadd.f32 %v3850_v20, %v3832_v61  ;;  %v3833_v33 = vpop.f32.mrf.mxu1  ;;  %v3815_v31 = vadd.f32 %v3814_v30, %v14595_v22 }
 0x1ed   :  { %4241 = vmatpush.bf16.msra.mxu3 %v11004_v0  ;;  %4185 = vmatpush.bf16.msra.mxu0 %v9404_v42  ;;  %v10299_v11 = vld [vmem:[#allocation6 + $0x9b0] sm:$0xf]  ;;  %15462 = vst [vmem:[#allocation30_spill] sm:$0xff] %v14602_v13  ;;  %v10876_v16 = vor.u32 %v13599_v5, %v10875_v63  ;;  %v3869_v0 = vpop.f32.mrf.mxu3 }
 0x1ee   :  { %v13455_v12 = vld [vmem:[#allocation6 + $0x9ec] sm:$0xf0]  ;;  %v14605_v38 = vadd.f32 %v3869_v0, %v3851_v25  ;;  %v3834_v27 = vadd.f32 %v3833_v33, %v3815_v31 }
 0x1ef   :  { %4204 = vmatpush.bf16.msra.mxu1 %v9916_v58  ;;  %v9275_v18 = vld [vmem:[#allocation6 + $0x1b0] sm:$0xf]  ;;  %4224 = vmatpush.bf16.msra.mxu2 %v10364_v10  ;;  %v10300_v32 = vor.u32 %v13455_v12, %v10299_v11 }
 0x1f0   :  { %v13199_v19 = vld [vmem:[#allocation6 + $0x1ec] sm:$0xf0] }
 0x1f1   :  { %4242 = vmatpush.bf16.msra.mxu3 %v10940_v39  ;;  %v9787_v21 = vld [vmem:[#allocation6 + $0x5b0] sm:$0xf]  ;;  %4186 = vmatpush.bf16.msra.mxu0 %v9340_v8  ;;  %v9276_v34 = vor.u32 %v13199_v19, %v9275_v18 }
 0x1f2   :  { %v13327_v15 = vld [vmem:[#allocation6 + $0x5ec] sm:$0xf0]  ;;  %4158 = vmatmul.bf16.gmra.mxu2 %v14404_v51 }
 0x1f3   :  { %v10811_v23 = vld [vmem:[#allocation6 + $0xdb0] sm:$0xf]  ;;  %4205 = vmatpush.bf16.msra.mxu1 %v9852_v45  ;;  %v9788_v41 = vor.u32 %v13327_v15, %v9787_v21  ;;  %4225 = vmatpush.bf16.msra.mxu2 %v10300_v32  ;;  %v3852_v10 = vpop.f32.mrf.mxu2  ;;  %v3817_v18 = vpop.f32.mrf.mxu0 }
 0x1f4   :  { %v13583_v26 = vld [vmem:[#allocation6 + $0xdec] sm:$0xf0]  ;;  %v3836_v19 = vpop.f32.mrf.mxu1  ;;  %v3818_v0 = vadd.f32 %v3817_v18, %v14595_v22  ;;  %4120 = vmatmul.bf16.gmra.mxu0 %v14400_v44 }
 0x1f5   :  { %v10235_v37 = vld [vmem:[#allocation6 + $0x930] sm:$0xf]  ;;  %4243 = vmatpush.bf16.msra.mxu3 %v10876_v16  ;;  %v10812_v14 = vor.u32 %v13583_v26, %v10811_v23  ;;  %4187 = vmatpush.bf16.msra.mxu0 %v9276_v34  ;;  %v3871_v8 = vpop.f32.mrf.mxu3  ;;  %v3853_v16 = vadd.f32 %v3852_v10, %v3834_v27 }
 0x1f6   :  { %v13439_v3 = vld [vmem:[#allocation6 + $0x96c] sm:$0xf0]  ;;  %4139 = vmatmul.bf16.gmra.mxu1 %v14402_v50 }
 0x1f7   :  { %v9211_v29 = vld [vmem:[#allocation6 + $0x130] sm:$0xf]  ;;  %v10236_v55 = vor.u32 %v13439_v3, %v10235_v37  ;;  %4206 = vmatpush.bf16.msra.mxu1 %v9788_v41  ;;  %v3872_v33 = vadd.f32 %v3871_v8, %v3853_v16  ;;  %v3837_v41 = vadd.f32 %v3836_v19, %v3818_v0  ;;  %v13495_v8 = vld [vmem:[#allocation6 + $0xb34] sm:$0xf] }
 0x1f8   :  { %v13183_v42 = vld [vmem:[#allocation6 + $0x16c] sm:$0xf0]  ;;  %4177 = vmatmul.bf16.gmra.mxu3 %v14406_v56  ;;  %v13367_v0 = vld [vmem:[#allocation6 + $0x734] sm:$0xf] }
 0x1f9   :  { %v9723_v46 = vld [vmem:[#allocation6 + $0x530] sm:$0xf]  ;;  %v9212_v59 = vor.u32 %v13183_v42, %v9211_v29  ;;  %4244 = vmatpush.bf16.msra.mxu3 %v10812_v14  ;;  %4226 = vmatpush.bf16.msra.mxu2 %v10236_v55  ;;  %v13511_v14 = vld [vmem:[#allocation6 + $0xbb4] sm:$0xf]  ;;  %v4510_v27 = vmax.f32 %v3872_v33, 0.0  ;;  %v14616_v33 = vld [vmem:[#allocation8 + $0x8] sm:$0xff] }
 0x1fa   :  { %v13311_v47 = vld [vmem:[#allocation6 + $0x56c] sm:$0xf0]  ;;  %v10557_v29 = vld [vmem:[#allocation6 + $0xbf0] sm:$0xf0] }
 0x1fb   :  { %v10747_v58 = vld [vmem:[#allocation6 + $0xd30] sm:$0xf]  ;;  %v9724_v62 = vor.u32 %v13311_v47, %v9723_v46  ;;  %4188 = vmatpush.bf16.msra.mxu0 %v9212_v59  ;;  %v13255_v42 = vld [vmem:[#allocation6 + $0x3b4] sm:$0xf]  ;;  %v4494_v46 = vmax.f32 %v14605_v38, 0.0 }
 0x1fc   :  { %v13567_v39 = vld [vmem:[#allocation6 + $0xd6c] sm:$0xf0]  ;;  %v9533_v47 = vld [vmem:[#allocation6 + $0x3f0] sm:$0xf0]  ;;  %v3838_v16 = vpop.f32.mrf.mxu1 }
 0x1fd   :  { %v10171_v60 = vld [vmem:[#allocation6 + $0x8b0] sm:$0xf]  ;;  %v10748_v63 = vor.u32 %v13567_v39, %v10747_v58  ;;  %4207 = vmatpush.bf16.msra.mxu1 %v9724_v62  ;;  %v13383_v58 = vld [vmem:[#allocation6 + $0x7b4] sm:$0xf]  ;;  %v14613_v62 = vpack.c.bf16 %v4510_v27, %v4494_v46  ;;  %v9536_v10 = vor.u32 %v13255_v42, %v9533_v47 }
 0x1fe   :  { %v13423_v61 = vld [vmem:[#allocation6 + $0x8ec] sm:$0xf0]  ;;  %v10045_v59 = vld [vmem:[#allocation6 + $0x7f0] sm:$0xf0] }
 0x1ff   :  { %v9147_v5 = vld [vmem:[#allocation6 + $0xb0] sm:$0xf]  ;;  %v10172_v15 = vor.u32 %v13423_v61, %v10171_v60  ;;  %4245 = vmatpush.bf16.msra.mxu3 %v10748_v63  ;;  %v13639_v60 = vld [vmem:[#allocation6 + $0xfb4] sm:$0xf]  ;;  %15463 = vst [vmem:[#allocation31_spill] sm:$0xff] %v14613_v62  ;;  %v10048_v18 = vor.u32 %v13383_v58, %v10045_v59 }
 0x200   :  { %v13167_v6 = vld [vmem:[#allocation6 + $0xec] sm:$0xf0]  ;;  %v11069_v61 = vld [vmem:[#allocation6 + $0xff0] sm:$0xf0] }
 0x201   :  { %v9659_v9 = vld [vmem:[#allocation6 + $0x4b0] sm:$0xf]  ;;  %v9148_v23 = vor.u32 %v13167_v6, %v9147_v5  ;;  %4227 = vmatpush.bf16.msra.mxu2 %v10172_v15  ;;  %v3855_v5 = vpop.f32.mrf.mxu2  ;;  %v3874_v6 = vpop.f32.mrf.mxu3  ;;  %v11072_v19 = vor.u32 %v13639_v60, %v11069_v61  ;;  %v9405_v42 = vld [vmem:[#allocation6 + $0x2f0] sm:$0xf0] }
 0x202   :  { %v13295_v11 = vld [vmem:[#allocation6 + $0x4ec] sm:$0xf0]  ;;  %v13351_v46 = vld [vmem:[#allocation6 + $0x6b4] sm:$0xf] }
 0x203   :  { %v10683_v12 = vld [vmem:[#allocation6 + $0xcb0] sm:$0xf]  ;;  %v9660_v31 = vor.u32 %v13295_v11, %v9659_v9  ;;  %4189 = vmatpush.bf16.msra.mxu0 %v9148_v23  ;;  %v10560_v9 = vor.u32 %v13511_v14, %v10557_v29  ;;  %v10493_v11 = vld [vmem:[#allocation6 + $0xb70] sm:$0xf0] }
 0x204   :  { %v13551_v45 = vld [vmem:[#allocation6 + $0xcec] sm:$0xf0]  ;;  %v9981_v23 = vld [vmem:[#allocation6 + $0x770] sm:$0xf0]  ;;  %v3907_v61 = vpop.f32.mrf.mxu1 }
 0x205   :  { %v10107_v21 = vld [vmem:[#allocation6 + $0x830] sm:$0xf]  ;;  %v10684_v32 = vor.u32 %v13551_v45, %v10683_v12  ;;  %4208 = vmatpush.bf16.msra.mxu1 %v9660_v31  ;;  %v3856_v12 = vadd.f32 %v3855_v5, %v3837_v41  ;;  %v3819_v45 = vpop.f32.mrf.mxu0  ;;  %v13479_v41 = vld [vmem:[#allocation6 + $0xab4] sm:$0xf] }
 0x206   :  { %v13407_v20 = vld [vmem:[#allocation6 + $0x86c] sm:$0xf0]  ;;  %v3820_v15 = vadd.f32 %v3819_v45, %v14595_v22  ;;  %v14619_v22 = vperm.slane %v14616_v33, 0  ;;  %v10429_v14 = vld [vmem:[#allocation6 + $0xaf0] sm:$0xf0] }
 0x207   :  { %v9083_v26 = vld [vmem:[#allocation6 + $0x30] sm:$0xf]  ;;  %v10108_v39 = vor.u32 %v13407_v20, %v10107_v21  ;;  %4246 = vmatpush.bf16.msra.mxu3 %v10684_v32  ;;  %v13239_v21 = vld [vmem:[#allocation6 + $0x334] sm:$0xf]  ;;  %v10496_v32 = vor.u32 %v13495_v8, %v10493_v11 }
 0x208   :  { %v13151_v25 = vld [vmem:[#allocation6 + $0x6c] sm:$0xf0]  ;;  %v9469_v20 = vld [vmem:[#allocation6 + $0x370] sm:$0xf0]  ;;  %v3839_v31 = vadd.f32 %v3838_v16, %v3820_v15 }
 0x209   :  { %v9595_v30 = vld [vmem:[#allocation6 + $0x430] sm:$0xf]  ;;  %v9084_v55 = vor.u32 %v13151_v25, %v9083_v26  ;;  %4228 = vmatpush.bf16.msra.mxu2 %v10108_v39  ;;  %v13623_v26 = vld [vmem:[#allocation6 + $0xf34] sm:$0xf]  ;;  %v3857_v27 = vpop.f32.mrf.mxu2  ;;  %v3876_v47 = vpop.f32.mrf.mxu3 }
 0x20a   :  { %v13279_v34 = vld [vmem:[#allocation6 + $0x46c] sm:$0xf0]  ;;  %v11005_v25 = vld [vmem:[#allocation6 + $0xf70] sm:$0xf0]  ;;  %v3858_v59 = vadd.f32 %v3857_v27, %v3839_v31 }
 0x20b   :  { %v10619_v37 = vld [vmem:[#allocation6 + $0xc30] sm:$0xf]  ;;  %v9596_v63 = vor.u32 %v13279_v34, %v9595_v30  ;;  %4190 = vmatpush.bf16.msra.mxu0 %v9084_v55  ;;  %v3875_v30 = vadd.f32 %v3874_v6, %v3856_v12  ;;  %v9472_v34 = vor.u32 %v13239_v21, %v9469_v20  ;;  %v13223_v29 = vld [vmem:[#allocation6 + $0x2b4] sm:$0xf] }
 0x20c   :  { %v13535_v3 = vld [vmem:[#allocation6 + $0xc6c] sm:$0xf0]  ;;  %v9917_v58 = vld [vmem:[#allocation6 + $0x6f0] sm:$0xf0]  ;;  %v9408_v5 = vor.u32 %v13223_v29, %v9405_v42  ;;  %4229 = vmatmul.bf16.vlgmr.msra.gmra.mxu2 %v14392_v54 }
 0x20d   :  { %v10620_v38 = vor.u32 %v13535_v3, %v10619_v37  ;;  %4209 = vmatpush.bf16.msra.mxu1 %v9596_v63  ;;  %4297 = vmatpush.bf16.msrb.mxu2 %v10560_v9  ;;  %v9984_v37 = vor.u32 %v13367_v0, %v9981_v23  ;;  %v11008_v3 = vor.u32 %v13623_v26, %v11005_v25  ;;  %v13607_v39 = vld [vmem:[#allocation6 + $0xeb4] sm:$0xf]  ;;  %v3888_v60 = vpop.f32.mrf.mxu0  ;;  %v4526_v0 = vmax.f32 %v3875_v30, 0.0 }
 0x20e   :  { %v10941_v55 = vld [vmem:[#allocation6 + $0xef0] sm:$0xf0]  ;;  %v3889_v63 = vadd.f32 %v3888_v60, %v14619_v22  ;;  %v9920_v8 = vor.u32 %v13351_v46, %v9917_v58  ;;  %4191 = vmatmul.bf16.vlgmr.msra.gmra.mxu0 %v14388_v48 }
 0x20f   :  { %4247 = vmatpush.bf16.msra.mxu3 %v10620_v38  ;;  %4259 = vmatpush.bf16.msrb.mxu0 %v9536_v10  ;;  %v10432_v38 = vor.u32 %v13479_v41, %v10429_v14  ;;  %v13463_v6 = vld [vmem:[#allocation6 + $0xa34] sm:$0xf]  ;;  %v3877_v10 = vadd.f32 %v3876_v47, %v3858_v59  ;;  %v10944_v11 = vor.u32 %v13607_v39, %v10941_v55  ;;  %v3909_v39 = vpop.f32.mrf.mxu1 }
 0x210   :  { %v10365_v9 = vld [vmem:[#allocation6 + $0xa70] sm:$0xf0]  ;;  %4210 = vmatmul.bf16.vlgmr.msra.gmra.mxu1 %v14390_v53 }
 0x211   :  { %4278 = vmatpush.bf16.msrb.mxu1 %v10048_v18  ;;  %4298 = vmatpush.bf16.msrb.mxu2 %v10496_v32  ;;  %v13207_v12 = vld [vmem:[#allocation6 + $0x234] sm:$0xf]  ;;  %v3908_v18 = vadd.f32 %v3907_v61, %v3889_v63  ;;  %v4542_v15 = vmax.f32 %v3877_v10, 0.0  ;;  %v10368_v23 = vor.u32 %v13463_v6, %v10365_v9  ;;  %v3926_v14 = vpop.f32.mrf.mxu2  ;;  %v3945_v29 = vpop.f32.mrf.mxu3 }
 0x212   :  { %v9341_v45 = vld [vmem:[#allocation6 + $0x270] sm:$0xf0]  ;;  %4248 = vmatmul.bf16.vlgmr.msra.gmra.mxu3 %v14394_v57 }
 0x213   :  { %4316 = vmatpush.bf16.msrb.mxu3 %v11072_v19  ;;  %4260 = vmatpush.bf16.msrb.mxu0 %v9472_v34  ;;  %v13335_v16 = vld [vmem:[#allocation6 + $0x634] sm:$0xf]  ;;  %v9344_v26 = vor.u32 %v13207_v12, %v9341_v45  ;;  %v14626_v32 = vpack.c.bf16 %v4542_v15, %v4526_v0  ;;  %v3927_v47 = vadd.f32 %v3926_v14, %v3908_v18 }
 0x214   :  { %v9853_v19 = vld [vmem:[#allocation6 + $0x670] sm:$0xf0] }
 0x215   :  { %4279 = vmatpush.bf16.msrb.mxu1 %v9984_v37  ;;  %v13591_v21 = vld [vmem:[#allocation6 + $0xe34] sm:$0xf]  ;;  %4299 = vmatpush.bf16.msrb.mxu2 %v10432_v38  ;;  %15464 = vst [vmem:[#allocation32_spill] sm:$0xff] %v14626_v32  ;;  %v9856_v34 = vor.u32 %v13335_v16, %v9853_v19  ;;  %v3890_v58 = vpop.f32.mrf.mxu0  ;;  %v14629_v38 = vadd.f32 %v3945_v29, %v3927_v47 }
 0x216   :  { %v10877_v20 = vld [vmem:[#allocation6 + $0xe70] sm:$0xf0]  ;;  %v3891_v55 = vadd.f32 %v3890_v58, %v14619_v22 }
 0x217   :  { %4317 = vmatpush.bf16.msrb.mxu3 %v11008_v3  ;;  %4261 = vmatpush.bf16.msrb.mxu0 %v9408_v5  ;;  %v13447_v25 = vld [vmem:[#allocation6 + $0x9b4] sm:$0xf]  ;;  %v10880_v37 = vor.u32 %v13591_v21, %v10877_v20  ;;  %v3912_v29 = vpop.f32.mrf.mxu1 }
 0x218   :  { %v10301_v31 = vld [vmem:[#allocation6 + $0x9f0] sm:$0xf0] }
 0x219   :  { %4280 = vmatpush.bf16.msrb.mxu1 %v9920_v8  ;;  %v13191_v3 = vld [vmem:[#allocation6 + $0x1b4] sm:$0xf]  ;;  %4300 = vmatpush.bf16.msrb.mxu2 %v10368_v23  ;;  %v10304_v59 = vor.u32 %v13447_v25, %v10301_v31  ;;  %v3928_v31 = vpop.f32.mrf.mxu2 }
 0x21a   :  { %v9277_v41 = vld [vmem:[#allocation6 + $0x1f0] sm:$0xf0] }
 0x21b   :  { %4318 = vmatpush.bf16.msrb.mxu3 %v10944_v11  ;;  %v13319_v30 = vld [vmem:[#allocation6 + $0x5b4] sm:$0xf]  ;;  %4262 = vmatpush.bf16.msrb.mxu0 %v9344_v26  ;;  %v9280_v60 = vor.u32 %v13191_v3, %v9277_v41  ;;  %v3910_v11 = vadd.f32 %v3909_v39, %v3891_v55 }
 0x21c   :  { %v9789_v42 = vld [vmem:[#allocation6 + $0x5f0] sm:$0xf0]  ;;  %4234 = vmatmul.bf16.gmra.mxu2 %v14404_v51 }
 0x21d   :  { %v13575_v46 = vld [vmem:[#allocation6 + $0xdb4] sm:$0xf]  ;;  %4281 = vmatpush.bf16.msrb.mxu1 %v9856_v34  ;;  %v9792_v5 = vor.u32 %v13319_v30, %v9789_v42  ;;  %4301 = vmatpush.bf16.msrb.mxu2 %v10304_v59  ;;  %v3947_v34 = vpop.f32.mrf.mxu3  ;;  %v3929_v30 = vadd.f32 %v3928_v31, %v3910_v11  ;;  %v3893_v14 = vpop.f32.mrf.mxu0  ;;  %v13520_v11 = vld [vmem:[#allocation6 + $0xbf4] sm:$0xf0] }
 0x21e   :  { %v10813_v27 = vld [vmem:[#allocation6 + $0xdf0] sm:$0xf0]  ;;  %4196 = vmatmul.bf16.gmra.mxu0 %v14400_v44 }
 0x21f   :  { %v13431_v61 = vld [vmem:[#allocation6 + $0x934] sm:$0xf]  ;;  %4319 = vmatpush.bf16.msrb.mxu3 %v10880_v37  ;;  %v10816_v6 = vor.u32 %v13575_v46, %v10813_v27  ;;  %4263 = vmatpush.bf16.msrb.mxu0 %v9280_v60  ;;  %v3894_v27 = vadd.f32 %v3893_v14, %v14619_v22  ;;  %v3948_v60 = vadd.f32 %v3947_v34, %v3929_v30  ;;  %v13504_v30 = vld [vmem:[#allocation6 + $0xb74] sm:$0xf0] }
 0x220   :  { %v10237_v63 = vld [vmem:[#allocation6 + $0x970] sm:$0xf0]  ;;  %4215 = vmatmul.bf16.gmra.mxu1 %v14402_v50 }
 0x221   :  { %v13175_v9 = vld [vmem:[#allocation6 + $0x134] sm:$0xf]  ;;  %v10240_v18 = vor.u32 %v13431_v61, %v10237_v63  ;;  %4282 = vmatpush.bf16.msrb.mxu1 %v9792_v5  ;;  %v3931_v31 = vpop.f32.mrf.mxu2 }
 0x222   :  { %v9213_v10 = vld [vmem:[#allocation6 + $0x170] sm:$0xf0]  ;;  %4253 = vmatmul.bf16.gmra.mxu3 %v14406_v56 }
 0x223   :  { %v13303_v8 = vld [vmem:[#allocation6 + $0x534] sm:$0xf]  ;;  %v9216_v19 = vor.u32 %v13175_v9, %v9213_v10  ;;  %4320 = vmatpush.bf16.msrb.mxu3 %v10816_v6  ;;  %4302 = vmatpush.bf16.msrb.mxu2 %v10240_v18  ;;  %v3913_v10 = vadd.f32 %v3912_v29, %v3894_v27  ;;  %v13264_v18 = vld [vmem:[#allocation6 + $0x3f4] sm:$0xf0]  ;;  %v3914_v27 = vpop.f32.mrf.mxu1 }
 0x224   :  { %v9725_v12 = vld [vmem:[#allocation6 + $0x570] sm:$0xf0] }
 0x225   :  { %v13559_v45 = vld [vmem:[#allocation6 + $0xd34] sm:$0xf]  ;;  %v9728_v0 = vor.u32 %v13303_v8, %v9725_v12  ;;  %4264 = vmatpush.bf16.msrb.mxu0 %v9216_v19  ;;  %v10563_v8 = vld [vmem:[#allocation6 + $0xbb8] sm:$0xf]  ;;  %v3950_v34 = vpop.f32.mrf.mxu3  ;;  %v3932_v14 = vadd.f32 %v3931_v31, %v3913_v10  ;;  %v3895_v29 = vpop.f32.mrf.mxu0 }
 0x226   :  { %v10749_v16 = vld [vmem:[#allocation6 + $0xd70] sm:$0xf0]  ;;  %v9539_v12 = vld [vmem:[#allocation6 + $0x3b8] sm:$0xf] }
 0x227   :  { %v13415_v21 = vld [vmem:[#allocation6 + $0x8b4] sm:$0xf]  ;;  %v10752_v15 = vor.u32 %v13559_v45, %v10749_v16  ;;  %4283 = vmatpush.bf16.msrb.mxu1 %v9728_v0  ;;  %v4495_v45 = vmax.f32 %v14629_v38, 0.0  ;;  %v4511_v16 = vmax.f32 %v3948_v60, 0.0  ;;  %v10051_v19 = vld [vmem:[#allocation6 + $0x7b8] sm:$0xf] }
 0x228   :  { %v10173_v20 = vld [vmem:[#allocation6 + $0x8f0] sm:$0xf0]  ;;  %v13392_v0 = vld [vmem:[#allocation6 + $0x7f4] sm:$0xf0] }
 0x229   :  { %v13159_v23 = vld [vmem:[#allocation6 + $0xb4] sm:$0xf]  ;;  %v10176_v47 = vor.u32 %v13415_v21, %v10173_v20  ;;  %4321 = vmatpush.bf16.msrb.mxu3 %v10752_v15  ;;  %v11075_v15 = vld [vmem:[#allocation6 + $0xfb8] sm:$0xf] }
 0x22a   :  { %v9149_v26 = vld [vmem:[#allocation6 + $0xf0] sm:$0xf0]  ;;  %v11011_v60 = vld [vmem:[#allocation6 + $0xf38] sm:$0xf] }
 0x22b   :  { %v13287_v25 = vld [vmem:[#allocation6 + $0x4b4] sm:$0xf]  ;;  %v9152_v58 = vor.u32 %v13159_v23, %v9149_v26  ;;  %4303 = vmatpush.bf16.msrb.mxu2 %v10176_v47  ;;  %v13648_v23 = vld [vmem:[#allocation6 + $0xff4] sm:$0xf0]  ;;  %v14637_v26 = vpack.c.bf16 %v4511_v16, %v4495_v45 }
 0x22c   :  { %v9661_v37 = vld [vmem:[#allocation6 + $0x4f0] sm:$0xf0]  ;;  %v9475_v47 = vld [vmem:[#allocation6 + $0x338] sm:$0xf] }
 0x22d   :  { %v13543_v3 = vld [vmem:[#allocation6 + $0xcb4] sm:$0xf]  ;;  %v9664_v61 = vor.u32 %v13287_v25, %v9661_v37  ;;  %4265 = vmatpush.bf16.msrb.mxu0 %v9152_v58  ;;  %15465 = vst [vmem:[#allocation33_spill] sm:$0xff] %v14637_v26  ;;  %v10564_v37 = vor.u32 %v13520_v11, %v10563_v8  ;;  %v13248_v58 = vld [vmem:[#allocation6 + $0x374] sm:$0xf0]  ;;  %v14641_v11 = vperm.slane %v14616_v33, 1 }
 0x22e   :  { %v10685_v41 = vld [vmem:[#allocation6 + $0xcf0] sm:$0xf0]  ;;  %v9411_v45 = vld [vmem:[#allocation6 + $0x2b8] sm:$0xf] }
 0x22f   :  { %v13399_v42 = vld [vmem:[#allocation6 + $0x834] sm:$0xf]  ;;  %v10688_v63 = vor.u32 %v13543_v3, %v10685_v41  ;;  %4284 = vmatpush.bf16.msrb.mxu1 %v9664_v61  ;;  %v9540_v3 = vor.u32 %v13264_v18, %v9539_v12  ;;  %v10499_v41 = vld [vmem:[#allocation6 + $0xb38] sm:$0xf] }
 0x230   :  { %v10109_v46 = vld [vmem:[#allocation6 + $0x870] sm:$0xf0]  ;;  %v13632_v61 = vld [vmem:[#allocation6 + $0xf74] sm:$0xf0] }
 0x231   :  { %v13143_v39 = vld [vmem:[#allocation6 + $0x34] sm:$0xf]  ;;  %v10112_v21 = vor.u32 %v13399_v42, %v10109_v46  ;;  %4322 = vmatpush.bf16.msrb.mxu3 %v10688_v63  ;;  %v10052_v42 = vor.u32 %v13392_v0, %v10051_v19  ;;  %v11076_v46 = vor.u32 %v13648_v23, %v11075_v15  ;;  %v3951_v63 = vadd.f32 %v3950_v34, %v3932_v14  ;;  %v13488_v12 = vld [vmem:[#allocation6 + $0xaf4] sm:$0xf0]  ;;  %v3933_v19 = vpop.f32.mrf.mxu2 }
 0x232   :  { %v9085_v55 = vld [vmem:[#allocation6 + $0x70] sm:$0xf0]  ;;  %v11012_v8 = vor.u32 %v13632_v61, %v11011_v60  ;;  %v13232_v16 = vld [vmem:[#allocation6 + $0x2f4] sm:$0xf0] }
 0x233   :  { %v13271_v59 = vld [vmem:[#allocation6 + $0x434] sm:$0xf]  ;;  %v9088_v20 = vor.u32 %v13143_v39, %v9085_v55  ;;  %v9987_v39 = vld [vmem:[#allocation6 + $0x738] sm:$0xf]  ;;  %v3896_v55 = vadd.f32 %v3895_v29, %v14619_v22  ;;  %4304 = vmatpush.bf16.msrb.mxu2 %v10112_v21  ;;  %v3952_v21 = vpop.f32.mrf.mxu3 }
 0x234   :  { %v9597_v5 = vld [vmem:[#allocation6 + $0x470] sm:$0xf0]  ;;  %v10435_v22 = vld [vmem:[#allocation6 + $0xab8] sm:$0xf] }
 0x235   :  { %v13527_v6 = vld [vmem:[#allocation6 + $0xc34] sm:$0xf]  ;;  %v9600_v25 = vor.u32 %v13271_v59, %v9597_v5  ;;  %4266 = vmatpush.bf16.msrb.mxu0 %v9088_v20  ;;  %v13376_v59 = vld [vmem:[#allocation6 + $0x774] sm:$0xf0]  ;;  %v3915_v5 = vadd.f32 %v3914_v27, %v3896_v55  ;;  %v10436_v34 = vor.u32 %v13488_v12, %v10435_v22 }
 0x236   :  { %v10621_v9 = vld [vmem:[#allocation6 + $0xc70] sm:$0xf0]  ;;  %v9988_v10 = vor.u32 %v13376_v59, %v9987_v39  ;;  %v9923_v18 = vld [vmem:[#allocation6 + $0x6b8] sm:$0xf]  ;;  %v4527_v59 = vmax.f32 %v3951_v63, 0.0  ;;  %4305 = vmatmul.bf16.vlgmr.msrb.gmra.mxu2 %v14392_v54 }
 0x237   :  { %v10624_v38 = vor.u32 %v13527_v6, %v10621_v9  ;;  %4285 = vmatpush.bf16.msrb.mxu1 %v9600_v25  ;;  %4373 = vmatpush.bf16.msra.mxu2 %v10564_v37  ;;  %v10500_v6 = vor.u32 %v13504_v30, %v10499_v41  ;;  %v9476_v9 = vor.u32 %v13248_v58, %v9475_v47  ;;  %v13360_v20 = vld [vmem:[#allocation6 + $0x6f4] sm:$0xf0]  ;;  %v3964_v25 = vpop.f32.mrf.mxu0 }
 0x238   :  { %v10947_v0 = vld [vmem:[#allocation6 + $0xeb8] sm:$0xf]  ;;  %v3934_v23 = vadd.f32 %v3933_v19, %v3915_v5  ;;  %v3965_v31 = vadd.f32 %v3964_v25, %v14641_v11  ;;  %v9412_v37 = vor.u32 %v13232_v16, %v9411_v45  ;;  %v9924_v14 = vor.u32 %v13360_v20, %v9923_v18  ;;  %4267 = vmatmul.bf16.vlgmr.msrb.gmra.mxu0 %v14388_v48 }
 0x239   :  { %4323 = vmatpush.bf16.msrb.mxu3 %v10624_v38  ;;  %4335 = vmatpush.bf16.msra.mxu0 %v9540_v3  ;;  %v13616_v15 = vld [vmem:[#allocation6 + $0xef4] sm:$0xf0]  ;;  %v3983_v38 = vpop.f32.mrf.mxu1  ;;  %v4002_v16 = vpop.f32.mrf.mxu2 }
 0x23a   :  { %v10371_v3 = vld [vmem:[#allocation6 + $0xa38] sm:$0xf]  ;;  %v3953_v30 = vadd.f32 %v3952_v21, %v3934_v23  ;;  %v10948_v29 = vor.u32 %v13616_v15, %v10947_v0  ;;  %v3984_v47 = vadd.f32 %v3983_v38, %v3965_v31  ;;  %4286 = vmatmul.bf16.vlgmr.msrb.gmra.mxu1 %v14390_v53 }
 0x23b   :  { %4354 = vmatpush.bf16.msra.mxu1 %v10052_v42  ;;  %4374 = vmatpush.bf16.msra.mxu2 %v10500_v6  ;;  %v13472_v41 = vld [vmem:[#allocation6 + $0xa74] sm:$0xf0]  ;;  %v4021_v18 = vpop.f32.mrf.mxu3 }
 0x23c   :  { %v9347_v27 = vld [vmem:[#allocation6 + $0x238] sm:$0xf]  ;;  %v4543_v60 = vmax.f32 %v3953_v30, 0.0  ;;  %4324 = vmatmul.bf16.vlgmr.msrb.gmra.mxu3 %v14394_v57  ;;  %v10372_v61 = vor.u32 %v13472_v41, %v10371_v3  ;;  %v4003_v0 = vadd.f32 %v4002_v16, %v3984_v47 }
 0x23d   :  { %4392 = vmatpush.bf16.msra.mxu3 %v11076_v46  ;;  %4336 = vmatpush.bf16.msra.mxu0 %v9476_v9  ;;  %v13216_v42 = vld [vmem:[#allocation6 + $0x274] sm:$0xf0] }
 0x23e   :  { %v9859_v46 = vld [vmem:[#allocation6 + $0x638] sm:$0xf]  ;;  %v9348_v5 = vor.u32 %v13216_v42, %v9347_v27  ;;  %v14651_v3 = vadd.f32 %v4021_v18, %v4003_v0 }
 0x23f   :  { %4355 = vmatpush.bf16.msra.mxu1 %v9988_v10  ;;  %v13344_v58 = vld [vmem:[#allocation6 + $0x674] sm:$0xf0]  ;;  %4375 = vmatpush.bf16.msra.mxu2 %v10436_v34  ;;  %v14648_v10 = vpack.c.bf16 %v4543_v60, %v4527_v59  ;;  %v3966_v15 = vpop.f32.mrf.mxu0 }
 0x240   :  { %v10883_v39 = vld [vmem:[#allocation6 + $0xe38] sm:$0xf]  ;;  %v3967_v25 = vadd.f32 %v3966_v15, %v14641_v11 }
 0x241   :  { %4393 = vmatpush.bf16.msra.mxu3 %v11012_v8  ;;  %v13600_v55 = vld [vmem:[#allocation6 + $0xe74] sm:$0xf0]  ;;  %4337 = vmatpush.bf16.msra.mxu0 %v9412_v37  ;;  %15466 = vst [vmem:[#allocation34_spill] sm:$0xff] %v14648_v10  ;;  %v9860_v8 = vor.u32 %v13344_v58, %v9859_v46  ;;  %v3985_v23 = vpop.f32.mrf.mxu1 }
 0x242   :  { %v10307_v6 = vld [vmem:[#allocation6 + $0x9b8] sm:$0xf]  ;;  %v10884_v22 = vor.u32 %v13600_v55, %v10883_v39  ;;  %v3986_v42 = vadd.f32 %v3985_v23, %v3967_v25 }
 0x243   :  { %v13456_v9 = vld [vmem:[#allocation6 + $0x9f4] sm:$0xf0]  ;;  %4356 = vmatpush.bf16.msra.mxu1 %v9924_v14  ;;  %4376 = vmatpush.bf16.msra.mxu2 %v10372_v61 }
 0x244   :  { %v9283_v12 = vld [vmem:[#allocation6 + $0x1b8] sm:$0xf]  ;;  %v10308_v38 = vor.u32 %v13456_v9, %v10307_v6 }
 0x245   :  { %4394 = vmatpush.bf16.msra.mxu3 %v10948_v29  ;;  %v13200_v45 = vld [vmem:[#allocation6 + $0x1f4] sm:$0xf0]  ;;  %4338 = vmatpush.bf16.msra.mxu0 %v9348_v5 }
 0x246   :  { %v9795_v63 = vld [vmem:[#allocation6 + $0x5b8] sm:$0xf]  ;;  %v9284_v31 = vor.u32 %v13200_v45, %v9283_v12  ;;  %v4023_v12 = vpop.f32.mrf.mxu3  ;;  %4310 = vmatmul.bf16.gmra.mxu2 %v14404_v51 }
 0x247   :  { %v13328_v19 = vld [vmem:[#allocation6 + $0x5f4] sm:$0xf0]  ;;  %4357 = vmatpush.bf16.msra.mxu1 %v9860_v8  ;;  %4377 = vmatpush.bf16.msra.mxu2 %v10308_v38 }
 0x248   :  { %v10819_v21 = vld [vmem:[#allocation6 + $0xdb8] sm:$0xf]  ;;  %v9796_v41 = vor.u32 %v13328_v19, %v9795_v63  ;;  %v3969_v19 = vpop.f32.mrf.mxu0  ;;  %4272 = vmatmul.bf16.gmra.mxu0 %v14400_v44 }
 0x249   :  { %v13584_v20 = vld [vmem:[#allocation6 + $0xdf4] sm:$0xf0]  ;;  %4395 = vmatpush.bf16.msra.mxu3 %v10884_v22  ;;  %4339 = vmatpush.bf16.msra.mxu0 %v9284_v31  ;;  %v4004_v22 = vpop.f32.mrf.mxu2  ;;  %v3970_v15 = vadd.f32 %v3969_v19, %v14641_v11  ;;  %v13496_v19 = vld [vmem:[#allocation6 + $0xb3c] sm:$0xf] }
 0x24a   :  { %v10243_v34 = vld [vmem:[#allocation6 + $0x938] sm:$0xf]  ;;  %v10820_v30 = vor.u32 %v13584_v20, %v10819_v21  ;;  %v4005_v18 = vadd.f32 %v4004_v22, %v3986_v42  ;;  %v3988_v21 = vpop.f32.mrf.mxu1  ;;  %4291 = vmatmul.bf16.gmra.mxu1 %v14402_v50 }
 0x24b   :  { %v13440_v37 = vld [vmem:[#allocation6 + $0x974] sm:$0xf0]  ;;  %4358 = vmatpush.bf16.msra.mxu1 %v9796_v41  ;;  %v3989_v42 = vadd.f32 %v3988_v21, %v3970_v15  ;;  %v10501_v21 = vld [vmem:[#allocation6 + $0xb78] sm:$0xf0] }
 0x24c   :  { %v9219_v14 = vld [vmem:[#allocation6 + $0x138] sm:$0xf]  ;;  %v10244_v39 = vor.u32 %v13440_v37, %v10243_v34  ;;  %v4024_v37 = vadd.f32 %v4023_v12, %v4005_v18  ;;  %4329 = vmatmul.bf16.gmra.mxu3 %v14406_v56 }
 0x24d   :  { %v13184_v29 = vld [vmem:[#allocation6 + $0x174] sm:$0xf0]  ;;  %4396 = vmatpush.bf16.msra.mxu3 %v10820_v30 }
 0x24e   :  { %v9731_v27 = vld [vmem:[#allocation6 + $0x538] sm:$0xf]  ;;  %v9220_v55 = vor.u32 %v13184_v29, %v9219_v14  ;;  %4378 = vmatpush.bf16.msra.mxu2 %v10244_v39  ;;  %v4496_v39 = vmax.f32 %v14651_v3, 0.0 }
 0x24f   :  { %v13312_v46 = vld [vmem:[#allocation6 + $0x574] sm:$0xf0] }
 0x250   :  { %v10755_v47 = vld [vmem:[#allocation6 + $0xd38] sm:$0xf]  ;;  %v9732_v61 = vor.u32 %v13312_v46, %v9731_v27  ;;  %4340 = vmatpush.bf16.msra.mxu0 %v9220_v55  ;;  %v13512_v46 = vld [vmem:[#allocation6 + $0xbbc] sm:$0xf]  ;;  %v4512_v55 = vmax.f32 %v4024_v37, 0.0 }
 0x251   :  { %v13568_v58 = vld [vmem:[#allocation6 + $0xd74] sm:$0xf0]  ;;  %v13368_v37 = vld [vmem:[#allocation6 + $0x73c] sm:$0xf] }
 0x252   :  { %v10179_v59 = vld [vmem:[#allocation6 + $0x8b8] sm:$0xf]  ;;  %v10756_v5 = vor.u32 %v13568_v58, %v10755_v47  ;;  %4359 = vmatpush.bf16.msra.mxu1 %v9732_v61  ;;  %v10565_v47 = vld [vmem:[#allocation6 + $0xbf8] sm:$0xf0]  ;;  %v14659_v22 = vpack.c.bf16 %v4512_v55, %v4496_v39 }
 0x253   :  { %v13424_v60 = vld [vmem:[#allocation6 + $0x8f4] sm:$0xf0]  ;;  %v13256_v58 = vld [vmem:[#allocation6 + $0x3bc] sm:$0xf] }
 0x254   :  { %v9155_v6 = vld [vmem:[#allocation6 + $0xb8] sm:$0xf]  ;;  %v10180_v23 = vor.u32 %v13424_v60, %v10179_v59  ;;  %4397 = vmatpush.bf16.msra.mxu3 %v10756_v5  ;;  %v9541_v59 = vld [vmem:[#allocation6 + $0x3f8] sm:$0xf0]  ;;  %15467 = vst [vmem:[#allocation35_spill] sm:$0xff] %v14659_v22 }
 0x255   :  { %v13168_v9 = vld [vmem:[#allocation6 + $0xf4] sm:$0xf0]  ;;  %v13384_v60 = vld [vmem:[#allocation6 + $0x7bc] sm:$0xf]  ;;  %v9544_v18 = vor.u32 %v13256_v58, %v9541_v59  ;;  %v14663_v58 = vperm.slane %v14616_v33, 2 }
 0x256   :  { %v9667_v8 = vld [vmem:[#allocation6 + $0x4b8] sm:$0xf]  ;;  %v9156_v25 = vor.u32 %v13168_v9, %v9155_v6  ;;  %4379 = vmatpush.bf16.msra.mxu2 %v10180_v23  ;;  %v10053_v6 = vld [vmem:[#allocation6 + $0x7f8] sm:$0xf0]  ;;  %v3971_v23 = vpop.f32.mrf.mxu0 }
 0x257   :  { %v13296_v45 = vld [vmem:[#allocation6 + $0x4f4] sm:$0xf0]  ;;  %v13640_v9 = vld [vmem:[#allocation6 + $0xfbc] sm:$0xf]  ;;  %v3972_v39 = vadd.f32 %v3971_v23, %v14641_v11 }
 0x258   :  { %v10691_v63 = vld [vmem:[#allocation6 + $0xcb8] sm:$0xf]  ;;  %v9668_v41 = vor.u32 %v13296_v45, %v9667_v8  ;;  %4341 = vmatpush.bf16.msra.mxu0 %v9156_v25  ;;  %v11077_v8 = vld [vmem:[#allocation6 + $0xff8] sm:$0xf0]  ;;  %v4007_v45 = vpop.f32.mrf.mxu2  ;;  %v3990_v25 = vpop.f32.mrf.mxu1 }
 0x259   :  { %v13552_v16 = vld [vmem:[#allocation6 + $0xcf4] sm:$0xf0]  ;;  %v4008_v15 = vadd.f32 %v4007_v45, %v3989_v42  ;;  %v13480_v11 = vld [vmem:[#allocation6 + $0xabc] sm:$0xf] }
 0x25a   :  { %v10115_v20 = vld [vmem:[#allocation6 + $0x838] sm:$0xf]  ;;  %v10692_v30 = vor.u32 %v13552_v16, %v10691_v63  ;;  %4360 = vmatpush.bf16.msra.mxu1 %v9668_v41  ;;  %v4026_v63 = vpop.f32.mrf.mxu3  ;;  %v10568_v16 = vor.u32 %v13512_v46, %v10565_v47  ;;  %v13624_v41 = vld [vmem:[#allocation6 + $0xf3c] sm:$0xf] }
 0x25b   :  { %v13408_v0 = vld [vmem:[#allocation6 + $0x874] sm:$0xf0]  ;;  %v10437_v55 = vld [vmem:[#allocation6 + $0xaf8] sm:$0xf0] }
 0x25c   :  { %v9091_v38 = vld [vmem:[#allocation6 + $0x38] sm:$0xf]  ;;  %v10116_v61 = vor.u32 %v13408_v0, %v10115_v20  ;;  %4398 = vmatpush.bf16.msra.mxu3 %v10692_v30  ;;  %v10056_v20 = vor.u32 %v13384_v60, %v10053_v6  ;;  %v11080_v0 = vor.u32 %v13640_v9, %v11077_v8  ;;  %v11013_v30 = vld [vmem:[#allocation6 + $0xf78] sm:$0xf0] }
 0x25d   :  { %v13152_v31 = vld [vmem:[#allocation6 + $0x74] sm:$0xf0]  ;;  %v11016_v47 = vor.u32 %v13624_v41, %v11013_v30  ;;  %v13224_v59 = vld [vmem:[#allocation6 + $0x2bc] sm:$0xf] }
 0x25e   :  { %v9603_v34 = vld [vmem:[#allocation6 + $0x438] sm:$0xf]  ;;  %v9092_v5 = vor.u32 %v13152_v31, %v9091_v38  ;;  %v13240_v38 = vld [vmem:[#allocation6 + $0x33c] sm:$0xf]  ;;  %4380 = vmatpush.bf16.msra.mxu2 %v10116_v61  ;;  %v4040_v45 = vpop.f32.mrf.mxu0 }
 0x25f   :  { %v13280_v14 = vld [vmem:[#allocation6 + $0x474] sm:$0xf0]  ;;  %v9477_v31 = vld [vmem:[#allocation6 + $0x378] sm:$0xf0]  ;;  %v4041_v33 = vadd.f32 %v4040_v45, %v14663_v58 }
 0x260   :  { %v10627_v29 = vld [vmem:[#allocation6 + $0xc38] sm:$0xf]  ;;  %v9604_v12 = vor.u32 %v13280_v14, %v9603_v34  ;;  %4342 = vmatpush.bf16.msra.mxu0 %v9092_v5  ;;  %v9989_v34 = vld [vmem:[#allocation6 + $0x778] sm:$0xf0]  ;;  %v4027_v14 = vadd.f32 %v4026_v63, %v4008_v15  ;;  %v9480_v42 = vor.u32 %v13240_v38, %v9477_v31  ;;  %v4009_v5 = vpop.f32.mrf.mxu2  ;;  %v4059_v63 = vpop.f32.mrf.mxu1 }
 0x261   :  { %v13536_v27 = vld [vmem:[#allocation6 + $0xc74] sm:$0xf0]  ;;  %v9992_v46 = vor.u32 %v13368_v37, %v9989_v34  ;;  %v9413_v60 = vld [vmem:[#allocation6 + $0x2f8] sm:$0xf0]  ;;  %v4060_v31 = vadd.f32 %v4059_v63, %v4041_v33  ;;  %4381 = vmatmul.bf16.vlgmr.msra.gmra.mxu2 %v14392_v54 }
 0x262   :  { %v10628_v3 = vor.u32 %v13536_v27, %v10627_v29  ;;  %4361 = vmatpush.bf16.msra.mxu1 %v9604_v12  ;;  %v3991_v29 = vadd.f32 %v3990_v25, %v3972_v39  ;;  %4449 = vmatpush.bf16.msrb.mxu2 %v10568_v16  ;;  %v10504_v27 = vor.u32 %v13496_v19, %v10501_v21  ;;  %v13352_v61 = vld [vmem:[#allocation6 + $0x6bc] sm:$0xf]  ;;  %v4028_v6 = vpop.f32.mrf.mxu3  ;;  %v4528_v41 = vmax.f32 %v4027_v14, 0.0 }
 0x263   :  { %v9925_v9 = vld [vmem:[#allocation6 + $0x6f8] sm:$0xf0]  ;;  %v10440_v16 = vor.u32 %v13480_v11, %v10437_v55  ;;  %4343 = vmatmul.bf16.vlgmr.msra.gmra.mxu0 %v14388_v48 }
 0x264   :  { %4399 = vmatpush.bf16.msra.mxu3 %v10628_v3  ;;  %4411 = vmatpush.bf16.msrb.mxu0 %v9544_v18  ;;  %v13608_v8 = vld [vmem:[#allocation6 + $0xebc] sm:$0xf]  ;;  %v4010_v3 = vadd.f32 %v4009_v5, %v3991_v29  ;;  %v9416_v18 = vor.u32 %v13224_v59, %v9413_v60  ;;  %v9928_v23 = vor.u32 %v13352_v61, %v9925_v9 }
 0x265   :  { %v10949_v12 = vld [vmem:[#allocation6 + $0xef8] sm:$0xf0]  ;;  %4362 = vmatmul.bf16.vlgmr.msra.gmra.mxu1 %v14390_v53 }
 0x266   :  { %4430 = vmatpush.bf16.msrb.mxu1 %v10056_v20  ;;  %4450 = vmatpush.bf16.msrb.mxu2 %v10504_v27  ;;  %v13464_v19 = vld [vmem:[#allocation6 + $0xa3c] sm:$0xf]  ;;  %v4029_v15 = vadd.f32 %v4028_v6, %v4010_v3  ;;  %v10952_v25 = vor.u32 %v13608_v8, %v10949_v12  ;;  %v4042_v3 = vpop.f32.mrf.mxu0 }
 0x267   :  { %v10373_v21 = vld [vmem:[#allocation6 + $0xa78] sm:$0xf0]  ;;  %4400 = vmatmul.bf16.vlgmr.msra.gmra.mxu3 %v14394_v57  ;;  %v4043_v63 = vadd.f32 %v4042_v3, %v14663_v58 }
 0x268   :  { %4468 = vmatpush.bf16.msrb.mxu3 %v11080_v0  ;;  %4412 = vmatpush.bf16.msrb.mxu0 %v9480_v42  ;;  %v13208_v20 = vld [vmem:[#allocation6 + $0x23c] sm:$0xf]  ;;  %v4544_v30 = vmax.f32 %v4029_v15, 0.0  ;;  %v10376_v29 = vor.u32 %v13464_v19, %v10373_v21  ;;  %v4078_v61 = vpop.f32.mrf.mxu2  ;;  %v4061_v45 = vpop.f32.mrf.mxu1 }
 0x269   :  { %v9349_v0 = vld [vmem:[#allocation6 + $0x278] sm:$0xf0]  ;;  %v4079_v12 = vadd.f32 %v4078_v61, %v4060_v31 }
 0x26a   :  { %4431 = vmatpush.bf16.msrb.mxu1 %v9992_v46  ;;  %v13336_v38 = vld [vmem:[#allocation6 + $0x63c] sm:$0xf]  ;;  %4451 = vmatpush.bf16.msrb.mxu2 %v10440_v16  ;;  %v9352_v27 = vor.u32 %v13208_v20, %v9349_v0  ;;  %v4097_v5 = vpop.f32.mrf.mxu3 }
 0x26b   :  { %v9861_v37 = vld [vmem:[#allocation6 + $0x678] sm:$0xf0]  ;;  %v14673_v21 = vadd.f32 %v4097_v5, %v4079_v12 }
 0x26c   :  { %4469 = vmatpush.bf16.msrb.mxu3 %v11016_v47  ;;  %v13592_v39 = vld [vmem:[#allocation6 + $0xe3c] sm:$0xf]  ;;  %4413 = vmatpush.bf16.msrb.mxu0 %v9416_v18  ;;  %v14670_v47 = vpack.c.bf16 %v4544_v30, %v4528_v41  ;;  %v9864_v11 = vor.u32 %v13336_v38, %v9861_v37  ;;  %v4062_v38 = vadd.f32 %v4061_v45, %v4043_v63 }
 0x26d   :  { %v10885_v34 = vld [vmem:[#allocation6 + $0xe78] sm:$0xf0] }
 0x26e   :  { %v13448_v42 = vld [vmem:[#allocation6 + $0x9bc] sm:$0xf]  ;;  %15468 = vst [vmem:[#allocation36_spill] sm:$0xff] %v14670_v47  ;;  %4432 = vmatpush.bf16.msrb.mxu1 %v9928_v23  ;;  %v10888_v55 = vor.u32 %v13592_v39, %v10885_v34  ;;  %4452 = vmatpush.bf16.msrb.mxu2 %v10376_v29  ;;  %v11435_v47 = vld [vmem:[#allocation9 + $0x2c0] sm:$0xf] }
 0x26f   :  { %v10309_v46 = vld [vmem:[#allocation6 + $0x9f8] sm:$0xf0] }
 0x270   :  { %4470 = vmatpush.bf16.msrb.mxu3 %v10952_v25  ;;  %v13192_v59 = vld [vmem:[#allocation6 + $0x1bc] sm:$0xf]  ;;  %4414 = vmatpush.bf16.msrb.mxu0 %v9352_v27  ;;  %v10312_v33 = vor.u32 %v13448_v42, %v10309_v46 }
 0x271   :  { %v9285_v60 = vld [vmem:[#allocation6 + $0x1f8] sm:$0xf0]  ;;  %4386 = vmatmul.bf16.gmra.mxu2 %v14404_v51 }
 0x272   :  { %v13320_v14 = vld [vmem:[#allocation6 + $0x5bc] sm:$0xf]  ;;  %v9288_v16 = vor.u32 %v13192_v59, %v9285_v60  ;;  %4433 = vmatpush.bf16.msrb.mxu1 %v9864_v11  ;;  %4453 = vmatpush.bf16.msrb.mxu2 %v10312_v33  ;;  %v4080_v59 = vpop.f32.mrf.mxu2  ;;  %v4099_v60 = vpop.f32.mrf.mxu3 }
 0x273   :  { %v9797_v6 = vld [vmem:[#allocation6 + $0x5f8] sm:$0xf0]  ;;  %4348 = vmatmul.bf16.gmra.mxu0 %v14400_v44 }
 0x274   :  { %v13576_v9 = vld [vmem:[#allocation6 + $0xdbc] sm:$0xf]  ;;  %4471 = vmatpush.bf16.msrb.mxu3 %v10888_v55  ;;  %v9800_v15 = vor.u32 %v13320_v14, %v9797_v6  ;;  %4415 = vmatpush.bf16.msrb.mxu0 %v9288_v16  ;;  %v4081_v6 = vadd.f32 %v4080_v59, %v4062_v38  ;;  %v13775_v59 = vld [vmem:[#allocation9 + $0x3ec] sm:$0xf0] }
 0x275   :  { %v10821_v8 = vld [vmem:[#allocation6 + $0xdf8] sm:$0xf0]  ;;  %4367 = vmatmul.bf16.gmra.mxu1 %v14402_v50 }
 0x276   :  { %v13432_v18 = vld [vmem:[#allocation6 + $0x93c] sm:$0xf]  ;;  %v10824_v23 = vor.u32 %v13576_v9, %v10821_v8  ;;  %4434 = vmatpush.bf16.msrb.mxu1 %v9800_v15  ;;  %v4045_v9 = vpop.f32.mrf.mxu0  ;;  %v4064_v8 = vpop.f32.mrf.mxu1  ;;  %v4100_v15 = vadd.f32 %v4099_v60, %v4081_v6 }
 0x277   :  { %v10245_v19 = vld [vmem:[#allocation6 + $0x978] sm:$0xf0]  ;;  %v4046_v45 = vadd.f32 %v4045_v9, %v14663_v58  ;;  %4405 = vmatmul.bf16.gmra.mxu3 %v14406_v56 }
 0x278   :  { %v13176_v25 = vld [vmem:[#allocation6 + $0x13c] sm:$0xf]  ;;  %v10248_v34 = vor.u32 %v13432_v18, %v10245_v19  ;;  %4472 = vmatpush.bf16.msrb.mxu3 %v10824_v23 }
 0x279   :  { %v9221_v20 = vld [vmem:[#allocation6 + $0x178] sm:$0xf0] }
 0x27a   :  { %v13304_v0 = vld [vmem:[#allocation6 + $0x53c] sm:$0xf]  ;;  %v9224_v41 = vor.u32 %v13176_v25, %v9221_v20  ;;  %4454 = vmatpush.bf16.msrb.mxu2 %v10248_v34  ;;  %v11323_v34 = vld [vmem:[#allocation9 + $0x1e0] sm:$0xf] }
 0x27b   :  { %v9733_v31 = vld [vmem:[#allocation6 + $0x578] sm:$0xf0] }
 0x27c   :  { %v13560_v37 = vld [vmem:[#allocation6 + $0xd3c] sm:$0xf]  ;;  %v9736_v27 = vor.u32 %v13304_v0, %v9733_v31  ;;  %4416 = vmatpush.bf16.msrb.mxu0 %v9224_v41  ;;  %v4065_v31 = vadd.f32 %v4064_v8, %v4046_v45  ;;  %v4497_v41 = vmax.f32 %v14673_v21, 0.0  ;;  %v11179_v8 = vld [vmem:[#allocation9 + $0xc0] sm:$0xf] }
 0x27d   :  { %v10757_v39 = vld [vmem:[#allocation6 + $0xd78] sm:$0xf0]  ;;  %v13675_v45 = vld [vmem:[#allocation9 + $0xcc] sm:$0xf0] }
 0x27e   :  { %v13416_v30 = vld [vmem:[#allocation6 + $0x8bc] sm:$0xf]  ;;  %v10760_v42 = vor.u32 %v13560_v37, %v10757_v39  ;;  %4435 = vmatpush.bf16.msrb.mxu1 %v9736_v27  ;;  %v11195_v37 = vld [vmem:[#allocation9 + $0xe0] sm:$0xf]  ;;  %v13679_v39 = vld [vmem:[#allocation9 + $0xec] sm:$0xf0] }
 0x27f   :  { %v10181_v29 = vld [vmem:[#allocation6 + $0x8f8] sm:$0xf0]  ;;  %v11451_v27 = vld [vmem:[#allocation9 + $0x2e0] sm:$0xf]  ;;  %v11196_v6 = vor.u32 %v13679_v39, %v11195_v37 }
 0x280   :  { %v13160_v46 = vld [vmem:[#allocation6 + $0xbc] sm:$0xf]  ;;  %v10184_v63 = vor.u32 %v13416_v30, %v10181_v29  ;;  %4473 = vmatpush.bf16.msrb.mxu3 %v10760_v42  ;;  %v4513_v30 = vmax.f32 %v4100_v15, 0.0  ;;  %v13711_v29 = vld [vmem:[#allocation9 + $0x1ec] sm:$0xf0] }
 0x281   :  { %v9157_v11 = vld [vmem:[#allocation6 + $0xf8] sm:$0xf0]  ;;  %v11324_v9 = vor.u32 %v13711_v29, %v11323_v34  ;;  %v14684_v34 = vld [vmem:[#allocation8 + $0x8] sm:$0xff]  ;;  %v13671_v29 = vld [vmem:[#allocation9 + $0xac] sm:$0xf0] }
 0x282   :  { %v13288_v55 = vld [vmem:[#allocation6 + $0x4bc] sm:$0xf]  ;;  %v9160_v33 = vor.u32 %v13160_v46, %v9157_v11  ;;  %4455 = vmatpush.bf16.msrb.mxu2 %v10184_v63  ;;  %v13743_v11 = vld [vmem:[#allocation9 + $0x2ec] sm:$0xf0]  ;;  %v14681_v60 = vpack.c.bf16 %v4513_v30, %v4497_v41  ;;  %v4047_v63 = vpop.f32.mrf.mxu0  ;;  %v11163_v30 = vld [vmem:[#allocation9 + $0xa0] sm:$0xf] }
 0x283   :  { %v9669_v14 = vld [vmem:[#allocation6 + $0x4f8] sm:$0xf0]  ;;  %v4048_v41 = vadd.f32 %v4047_v63, %v14663_v58  ;;  %v14687_v58 = vperm.slane %v14684_v34, 3 }
 0x284   :  { %v13544_v61 = vld [vmem:[#allocation6 + $0xcbc] sm:$0xf]  ;;  %v9672_v23 = vor.u32 %v13288_v55, %v9669_v14  ;;  %4417 = vmatpush.bf16.msrb.mxu0 %v9160_v33  ;;  %v11579_v55 = vld [vmem:[#allocation9 + $0x3e0] sm:$0xf]  ;;  %15469 = vst [vmem:[#allocation37_spill] sm:$0xff] %v14681_v60  ;;  %v4066_v33 = vpop.f32.mrf.mxu1 }
 0x285   :  { %v10693_v5 = vld [vmem:[#allocation6 + $0xcf8] sm:$0xf0] }
 0x286   :  { %v13400_v12 = vld [vmem:[#allocation6 + $0x83c] sm:$0xf]  ;;  %v10696_v25 = vor.u32 %v13544_v61, %v10693_v5  ;;  %4436 = vmatpush.bf16.msrb.mxu1 %v9672_v23  ;;  %v4083_v61 = vpop.f32.mrf.mxu2  ;;  %v4102_v5 = vpop.f32.mrf.mxu3  ;;  %v11563_v23 = vld [vmem:[#allocation9 + $0x3c0] sm:$0xf] }
 0x287   :  { %v10117_v3 = vld [vmem:[#allocation6 + $0x878] sm:$0xf0]  ;;  %v4084_v15 = vadd.f32 %v4083_v61, %v4065_v31 }
 0x288   :  { %v13144_v16 = vld [vmem:[#allocation6 + $0x3c] sm:$0xf]  ;;  %v10120_v42 = vor.u32 %v13400_v12, %v10117_v3  ;;  %4474 = vmatpush.bf16.msrb.mxu3 %v10696_v25  ;;  %v11452_v12 = vor.u32 %v13743_v11, %v11451_v27  ;;  %v11580_v3 = vor.u32 %v13775_v59, %v11579_v55  ;;  %v13771_v25 = vld [vmem:[#allocation9 + $0x3cc] sm:$0xf0]  ;;  %v11291_v27 = vld [vmem:[#allocation9 + $0x1a0] sm:$0xf] }
 0x289   :  { %v9093_v18 = vld [vmem:[#allocation6 + $0x78] sm:$0xf0]  ;;  %v11564_v39 = vor.u32 %v13771_v25, %v11563_v23  ;;  %v13735_v59 = vld [vmem:[#allocation9 + $0x2ac] sm:$0xf0]  ;;  %v11531_v23 = vld [vmem:[#allocation9 + $0x380] sm:$0xf] }
 0x28a   :  { %v13272_v19 = vld [vmem:[#allocation6 + $0x43c] sm:$0xf]  ;;  %v9096_v46 = vor.u32 %v13144_v16, %v9093_v18  ;;  %v11307_v16 = vld [vmem:[#allocation9 + $0x1c0] sm:$0xf]  ;;  %v13707_v18 = vld [vmem:[#allocation9 + $0x1cc] sm:$0xf0]  ;;  %4456 = vmatpush.bf16.msrb.mxu2 %v10120_v42 }
 0x28b   :  { %v9605_v20 = vld [vmem:[#allocation6 + $0x478] sm:$0xf0]  ;;  %v11308_v31 = vor.u32 %v13707_v18, %v11307_v16  ;;  %v13703_v42 = vld [vmem:[#allocation9 + $0x1ac] sm:$0xf0]  ;;  %v11403_v18 = vld [vmem:[#allocation9 + $0x280] sm:$0xf] }
 0x28c   :  { %v13528_v0 = vld [vmem:[#allocation6 + $0xc3c] sm:$0xf]  ;;  %v9608_v14 = vor.u32 %v13272_v19, %v9605_v20  ;;  %4418 = vmatpush.bf16.msrb.mxu0 %v9096_v46  ;;  %v13739_v19 = vld [vmem:[#allocation9 + $0x2cc] sm:$0xf0]  ;;  %v4103_v20 = vadd.f32 %v4102_v5, %v4084_v15  ;;  %v11419_v46 = vld [vmem:[#allocation9 + $0x2a0] sm:$0xf]  ;;  %v4135_v5 = vpop.f32.mrf.mxu1 }
 0x28d   :  { %v10629_v38 = vld [vmem:[#allocation6 + $0xc78] sm:$0xf0]  ;;  %v11436_v37 = vor.u32 %v13739_v19, %v11435_v47  ;;  %v4116_v47 = vpop.f32.mrf.mxu0  ;;  %v13667_v15 = vld [vmem:[#allocation9 + $0x8c] sm:$0xf0]  ;;  %4457 = vmatmul.bf16.vlgmr.msrb.gmra.mxu2 %v14392_v54 }
 0x28e   :  { %v10632_v21 = vor.u32 %v13528_v0, %v10629_v38  ;;  %4437 = vmatpush.bf16.msrb.mxu1 %v9608_v14  ;;  %v4067_v0 = vadd.f32 %v4066_v33, %v4048_v41  ;;  %v11180_v38 = vor.u32 %v13675_v45, %v11179_v8  ;;  %7709 = vmatpush.bf16.msra.mxu2 %v11452_v12  ;;  %v4085_v11 = vpop.f32.mrf.mxu2  ;;  %v4104_v55 = vpop.f32.mrf.mxu3  ;;  %v11547_v14 = vld [vmem:[#allocation9 + $0x3a0] sm:$0xf]  ;;  %v13699_v16 = vld [vmem:[#allocation9 + $0x18c] sm:$0xf0] }
 0x28f   :  { %v11292_v8 = vor.u32 %v13703_v42, %v11291_v27  ;;  %v11147_v45 = vld [vmem:[#allocation9 + $0x80] sm:$0xf]  ;;  %v11420_v33 = vor.u32 %v13735_v59, %v11419_v46  ;;  %4419 = vmatmul.bf16.vlgmr.msrb.gmra.mxu0 %v14388_v48  ;;  %v13731_v19 = vld [vmem:[#allocation9 + $0x28c] sm:$0xf0] }
 0x290   :  { %4475 = vmatpush.bf16.msrb.mxu3 %v10632_v21  ;;  %7671 = vmatpush.bf16.msra.mxu0 %v11196_v6  ;;  %v13767_v21 = vld [vmem:[#allocation9 + $0x3ac] sm:$0xf0]  ;;  %v4086_v61 = vadd.f32 %v4085_v11, %v4067_v0  ;;  %v4117_v6 = vadd.f32 %v4116_v47, %v14687_v58  ;;  %v4529_v0 = vmax.f32 %v4103_v20, 0.0  ;;  %v11404_v48 = vor.u32 %v13731_v19, %v11403_v18  ;;  %v11259_v27 = vld [vmem:[#allocation9 + $0x160] sm:$0xf] }
 0x291   :  { %v11548_v12 = vor.u32 %v13767_v21, %v11547_v14  ;;  %4438 = vmatmul.bf16.vlgmr.msrb.gmra.mxu1 %v14390_v53  ;;  %v13763_v25 = vld [vmem:[#allocation9 + $0x38c] sm:$0xf0]  ;;  %v11387_v20 = vld [vmem:[#allocation9 + $0x260] sm:$0xf] }
 0x292   :  { %7690 = vmatpush.bf16.msra.mxu1 %v11324_v9  ;;  %7710 = vmatpush.bf16.msra.mxu2 %v11436_v37  ;;  %v11164_v9 = vor.u32 %v13671_v29, %v11163_v30  ;;  %v4105_v63 = vadd.f32 %v4104_v55, %v4086_v61  ;;  %v4136_v41 = vadd.f32 %v4135_v5, %v4117_v6  ;;  %v13663_v30 = vld [vmem:[#allocation9 + $0x6c] sm:$0xf0]  ;;  %v11515_v55 = vld [vmem:[#allocation9 + $0x360] sm:$0xf] }
 0x293   :  { %4476 = vmatmul.bf16.vlgmr.msrb.gmra.mxu3 %v14394_v57  ;;  %v11532_v53 = vor.u32 %v13763_v25, %v11531_v23  ;;  %v13695_v42 = vld [vmem:[#allocation9 + $0x16c] sm:$0xf0]  ;;  %v11115_v6 = vld [vmem:[#allocation9 + $0x40] sm:$0xf] }
 0x294   :  { %7728 = vmatpush.bf16.msra.mxu3 %v11580_v3  ;;  %7672 = vmatpush.bf16.msra.mxu0 %v11180_v38  ;;  %v11275_v3 = vld [vmem:[#allocation9 + $0x180] sm:$0xf]  ;;  %v4545_v38 = vmax.f32 %v4105_v63, 0.0  ;;  %v13727_v54 = vld [vmem:[#allocation9 + $0x26c] sm:$0xf0]  ;;  %v4137_v21 = vpop.f32.mrf.mxu1  ;;  %v11260_v5 = vor.u32 %v13695_v42, %v11259_v27 }
 0x295   :  { %v11276_v37 = vor.u32 %v13699_v16, %v11275_v3  ;;  %v13759_v57 = vld [vmem:[#allocation9 + $0x36c] sm:$0xf0]  ;;  %v4118_v14 = vpop.f32.mrf.mxu0  ;;  %v11243_v63 = vld [vmem:[#allocation9 + $0x140] sm:$0xf] }
 0x296   :  { %7691 = vmatpush.bf16.msra.mxu1 %v11308_v31  ;;  %v11148_v31 = vor.u32 %v13667_v15, %v11147_v45  ;;  %v14694_v29 = vpack.c.bf16 %v4545_v38, %v4529_v0  ;;  %7711 = vmatpush.bf16.msra.mxu2 %v11420_v33  ;;  %v4154_v46 = vpop.f32.mrf.mxu2  ;;  %v4173_v11 = vpop.f32.mrf.mxu3  ;;  %v4119_v61 = vadd.f32 %v4118_v14, %v14687_v58  ;;  %v13691_v33 = vld [vmem:[#allocation9 + $0x14c] sm:$0xf0]  ;;  %v11499_v18 = vld [vmem:[#allocation9 + $0x340] sm:$0xf] }
 0x297   :  { %v4155_v59 = vadd.f32 %v4154_v46, %v4136_v41  ;;  %v11388_v45 = vor.u32 %v13727_v54, %v11387_v20  ;;  %v11516_v15 = vor.u32 %v13759_v57, %v11515_v55  ;;  %v13723_v16 = vld [vmem:[#allocation9 + $0x24c] sm:$0xf0]  ;;  %v11244_v23 = vor.u32 %v13691_v33, %v11243_v63  ;;  %v11099_v25 = vld [vmem:[#allocation9 + $0x20] sm:$0xf] }
 0x298   :  { %7729 = vmatpush.bf16.msra.mxu3 %v11564_v39  ;;  %7673 = vmatpush.bf16.msra.mxu0 %v11164_v9  ;;  %v11131_v39 = vld [vmem:[#allocation9 + $0x60] sm:$0xf]  ;;  %15470 = vst [vmem:[#allocation38_spill] sm:$0xff] %v14694_v29  ;;  %v13659_v9 = vld [vmem:[#allocation9 + $0x4c] sm:$0xf0]  ;;  %v4138_v3 = vadd.f32 %v4137_v21, %v4119_v61 }
 0x299   :  { %v11132_v47 = vor.u32 %v13663_v30, %v11131_v39  ;;  %v13755_v41 = vld [vmem:[#allocation9 + $0x34c] sm:$0xf0]  ;;  %v11116_v19 = vor.u32 %v13659_v9, %v11115_v6  ;;  %v11355_v30 = vld [vmem:[#allocation9 + $0x220] sm:$0xf] }
 0x29a   :  { %7692 = vmatpush.bf16.msra.mxu1 %v11292_v8  ;;  %v14697_v8 = vadd.f32 %v4173_v11, %v4155_v59  ;;  %7712 = vmatpush.bf16.msra.mxu2 %v11404_v48  ;;  %v13655_v0 = vld [vmem:[#allocation9 + $0x2c] sm:$0xf0]  ;;  %v11483_v42 = vld [vmem:[#allocation9 + $0x320] sm:$0xf] }
 0x29b   :  { %v13687_v39 = vld [vmem:[#allocation9 + $0x12c] sm:$0xf0]  ;;  %v11083_v55 = vld [vmem:[#allocation9] sm:$0xf]  ;;  %v11100_v14 = vor.u32 %v13655_v0, %v11099_v25 }
 0x29c   :  { %7730 = vmatpush.bf16.msra.mxu3 %v11548_v12  ;;  %7674 = vmatpush.bf16.msra.mxu0 %v11148_v31  ;;  %v11371_v12 = vld [vmem:[#allocation9 + $0x240] sm:$0xf]  ;;  %v11500_v31 = vor.u32 %v13755_v41, %v11499_v18  ;;  %v13719_v27 = vld [vmem:[#allocation9 + $0x22c] sm:$0xf0]  ;;  %v4140_v54 = vpop.f32.mrf.mxu1  ;;  %v4498_v41 = vmax.f32 %v14697_v8, 0.0 }
 0x29d   :  { %v11372_v38 = vor.u32 %v13723_v16, %v11371_v12  ;;  %v13751_v20 = vld [vmem:[#allocation9 + $0x32c] sm:$0xf0]  ;;  %v4121_v11 = vpop.f32.mrf.mxu0  ;;  %v11211_v61 = vld [vmem:[#allocation9 + $0x100] sm:$0xf]  ;;  %v11356_v9 = vor.u32 %v13719_v27, %v11355_v30  ;;  %4462 = vmatmul.bf16.gmra.mxu2 %v14404_v51 }
 0x29e   :  { %7693 = vmatpush.bf16.msra.mxu1 %v11276_v37  ;;  %7713 = vmatpush.bf16.msra.mxu2 %v11388_v45  ;;  %v11227_v37 = vld [vmem:[#allocation9 + $0x120] sm:$0xf]  ;;  %v4156_v48 = vpop.f32.mrf.mxu2  ;;  %v13651_v57 = vld [vmem:[#allocation9 + $0xc] sm:$0xf0]  ;;  %v4122_v59 = vadd.f32 %v4121_v11, %v14687_v58  ;;  %v11484_v45 = vor.u32 %v13751_v20, %v11483_v42 }
 0x29f   :  { %v4157_v46 = vadd.f32 %v4156_v48, %v4138_v3  ;;  %v11228_v21 = vor.u32 %v13687_v39, %v11227_v37  ;;  %v11467_v63 = vld [vmem:[#allocation9 + $0x300] sm:$0xf]  ;;  %v13747_v33 = vld [vmem:[#allocation9 + $0x30c] sm:$0xf0]  ;;  %4424 = vmatmul.bf16.gmra.mxu0 %v14400_v44  ;;  %v11084_v0 = vor.u32 %v13651_v57, %v11083_v55 }
 0x2a0   :  { %7731 = vmatpush.bf16.msra.mxu3 %v11532_v53  ;;  %7675 = vmatpush.bf16.msra.mxu0 %v11132_v47  ;;  %v4175_v53 = vpop.f32.mrf.mxu3  ;;  %v13683_v47 = vld [vmem:[#allocation9 + $0x10c] sm:$0xf0]  ;;  %v4141_v12 = vadd.f32 %v4140_v54, %v4122_v59  ;;  %v11707_v3 = vld [vmem:[#allocation9 + $0x4e0] sm:$0xf]  ;;  %v11468_v8 = vor.u32 %v13747_v33, %v11467_v63  ;;  %v14709_v33 = vperm.slane %v14684_v34, 4 }
 0x2a1   :  { %v4176_v6 = vadd.f32 %v4175_v53, %v4157_v46  ;;  %4443 = vmatmul.bf16.gmra.mxu1 %v14402_v50  ;;  %v13807_v16 = vld [vmem:[#allocation9 + $0x4ec] sm:$0xf0]  ;;  %v11835_v18 = vld [vmem:[#allocation9 + $0x5e0] sm:$0xf] }
 0x2a2   :  { %7694 = vmatpush.bf16.msra.mxu1 %v11260_v5  ;;  %v11339_v5 = vld [vmem:[#allocation9 + $0x200] sm:$0xf]  ;;  %7714 = vmatpush.bf16.msra.mxu2 %v11372_v38  ;;  %v11212_v38 = vor.u32 %v13683_v47, %v11211_v61  ;;  %v13903_v37 = vld [vmem:[#allocation9 + $0x7ec] sm:$0xf0]  ;;  %v11708_v51 = vor.u32 %v13807_v16, %v11707_v3 }
 0x2a3   :  { %4481 = vmatmul.bf16.gmra.mxu3 %v14406_v56  ;;  %v11963_v25 = vld [vmem:[#allocation9 + $0x6e0] sm:$0xf]  ;;  %v13803_v27 = vld [vmem:[#allocation9 + $0x4cc] sm:$0xf0] }
 0x2a4   :  { %7732 = vmatpush.bf16.msra.mxu3 %v11516_v15  ;;  %7676 = vmatpush.bf16.msra.mxu0 %v11116_v19  ;;  %v13715_v15 = vld [vmem:[#allocation9 + $0x20c] sm:$0xf0]  ;;  %v4514_v19 = vmax.f32 %v4176_v6, 0.0  ;;  %v12091_v44 = vld [vmem:[#allocation9 + $0x7e0] sm:$0xf]  ;;  %v4142_v46 = vpop.f32.mrf.mxu1 }
 0x2a5   :  { %v11340_v39 = vor.u32 %v13715_v15, %v11339_v5  ;;  %v11691_v56 = vld [vmem:[#allocation9 + $0x4c0] sm:$0xf]  ;;  %v4123_v20 = vpop.f32.mrf.mxu0  ;;  %v12092_v54 = vor.u32 %v13903_v37, %v12091_v44  ;;  %v13835_v57 = vld [vmem:[#allocation9 + $0x5cc] sm:$0xf0] }
 0x2a6   :  { %7695 = vmatpush.bf16.msra.mxu1 %v11244_v23  ;;  %v13839_v23 = vld [vmem:[#allocation9 + $0x5ec] sm:$0xf0]  ;;  %v14705_v50 = vpack.c.bf16 %v4514_v19, %v4498_v41  ;;  %7715 = vmatpush.bf16.msra.mxu2 %v11356_v9  ;;  %v4159_v30 = vpop.f32.mrf.mxu2  ;;  %v11819_v55 = vld [vmem:[#allocation9 + $0x5c0] sm:$0xf]  ;;  %v11692_v9 = vor.u32 %v13803_v27, %v11691_v56 }
 0x2a7   :  { %v11836_v53 = vor.u32 %v13839_v23, %v11835_v18  ;;  %v4160_v42 = vadd.f32 %v4159_v30, %v4141_v12  ;;  %v11947_v59 = vld [vmem:[#allocation9 + $0x6c0] sm:$0xf]  ;;  %v13899_v47 = vld [vmem:[#allocation9 + $0x7cc] sm:$0xf0] }
 0x2a8   :  { %7733 = vmatpush.bf16.msra.mxu3 %v11500_v31  ;;  %7677 = vmatpush.bf16.msra.mxu0 %v11100_v14  ;;  %v13871_v31 = vld [vmem:[#allocation9 + $0x6ec] sm:$0xf0]  ;;  %15471 = vst [vmem:[#allocation39_spill] sm:$0xff] %v14705_v50  ;;  %v4178_v48 = vpop.f32.mrf.mxu3  ;;  %v4124_v14 = vadd.f32 %v4123_v20, %v14687_v58  ;;  %v12075_v61 = vld [vmem:[#allocation9 + $0x7c0] sm:$0xf] }
 0x2a9   :  { %v11964_v11 = vor.u32 %v13871_v31, %v11963_v25  ;;  %v4179_v5 = vadd.f32 %v4178_v48, %v4160_v42  ;;  %v12076_v63 = vor.u32 %v13899_v47, %v12075_v61  ;;  %v11675_v58 = vld [vmem:[#allocation9 + $0x4a0] sm:$0xf]  ;;  %v13799_v12 = vld [vmem:[#allocation9 + $0x4ac] sm:$0xf0] }
 0x2aa   :  { %7696 = vmatpush.bf16.msra.mxu1 %v11228_v21  ;;  %v13867_v21 = vld [vmem:[#allocation9 + $0x6cc] sm:$0xf0]  ;;  %7716 = vmatpush.bf16.msra.mxu2 %v11340_v39  ;;  %v4143_v6 = vadd.f32 %v4142_v46, %v4124_v14  ;;  %v11803_v3 = vld [vmem:[#allocation9 + $0x5a0] sm:$0xf]  ;;  %v11676_v37 = vor.u32 %v13799_v12, %v11675_v58 }
 0x2ab   :  { %v11948_v15 = vor.u32 %v13867_v21, %v11947_v59  ;;  %v13831_v16 = vld [vmem:[#allocation9 + $0x5ac] sm:$0xf0]  ;;  %v11931_v18 = vld [vmem:[#allocation9 + $0x6a0] sm:$0xf] }
 0x2ac   :  { %7734 = vmatpush.bf16.msra.mxu3 %v11484_v45  ;;  %7678 = vmatpush.bf16.msra.mxu0 %v11084_v0  ;;  %v11820_v45 = vor.u32 %v13835_v57, %v11819_v55  ;;  %v13863_v23 = vld [vmem:[#allocation9 + $0x6ac] sm:$0xf0]  ;;  %v12059_v25 = vld [vmem:[#allocation9 + $0x7a0] sm:$0xf]  ;;  %v4211_v44 = vpop.f32.mrf.mxu1  ;;  %v11804_v39 = vor.u32 %v13831_v16, %v11803_v3  ;;  %v4530_v55 = vmax.f32 %v4179_v5, 0.0 }
 0x2ad   :  { %v13895_v0 = vld [vmem:[#allocation9 + $0x7ac] sm:$0xf0]  ;;  %v4192_v31 = vpop.f32.mrf.mxu0  ;;  %v11787_v56 = vld [vmem:[#allocation9 + $0x580] sm:$0xf]  ;;  %7717 = vmatmul.bf16.vlgmr.msra.gmra.mxu2 %v14499_v7 }
 0x2ae   :  { %7697 = vmatpush.bf16.msra.mxu1 %v11212_v38  ;;  %7785 = vmatpush.bf16.msrb.mxu2 %v11964_v11  ;;  %v4161_v41 = vpop.f32.mrf.mxu2  ;;  %v4193_v34 = vadd.f32 %v4192_v31, %v14709_v33  ;;  %v13795_v30 = vld [vmem:[#allocation9 + $0x48c] sm:$0xf0]  ;;  %v11915_v42 = vld [vmem:[#allocation9 + $0x680] sm:$0xf] }
 0x2af   :  { %v4162_v38 = vadd.f32 %v4161_v41, %v4143_v6  ;;  %v13827_v27 = vld [vmem:[#allocation9 + $0x58c] sm:$0xf0]  ;;  %7679 = vmatmul.bf16.vlgmr.msra.gmra.mxu0 %v14455_v52  ;;  %v12043_v11 = vld [vmem:[#allocation9 + $0x780] sm:$0xf] }
 0x2b0   :  { %7735 = vmatpush.bf16.msra.mxu3 %v11468_v8  ;;  %7747 = vmatpush.bf16.msrb.mxu0 %v11708_v51  ;;  %v4180_v19 = vpop.f32.mrf.mxu3  ;;  %v11659_v8 = vld [vmem:[#allocation9 + $0x480] sm:$0xf]  ;;  %v11932_v51 = vor.u32 %v13863_v23, %v11931_v18  ;;  %v4212_v20 = vadd.f32 %v4211_v44, %v4193_v34  ;;  %v13859_v46 = vld [vmem:[#allocation9 + $0x68c] sm:$0xf0]  ;;  %v11788_v14 = vor.u32 %v13827_v27, %v11787_v56 }
 0x2b1   :  { %v4181_v48 = vadd.f32 %v4180_v19, %v4162_v38  ;;  %7698 = vmatmul.bf16.vlgmr.msra.gmra.mxu1 %v14477_v28  ;;  %v11660_v59 = vor.u32 %v13795_v30, %v11659_v8  ;;  %v11643_v21 = vld [vmem:[#allocation9 + $0x460] sm:$0xf]  ;;  %v13791_v61 = vld [vmem:[#allocation9 + $0x46c] sm:$0xf0]  ;;  %v11916_v6 = vor.u32 %v13859_v46, %v11915_v42 }
 0x2b2   :  { %7766 = vmatpush.bf16.msrb.mxu1 %v11836_v53  ;;  %7786 = vmatpush.bf16.msrb.mxu2 %v11948_v15  ;;  %v12060_v53 = vor.u32 %v13895_v0, %v12059_v25  ;;  %v13823_v15 = vld [vmem:[#allocation9 + $0x56c] sm:$0xf0]  ;;  %v11899_v5 = vld [vmem:[#allocation9 + $0x660] sm:$0xf]  ;;  %v11644_v25 = vor.u32 %v13791_v61, %v11643_v21 }
 0x2b3   :  { %v4546_v57 = vmax.f32 %v4181_v48, 0.0  ;;  %7736 = vmatmul.bf16.vlgmr.msra.gmra.mxu3 %v14523_v49  ;;  %v13855_v12 = vld [vmem:[#allocation9 + $0x66c] sm:$0xf0]  ;;  %v12027_v3 = vld [vmem:[#allocation9 + $0x760] sm:$0xf] }
 0x2b4   :  { %7804 = vmatpush.bf16.msrb.mxu3 %v12092_v54  ;;  %7748 = vmatpush.bf16.msrb.mxu0 %v11692_v9  ;;  %v13891_v54 = vld [vmem:[#allocation9 + $0x78c] sm:$0xf0]  ;;  %v4213_v19 = vpop.f32.mrf.mxu1  ;;  %v11627_v38 = vld [vmem:[#allocation9 + $0x440] sm:$0xf]  ;;  %v11900_v34 = vor.u32 %v13855_v12, %v11899_v5 }
 0x2b5   :  { %v14716_v47 = vpack.c.bf16 %v4546_v57, %v4530_v55  ;;  %v12044_v9 = vor.u32 %v13891_v54, %v12043_v11  ;;  %v13887_v16 = vld [vmem:[#allocation9 + $0x76c] sm:$0xf0]  ;;  %v4194_v41 = vpop.f32.mrf.mxu0  ;;  %v11883_v30 = vld [vmem:[#allocation9 + $0x640] sm:$0xf] }
 0x2b6   :  { %7767 = vmatpush.bf16.msrb.mxu1 %v11820_v45  ;;  %7787 = vmatpush.bf16.msrb.mxu2 %v11932_v51  ;;  %v11771_v45 = vld [vmem:[#allocation9 + $0x560] sm:$0xf]  ;;  %v4195_v23 = vadd.f32 %v4194_v41, %v14709_v33  ;;  %v13787_v31 = vld [vmem:[#allocation9 + $0x44c] sm:$0xf0] }
 0x2b7   :  { %15472 = vst [vmem:[#allocation40_spill] sm:$0xff] %v14716_v47  ;;  %v11772_v0 = vor.u32 %v13823_v15, %v11771_v45  ;;  %v13819_v8 = vld [vmem:[#allocation9 + $0x54c] sm:$0xf0]  ;;  %v11628_v27 = vor.u32 %v13787_v31, %v11627_v38  ;;  %v11739_v55 = vld [vmem:[#allocation9 + $0x520] sm:$0xf] }
 0x2b8   :  { %7805 = vmatpush.bf16.msrb.mxu3 %v12076_v63  ;;  %7749 = vmatpush.bf16.msrb.mxu0 %v11676_v37  ;;  %v4230_v63 = vpop.f32.mrf.mxu2  ;;  %v4249_v58 = vpop.f32.mrf.mxu3  ;;  %v12028_v37 = vor.u32 %v13887_v16, %v12027_v3  ;;  %v4214_v48 = vadd.f32 %v4213_v19, %v4195_v23  ;;  %v13851_v51 = vld [vmem:[#allocation9 + $0x64c] sm:$0xf0]  ;;  %v11851_v19 = vld [vmem:[#allocation9 + $0x600] sm:$0xf] }
 0x2b9   :  { %v4231_v18 = vadd.f32 %v4230_v63, %v4212_v20  ;;  %v13883_v56 = vld [vmem:[#allocation9 + $0x74c] sm:$0xf0]  ;;  %v11611_v20 = vld [vmem:[#allocation9 + $0x420] sm:$0xf]  ;;  %v11884_v11 = vor.u32 %v13851_v51, %v11883_v30 }
 0x2ba   :  { %7768 = vmatpush.bf16.msrb.mxu1 %v11804_v39  ;;  %7788 = vmatpush.bf16.msrb.mxu2 %v11916_v6  ;;  %v11755_v39 = vld [vmem:[#allocation9 + $0x540] sm:$0xf]  ;;  %v13783_v46 = vld [vmem:[#allocation9 + $0x42c] sm:$0xf0] }
 0x2bb   :  { %v14719_v44 = vadd.f32 %v4249_v58, %v4231_v18  ;;  %v11756_v42 = vor.u32 %v13819_v8, %v11755_v39  ;;  %v13815_v57 = vld [vmem:[#allocation9 + $0x52c] sm:$0xf0]  ;;  %v11995_v6 = vld [vmem:[#allocation9 + $0x720] sm:$0xf]  ;;  %v11612_v3 = vor.u32 %v13783_v46, %v11611_v20 }
 0x2bc   :  { %7806 = vmatpush.bf16.msrb.mxu3 %v12060_v53  ;;  %7750 = vmatpush.bf16.msrb.mxu0 %v11660_v59  ;;  %v12011_v53 = vld [vmem:[#allocation9 + $0x740] sm:$0xf]  ;;  %v13847_v61 = vld [vmem:[#allocation9 + $0x62c] sm:$0xf0]  ;;  %v4216_v5 = vpop.f32.mrf.mxu1  ;;  %v11740_v16 = vor.u32 %v13815_v57, %v11739_v55 }
 0x2bd   :  { %v12012_v54 = vor.u32 %v13883_v56, %v12011_v53  ;;  %v11867_v59 = vld [vmem:[#allocation9 + $0x620] sm:$0xf]  ;;  %v4197_v15 = vpop.f32.mrf.mxu0  ;;  %v13779_v58 = vld [vmem:[#allocation9 + $0x40c] sm:$0xf0]  ;;  %7722 = vmatmul.bf16.gmra.mxu2 %v14512_v17 }
 0x2be   :  { %7769 = vmatpush.bf16.msrb.mxu1 %v11788_v14  ;;  %7789 = vmatpush.bf16.msrb.mxu2 %v11900_v34  ;;  %v11595_v63 = vld [vmem:[#allocation9 + $0x400] sm:$0xf]  ;;  %v4198_v12 = vadd.f32 %v4197_v15, %v14709_v33  ;;  %v13811_v41 = vld [vmem:[#allocation9 + $0x50c] sm:$0xf0] }
 0x2bf   :  { %v11723_v18 = vld [vmem:[#allocation9 + $0x500] sm:$0xf]  ;;  %v13843_v38 = vld [vmem:[#allocation9 + $0x60c] sm:$0xf0]  ;;  %7684 = vmatmul.bf16.gmra.mxu0 %v14466_v1 }
 0x2c0   :  { %7807 = vmatpush.bf16.msrb.mxu3 %v12044_v9  ;;  %7751 = vmatpush.bf16.msrb.mxu0 %v11644_v25  ;;  %v4232_v14 = vpop.f32.mrf.mxu2  ;;  %v4251_v21 = vpop.f32.mrf.mxu3  ;;  %v13879_v9 = vld [vmem:[#allocation9 + $0x72c] sm:$0xf0]  ;;  %v11868_v25 = vor.u32 %v13847_v61, %v11867_v59  ;;  %v11979_v31 = vld [vmem:[#allocation9 + $0x700] sm:$0xf]  ;;  %v11852_v55 = vor.u32 %v13843_v38, %v11851_v19 }
 0x2c1   :  { %v4233_v45 = vadd.f32 %v4232_v14, %v4214_v48  ;;  %v13875_v34 = vld [vmem:[#allocation9 + $0x70c] sm:$0xf0]  ;;  %7703 = vmatmul.bf16.gmra.mxu1 %v14488_v36  ;;  %v12219_v39 = vld [vmem:[#allocation9 + $0x8e0] sm:$0xf]  ;;  %v4499_v48 = vmax.f32 %v14719_v44, 0.0 }
 0x2c2   :  { %7770 = vmatpush.bf16.msrb.mxu1 %v11772_v0  ;;  %7790 = vmatpush.bf16.msrb.mxu2 %v11884_v11  ;;  %v11996_v0 = vor.u32 %v13879_v9, %v11995_v6  ;;  %v13935_v8 = vld [vmem:[#allocation9 + $0x8ec] sm:$0xf0]  ;;  %v12347_v30 = vld [vmem:[#allocation9 + $0x9e0] sm:$0xf]  ;;  %v11980_v44 = vor.u32 %v13875_v34, %v11979_v31 }
 0x2c3   :  { %v4252_v23 = vadd.f32 %v4251_v21, %v4233_v45  ;;  %7741 = vmatmul.bf16.gmra.mxu3 %v14534_v2  ;;  %v13967_v53 = vld [vmem:[#allocation9 + $0x9ec] sm:$0xf0]  ;;  %v12475_v56 = vld [vmem:[#allocation9 + $0xae0] sm:$0xf]  ;;  %v12220_v14 = vor.u32 %v13935_v8, %v12219_v39 }
 0x2c4   :  { %7808 = vmatpush.bf16.msrb.mxu3 %v12028_v37  ;;  %7752 = vmatpush.bf16.msrb.mxu0 %v11628_v27  ;;  %v4217_v37 = vadd.f32 %v4216_v5, %v4198_v12  ;;  %v11596_v27 = vor.u32 %v13779_v58, %v11595_v63  ;;  %v13999_v20 = vld [vmem:[#allocation9 + $0xaec] sm:$0xf0]  ;;  %v12603_v46 = vld [vmem:[#allocation9 + $0xbe0] sm:$0xf]  ;;  %v12348_v21 = vor.u32 %v13967_v53, %v12347_v30  ;;  %v4218_v15 = vpop.f32.mrf.mxu1 }
 0x2c5   :  { %v4515_v51 = vmax.f32 %v4252_v23, 0.0  ;;  %v14031_v11 = vld [vmem:[#allocation9 + $0xbec] sm:$0xf0]  ;;  %v12203_v61 = vld [vmem:[#allocation9 + $0x8c0] sm:$0xf]  ;;  %v4199_v45 = vpop.f32.mrf.mxu0  ;;  %v12476_v5 = vor.u32 %v13999_v20, %v12475_v56 }
 0x2c6   :  { %7771 = vmatpush.bf16.msrb.mxu1 %v11756_v42  ;;  %v11724_v42 = vor.u32 %v13811_v41, %v11723_v18  ;;  %7791 = vmatpush.bf16.msrb.mxu2 %v11868_v25  ;;  %v13931_v6 = vld [vmem:[#allocation9 + $0x8cc] sm:$0xf0]  ;;  %v12604_v63 = vor.u32 %v14031_v11, %v12603_v46  ;;  %v12331_v58 = vld [vmem:[#allocation9 + $0x9c0] sm:$0xf] }
 0x2c7   :  { %v13963_v12 = vld [vmem:[#allocation9 + $0x9cc] sm:$0xf0]  ;;  %v12587_v41 = vld [vmem:[#allocation9 + $0xbc0] sm:$0xf] }
 0x2c8   :  { %7809 = vmatpush.bf16.msrb.mxu3 %v12012_v54  ;;  %7753 = vmatpush.bf16.msrb.mxu0 %v11612_v3  ;;  %v14727_v54 = vpack.c.bf16 %v4515_v51, %v4499_v48  ;;  %v4235_v57 = vpop.f32.mrf.mxu2  ;;  %v4254_v59 = vpop.f32.mrf.mxu3  ;;  %v12459_v3 = vld [vmem:[#allocation9 + $0xac0] sm:$0xf]  ;;  %v13995_v18 = vld [vmem:[#allocation9 + $0xacc] sm:$0xf0]  ;;  %v12332_v38 = vor.u32 %v13963_v12, %v12331_v58 }
 0x2c9   :  { %v4236_v9 = vadd.f32 %v4235_v57, %v4217_v37  ;;  %v14027_v19 = vld [vmem:[#allocation9 + $0xbcc] sm:$0xf0]  ;;  %v12460_v31 = vor.u32 %v13995_v18, %v12459_v3  ;;  %v12187_v37 = vld [vmem:[#allocation9 + $0x8a0] sm:$0xf] }
 0x2ca   :  { %7772 = vmatpush.bf16.msrb.mxu1 %v11740_v16  ;;  %15473 = vst [vmem:[#allocation41_spill] sm:$0xff] %v14727_v54  ;;  %v4200_v16 = vadd.f32 %v4199_v45, %v14709_v33  ;;  %7792 = vmatpush.bf16.msrb.mxu2 %v11852_v55  ;;  %v12588_v34 = vor.u32 %v14027_v19, %v12587_v41  ;;  %v13927_v39 = vld [vmem:[#allocation9 + $0x8ac] sm:$0xf0]  ;;  %v12315_v33 = vld [vmem:[#allocation9 + $0x9a0] sm:$0xf] }
 0x2cb   :  { %v4255_v23 = vadd.f32 %v4254_v59, %v4236_v9  ;;  %v13959_v8 = vld [vmem:[#allocation9 + $0x9ac] sm:$0xf0]  ;;  %v12443_v30 = vld [vmem:[#allocation9 + $0xaa0] sm:$0xf]  ;;  %v12188_v11 = vor.u32 %v13927_v39, %v12187_v37 }
 0x2cc   :  { %7810 = vmatpush.bf16.msrb.mxu3 %v11996_v0  ;;  %7754 = vmatpush.bf16.msrb.mxu0 %v11596_v27  ;;  %v4219_v25 = vadd.f32 %v4218_v15, %v4200_v16  ;;  %v12204_v0 = vor.u32 %v13931_v6, %v12203_v61  ;;  %v13991_v53 = vld [vmem:[#allocation9 + $0xaac] sm:$0xf0]  ;;  %v12571_v56 = vld [vmem:[#allocation9 + $0xba0] sm:$0xf]  ;;  %v14732_v46 = vpop.f32.mrf.mxu1  ;;  %v12316_v55 = vor.u32 %v13959_v8, %v12315_v33 }
 0x2cd   :  { %v14023_v27 = vld [vmem:[#allocation9 + $0xbac] sm:$0xf0]  ;;  %v14730_v20 = vpop.f32.mrf.mxu0  ;;  %v12299_v61 = vld [vmem:[#allocation9 + $0x980] sm:$0xf]  ;;  %7793 = vmatmul.bf16.vlgmr.msrb.gmra.mxu2 %v14591_v43 }
 0x2ce   :  { %7773 = vmatpush.bf16.msrb.mxu1 %v11724_v42  ;;  %7861 = vmatpush.bf16.msra.mxu2 %v12476_v5  ;;  %v13923_v57 = vld [vmem:[#allocation9 + $0x88c] sm:$0xf0]  ;;  %v12427_v9 = vld [vmem:[#allocation9 + $0xa80] sm:$0xf] }
 0x2cf   :  { %v13955_v6 = vld [vmem:[#allocation9 + $0x98c] sm:$0xf0]  ;;  %7755 = vmatmul.bf16.vlgmr.msrb.gmra.mxu0 %v14545_v40  ;;  %v12555_v15 = vld [vmem:[#allocation9 + $0xb80] sm:$0xf] }
 0x2d0   :  { %7811 = vmatpush.bf16.msrb.mxu3 %v11980_v44  ;;  %7823 = vmatpush.bf16.msra.mxu0 %v12220_v14  ;;  %v4237_v48 = vpop.f32.mrf.mxu2  ;;  %v4256_v51 = vpop.f32.mrf.mxu3  ;;  %v12171_v44 = vld [vmem:[#allocation9 + $0x880] sm:$0xf]  ;;  %v12444_v14 = vor.u32 %v13991_v53, %v12443_v30  ;;  %v13987_v45 = vld [vmem:[#allocation9 + $0xa8c] sm:$0xf0]  ;;  %v12300_v3 = vor.u32 %v13955_v6, %v12299_v61 }
 0x2d1   :  { %v4238_v42 = vadd.f32 %v4237_v48, %v4219_v25  ;;  %7774 = vmatmul.bf16.vlgmr.msrb.gmra.mxu1 %v14567_v35  ;;  %v14019_v5 = vld [vmem:[#allocation9 + $0xb8c] sm:$0xf0]  ;;  %v12172_v12 = vor.u32 %v13923_v57, %v12171_v44  ;;  %v12155_v16 = vld [vmem:[#allocation9 + $0x860] sm:$0xf]  ;;  %v12428_v19 = vor.u32 %v13987_v45, %v12427_v9 }
 0x2d2   :  { %7842 = vmatpush.bf16.msra.mxu1 %v12348_v21  ;;  %7862 = vmatpush.bf16.msra.mxu2 %v12460_v31  ;;  %v12572_v21 = vor.u32 %v14023_v27, %v12571_v56  ;;  %v13919_v18 = vld [vmem:[#allocation9 + $0x86c] sm:$0xf0]  ;;  %v12556_v25 = vor.u32 %v14019_v5, %v12555_v15  ;;  %v12539_v39 = vld [vmem:[#allocation9 + $0xb60] sm:$0xf] }
 0x2d3   :  { %v4257_v59 = vadd.f32 %v4256_v51, %v4238_v42  ;;  %7812 = vmatmul.bf16.vlgmr.msrb.gmra.mxu3 %v14613_v62  ;;  %v13983_v37 = vld [vmem:[#allocation9 + $0xa6c] sm:$0xf0]  ;;  %v12156_v48 = vor.u32 %v13919_v18, %v12155_v16  ;;  %v12139_v53 = vld [vmem:[#allocation9 + $0x840] sm:$0xf] }
 0x2d4   :  { %7880 = vmatpush.bf16.msra.mxu3 %v12604_v63  ;;  %7824 = vmatpush.bf16.msra.mxu0 %v12204_v0  ;;  %v4531_v63 = vmax.f32 %v4255_v23, 0.0  ;;  %v12283_v0 = vld [vmem:[#allocation9 + $0x960] sm:$0xf]  ;;  %v14015_v33 = vld [vmem:[#allocation9 + $0xb6c] sm:$0xf0]  ;;  %v14746_v30 = vpop.f32.mrf.mxu1 }
 0x2d5   :  { %v4547_v58 = vmax.f32 %v4257_v59, 0.0  ;;  %v12411_v23 = vld [vmem:[#allocation9 + $0xa60] sm:$0xf]  ;;  %v14744_v8 = vpop.f32.mrf.mxu0  ;;  %v13915_v56 = vld [vmem:[#allocation9 + $0x84c] sm:$0xf0]  ;;  %v12540_v42 = vor.u32 %v14015_v33, %v12539_v39 }
 0x2d6   :  { %7843 = vmatpush.bf16.msra.mxu1 %v12332_v38  ;;  %7863 = vmatpush.bf16.msra.mxu2 %v12444_v14  ;;  %v13951_v38 = vld [vmem:[#allocation9 + $0x96c] sm:$0xf0]  ;;  %v12412_v27 = vor.u32 %v13983_v37, %v12411_v23  ;;  %v12395_v44 = vld [vmem:[#allocation9 + $0xa40] sm:$0xf] }
 0x2d7   :  { %v14738_v41 = vpack.c.bf16 %v4547_v58, %v4531_v63  ;;  %v12284_v51 = vor.u32 %v13951_v38, %v12283_v0  ;;  %v13979_v57 = vld [vmem:[#allocation9 + $0xa4c] sm:$0xf0]  ;;  %v12523_v59 = vld [vmem:[#allocation9 + $0xb40] sm:$0xf] }
 0x2d8   :  { %7881 = vmatpush.bf16.msra.mxu3 %v12588_v34  ;;  %7825 = vmatpush.bf16.msra.mxu0 %v12188_v11  ;;  %v14740_v31 = vpop.f32.mrf.mxu2  ;;  %v14742_v34 = vpop.f32.mrf.mxu3  ;;  %v12267_v11 = vld [vmem:[#allocation9 + $0x940] sm:$0xf]  ;;  %v14011_v14 = vld [vmem:[#allocation9 + $0xb4c] sm:$0xf0]  ;;  %v12396_v45 = vor.u32 %v13979_v57, %v12395_v44 }
 0x2d9   :  { %v12123_v6 = vld [vmem:[#allocation9 + $0x820] sm:$0xf]  ;;  %v13911_v9 = vld [vmem:[#allocation9 + $0x82c] sm:$0xf0]  ;;  %v12524_v15 = vor.u32 %v14011_v14, %v12523_v59 }
 0x2da   :  { %7844 = vmatpush.bf16.msra.mxu1 %v12316_v55  ;;  %7864 = vmatpush.bf16.msra.mxu2 %v12428_v19  ;;  %v13947_v55 = vld [vmem:[#allocation9 + $0x94c] sm:$0xf0]  ;;  %v12251_v5 = vld [vmem:[#allocation9 + $0x920] sm:$0xf]  ;;  %v12124_v38 = vor.u32 %v13911_v9, %v12123_v6 }
 0x2db   :  { %v12268_v61 = vor.u32 %v13947_v55, %v12267_v11  ;;  %v13943_v63 = vld [vmem:[#allocation9 + $0x92c] sm:$0xf0]  ;;  %v12379_v58 = vld [vmem:[#allocation9 + $0xa20] sm:$0xf] }
 0x2dc   :  { %7882 = vmatpush.bf16.msra.mxu3 %v12572_v21  ;;  %7826 = vmatpush.bf16.msra.mxu0 %v12172_v12  ;;  %v12140_v21 = vor.u32 %v13915_v56, %v12139_v53  ;;  %v13975_v16 = vld [vmem:[#allocation9 + $0xa2c] sm:$0xf0]  ;;  %v12507_v18 = vld [vmem:[#allocation9 + $0xb20] sm:$0xf]  ;;  %v14754_v0 = vpop.f32.mrf.mxu1  ;;  %v12252_v23 = vor.u32 %v13943_v63, %v12251_v5 }
 0x2dd   :  { %v14007_v19 = vld [vmem:[#allocation9 + $0xb2c] sm:$0xf0]  ;;  %v12107_v37 = vld [vmem:[#allocation9 + $0x800] sm:$0xf]  ;;  %7798 = vmatmul.bf16.gmra.mxu2 %v14602_v13 }
 0x2de   :  { %7845 = vmatpush.bf16.msra.mxu1 %v12300_v3  ;;  %7865 = vmatpush.bf16.msra.mxu2 %v12412_v27  ;;  %v13907_v39 = vld [vmem:[#allocation9 + $0x80c] sm:$0xf0]  ;;  %v12235_v33 = vld [vmem:[#allocation9 + $0x900] sm:$0xf] }
 0x2df   :  { %v13939_v53 = vld [vmem:[#allocation9 + $0x90c] sm:$0xf0]  ;;  %v12363_v56 = vld [vmem:[#allocation9 + $0xa00] sm:$0xf]  ;;  %7760 = vmatmul.bf16.gmra.mxu0 %v14556_v24  ;;  %v12108_v14 = vor.u32 %v13907_v39, %v12107_v37 }
 0x2e0   :  { %7883 = vmatpush.bf16.msra.mxu3 %v12556_v25  ;;  %7827 = vmatpush.bf16.msra.mxu0 %v12156_v48  ;;  %v14748_v12 = vpop.f32.mrf.mxu2  ;;  %v14750_v3 = vpop.f32.mrf.mxu3  ;;  %v12380_v48 = vor.u32 %v13975_v16, %v12379_v58  ;;  %v13971_v27 = vld [vmem:[#allocation9 + $0xa0c] sm:$0xf0]  ;;  %v12731_v55 = vld [vmem:[#allocation9 + $0xce0] sm:$0xf] }
 0x2e1   :  { %v14752_v25 = vpop.f32.mrf.mxu0  ;;  %7779 = vmatmul.bf16.gmra.mxu1 %v14580_v4  ;;  %v14003_v11 = vld [vmem:[#allocation9 + $0xb0c] sm:$0xf0]  ;;  %v12859_v57 = vld [vmem:[#allocation9 + $0xde0] sm:$0xf]  ;;  %v12364_v9 = vor.u32 %v13971_v27, %v12363_v56 }
 0x2e2   :  { %7846 = vmatpush.bf16.msra.mxu1 %v12284_v51  ;;  %7866 = vmatpush.bf16.msra.mxu2 %v12396_v45  ;;  %v12508_v51 = vor.u32 %v14007_v19, %v12507_v18  ;;  %v14063_v44 = vld [vmem:[#allocation9 + $0xcec] sm:$0xf0]  ;;  %v12715_v19 = vld [vmem:[#allocation9 + $0xcc0] sm:$0xf] }
 0x2e3   :  { %7817 = vmatmul.bf16.gmra.mxu3 %v14626_v32  ;;  %v14095_v59 = vld [vmem:[#allocation9 + $0xdec] sm:$0xf0]  ;;  %v12732_v16 = vor.u32 %v14063_v44, %v12731_v55  ;;  %v12843_v39 = vld [vmem:[#allocation9 + $0xdc0] sm:$0xf] }
 0x2e4   :  { %7884 = vmatpush.bf16.msra.mxu3 %v12540_v42  ;;  %7828 = vmatpush.bf16.msra.mxu0 %v12140_v21  ;;  %v12491_v42 = vld [vmem:[#allocation9 + $0xb00] sm:$0xf]  ;;  %v12236_v21 = vor.u32 %v13939_v53, %v12235_v33  ;;  %v14127_v6 = vld [vmem:[#allocation9 + $0xeec] sm:$0xf0]  ;;  %v12860_v18 = vor.u32 %v14095_v59, %v12859_v57 }
 0x2e5   :  { %v12492_v45 = vor.u32 %v14003_v11, %v12491_v42  ;;  %v14159_v5 = vld [vmem:[#allocation9 + $0xfec] sm:$0xf0]  ;;  %v13099_v56 = vld [vmem:[#allocation9 + $0xfc0] sm:$0xf] }
 0x2e6   :  { %7847 = vmatpush.bf16.msra.mxu1 %v12268_v61  ;;  %v12987_v61 = vld [vmem:[#allocation9 + $0xee0] sm:$0xf]  ;;  %7867 = vmatpush.bf16.msra.mxu2 %v12380_v48  ;;  %v14059_v37 = vld [vmem:[#allocation9 + $0xccc] sm:$0xf0] }
 0x2e7   :  { %v14091_v33 = vld [vmem:[#allocation9 + $0xdcc] sm:$0xf0]  ;;  %v12716_v42 = vor.u32 %v14059_v37, %v12715_v19  ;;  %v12699_v57 = vld [vmem:[#allocation9 + $0xca0] sm:$0xf] }
 0x2e8   :  { %7885 = vmatpush.bf16.msra.mxu3 %v12524_v15  ;;  %7829 = vmatpush.bf16.msra.mxu0 %v12124_v38  ;;  %v13115_v15 = vld [vmem:[#allocation9 + $0xfe0] sm:$0xf]  ;;  %v14760_v63 = vpop.f32.mrf.mxu2  ;;  %v14762_v58 = vpop.f32.mrf.mxu3  ;;  %v14123_v53 = vld [vmem:[#allocation9 + $0xecc] sm:$0xf0]  ;;  %v12844_v11 = vor.u32 %v14091_v33, %v12843_v39 }
 0x2e9   :  { %v14764_v32 = vpop.f32.mrf.mxu0  ;;  %v14766_v38 = vpop.f32.mrf.mxu1  ;;  %v13116_v48 = vor.u32 %v14159_v5, %v13115_v15  ;;  %v14155_v27 = vld [vmem:[#allocation9 + $0xfcc] sm:$0xf0]  ;;  %v12683_v37 = vld [vmem:[#allocation9 + $0xc80] sm:$0xf] }
 0x2ea   :  { %7848 = vmatpush.bf16.msra.mxu1 %v12252_v23  ;;  %v12988_v23 = vor.u32 %v14127_v6, %v12987_v61  ;;  %7868 = vmatpush.bf16.msra.mxu2 %v12364_v9  ;;  %v13100_v44 = vor.u32 %v14155_v27, %v13099_v56  ;;  %v14055_v59 = vld [vmem:[#allocation9 + $0xcac] sm:$0xf0]  ;;  %v12827_v61 = vld [vmem:[#allocation9 + $0xda0] sm:$0xf] }
 0x2eb   :  { %v14087_v6 = vld [vmem:[#allocation9 + $0xdac] sm:$0xf0]  ;;  %v12700_v19 = vor.u32 %v14055_v59, %v12699_v57  ;;  %v12667_v57 = vld [vmem:[#allocation9 + $0xc60] sm:$0xf] }
 0x2ec   :  { %7886 = vmatpush.bf16.msra.mxu3 %v12508_v51  ;;  %7830 = vmatpush.bf16.msra.mxu0 %v12108_v14  ;;  %v12971_v51 = vld [vmem:[#allocation9 + $0xec0] sm:$0xf]  ;;  %v14119_v9 = vld [vmem:[#allocation9 + $0xeac] sm:$0xf0] }
 0x2ed   :  { %v12972_v55 = vor.u32 %v14123_v53, %v12971_v51  ;;  %v12955_v14 = vld [vmem:[#allocation9 + $0xea0] sm:$0xf]  ;;  %v14151_v5 = vld [vmem:[#allocation9 + $0xfac] sm:$0xf0]  ;;  %7869 = vmatmul.bf16.vlgmr.msra.gmra.mxu2 %v14681_v60 }
 0x2ee   :  { %7849 = vmatpush.bf16.msra.mxu1 %v12236_v21  ;;  %7937 = vmatpush.bf16.msrb.mxu2 %v12988_v23  ;;  %v12828_v23 = vor.u32 %v14087_v6, %v12827_v61  ;;  %v14051_v39 = vld [vmem:[#allocation9 + $0xc8c] sm:$0xf0]  ;;  %v12956_v33 = vor.u32 %v14119_v9, %v12955_v14  ;;  %v12939_v53 = vld [vmem:[#allocation9 + $0xe80] sm:$0xf] }
 0x2ef   :  { %v14083_v51 = vld [vmem:[#allocation9 + $0xd8c] sm:$0xf0]  ;;  %7831 = vmatmul.bf16.vlgmr.msra.gmra.mxu0 %v14637_v26  ;;  %v12795_v6 = vld [vmem:[#allocation9 + $0xd60] sm:$0xf] }
 0x2f0   :  { %7887 = vmatpush.bf16.msra.mxu3 %v12492_v45  ;;  %7899 = vmatpush.bf16.msrb.mxu0 %v12732_v16  ;;  %v14768_v21 = vpop.f32.mrf.mxu2  ;;  %v14770_v15 = vpop.f32.mrf.mxu3  ;;  %v13083_v45 = vld [vmem:[#allocation9 + $0xfa0] sm:$0xf]  ;;  %v14115_v27 = vld [vmem:[#allocation9 + $0xe8c] sm:$0xf0] }
 0x2f1   :  { %v14772_v16 = vpop.f32.mrf.mxu0  ;;  %v13084_v56 = vor.u32 %v14151_v5, %v13083_v45  ;;  %7850 = vmatmul.bf16.vlgmr.msra.gmra.mxu1 %v14659_v22  ;;  %v14047_v59 = vld [vmem:[#allocation9 + $0xc6c] sm:$0xf0]  ;;  %v12940_v61 = vor.u32 %v14115_v27, %v12939_v53  ;;  %v12923_v9 = vld [vmem:[#allocation9 + $0xe60] sm:$0xf] }
 0x2f2   :  { %7918 = vmatpush.bf16.msrb.mxu1 %v12860_v18  ;;  %v14774_v18 = vpop.f32.mrf.mxu1  ;;  %7938 = vmatpush.bf16.msrb.mxu2 %v12972_v55  ;;  %v12684_v55 = vor.u32 %v14051_v39, %v12683_v37  ;;  %v14079_v14 = vld [vmem:[#allocation9 + $0xd6c] sm:$0xf0]  ;;  %v13051_v26 = vld [vmem:[#allocation9 + $0xf60] sm:$0xf]  ;;  %v14786_v37 = vld [vmem:[#allocation8 + $0x8] sm:$0xff] }
 0x2f3   :  { %7888 = vmatmul.bf16.vlgmr.msra.gmra.mxu3 %v14705_v50  ;;  %v14111_v60 = vld [vmem:[#allocation9 + $0xe6c] sm:$0xf0]  ;;  %v14789_v39 = vperm.slane %v14786_v37, 5  ;;  %v12779_v27 = vld [vmem:[#allocation9 + $0xd40] sm:$0xf]  ;;  %v14792_v2 = vperm.slane %v14786_v37, 6 }
 0x2f4   :  { %7956 = vmatpush.bf16.msrb.mxu3 %v13116_v48  ;;  %7900 = vmatpush.bf16.msrb.mxu0 %v12716_v42  ;;  %v12811_v48 = vld [vmem:[#allocation9 + $0xd80] sm:$0xf]  ;;  %v14143_v50 = vld [vmem:[#allocation9 + $0xf6c] sm:$0xf0] }
 0x2f5   :  { %v13067_v42 = vld [vmem:[#allocation9 + $0xf80] sm:$0xf]  ;;  %v14043_v53 = vld [vmem:[#allocation9 + $0xc4c] sm:$0xf0]  ;;  %v13052_v62 = vor.u32 %v14143_v50, %v13051_v26 }
 0x2f6   :  { %7919 = vmatpush.bf16.msrb.mxu1 %v12844_v11  ;;  %v14147_v11 = vld [vmem:[#allocation9 + $0xf8c] sm:$0xf0]  ;;  %7939 = vmatpush.bf16.msrb.mxu2 %v12956_v33  ;;  %v12668_v33 = vor.u32 %v14047_v59, %v12667_v57  ;;  %v13035_v4 = vld [vmem:[#allocation9 + $0xf40] sm:$0xf] }
 0x2f7   :  { %v13068_v45 = vor.u32 %v14147_v11, %v13067_v42  ;;  %v14075_v42 = vld [vmem:[#allocation9 + $0xd4c] sm:$0xf0]  ;;  %v12907_v11 = vld [vmem:[#allocation9 + $0xe40] sm:$0xf] }
 0x2f8   :  { %7957 = vmatpush.bf16.msrb.mxu3 %v13100_v44  ;;  %7901 = vmatpush.bf16.msrb.mxu0 %v12700_v19  ;;  %v12812_v44 = vor.u32 %v14083_v51, %v12811_v48  ;;  %v14780_v5 = vpop.f32.mrf.mxu2  ;;  %v14782_v22 = vpop.f32.mrf.mxu3  ;;  %v12796_v48 = vor.u32 %v14079_v14, %v12795_v6  ;;  %v12651_v51 = vld [vmem:[#allocation9 + $0xc40] sm:$0xf]  ;;  %v14107_v13 = vld [vmem:[#allocation9 + $0xe4c] sm:$0xf0] }
 0x2f9   :  { %v4346_v19 = vpop.f32.mrf.mxu0  ;;  %v14139_v24 = vld [vmem:[#allocation9 + $0xf4c] sm:$0xf0]  ;;  %v12635_v57 = vld [vmem:[#allocation9 + $0xc20] sm:$0xf] }
 0x2fa   :  { %7920 = vmatpush.bf16.msrb.mxu1 %v12828_v23  ;;  %v14784_v23 = vpop.f32.mrf.mxu1  ;;  %7940 = vmatpush.bf16.msrb.mxu2 %v12940_v61  ;;  %v14039_v59 = vld [vmem:[#allocation9 + $0xc2c] sm:$0xf0]  ;;  %v12908_v61 = vor.u32 %v14107_v13, %v12907_v11  ;;  %v12763_v6 = vld [vmem:[#allocation9 + $0xd20] sm:$0xf]  ;;  %v13036_v50 = vor.u32 %v14139_v24, %v13035_v4 }
 0x2fb   :  { %v14071_v14 = vld [vmem:[#allocation9 + $0xd2c] sm:$0xf0]  ;;  %v12891_v26 = vld [vmem:[#allocation9 + $0xe20] sm:$0xf]  ;;  %v12636_v24 = vor.u32 %v14039_v59, %v12635_v57  ;;  %v11197_v57 = vld [vmem:[#allocation9 + $0xf0] sm:$0xf0] }
 0x2fc   :  { %7958 = vmatpush.bf16.msrb.mxu3 %v13084_v56  ;;  %7902 = vmatpush.bf16.msrb.mxu0 %v12684_v55  ;;  %v12924_v56 = vor.u32 %v14111_v60, %v12923_v9  ;;  %v12652_v55 = vor.u32 %v14043_v53, %v12651_v51  ;;  %v4271_v60 = vadd.f32 %v14744_v8, %v14789_v39  ;;  %v13019_v51 = vld [vmem:[#allocation9 + $0xf20] sm:$0xf]  ;;  %v14135_v53 = vld [vmem:[#allocation9 + $0xf2c] sm:$0xf0]  ;;  %v13709_v59 = vld [vmem:[#allocation9 + $0x1e4] sm:$0xf] }
 0x2fd   :  { %v4269_v9 = vadd.f32 %v14730_v20, %v14789_v39  ;;  %v4347_v8 = vadd.f32 %v4346_v19, %v14792_v2  ;;  %v12764_v4 = vor.u32 %v14071_v14, %v12763_v6  ;;  %v14035_v20 = vld [vmem:[#allocation9 + $0xc0c] sm:$0xf0]  ;;  %v12875_v40 = vld [vmem:[#allocation9 + $0xe00] sm:$0xf]  ;;  %v13020_v19 = vor.u32 %v14135_v53, %v13019_v51  ;;  %7874 = vmatmul.bf16.gmra.mxu2 %v14694_v29  ;;  %v13741_v14 = vld [vmem:[#allocation9 + $0x2e4] sm:$0xf] }
 0x2fe   :  { %7921 = vmatpush.bf16.msrb.mxu1 %v12812_v44  ;;  %v12780_v44 = vor.u32 %v14075_v42, %v12779_v27  ;;  %7941 = vmatpush.bf16.msrb.mxu2 %v12924_v56  ;;  %v4345_v27 = vadd.f32 %v14772_v16, %v14792_v2  ;;  %v12747_v42 = vld [vmem:[#allocation9 + $0xd00] sm:$0xf]  ;;  %v4290_v11 = vadd.f32 %v14746_v30, %v4271_v60  ;;  %v14067_v35 = vld [vmem:[#allocation9 + $0xd0c] sm:$0xf0] }
 0x2ff   :  { %v14099_v16 = vld [vmem:[#allocation9 + $0xe0c] sm:$0xf0]  ;;  %v4288_v49 = vadd.f32 %v14732_v46, %v4269_v9  ;;  %7836 = vmatmul.bf16.gmra.mxu0 %v14648_v10  ;;  %v4366_v60 = vadd.f32 %v14784_v23, %v4347_v8  ;;  %v11453_v46 = vld [vmem:[#allocation9 + $0x2f0] sm:$0xf0]  ;;  %v13003_v9 = vld [vmem:[#allocation9 + $0xf00] sm:$0xf] }
 0x300   :  { %7959 = vmatpush.bf16.msrb.mxu3 %v13068_v45  ;;  %7903 = vmatpush.bf16.msrb.mxu0 %v12668_v33  ;;  %v4384_v45 = vpop.f32.mrf.mxu2  ;;  %v14798_v33 = vpop.f32.mrf.mxu3  ;;  %v4309_v6 = vadd.f32 %v14748_v12, %v4290_v11  ;;  %v4364_v30 = vadd.f32 %v14774_v18, %v4345_v27  ;;  %v12876_v12 = vor.u32 %v14099_v16, %v12875_v40  ;;  %v13773_v18 = vld [vmem:[#allocation9 + $0x3e4] sm:$0xf]  ;;  %v11581_v23 = vld [vmem:[#allocation9 + $0x3f0] sm:$0xf0] }
 0x301   :  { %v14803_v13 = vpop.f32.mrf.mxu0  ;;  %v4385_v51 = vadd.f32 %v4384_v45, %v4366_v60  ;;  %v4307_v27 = vadd.f32 %v14740_v31, %v4288_v49  ;;  %v13737_v16 = vld [vmem:[#allocation9 + $0x2c4] sm:$0xf]  ;;  %v11584_v31 = vor.u32 %v13773_v18, %v11581_v23  ;;  %v11565_v60 = vld [vmem:[#allocation9 + $0x3d0] sm:$0xf0]  ;;  %v4274_v23 = vadd.f32 %v14752_v25, %v14789_v39 }
 0x302   :  { %7922 = vmatpush.bf16.msrb.mxu1 %v12796_v48  ;;  %v14103_v48 = vld [vmem:[#allocation9 + $0xe2c] sm:$0xf0]  ;;  %v14805_v56 = vpop.f32.mrf.mxu1  ;;  %7942 = vmatpush.bf16.msrb.mxu2 %v12908_v61  ;;  %v11325_v61 = vld [vmem:[#allocation9 + $0x1f0] sm:$0xf0] }
 0x303   :  { %v12892_v43 = vor.u32 %v14103_v48, %v12891_v26  ;;  %7893 = vmatmul.bf16.gmra.mxu3 %v14716_v47  ;;  %v14131_v48 = vld [vmem:[#allocation9 + $0xf0c] sm:$0xf0]  ;;  %v11328_v47 = vor.u32 %v13709_v59, %v11325_v61  ;;  %v13769_v59 = vld [vmem:[#allocation9 + $0x3c4] sm:$0xf]  ;;  %v11165_v61 = vld [vmem:[#allocation9 + $0xb0] sm:$0xf0] }
 0x304   :  { %7960 = vmatpush.bf16.msrb.mxu3 %v13052_v62  ;;  %7904 = vmatpush.bf16.msrb.mxu0 %v12652_v55  ;;  %v12619_v62 = vld [vmem:[#allocation9 + $0xc00] sm:$0xf]  ;;  %v13004_v49 = vor.u32 %v14131_v48, %v13003_v9  ;;  %v13733_v9 = vld [vmem:[#allocation9 + $0x2a4] sm:$0xf]  ;;  %v11421_v48 = vld [vmem:[#allocation9 + $0x2b0] sm:$0xf0] }
 0x305   :  { %v15474_v55 = vld [vmem:[#allocation36_spill] sm:$0xff]  ;;  %v12620_v26 = vor.u32 %v14035_v20, %v12619_v62  ;;  %v11181_v62 = vld [vmem:[#allocation9 + $0xd0] sm:$0xf0]  ;;  %v4328_v20 = vadd.f32 %v14750_v3, %v4309_v6  ;;  %v4326_v3 = vadd.f32 %v14742_v34, %v4307_v27 }
 0x306   :  { %7923 = vmatpush.bf16.msrb.mxu1 %v12780_v44  ;;  %v13677_v44 = vld [vmem:[#allocation9 + $0xe4] sm:$0xf]  ;;  %7943 = vmatpush.bf16.msrb.mxu2 %v12892_v43  ;;  %v4383_v43 = vadd.f32 %v14780_v5, %v4364_v30 }
 0x307   :  { %7855 = vmatmul.bf16.gmra.mxu1 %v15474_v55  ;;  %v11200_v53 = vor.u32 %v13677_v44, %v11197_v57  ;;  %v4404_v44 = vadd.f32 %v14798_v33, %v4385_v51  ;;  %v13669_v30 = vld [vmem:[#allocation9 + $0xa4] sm:$0xf]  ;;  %v4276_v33 = vadd.f32 %v14764_v32, %v14789_v39  ;;  %v11568_v51 = vor.u32 %v13769_v59, %v11565_v60  ;;  %v11533_v59 = vld [vmem:[#allocation9 + $0x390] sm:$0xf0] }
 0x308   :  { %7961 = vmatpush.bf16.msrb.mxu3 %v13036_v50  ;;  %7905 = vmatpush.bf16.msrb.mxu0 %v12636_v24  ;;  %v12748_v50 = vor.u32 %v14067_v35, %v12747_v42  ;;  %v14817_v8 = vpop.f32.mrf.mxu2  ;;  %v14819_v11 = vpop.f32.mrf.mxu3  ;;  %v11456_v24 = vor.u32 %v13741_v14, %v11453_v46  ;;  %v13705_v35 = vld [vmem:[#allocation9 + $0x1c4] sm:$0xf]  ;;  %v11309_v42 = vld [vmem:[#allocation9 + $0x1d0] sm:$0xf0]  ;;  %v4516_v14 = vmax.f32 %v4328_v20, 0.0  ;;  %v4402_v46 = vadd.f32 %v14782_v22, %v4383_v43 }
 0x309   :  { %v4351_v40 = vpop.f32.mrf.mxu0  ;;  %v11312_v5 = vor.u32 %v13705_v35, %v11309_v42  ;;  %v4517_v34 = vmax.f32 %v4404_v44, 0.0  ;;  %v4500_v18 = vmax.f32 %v4326_v3, 0.0  ;;  %v4350_v22 = vadd.f32 %v14803_v13, %v14792_v2  ;;  %v13665_v32 = vld [vmem:[#allocation9 + $0x84] sm:$0xf] }
 0x30a   :  { %7924 = vmatpush.bf16.msrb.mxu1 %v12764_v4  ;;  %v13673_v4 = vld [vmem:[#allocation9 + $0xc4] sm:$0xf]  ;;  %v14823_v45 = vpop.f32.mrf.mxu1  ;;  %7944 = vmatpush.bf16.msrb.mxu2 %v12876_v12  ;;  %v4352_v35 = vadd.f32 %v4351_v40, %v14792_v2  ;;  %v14838_v20 = vperm.slane %v14786_v37, 7  ;;  %v4295_v39 = vadd.f32 %v14766_v38, %v4276_v33  ;;  %v11424_v13 = vor.u32 %v13733_v9, %v11421_v48  ;;  %v11405_v40 = vld [vmem:[#allocation9 + $0x290] sm:$0xf0] }
 0x30b   :  { %v11184_v57 = vor.u32 %v13673_v4, %v11181_v62  ;;  %v13765_v12 = vld [vmem:[#allocation9 + $0x3a4] sm:$0xf]  ;;  %v11149_v4 = vld [vmem:[#allocation9 + $0x90] sm:$0xf0]  ;;  %v4501_v62 = vmax.f32 %v4402_v46, 0.0  ;;  %v14840_v25 = vpack.c.bf16 %v4516_v14, %v4500_v18  ;;  %v4293_v60 = vadd.f32 %v14754_v0, %v4274_v23 }
 0x30c   :  { %7962 = vmatpush.bf16.msrb.mxu3 %v13020_v19  ;;  %v11437_v19 = vld [vmem:[#allocation9 + $0x2d0] sm:$0xf0]  ;;  %7906 = vmatpush.bf16.msrb.mxu0 %v12620_v26  ;;  %v13701_v26 = vld [vmem:[#allocation9 + $0x1a4] sm:$0xf]  ;;  %v11152_v2 = vor.u32 %v13665_v32, %v11149_v4  ;;  %v4314_v3 = vadd.f32 %v14768_v21, %v4295_v39 }
 0x30d   :  { %v11440_v6 = vor.u32 %v13737_v16, %v11437_v19  ;;  %15475 = vst [vmem:[#allocation42_spill] sm:$0xff] %v14840_v25  ;;  %v13697_v19 = vld [vmem:[#allocation9 + $0x184] sm:$0xf]  ;;  %v11261_v21 = vld [vmem:[#allocation9 + $0x170] sm:$0xf0] }
 0x30e   :  { %7925 = vmatpush.bf16.msrb.mxu1 %v12748_v50  ;;  %8013 = vmatpush.bf16.msra.mxu2 %v11456_v24  ;;  %v11293_v50 = vld [vmem:[#allocation9 + $0x1b0] sm:$0xf0]  ;;  %v13761_v37 = vld [vmem:[#allocation9 + $0x384] sm:$0xf]  ;;  %v4333_v23 = vadd.f32 %v14770_v15, %v4314_v3 }
 0x30f   :  { %v11296_v16 = vor.u32 %v13701_v26, %v11293_v50  ;;  %7907 = vmatmul.bf16.vlgmr.msrb.gmra.mxu0 %v14727_v54  ;;  %v13661_v38 = vld [vmem:[#allocation9 + $0x64] sm:$0xf]  ;;  %v11389_v9 = vld [vmem:[#allocation9 + $0x270] sm:$0xf0] }
 0x310   :  { %7975 = vmatpush.bf16.msra.mxu0 %v11200_v53  ;;  %7963 = vmatpush.bf16.msrb.mxu3 %v13004_v49  ;;  %v11549_v53 = vld [vmem:[#allocation9 + $0x3b0] sm:$0xf0]  ;;  %v4389_v27 = vpop.f32.mrf.mxu2  ;;  %v14834_v24 = vpop.f32.mrf.mxu3  ;;  %v13693_v46 = vld [vmem:[#allocation9 + $0x164] sm:$0xf] }
 0x311   :  { %v4420_v43 = vpop.f32.mrf.mxu0  ;;  %v11277_v49 = vld [vmem:[#allocation9 + $0x190] sm:$0xf0]  ;;  %v11552_v44 = vor.u32 %v13765_v12, %v11549_v53  ;;  %v13725_v26 = vld [vmem:[#allocation9 + $0x264] sm:$0xf] }
 0x312   :  { %7994 = vmatpush.bf16.msra.mxu1 %v11328_v47  ;;  %v11168_v47 = vor.u32 %v13669_v30, %v11165_v61  ;;  %8014 = vmatpush.bf16.msra.mxu2 %v11440_v6  ;;  %v4439_v42 = vpop.f32.mrf.mxu1  ;;  %v11133_v6 = vld [vmem:[#allocation9 + $0x70] sm:$0xf0]  ;;  %v4371_v30 = vadd.f32 %v14823_v45, %v4352_v35  ;;  %v4421_v61 = vadd.f32 %v4420_v43, %v14838_v20  ;;  %v13757_v48 = vld [vmem:[#allocation9 + $0x364] sm:$0xf] }
 0x313   :  { %v11280_v14 = vor.u32 %v13697_v19, %v11277_v49  ;;  %v11136_v50 = vor.u32 %v13661_v38, %v11133_v6  ;;  %v4312_v45 = vadd.f32 %v14760_v63, %v4293_v60  ;;  %v13657_v53 = vld [vmem:[#allocation9 + $0x44] sm:$0xf]  ;;  %v11117_v18 = vld [vmem:[#allocation9 + $0x50] sm:$0xf0] }
 0x314   :  { %8032 = vmatpush.bf16.msra.mxu3 %v11584_v31  ;;  %7976 = vmatpush.bf16.msra.mxu0 %v11184_v57  ;;  %v13729_v31 = vld [vmem:[#allocation9 + $0x284] sm:$0xf]  ;;  %v14843_v57 = vpack.c.bf16 %v4517_v34, %v4501_v62  ;;  %v4390_v33 = vadd.f32 %v4389_v27, %v4371_v30  ;;  %v11264_v27 = vor.u32 %v13693_v46, %v11261_v21  ;;  %v11245_v43 = vld [vmem:[#allocation9 + $0x150] sm:$0xf0] }
 0x315   :  { %v11408_v0 = vor.u32 %v13729_v31, %v11405_v40  ;;  %v11392_v62 = vor.u32 %v13725_v26, %v11389_v9  ;;  %v13689_v35 = vld [vmem:[#allocation9 + $0x144] sm:$0xf]  ;;  %v11373_v19 = vld [vmem:[#allocation9 + $0x250] sm:$0xf0]  ;;  %v4331_v49 = vadd.f32 %v14762_v58, %v4312_v45  ;;  %v4548_v40 = vmax.f32 %v4333_v23, 0.0 }
 0x316   :  { %7995 = vmatpush.bf16.msra.mxu1 %v11312_v5  ;;  %15476 = vst [vmem:[#allocation43_spill] sm:$0xff] %v14843_v57  ;;  %v4369_v5 = vadd.f32 %v14805_v56, %v4350_v22  ;;  %7945 = vmatmul.bf16.vlgmr.msrb.gmra.mxu2 %v14843_v57  ;;  %v11536_v56 = vor.u32 %v13761_v37, %v11533_v59  ;;  %v13753_v15 = vld [vmem:[#allocation9 + $0x344] sm:$0xf]  ;;  %v11229_v3 = vld [vmem:[#allocation9 + $0x130] sm:$0xf0] }
 0x317   :  { %7926 = vmatmul.bf16.vlgmr.msrb.gmra.mxu1 %v14840_v25  ;;  %8015 = vmatpush.bf16.msra.mxu2 %v11424_v13  ;;  %v4440_v22 = vadd.f32 %v4439_v42, %v4421_v61  ;;  %v11120_v13 = vor.u32 %v13657_v53, %v11117_v18  ;;  %v11501_v42 = vld [vmem:[#allocation9 + $0x350] sm:$0xf0]  ;;  %v11248_v59 = vor.u32 %v13689_v35, %v11245_v43  ;;  %v13685_v60 = vld [vmem:[#allocation9 + $0x124] sm:$0xf] }
 0x318   :  { %8033 = vmatpush.bf16.msra.mxu3 %v11568_v51  ;;  %7977 = vmatpush.bf16.msra.mxu0 %v11168_v47  ;;  %v11517_v51 = vld [vmem:[#allocation9 + $0x370] sm:$0xf0]  ;;  %v4388_v34 = vadd.f32 %v14817_v8, %v4369_v5  ;;  %v4458_v47 = vpop.f32.mrf.mxu2  ;;  %v4477_v12 = vpop.f32.mrf.mxu3  ;;  %v4409_v8 = vadd.f32 %v14834_v24, %v4390_v33  ;;  %v13717_v5 = vld [vmem:[#allocation9 + $0x224] sm:$0xf]  ;;  %v11504_v6 = vor.u32 %v13753_v15, %v11501_v42 }
 0x319   :  { %v4422_v32 = vpop.f32.mrf.mxu0  ;;  %v11520_v63 = vor.u32 %v13757_v48, %v11517_v51  ;;  %v4459_v37 = vadd.f32 %v4458_v47, %v4440_v22  ;;  %v11357_v38 = vld [vmem:[#allocation9 + $0x230] sm:$0xf0]  ;;  %v11232_v45 = vor.u32 %v13685_v60, %v11229_v3  ;;  %v13805_v47 = vld [vmem:[#allocation9 + $0x4e4] sm:$0xf] }
 0x31a   :  { %7996 = vmatpush.bf16.msra.mxu1 %v11296_v16  ;;  %v4441_v4 = vpop.f32.mrf.mxu1  ;;  %v13721_v16 = vld [vmem:[#allocation9 + $0x244] sm:$0xf]  ;;  %v4423_v39 = vadd.f32 %v4422_v32, %v14838_v20  ;;  %v4407_v31 = vadd.f32 %v14819_v11, %v4388_v34  ;;  %v4549_v30 = vmax.f32 %v4409_v8, 0.0  ;;  %v11485_v11 = vld [vmem:[#allocation9 + $0x330] sm:$0xf0]  ;;  %v11360_v23 = vor.u32 %v13717_v5, %v11357_v38 }
 0x31b   :  { %8016 = vmatpush.bf16.msra.mxu2 %v11408_v0  ;;  %v11376_v24 = vor.u32 %v13721_v16, %v11373_v19  ;;  %v4532_v0 = vmax.f32 %v4331_v49, 0.0  ;;  %v11085_v33 = vld [vmem:[#allocation9 + $0x10] sm:$0xf0]  ;;  %v13681_v34 = vld [vmem:[#allocation9 + $0x104] sm:$0xf] }
 0x31c   :  { %8034 = vmatpush.bf16.msra.mxu3 %v11552_v44  ;;  %7978 = vmatpush.bf16.msra.mxu0 %v11152_v2  ;;  %v13653_v44 = vld [vmem:[#allocation9 + $0x24] sm:$0xf]  ;;  %v11101_v2 = vld [vmem:[#allocation9 + $0x30] sm:$0xf0]  ;;  %v4442_v61 = vadd.f32 %v4441_v4, %v4423_v39  ;;  %v4533_v46 = vmax.f32 %v4407_v31, 0.0 }
 0x31d   :  { %v11104_v58 = vor.u32 %v13653_v44, %v11101_v2  ;;  %v11709_v53 = vld [vmem:[#allocation9 + $0x4f0] sm:$0xf0]  ;;  %v14860_v18 = vpack.c.bf16 %v4548_v40, %v4532_v0  ;;  %v13713_v32 = vld [vmem:[#allocation9 + $0x204] sm:$0xf] }
 0x31e   :  { %7997 = vmatpush.bf16.msra.mxu1 %v11280_v14  ;;  %v13749_v14 = vld [vmem:[#allocation9 + $0x324] sm:$0xf]  ;;  %v11213_v22 = vld [vmem:[#allocation9 + $0x110] sm:$0xf0]  ;;  %v11712_v8 = vor.u32 %v13805_v47, %v11709_v53 }
 0x31f   :  { %8017 = vmatpush.bf16.msra.mxu2 %v11392_v62  ;;  %v11341_v4 = vld [vmem:[#allocation9 + $0x210] sm:$0xf0]  ;;  %v14862_v62 = vpack.c.bf16 %v4549_v30, %v4533_v46  ;;  %v13837_v43 = vld [vmem:[#allocation9 + $0x5e4] sm:$0xf]  ;;  %7912 = vmatmul.bf16.gmra.mxu0 %v14738_v41  ;;  %v11216_v31 = vor.u32 %v13681_v34, %v11213_v22 }
 0x320   :  { %8035 = vmatpush.bf16.msra.mxu3 %v11536_v56  ;;  %7979 = vmatpush.bf16.msra.mxu0 %v11136_v50  ;;  %v4460_v21 = vpop.f32.mrf.mxu2  ;;  %v4479_v26 = vpop.f32.mrf.mxu3  ;;  %v13649_v56 = vld [vmem:[#allocation9 + $0x4] sm:$0xf]  ;;  %v4478_v50 = vadd.f32 %v4477_v12, %v4459_v37  ;;  %v11837_v16 = vld [vmem:[#allocation9 + $0x5f0] sm:$0xf0]  ;;  %v11344_v40 = vor.u32 %v13713_v32, %v11341_v4 }
 0x321   :  { %v4461_v9 = vadd.f32 %v4460_v21, %v4442_v61  ;;  %v4425_v48 = vpop.f32.mrf.mxu0  ;;  %v11088_v35 = vor.u32 %v13649_v56, %v11085_v33  ;;  %v11965_v39 = vld [vmem:[#allocation9 + $0x6f0] sm:$0xf0]  ;;  %v13801_v44 = vld [vmem:[#allocation9 + $0x4c4] sm:$0xf]  ;;  %v11840_v37 = vor.u32 %v13837_v43, %v11837_v16 }
 0x322   :  { %7998 = vmatpush.bf16.msra.mxu1 %v11264_v27  ;;  %v4444_v51 = vpop.f32.mrf.mxu1  ;;  %v11488_v27 = vor.u32 %v13749_v14, %v11485_v11  ;;  %v11469_v19 = vld [vmem:[#allocation9 + $0x310] sm:$0xf0]  ;;  %v4502_v15 = vmax.f32 %v4478_v50, 0.0  ;;  %v4426_v49 = vadd.f32 %v4425_v48, %v14838_v20  ;;  %v13901_v38 = vld [vmem:[#allocation9 + $0x7e4] sm:$0xf] }
 0x323   :  { %8018 = vmatpush.bf16.msra.mxu2 %v11376_v24  ;;  %v4480_v12 = vadd.f32 %v4479_v26, %v4461_v9  ;;  %v11693_v2 = vld [vmem:[#allocation9 + $0x4d0] sm:$0xf0]  ;;  %v13865_v14 = vld [vmem:[#allocation9 + $0x6c4] sm:$0xf] }
 0x324   :  { %8036 = vmatpush.bf16.msra.mxu3 %v11520_v63  ;;  %7980 = vmatpush.bf16.msra.mxu0 %v11120_v13  ;;  %v13869_v63 = vld [vmem:[#allocation9 + $0x6e4] sm:$0xf]  ;;  %v11821_v3 = vld [vmem:[#allocation9 + $0x5d0] sm:$0xf0]  ;;  %v4445_v46 = vadd.f32 %v4444_v51, %v4426_v49 }
 0x325   :  { %v13745_v13 = vld [vmem:[#allocation9 + $0x304] sm:$0xf]  ;;  %v4518_v42 = vmax.f32 %v4480_v12, 0.0  ;;  %v11968_v24 = vor.u32 %v13869_v63, %v11965_v39  ;;  %v11949_v11 = vld [vmem:[#allocation9 + $0x6d0] sm:$0xf0] }
 0x326   :  { %7999 = vmatpush.bf16.msra.mxu1 %v11248_v59  ;;  %7950 = vmatmul.bf16.gmra.mxu2 %v14862_v62  ;;  %v13833_v59 = vld [vmem:[#allocation9 + $0x5c4] sm:$0xf]  ;;  %v11472_v5 = vor.u32 %v13745_v13, %v11469_v19  ;;  %v11677_v33 = vld [vmem:[#allocation9 + $0x4b0] sm:$0xf0] }
 0x327   :  { %7931 = vmatmul.bf16.gmra.mxu1 %v14860_v18  ;;  %8019 = vmatpush.bf16.msra.mxu2 %v11360_v23  ;;  %v14868_v60 = vpack.c.bf16 %v4518_v42, %v4502_v15  ;;  %v13797_v56 = vld [vmem:[#allocation9 + $0x4a4] sm:$0xf]  ;;  %v11824_v50 = vor.u32 %v13833_v59, %v11821_v3  ;;  %v11805_v34 = vld [vmem:[#allocation9 + $0x5b0] sm:$0xf0] }
 0x328   :  { %8037 = vmatpush.bf16.msra.mxu3 %v11504_v6  ;;  %7981 = vmatpush.bf16.msra.mxu0 %v11104_v58  ;;  %v12093_v6 = vld [vmem:[#allocation9 + $0x7f0] sm:$0xf0]  ;;  %v4463_v30 = vpop.f32.mrf.mxu2  ;;  %v4482_v61 = vpop.f32.mrf.mxu3  ;;  %v11696_v58 = vor.u32 %v13801_v44, %v11693_v2  ;;  %v13829_v9 = vld [vmem:[#allocation9 + $0x5a4] sm:$0xf]  ;;  %v11680_v51 = vor.u32 %v13797_v56, %v11677_v33 }
 0x329   :  { %v12096_v0 = vor.u32 %v13901_v38, %v12093_v6  ;;  %7964 = vmatmul.bf16.vlgmr.msrb.gmra.mxu3 %v14868_v60  ;;  %v4427_v21 = vpop.f32.mrf.mxu0  ;;  %v13897_v47 = vld [vmem:[#allocation9 + $0x7c4] sm:$0xf]  ;;  %v12077_v53 = vld [vmem:[#allocation9 + $0x7d0] sm:$0xf0]  ;;  %v4464_v4 = vadd.f32 %v4463_v30, %v4445_v46 }
 0x32a   :  { %8000 = vmatpush.bf16.msra.mxu1 %v11232_v45  ;;  %v4446_v26 = vpop.f32.mrf.mxu1  ;;  %v4428_v48 = vadd.f32 %v4427_v21, %v14838_v20  ;;  %v11952_v45 = vor.u32 %v13865_v14, %v11949_v11  ;;  %v13861_v23 = vld [vmem:[#allocation9 + $0x6a4] sm:$0xf]  ;;  %v11933_v22 = vld [vmem:[#allocation9 + $0x6b0] sm:$0xf0]  ;;  %v12080_v32 = vor.u32 %v13897_v47, %v12077_v53 }
 0x32b   :  { %8020 = vmatpush.bf16.msra.mxu2 %v11344_v40  ;;  %v13793_v12 = vld [vmem:[#allocation9 + $0x484] sm:$0xf]  ;;  %v11936_v20 = vor.u32 %v13861_v23, %v11933_v22  ;;  %v11789_v63 = vld [vmem:[#allocation9 + $0x590] sm:$0xf0]  ;;  %v4483_v49 = vadd.f32 %v4482_v61, %v4464_v4 }
 0x32c   :  { %8038 = vmatpush.bf16.msra.mxu3 %v11488_v27  ;;  %7982 = vmatpush.bf16.msra.mxu0 %v11088_v35  ;;  %v11808_v27 = vor.u32 %v13829_v9, %v11805_v34  ;;  %v11661_v35 = vld [vmem:[#allocation9 + $0x490] sm:$0xf0]  ;;  %v13825_v43 = vld [vmem:[#allocation9 + $0x584] sm:$0xf]  ;;  %v4447_v16 = vadd.f32 %v4446_v26, %v4428_v48 }
 0x32d   :  { %v12061_v39 = vld [vmem:[#allocation9 + $0x7b0] sm:$0xf0]  ;;  %v13857_v15 = vld [vmem:[#allocation9 + $0x684] sm:$0xf]  ;;  %v11664_v40 = vor.u32 %v13793_v12, %v11661_v35  ;;  %v11792_v59 = vor.u32 %v13825_v43, %v11789_v63  ;;  %v4534_v46 = vmax.f32 %v4483_v49, 0.0 }
 0x32e   :  { %8001 = vmatpush.bf16.msra.mxu1 %v11216_v31  ;;  %v11917_v42 = vld [vmem:[#allocation9 + $0x690] sm:$0xf0]  ;;  %v13889_v14 = vld [vmem:[#allocation9 + $0x784] sm:$0xf] }
 0x32f   :  { %8089 = vmatpush.bf16.msrb.mxu2 %v11968_v24  ;;  %v13789_v24 = vld [vmem:[#allocation9 + $0x464] sm:$0xf]  ;;  %v11645_v3 = vld [vmem:[#allocation9 + $0x470] sm:$0xf0]  ;;  %v11920_v30 = vor.u32 %v13857_v15, %v11917_v42  ;;  %7983 = vmatmul.bf16.vlgmr.msra.gmra.mxu0 %v14455_v52 }
 0x330   :  { %8051 = vmatpush.bf16.msrb.mxu0 %v11712_v8  ;;  %8039 = vmatpush.bf16.msra.mxu3 %v11472_v5  ;;  %v13893_v8 = vld [vmem:[#allocation9 + $0x7a4] sm:$0xf]  ;;  %v4465_v13 = vpop.f32.mrf.mxu2  ;;  %v4484_v19 = vpop.f32.mrf.mxu3  ;;  %v12045_v11 = vld [vmem:[#allocation9 + $0x790] sm:$0xf0]  ;;  %v11648_v26 = vor.u32 %v13789_v24, %v11645_v3 }
 0x331   :  { %v4466_v31 = vadd.f32 %v4465_v13, %v4447_v16  ;;  %v7680_v44 = vpop.f32.mrf.mxu0  ;;  %v13821_v5 = vld [vmem:[#allocation9 + $0x564] sm:$0xf]  ;;  %v12064_v38 = vor.u32 %v13893_v8, %v12061_v39  ;;  %v12048_v48 = vor.u32 %v13889_v14, %v12045_v11  ;;  %v11757_v47 = vld [vmem:[#allocation9 + $0x550] sm:$0xf0] }
 0x332   :  { %8070 = vmatpush.bf16.msrb.mxu1 %v11840_v37  ;;  %v7699_v2 = vpop.f32.mrf.mxu1  ;;  %v13853_v61 = vld [vmem:[#allocation9 + $0x664] sm:$0xf]  ;;  %v11885_v4 = vld [vmem:[#allocation9 + $0x650] sm:$0xf0] }
 0x333   :  { %8090 = vmatpush.bf16.msrb.mxu2 %v11952_v45  ;;  %v7700_v37 = vadd.f32 %v7699_v2, %v7680_v44  ;;  %v4485_v6 = vadd.f32 %v4484_v19, %v4466_v31  ;;  %v13785_v33 = vld [vmem:[#allocation9 + $0x444] sm:$0xf]  ;;  %v11613_v8 = vld [vmem:[#allocation9 + $0x430] sm:$0xf0] }
 0x334   :  { %8052 = vmatpush.bf16.msrb.mxu0 %v11696_v58  ;;  %8108 = vmatpush.bf16.msrb.mxu3 %v12096_v0  ;;  %v11773_v58 = vld [vmem:[#allocation9 + $0x570] sm:$0xf0]  ;;  %v13817_v9 = vld [vmem:[#allocation9 + $0x544] sm:$0xf] }
 0x335   :  { %v11901_v0 = vld [vmem:[#allocation9 + $0x670] sm:$0xf0]  ;;  %v4550_v21 = vmax.f32 %v4485_v6, 0.0  ;;  %v11776_v56 = vor.u32 %v13821_v5, %v11773_v58  ;;  %v13885_v53 = vld [vmem:[#allocation9 + $0x764] sm:$0xf] }
 0x336   :  { %8071 = vmatpush.bf16.msrb.mxu1 %v11824_v50  ;;  %8021 = vmatmul.bf16.vlgmr.msra.gmra.mxu2 %v14499_v7  ;;  %v11629_v50 = vld [vmem:[#allocation9 + $0x450] sm:$0xf0]  ;;  %v11904_v34 = vor.u32 %v13853_v61, %v11901_v0  ;;  %v13781_v63 = vld [vmem:[#allocation9 + $0x424] sm:$0xf] }
 0x337   :  { %8091 = vmatpush.bf16.msrb.mxu2 %v11936_v20  ;;  %8002 = vmatmul.bf16.vlgmr.msra.gmra.mxu1 %v14477_v28  ;;  %v14875_v45 = vpack.c.bf16 %v4550_v21, %v4534_v46  ;;  %v11632_v43 = vor.u32 %v13785_v33, %v11629_v50  ;;  %v11760_v20 = vor.u32 %v13817_v9, %v11757_v47  ;;  %v13813_v39 = vld [vmem:[#allocation9 + $0x524] sm:$0xf]  ;;  %v11741_v42 = vld [vmem:[#allocation9 + $0x530] sm:$0xf0] }
 0x338   :  { %8053 = vmatpush.bf16.msrb.mxu0 %v11680_v51  ;;  %8109 = vmatpush.bf16.msrb.mxu3 %v12080_v32  ;;  %v12029_v51 = vld [vmem:[#allocation9 + $0x770] sm:$0xf0]  ;;  %v7718_v23 = vpop.f32.mrf.mxu2  ;;  %v7737_v22 = vpop.f32.mrf.mxu3  ;;  %v13849_v32 = vld [vmem:[#allocation9 + $0x644] sm:$0xf]  ;;  %v11744_v24 = vor.u32 %v13813_v39, %v11741_v42 }
 0x339   :  { %15477 = vst [vmem:[#allocation44_spill] sm:$0xff] %v14875_v45  ;;  %7969 = vmatmul.bf16.gmra.mxu3 %v14875_v45  ;;  %v7682_v12 = vpop.f32.mrf.mxu0  ;;  %v12032_v13 = vor.u32 %v13885_v53, %v12029_v51  ;;  %v11888_v15 = vor.u32 %v13849_v32, %v11885_v4  ;;  %v13881_v49 = vld [vmem:[#allocation9 + $0x744] sm:$0xf]  ;;  %v12013_v31 = vld [vmem:[#allocation9 + $0x750] sm:$0xf0] }
 0x33a   :  { %8072 = vmatpush.bf16.msrb.mxu1 %v11808_v27  ;;  %v7719_v27 = vadd.f32 %v7718_v23, %v7700_v37  ;;  %v7701_v35 = vpop.f32.mrf.mxu1  ;;  %v13845_v44 = vld [vmem:[#allocation9 + $0x624] sm:$0xf]  ;;  %v11869_v2 = vld [vmem:[#allocation9 + $0x630] sm:$0xf0]  ;;  %v12016_v6 = vor.u32 %v13881_v49, %v12013_v31 }
 0x33b   :  { %8092 = vmatpush.bf16.msrb.mxu2 %v11920_v30  ;;  %v7702_v16 = vadd.f32 %v7701_v35, %v7682_v12  ;;  %v13777_v37 = vld [vmem:[#allocation9 + $0x404] sm:$0xf]  ;;  %v11725_v5 = vld [vmem:[#allocation9 + $0x510] sm:$0xf0]  ;;  %v11872_v30 = vor.u32 %v13845_v44, %v11869_v2 }
 0x33c   :  { %8054 = vmatpush.bf16.msrb.mxu0 %v11664_v40  ;;  %8110 = vmatpush.bf16.msrb.mxu3 %v12064_v38  ;;  %v14878_v19 = vadd.f32 %v7737_v22, %v7719_v27  ;;  %v11616_v40 = vor.u32 %v13781_v63, %v11613_v8  ;;  %v13809_v3 = vld [vmem:[#allocation9 + $0x504] sm:$0xf]  ;;  %v11853_v58 = vld [vmem:[#allocation9 + $0x610] sm:$0xf0] }
 0x33d   :  { %v13841_v38 = vld [vmem:[#allocation9 + $0x604] sm:$0xf]  ;;  %v12221_v11 = vld [vmem:[#allocation9 + $0x8f0] sm:$0xf0]  ;;  %v11728_v51 = vor.u32 %v13809_v3, %v11725_v5 }
 0x33e   :  { %8073 = vmatpush.bf16.msrb.mxu1 %v11792_v59  ;;  %v11597_v59 = vld [vmem:[#allocation9 + $0x410] sm:$0xf0]  ;;  %v13933_v14 = vld [vmem:[#allocation9 + $0x8e4] sm:$0xf]  ;;  %v11856_v22 = vor.u32 %v13841_v38, %v11853_v58 }
 0x33f   :  { %8093 = vmatpush.bf16.msrb.mxu2 %v11904_v34  ;;  %v13965_v46 = vld [vmem:[#allocation9 + $0x9e4] sm:$0xf]  ;;  %v12349_v21 = vld [vmem:[#allocation9 + $0x9f0] sm:$0xf0]  ;;  %v11600_v9 = vor.u32 %v13777_v37, %v11597_v59  ;;  %v12224_v23 = vor.u32 %v13933_v14, %v12221_v11  ;;  %7988 = vmatmul.bf16.gmra.mxu0 %v14466_v1  ;;  %v15490_v1 = vld [vmem:[#allocation32_spill] sm:$0xff] }
 0x340   :  { %8055 = vmatpush.bf16.msrb.mxu0 %v11648_v26  ;;  %8111 = vmatpush.bf16.msrb.mxu3 %v12048_v48  ;;  %v7720_v61 = vpop.f32.mrf.mxu2  ;;  %v14880_v0 = vpop.f32.mrf.mxu3  ;;  %v13997_v26 = vld [vmem:[#allocation9 + $0xae4] sm:$0xf]  ;;  %v12477_v48 = vld [vmem:[#allocation9 + $0xaf0] sm:$0xf0]  ;;  %v12352_v32 = vor.u32 %v13965_v46, %v12349_v21 }
 0x341   :  { %v7685_v33 = vpop.f32.mrf.mxu0  ;;  %v13877_v34 = vld [vmem:[#allocation9 + $0x724] sm:$0xf]  ;;  %v11997_v47 = vld [vmem:[#allocation9 + $0x730] sm:$0xf0]  ;;  %v12480_v12 = vor.u32 %v13997_v26, %v12477_v48 }
 0x342   :  { %8074 = vmatpush.bf16.msrb.mxu1 %v11776_v56  ;;  %v14882_v56 = vadd.f32 %v7720_v61, %v7702_v16  ;;  %v7704_v50 = vpop.f32.mrf.mxu1  ;;  %v13929_v4 = vld [vmem:[#allocation9 + $0x8c4] sm:$0xf]  ;;  %v12205_v27 = vld [vmem:[#allocation9 + $0x8d0] sm:$0xf0] }
 0x343   :  { %8094 = vmatpush.bf16.msrb.mxu2 %v11888_v15  ;;  %v7705_v53 = vadd.f32 %v7704_v50, %v7685_v33  ;;  %v13961_v35 = vld [vmem:[#allocation9 + $0x9c4] sm:$0xf]  ;;  %v12461_v63 = vld [vmem:[#allocation9 + $0xad0] sm:$0xf0] }
 0x344   :  { %8056 = vmatpush.bf16.msrb.mxu0 %v11632_v43  ;;  %8112 = vmatpush.bf16.msrb.mxu3 %v12032_v13  ;;  %v12333_v43 = vld [vmem:[#allocation9 + $0x9d0] sm:$0xf0]  ;;  %v13993_v16 = vld [vmem:[#allocation9 + $0xac4] sm:$0xf]  ;;  %v12208_v13 = vor.u32 %v13929_v4, %v12205_v27 }
 0x345   :  { %v13873_v8 = vld [vmem:[#allocation9 + $0x704] sm:$0xf]  ;;  %v11981_v39 = vld [vmem:[#allocation9 + $0x710] sm:$0xf0]  ;;  %v12336_v42 = vor.u32 %v13961_v35, %v12333_v43 }
 0x346   :  { %8075 = vmatpush.bf16.msrb.mxu1 %v11760_v20  ;;  %v12000_v20 = vor.u32 %v13877_v34, %v11997_v47  ;;  %8026 = vmatmul.bf16.gmra.mxu2 %v14512_v17  ;;  %v13925_v15 = vld [vmem:[#allocation9 + $0x8a4] sm:$0xf]  ;;  %v12189_v49 = vld [vmem:[#allocation9 + $0x8b0] sm:$0xf0] }
 0x347   :  { %8095 = vmatpush.bf16.msrb.mxu2 %v11872_v30  ;;  %8007 = vmatmul.bf16.gmra.mxu1 %v14488_v36  ;;  %v14029_v31 = vld [vmem:[#allocation9 + $0xbe4] sm:$0xf]  ;;  %v12605_v44 = vld [vmem:[#allocation9 + $0xbf0] sm:$0xf0]  ;;  %v12192_v46 = vor.u32 %v13925_v15, %v12189_v49 }
 0x348   :  { %8057 = vmatpush.bf16.msrb.mxu0 %v11616_v40  ;;  %8113 = vmatpush.bf16.msrb.mxu3 %v12016_v6  ;;  %v7723_v2 = vpop.f32.mrf.mxu2  ;;  %v12464_v40 = vor.u32 %v13993_v16, %v12461_v63  ;;  %v13957_v37 = vld [vmem:[#allocation9 + $0x9a4] sm:$0xf]  ;;  %v12317_v59 = vld [vmem:[#allocation9 + $0x9b0] sm:$0xf0]  ;;  %v12608_v14 = vor.u32 %v14029_v31, %v12605_v44  ;;  %v7742_v11 = vpop.f32.mrf.mxu3 }
 0x349   :  { %v7724_v3 = vadd.f32 %v7723_v2, %v7705_v53  ;;  %v15478_v5 = vld [vmem:[#allocation23_spill] sm:$0xff]  ;;  %v7687_v38 = vpop.f32.mrf.mxu0  ;;  %v13989_v30 = vld [vmem:[#allocation9 + $0xaa4] sm:$0xf]  ;;  %v12320_v33 = vor.u32 %v13957_v37, %v12317_v59 }
 0x34a   :  { %8076 = vmatpush.bf16.msrb.mxu1 %v11744_v24  ;;  %v11984_v24 = vor.u32 %v13873_v8, %v11981_v39  ;;  %8040 = vmatmul.bf16.vlgmr.msra.gmra.mxu3 %v15478_v5  ;;  %v7706_v6 = vpop.f32.mrf.mxu1  ;;  %v12445_v58 = vld [vmem:[#allocation9 + $0xab0] sm:$0xf0]  ;;  %v13921_v21 = vld [vmem:[#allocation9 + $0x884] sm:$0xf] }
 0x34b   :  { %8096 = vmatpush.bf16.msrb.mxu2 %v11856_v22  ;;  %v7707_v61 = vadd.f32 %v7706_v6, %v7687_v38  ;;  %v14888_v26 = vadd.f32 %v7742_v11, %v7724_v3  ;;  %v12173_v50 = vld [vmem:[#allocation9 + $0x890] sm:$0xf0]  ;;  %v12448_v34 = vor.u32 %v13989_v30, %v12445_v58  ;;  %v13953_v47 = vld [vmem:[#allocation9 + $0x984] sm:$0xf] }
 0x34c   :  { %8058 = vmatpush.bf16.msrb.mxu0 %v11600_v9  ;;  %8114 = vmatpush.bf16.msrb.mxu3 %v12000_v20  ;;  %v14025_v9 = vld [vmem:[#allocation9 + $0xbc4] sm:$0xf]  ;;  %v12589_v48 = vld [vmem:[#allocation9 + $0xbd0] sm:$0xf0] }
 0x34d   :  { %v12301_v53 = vld [vmem:[#allocation9 + $0x990] sm:$0xf0]  ;;  %v13985_v22 = vld [vmem:[#allocation9 + $0xa84] sm:$0xf] }
 0x34e   :  { %8077 = vmatpush.bf16.msrb.mxu1 %v11728_v51  ;;  %v12592_v51 = vor.u32 %v14025_v9, %v12589_v48  ;;  %v13917_v4 = vld [vmem:[#allocation9 + $0x864] sm:$0xf]  ;;  %v12304_v27 = vor.u32 %v13953_v47, %v12301_v53  ;;  %v12573_v43 = vld [vmem:[#allocation9 + $0xbb0] sm:$0xf0] }
 0x34f   :  { %8165 = vmatpush.bf16.msra.mxu2 %v12480_v12  ;;  %v12157_v12 = vld [vmem:[#allocation9 + $0x870] sm:$0xf0]  ;;  %v14021_v35 = vld [vmem:[#allocation9 + $0xba4] sm:$0xf] }
 0x350   :  { %8127 = vmatpush.bf16.msra.mxu0 %v12224_v23  ;;  %8115 = vmatpush.bf16.msrb.mxu3 %v11984_v24  ;;  %v12176_v23 = vor.u32 %v13921_v21, %v12173_v50  ;;  %v7725_v16 = vpop.f32.mrf.mxu2  ;;  %v13949_v20 = vld [vmem:[#allocation9 + $0x964] sm:$0xf]  ;;  %v12285_v63 = vld [vmem:[#allocation9 + $0x970] sm:$0xf0]  ;;  %v12576_v15 = vor.u32 %v14021_v35, %v12573_v43  ;;  %v12160_v49 = vor.u32 %v13917_v4, %v12157_v12  ;;  %v14896_v24 = vpop.f32.mrf.mxu3 }
 0x351   :  { %v14890_v8 = vadd.f32 %v7725_v16, %v7707_v61  ;;  %v14892_v39 = vpop.f32.mrf.mxu0  ;;  %v13981_v31 = vld [vmem:[#allocation9 + $0xa64] sm:$0xf]  ;;  %v12413_v44 = vld [vmem:[#allocation9 + $0xa70] sm:$0xf0]  ;;  %v12288_v2 = vor.u32 %v13949_v20, %v12285_v63 }
 0x352   :  { %8146 = vmatpush.bf16.msra.mxu1 %v12352_v32  ;;  %v12429_v32 = vld [vmem:[#allocation9 + $0xa90] sm:$0xf0]  ;;  %v13945_v59 = vld [vmem:[#allocation9 + $0x944] sm:$0xf]  ;;  %v12416_v11 = vor.u32 %v13981_v31, %v12413_v44 }
 0x353   :  { %8166 = vmatpush.bf16.msra.mxu2 %v12464_v40  ;;  %v13913_v40 = vld [vmem:[#allocation9 + $0x844] sm:$0xf]  ;;  %v12141_v37 = vld [vmem:[#allocation9 + $0x850] sm:$0xf0] }
 0x354   :  { %8128 = vmatpush.bf16.msra.mxu0 %v12208_v13  ;;  %8184 = vmatpush.bf16.msra.mxu3 %v12608_v14  ;;  %v14894_v13 = vpop.f32.mrf.mxu1  ;;  %v15479_v3 = vld [vmem:[#allocation25_spill] sm:$0xff]  ;;  %v15480_v38 = vld [vmem:[#allocation27_spill] sm:$0xff]  ;;  %v12144_v61 = vor.u32 %v13913_v40, %v12141_v37 }
 0x355   :  { %8059 = vmatmul.bf16.vlgmr.msrb.gmra.mxu0 %v15479_v3  ;;  %v12269_v6 = vld [vmem:[#allocation9 + $0x950] sm:$0xf0]  ;;  %v14017_v30 = vld [vmem:[#allocation9 + $0xb84] sm:$0xf] }
 0x356   :  { %8147 = vmatpush.bf16.msra.mxu1 %v12336_v42  ;;  %v12432_v42 = vor.u32 %v13985_v22, %v12429_v32  ;;  %v12557_v58 = vld [vmem:[#allocation9 + $0xb90] sm:$0xf0]  ;;  %v15481_v14 = vld [vmem:[#allocation29_spill] sm:$0xff]  ;;  %v15482_v22 = vld [vmem:[#allocation24_spill] sm:$0xff] }
 0x357   :  { %8167 = vmatpush.bf16.msra.mxu2 %v12448_v34  ;;  %8078 = vmatmul.bf16.vlgmr.msrb.gmra.mxu1 %v15480_v38  ;;  %v12397_v21 = vld [vmem:[#allocation9 + $0xa50] sm:$0xf0]  ;;  %v13909_v50 = vld [vmem:[#allocation9 + $0x824] sm:$0xf]  ;;  %v12560_v34 = vor.u32 %v14017_v30, %v12557_v58 }
 0x358   :  { %8129 = vmatpush.bf16.msra.mxu0 %v12192_v46  ;;  %8185 = vmatpush.bf16.msra.mxu3 %v12592_v51  ;;  %v13977_v46 = vld [vmem:[#allocation9 + $0xa44] sm:$0xf]  ;;  %v12125_v9 = vld [vmem:[#allocation9 + $0x830] sm:$0xf0]  ;;  %v14901_v47 = vpop.f32.mrf.mxu2  ;;  %v14908_v40 = vpop.f32.mrf.mxu3 }
 0x359   :  { %8097 = vmatmul.bf16.vlgmr.msrb.gmra.mxu2 %v15481_v14  ;;  %v13941_v48 = vld [vmem:[#allocation9 + $0x924] sm:$0xf]  ;;  %v12253_v53 = vld [vmem:[#allocation9 + $0x930] sm:$0xf0]  ;;  %v14904_v32 = vpop.f32.mrf.mxu0  ;;  %v12128_v12 = vor.u32 %v13909_v50, %v12125_v9 }
 0x35a   :  { %8148 = vmatpush.bf16.msra.mxu1 %v12320_v33  ;;  %v12272_v33 = vor.u32 %v13945_v59, %v12269_v6  ;;  %v14013_v51 = vld [vmem:[#allocation9 + $0xb64] sm:$0xf]  ;;  %8045 = vmatmul.bf16.gmra.mxu3 %v15482_v22  ;;  %v12381_v43 = vld [vmem:[#allocation9 + $0xa30] sm:$0xf0]  ;;  %v12256_v16 = vor.u32 %v13941_v48, %v12253_v53 }
 0x35b   :  { %8168 = vmatpush.bf16.msra.mxu2 %v12432_v42  ;;  %v13973_v35 = vld [vmem:[#allocation9 + $0xa24] sm:$0xf]  ;;  %v12109_v63 = vld [vmem:[#allocation9 + $0x810] sm:$0xf0] }
 0x35c   :  { %8130 = vmatpush.bf16.msra.mxu0 %v12176_v23  ;;  %8186 = vmatpush.bf16.msra.mxu3 %v12576_v15  ;;  %v12541_v23 = vld [vmem:[#allocation9 + $0xb70] sm:$0xf0]  ;;  %v14906_v4 = vpop.f32.mrf.mxu1  ;;  %v13905_v20 = vld [vmem:[#allocation9 + $0x804] sm:$0xf]  ;;  %v12384_v37 = vor.u32 %v13973_v35, %v12381_v43 }
 0x35d   :  { %v13937_v15 = vld [vmem:[#allocation9 + $0x904] sm:$0xf]  ;;  %v12544_v42 = vor.u32 %v14013_v51, %v12541_v23  ;;  %v12733_v44 = vld [vmem:[#allocation9 + $0xcf0] sm:$0xf0]  ;;  %v12112_v59 = vor.u32 %v13905_v20, %v12109_v63 }
 0x35e   :  { %8149 = vmatpush.bf16.msra.mxu1 %v12304_v27  ;;  %v12400_v27 = vor.u32 %v13977_v46, %v12397_v21  ;;  %v14061_v31 = vld [vmem:[#allocation9 + $0xce4] sm:$0xf]  ;;  %v12365_v6 = vld [vmem:[#allocation9 + $0xa10] sm:$0xf0] }
 0x35f   :  { %8169 = vmatpush.bf16.msra.mxu2 %v12416_v11  ;;  %v14093_v30 = vld [vmem:[#allocation9 + $0xde4] sm:$0xf]  ;;  %v12861_v58 = vld [vmem:[#allocation9 + $0xdf0] sm:$0xf0] }
 0x360   :  { %8131 = vmatpush.bf16.msra.mxu0 %v12160_v49  ;;  %8187 = vmatpush.bf16.msra.mxu3 %v12560_v34  ;;  %v12237_v49 = vld [vmem:[#allocation9 + $0x910] sm:$0xf0]  ;;  %v14125_v46 = vld [vmem:[#allocation9 + $0xee4] sm:$0xf]  ;;  %v14910_v50 = vpop.f32.mrf.mxu2  ;;  %v12864_v23 = vor.u32 %v14093_v30, %v12861_v58 }
 0x361   :  { %v12240_v11 = vor.u32 %v13937_v15, %v12237_v49  ;;  %v14009_v21 = vld [vmem:[#allocation9 + $0xb44] sm:$0xf]  ;;  %v12989_v9 = vld [vmem:[#allocation9 + $0xef0] sm:$0xf0]  ;;  %v14912_v53 = vpop.f32.mrf.mxu0  ;;  %v15483_v49 = vld [vmem:[#allocation26_spill] sm:$0xff] }
 0x362   :  { %8150 = vmatpush.bf16.msra.mxu1 %v12288_v2  ;;  %v13969_v2 = vld [vmem:[#allocation9 + $0xa04] sm:$0xf]  ;;  %v12717_v34 = vld [vmem:[#allocation9 + $0xcd0] sm:$0xf0] }
 0x363   :  { %8170 = vmatpush.bf16.msra.mxu2 %v12400_v27  ;;  %v14057_v48 = vld [vmem:[#allocation9 + $0xcc4] sm:$0xf]  ;;  %v12368_v27 = vor.u32 %v13969_v2, %v12365_v6  ;;  %v12845_v35 = vld [vmem:[#allocation9 + $0xdd0] sm:$0xf0] }
 0x364   :  { %8132 = vmatpush.bf16.msra.mxu0 %v12144_v61  ;;  %v12736_v61 = vor.u32 %v14061_v31, %v12733_v44  ;;  %8188 = vmatpush.bf16.msra.mxu3 %v12544_v42  ;;  %v14914_v51 = vpop.f32.mrf.mxu1  ;;  %v12720_v20 = vor.u32 %v14057_v48, %v12717_v34  ;;  %v14121_v63 = vld [vmem:[#allocation9 + $0xec4] sm:$0xf]  ;;  %v12509_v42 = vld [vmem:[#allocation9 + $0xb30] sm:$0xf0]  ;;  %v15484_v31 = vld [vmem:[#allocation28_spill] sm:$0xff] }
 0x365   :  { %v14005_v15 = vld [vmem:[#allocation9 + $0xb24] sm:$0xf]  ;;  %8064 = vmatmul.bf16.gmra.mxu0 %v15483_v49  ;;  %v12973_v44 = vld [vmem:[#allocation9 + $0xed0] sm:$0xf0] }
 0x366   :  { %8151 = vmatpush.bf16.msra.mxu1 %v12272_v33  ;;  %v12525_v33 = vld [vmem:[#allocation9 + $0xb50] sm:$0xf0]  ;;  %v14053_v22 = vld [vmem:[#allocation9 + $0xca4] sm:$0xf]  ;;  %v12512_v58 = vor.u32 %v14005_v15, %v12509_v42 }
 0x367   :  { %8171 = vmatpush.bf16.msra.mxu2 %v12384_v37  ;;  %v12528_v43 = vor.u32 %v14009_v21, %v12525_v33  ;;  %8083 = vmatmul.bf16.gmra.mxu1 %v15484_v31  ;;  %v12701_v30 = vld [vmem:[#allocation9 + $0xcb0] sm:$0xf0]  ;;  %v15485_v37 = vld [vmem:[#allocation30_spill] sm:$0xff]  ;;  %v14001_v21 = vld [vmem:[#allocation9 + $0xb04] sm:$0xf] }
 0x368   :  { %8133 = vmatpush.bf16.msra.mxu0 %v12128_v12  ;;  %v14089_v12 = vld [vmem:[#allocation9 + $0xdc4] sm:$0xf]  ;;  %v12829_v6 = vld [vmem:[#allocation9 + $0xdb0] sm:$0xf0]  ;;  %v14921_v48 = vpop.f32.mrf.mxu2 }
 0x369   :  { %8102 = vmatmul.bf16.gmra.mxu2 %v15485_v37  ;;  %v12848_v2 = vor.u32 %v14089_v12, %v12845_v35  ;;  %8189 = vmatpush.bf16.msra.mxu3 %v12528_v43  ;;  %v12493_v33 = vld [vmem:[#allocation9 + $0xb10] sm:$0xf0]  ;;  %v14049_v37 = vld [vmem:[#allocation9 + $0xc84] sm:$0xf] }
 0x36a   :  { %8152 = vmatpush.bf16.msra.mxu1 %v12256_v16  ;;  %v12992_v16 = vor.u32 %v14125_v46, %v12989_v9  ;;  %v14117_v46 = vld [vmem:[#allocation9 + $0xea4] sm:$0xf]  ;;  %v14919_v9 = vpop.f32.mrf.mxu3  ;;  %v12957_v34 = vld [vmem:[#allocation9 + $0xeb0] sm:$0xf0]  ;;  %v12496_v15 = vor.u32 %v14001_v21, %v12493_v33 }
 0x36b   :  { %8172 = vmatpush.bf16.msra.mxu2 %v12368_v27  ;;  %v15486_v12 = vld [vmem:[#allocation31_spill] sm:$0xff]  ;;  %v14924_v27 = vpop.f32.mrf.mxu0  ;;  %v12960_v42 = vor.u32 %v14117_v46, %v12957_v34  ;;  %v14045_v49 = vld [vmem:[#allocation9 + $0xc64] sm:$0xf] }
 0x36c   :  { %8134 = vmatpush.bf16.msra.mxu0 %v12112_v59  ;;  %v14085_v59 = vld [vmem:[#allocation9 + $0xda4] sm:$0xf]  ;;  %8116 = vmatmul.bf16.vlgmr.msrb.gmra.mxu3 %v15486_v12  ;;  %v14926_v35 = vpop.f32.mrf.mxu1  ;;  %v12941_v31 = vld [vmem:[#allocation9 + $0xe90] sm:$0xf0] }
 0x36d   :  { %v12832_v43 = vor.u32 %v14085_v59, %v12829_v6  ;;  %8190 = vmatpush.bf16.msra.mxu3 %v12512_v58  ;;  %v12669_v12 = vld [vmem:[#allocation9 + $0xc70] sm:$0xf0]  ;;  %v14109_v3 = vld [vmem:[#allocation9 + $0xe64] sm:$0xf] }
 0x36e   :  { %8153 = vmatpush.bf16.msra.mxu1 %v12240_v11  ;;  %v12976_v11 = vor.u32 %v14121_v63, %v12973_v44  ;;  %v12813_v63 = vld [vmem:[#allocation9 + $0xd90] sm:$0xf0]  ;;  %v12672_v58 = vor.u32 %v14045_v49, %v12669_v12  ;;  %v14153_v21 = vld [vmem:[#allocation9 + $0xfc4] sm:$0xf] }
 0x36f   :  { %8241 = vmatpush.bf16.msrb.mxu2 %v12992_v16  ;;  %v14157_v16 = vld [vmem:[#allocation9 + $0xfe4] sm:$0xf]  ;;  %v12797_v59 = vld [vmem:[#allocation9 + $0xd70] sm:$0xf0] }
 0x370   :  { %8203 = vmatpush.bf16.msrb.mxu0 %v12736_v61  ;;  %v12704_v61 = vor.u32 %v14053_v22, %v12701_v30  ;;  %v13117_v22 = vld [vmem:[#allocation9 + $0xff0] sm:$0xf0]  ;;  %v14113_v30 = vld [vmem:[#allocation9 + $0xe84] sm:$0xf] }
 0x371   :  { %v13120_v14 = vor.u32 %v14157_v16, %v13117_v22  ;;  %8191 = vmatpush.bf16.msra.mxu3 %v12496_v15  ;;  %v12944_v6 = vor.u32 %v14113_v30, %v12941_v31  ;;  %v14041_v46 = vld [vmem:[#allocation9 + $0xc44] sm:$0xf]  ;;  %v12653_v33 = vld [vmem:[#allocation9 + $0xc50] sm:$0xf0] }
 0x372   :  { %8222 = vmatpush.bf16.msrb.mxu1 %v12864_v23  ;;  %v12685_v23 = vld [vmem:[#allocation9 + $0xc90] sm:$0xf0]  ;;  %v14934_v16 = vpop.f32.mrf.mxu3  ;;  %v14073_v22 = vld [vmem:[#allocation9 + $0xd44] sm:$0xf] }
 0x373   :  { %8242 = vmatpush.bf16.msrb.mxu2 %v12976_v11  ;;  %v12688_v44 = vor.u32 %v14049_v37, %v12685_v23  ;;  %v13101_v11 = vld [vmem:[#allocation9 + $0xfd0] sm:$0xf0]  ;;  %v14930_v34 = vpop.f32.mrf.mxu0  ;;  %v14149_v15 = vld [vmem:[#allocation9 + $0xfa4] sm:$0xf] }
 0x374   :  { %8204 = vmatpush.bf16.msrb.mxu0 %v12720_v20  ;;  %v14081_v20 = vld [vmem:[#allocation9 + $0xd84] sm:$0xf]  ;;  %v12925_v37 = vld [vmem:[#allocation9 + $0xe70] sm:$0xf0]  ;;  %v14932_v23 = vpop.f32.mrf.mxu1  ;;  %v13104_v49 = vor.u32 %v14153_v21, %v13101_v11 }
 0x375   :  { %v12816_v38 = vor.u32 %v14081_v20, %v12813_v63  ;;  %8260 = vmatpush.bf16.msrb.mxu3 %v13120_v14  ;;  %v12781_v31 = vld [vmem:[#allocation9 + $0xd50] sm:$0xf0]  ;;  %v12928_v12 = vor.u32 %v14109_v3, %v12925_v37  ;;  %v12656_v20 = vor.u32 %v14041_v46, %v12653_v33  ;;  %v14105_v63 = vld [vmem:[#allocation9 + $0xe44] sm:$0xf] }
 0x376   :  { %8223 = vmatpush.bf16.msrb.mxu1 %v12848_v2  ;;  %v14077_v2 = vld [vmem:[#allocation9 + $0xd64] sm:$0xf]  ;;  %v13085_v14 = vld [vmem:[#allocation9 + $0xfb0] sm:$0xf0] }
 0x377   :  { %8243 = vmatpush.bf16.msrb.mxu2 %v12960_v42  ;;  %v15487_v42 = vld [vmem:[#allocation33_spill] sm:$0xff]  ;;  %v12909_v30 = vld [vmem:[#allocation9 + $0xe50] sm:$0xf0] }
 0x378   :  { %8205 = vmatpush.bf16.msrb.mxu0 %v12704_v61  ;;  %v14928_v61 = vpop.f32.mrf.mxu2  ;;  %v14037_v5 = vld [vmem:[#allocation9 + $0xc24] sm:$0xf]  ;;  %v12912_v3 = vor.u32 %v14105_v63, %v12909_v30  ;;  %v13069_v33 = vld [vmem:[#allocation9 + $0xf90] sm:$0xf0] }
 0x379   :  { %8135 = vmatmul.bf16.vlgmr.msra.gmra.mxu0 %v15487_v42  ;;  %8261 = vmatpush.bf16.msrb.mxu3 %v13104_v49  ;;  %v14069_v21 = vld [vmem:[#allocation9 + $0xd24] sm:$0xf]  ;;  %v12621_v36 = vld [vmem:[#allocation9 + $0xc10] sm:$0xf0]  ;;  %v11203_v49 = vld [vmem:[#allocation9 + $0xe8] sm:$0xf] }
 0x37a   :  { %8224 = vmatpush.bf16.msrb.mxu1 %v12832_v43  ;;  %v12800_v43 = vor.u32 %v14077_v2, %v12797_v59  ;;  %v15489_v2 = vld [vmem:[#allocation37_spill] sm:$0xff]  ;;  %v12784_v59 = vor.u32 %v14073_v22, %v12781_v31  ;;  %v14946_v45 = vpop.f32.mrf.mxu3  ;;  %v12877_v28 = vld [vmem:[#allocation9 + $0xe10] sm:$0xf0] }
 0x37b   :  { %8244 = vmatpush.bf16.msrb.mxu2 %v12944_v6  ;;  %v12765_v6 = vld [vmem:[#allocation9 + $0xd30] sm:$0xf0]  ;;  %v14101_v37 = vld [vmem:[#allocation9 + $0xe24] sm:$0xf]  ;;  %15491 = vst [vmem:[#allocation45_spill] sm:$0xff] %v14946_v45 }
 0x37c   :  { %8206 = vmatpush.bf16.msrb.mxu0 %v12688_v44  ;;  %v15488_v44 = vld [vmem:[#allocation35_spill] sm:$0xff]  ;;  %8173 = vmatmul.bf16.vlgmr.msra.gmra.mxu2 %v15489_v2  ;;  %v14145_v46 = vld [vmem:[#allocation9 + $0xf84] sm:$0xf]  ;;  %v14944_v22 = vpop.f32.mrf.mxu1  ;;  %v12768_v31 = vor.u32 %v14069_v21, %v12765_v6 }
 0x37d   :  { %8154 = vmatmul.bf16.vlgmr.msra.gmra.mxu1 %v15488_v44  ;;  %v12893_v44 = vld [vmem:[#allocation9 + $0xe30] sm:$0xf0]  ;;  %v14033_v17 = vld [vmem:[#allocation9 + $0xc04] sm:$0xf]  ;;  %8121 = vmatmul.bf16.gmra.mxu3 %v15490_v1  ;;  %v13072_v63 = vor.u32 %v14145_v46, %v13069_v33  ;;  %v11187_v46 = vld [vmem:[#allocation9 + $0xc8] sm:$0xf] }
 0x37e   :  { %8225 = vmatpush.bf16.msrb.mxu1 %v12816_v38  ;;  %v12637_v38 = vld [vmem:[#allocation9 + $0xc30] sm:$0xf0]  ;;  %v12624_v30 = vor.u32 %v14033_v17, %v12621_v36  ;;  %v14141_v2 = vld [vmem:[#allocation9 + $0xf64] sm:$0xf]  ;;  %v13676_v33 = vld [vmem:[#allocation9 + $0xd4] sm:$0xf0] }
 0x37f   :  { %8245 = vmatpush.bf16.msrb.mxu2 %v12928_v12  ;;  %v12640_v11 = vor.u32 %v14037_v5, %v12637_v38  ;;  %v13680_v12 = vld [vmem:[#allocation9 + $0xf4] sm:$0xf0]  ;;  %v14065_v5 = vld [vmem:[#allocation9 + $0xd04] sm:$0xf]  ;;  %v13053_v1 = vld [vmem:[#allocation9 + $0xf70] sm:$0xf0] }
 0x380   :  { %8207 = vmatpush.bf16.msrb.mxu0 %v12672_v58  ;;  %v13088_v58 = vor.u32 %v14149_v15, %v13085_v14  ;;  %v14939_v42 = vpop.f32.mrf.mxu2  ;;  %v11331_v15 = vld [vmem:[#allocation9 + $0x1e8] sm:$0xf]  ;;  %v12896_v14 = vor.u32 %v14101_v37, %v12893_v44  ;;  %v13712_v38 = vld [vmem:[#allocation9 + $0x1f4] sm:$0xf0]  ;;  %v14097_v7 = vld [vmem:[#allocation9 + $0xe04] sm:$0xf]  ;;  %v13056_v52 = vor.u32 %v14141_v2, %v13053_v1 }
 0x381   :  { %v11332_v6 = vor.u32 %v13712_v38, %v11331_v15  ;;  %v12880_v44 = vor.u32 %v14097_v7, %v12877_v28  ;;  %v13744_v36 = vld [vmem:[#allocation9 + $0x2f4] sm:$0xf0]  ;;  %v11315_v17 = vld [vmem:[#allocation9 + $0x1c8] sm:$0xf]  ;;  %v14137_v37 = vld [vmem:[#allocation9 + $0xf44] sm:$0xf] }
 0x382   :  { %8226 = vmatpush.bf16.msrb.mxu1 %v12800_v43  ;;  %v14942_v43 = vpop.f32.mrf.mxu0  ;;  %8262 = vmatpush.bf16.msrb.mxu3 %v13088_v58  ;;  %v11459_v58 = vld [vmem:[#allocation9 + $0x2e8] sm:$0xf]  ;;  %v13037_v45 = vld [vmem:[#allocation9 + $0xf50] sm:$0xf0]  ;;  %v13672_v7 = vld [vmem:[#allocation9 + $0xb4] sm:$0xf0] }
 0x383   :  { %8246 = vmatpush.bf16.msrb.mxu2 %v12912_v3  ;;  %v13708_v3 = vld [vmem:[#allocation9 + $0x1d4] sm:$0xf0]  ;;  %v11460_v1 = vor.u32 %v13744_v36, %v11459_v58  ;;  %v11171_v28 = vld [vmem:[#allocation9 + $0xa8] sm:$0xf]  ;;  %v13021_v38 = vld [vmem:[#allocation9 + $0xf30] sm:$0xf0] }
 0x384   :  { %8208 = vmatpush.bf16.msrb.mxu0 %v12656_v20  ;;  %v12749_v20 = vld [vmem:[#allocation9 + $0xd10] sm:$0xf0]  ;;  %v11316_v2 = vor.u32 %v13708_v3, %v11315_v17  ;;  %v11299_v15 = vld [vmem:[#allocation9 + $0x1a8] sm:$0xf]  ;;  %v13700_v17 = vld [vmem:[#allocation9 + $0x194] sm:$0xf0] }
 0x385   :  { %v12752_v21 = vor.u32 %v14065_v5, %v12749_v20  ;;  %v11443_v5 = vld [vmem:[#allocation9 + $0x2c8] sm:$0xf]  ;;  %v13740_v20 = vld [vmem:[#allocation9 + $0x2d4] sm:$0xf0] }
 0x386   :  { %8227 = vmatpush.bf16.msrb.mxu1 %v12784_v59  ;;  %v11204_v59 = vor.u32 %v13680_v12, %v11203_v49  ;;  %8263 = vmatpush.bf16.msrb.mxu3 %v13072_v63  ;;  %v11188_v12 = vor.u32 %v13676_v33, %v11187_v46  ;;  %v13040_v63 = vor.u32 %v14137_v37, %v13037_v45  ;;  %v11427_v58 = vld [vmem:[#allocation9 + $0x2a8] sm:$0xf]  ;;  %v13668_v46 = vld [vmem:[#allocation9 + $0x94] sm:$0xf0]  ;;  %v14129_v37 = vld [vmem:[#allocation9 + $0xf04] sm:$0xf] }
 0x387   :  { %8247 = vmatpush.bf16.msrb.mxu2 %v12896_v14  ;;  %v13704_v14 = vld [vmem:[#allocation9 + $0x1b4] sm:$0xf0]  ;;  %v11155_v45 = vld [vmem:[#allocation9 + $0x88] sm:$0xf] }
 0x388   :  { %8209 = vmatpush.bf16.msrb.mxu0 %v12640_v11  ;;  %v14948_v11 = vpop.f32.mrf.mxu2  ;;  %v13736_v33 = vld [vmem:[#allocation9 + $0x2b4] sm:$0xf0]  ;;  %v11283_v36 = vld [vmem:[#allocation9 + $0x188] sm:$0xf] }
 0x389   :  { %8140 = vmatmul.bf16.gmra.mxu0 %v14648_v10  ;;  %v11267_v10 = vld [vmem:[#allocation9 + $0x168] sm:$0xf] }
 0x38a   :  { %8228 = vmatpush.bf16.msrb.mxu1 %v12768_v31  ;;  %v14950_v49 = vpop.f32.mrf.mxu0  ;;  %v14952_v31 = vpop.f32.mrf.mxu1  ;;  %8264 = vmatpush.bf16.msrb.mxu3 %v13056_v52 }
 0x38b   :  { %8248 = vmatpush.bf16.msrb.mxu2 %v12880_v44  ;;  %v14957_v52 = vpop.f32.mrf.mxu3 }
 0x38c   :  { %8210 = vmatpush.bf16.msrb.mxu0 %v12624_v30  ;;  %v14133_v30 = vld [vmem:[#allocation9 + $0xf24] sm:$0xf]  ;;  %8178 = vmatmul.bf16.gmra.mxu2 %v14694_v29  ;;  %v13005_v29 = vld [vmem:[#allocation9 + $0xf10] sm:$0xf0] }
 0x38d   :  { %8159 = vmatmul.bf16.gmra.mxu1 %v15474_v55  ;;  %v13024_v44 = vor.u32 %v14133_v30, %v13021_v38  ;;  %v13664_v30 = vld [vmem:[#allocation9 + $0x74] sm:$0xf0]  ;;  %v13008_v55 = vor.u32 %v14129_v37, %v13005_v29  ;;  %v11571_v37 = vld [vmem:[#allocation9 + $0x3c8] sm:$0xf] }
 0x38e   :  { %8229 = vmatpush.bf16.msrb.mxu1 %v12752_v21  ;;  %v11444_v21 = vor.u32 %v13740_v20, %v11443_v5  ;;  %8265 = vmatpush.bf16.msrb.mxu3 %v13040_v63  ;;  %v11587_v5 = vld [vmem:[#allocation9 + $0x3e8] sm:$0xf]  ;;  %v11428_v20 = vor.u32 %v13736_v33, %v11427_v58  ;;  %v11284_v63 = vor.u32 %v13700_v17, %v11283_v36  ;;  %v13732_v38 = vld [vmem:[#allocation9 + $0x294] sm:$0xf0] }
 0x38f   :  { %8317 = vmatpush.bf16.msra.mxu2 %v11460_v1  ;;  %v11395_v58 = vld [vmem:[#allocation9 + $0x268] sm:$0xf]  ;;  %v13728_v33 = vld [vmem:[#allocation9 + $0x274] sm:$0xf0] }
 0x390   :  { %8279 = vmatpush.bf16.msra.mxu0 %v11204_v59  ;;  %v11172_v59 = vor.u32 %v13672_v7, %v11171_v28  ;;  %v14959_v3 = vpop.f32.mrf.mxu2  ;;  %v13776_v7 = vld [vmem:[#allocation9 + $0x3f4] sm:$0xf0] }
 0x391   :  { %15492 = vst [vmem:[#allocation46_spill] sm:$0xff] %v14959_v3  ;;  %v11588_v3 = vor.u32 %v13776_v7, %v11587_v5  ;;  %v13692_v36 = vld [vmem:[#allocation9 + $0x154] sm:$0xf0] }
 0x392   :  { %8298 = vmatpush.bf16.msra.mxu1 %v11332_v6  ;;  %v11300_v6 = vor.u32 %v13704_v14, %v11299_v15  ;;  %v14962_v28 = vpop.f32.mrf.mxu0  ;;  %v14964_v1 = vpop.f32.mrf.mxu1  ;;  %v11411_v15 = vld [vmem:[#allocation9 + $0x288] sm:$0xf]  ;;  %8266 = vmatpush.bf16.msrb.mxu3 %v13024_v44 }
 0x393   :  { %15494 = vst [vmem:[#allocation47_spill] sm:$0xff] %v14964_v1  ;;  %8318 = vmatpush.bf16.msra.mxu2 %v11444_v21  ;;  %v11139_v14 = vld [vmem:[#allocation9 + $0x68] sm:$0xf]  ;;  %v7757_v1 = vadd.f32 %v14892_v39, %v14878_v19  ;;  %v11412_v21 = vor.u32 %v13732_v38, %v11411_v15  ;;  %v14968_v29 = vpop.f32.mrf.mxu3  ;;  %v13772_v19 = vld [vmem:[#allocation9 + $0x3d4] sm:$0xf0] }
 0x394   :  { %8280 = vmatpush.bf16.msra.mxu0 %v11188_v12  ;;  %v15493_v12 = vld [vmem:[#allocation39_spill] sm:$0xff]  ;;  %v11251_v44 = vld [vmem:[#allocation9 + $0x148] sm:$0xf] }
 0x395   :  { %8192 = vmatmul.bf16.vlgmr.msra.gmra.mxu3 %v15493_v12  ;;  %v13696_v12 = vld [vmem:[#allocation9 + $0x174] sm:$0xf0]  ;;  %v7776_v39 = vadd.f32 %v14894_v13, %v7757_v1  ;;  %v11252_v7 = vor.u32 %v13692_v36, %v11251_v44  ;;  %v11572_v13 = vor.u32 %v13772_v19, %v11571_v37  ;;  %v11235_v1 = vld [vmem:[#allocation9 + $0x128] sm:$0xf] }
 0x396   :  { %8299 = vmatpush.bf16.msra.mxu1 %v11316_v2  ;;  %v11156_v2 = vor.u32 %v13668_v46, %v11155_v45  ;;  %v11123_v45 = vld [vmem:[#allocation9 + $0x48] sm:$0xf]  ;;  %v13660_v46 = vld [vmem:[#allocation9 + $0x54] sm:$0xf0]  ;;  %8267 = vmatpush.bf16.msrb.mxu3 %v13008_v55  ;;  %v7740_v55 = vadd.f32 %v14880_v0, %v14882_v56 }
 0x397   :  { %8319 = vmatpush.bf16.msra.mxu2 %v11428_v20  ;;  %v11379_v20 = vld [vmem:[#allocation9 + $0x248] sm:$0xf]  ;;  %v7795_v15 = vadd.f32 %v14901_v47, %v7776_v39  ;;  %v13768_v56 = vld [vmem:[#allocation9 + $0x3b4] sm:$0xf0] }
 0x398   :  { %8281 = vmatpush.bf16.msra.mxu0 %v11172_v59  ;;  %v11140_v59 = vor.u32 %v13664_v30, %v11139_v14  ;;  %v14970_v17 = vpop.f32.mrf.mxu2  ;;  %v13724_v14 = vld [vmem:[#allocation9 + $0x254] sm:$0xf0]  ;;  %v7759_v38 = vadd.f32 %v14904_v32, %v7740_v55  ;;  %v11555_v0 = vld [vmem:[#allocation9 + $0x3a8] sm:$0xf] }
 0x399   :  { %v13688_v30 = vld [vmem:[#allocation9 + $0x134] sm:$0xf0]  ;;  %8211 = vmatmul.bf16.vlgmr.msrb.gmra.mxu0 %v14727_v54  ;;  %v11380_v47 = vor.u32 %v13724_v14, %v11379_v20  ;;  %v7814_v32 = vadd.f32 %v14908_v40, %v7795_v15  ;;  %v11219_v44 = vld [vmem:[#allocation9 + $0x108] sm:$0xf]  ;;  %v15495_v20 = vld [vmem:[#allocation40_spill] sm:$0xff] }
 0x39a   :  { %8300 = vmatpush.bf16.msra.mxu1 %v11300_v6  ;;  %v11268_v6 = vor.u32 %v13696_v12, %v11267_v10  ;;  %8336 = vmatpush.bf16.msra.mxu3 %v11588_v3  ;;  %v14975_v5 = vpop.f32.mrf.mxu1  ;;  %v11124_v10 = vor.u32 %v13660_v46, %v11123_v45  ;;  %v11396_v12 = vor.u32 %v13728_v33, %v11395_v58  ;;  %v13656_v3 = vld [vmem:[#allocation9 + $0x34] sm:$0xf0]  ;;  %v11091_v45 = vld [vmem:[#allocation9 + $0x8] sm:$0xf] }
 0x39b   :  { %8320 = vmatpush.bf16.msra.mxu2 %v11412_v21  ;;  %v11363_v21 = vld [vmem:[#allocation9 + $0x228] sm:$0xf]  ;;  %v13720_v58 = vld [vmem:[#allocation9 + $0x234] sm:$0xf0]  ;;  %v11556_v33 = vor.u32 %v13768_v56, %v11555_v0  ;;  %v7778_v19 = vadd.f32 %v14906_v4, %v7759_v38  ;;  %v14995_v4 = vpop.f32.mrf.mxu3 }
 0x39c   :  { %8282 = vmatpush.bf16.msra.mxu0 %v11156_v2  ;;  %v14973_v2 = vpop.f32.mrf.mxu0  ;;  %8249 = vmatmul.bf16.vlgmr.msrb.gmra.mxu2 %v14843_v57  ;;  %v13652_v46 = vld [vmem:[#allocation9 + $0x14] sm:$0xf0]  ;;  %v11539_v37 = vld [vmem:[#allocation9 + $0x388] sm:$0xf] }
 0x39d   :  { %8230 = vmatmul.bf16.vlgmr.msrb.gmra.mxu1 %v14840_v25  ;;  %v13684_v36 = vld [vmem:[#allocation9 + $0x114] sm:$0xf0]  ;;  %v11715_v55 = vld [vmem:[#allocation9 + $0x4e8] sm:$0xf]  ;;  %v11092_v40 = vor.u32 %v13652_v46, %v11091_v45 }
 0x39e   :  { %8301 = vmatpush.bf16.msra.mxu1 %v11284_v63  ;;  %v11107_v63 = vld [vmem:[#allocation9 + $0x28] sm:$0xf]  ;;  %8337 = vmatpush.bf16.msra.mxu3 %v11572_v13  ;;  %v13840_v14 = vld [vmem:[#allocation9 + $0x5f4] sm:$0xf0]  ;;  %v7797_v13 = vadd.f32 %v14910_v50, %v7778_v19 }
 0x39f   :  { %8321 = vmatpush.bf16.msra.mxu2 %v11396_v12  ;;  %v13808_v12 = vld [vmem:[#allocation9 + $0x4f4] sm:$0xf0]  ;;  %v11843_v15 = vld [vmem:[#allocation9 + $0x5e8] sm:$0xf] }
 0x3a0   :  { %8283 = vmatpush.bf16.msra.mxu0 %v11140_v59  ;;  %v11108_v59 = vor.u32 %v13656_v3, %v11107_v63  ;;  %v14986_v39 = vpop.f32.mrf.mxu2  ;;  %v13716_v38 = vld [vmem:[#allocation9 + $0x214] sm:$0xf0]  ;;  %v11716_v56 = vor.u32 %v13808_v12, %v11715_v55  ;;  %v11844_v45 = vor.u32 %v13840_v14, %v11843_v15  ;;  %v11507_v55 = vld [vmem:[#allocation9 + $0x348] sm:$0xf] }
 0x3a1   :  { %v13872_v46 = vld [vmem:[#allocation9 + $0x6f4] sm:$0xf0]  ;;  %v11683_v15 = vld [vmem:[#allocation9 + $0x4a8] sm:$0xf] }
 0x3a2   :  { %8302 = vmatpush.bf16.msra.mxu1 %v11268_v6  ;;  %v11236_v6 = vor.u32 %v13688_v30, %v11235_v1  ;;  %v14992_v3 = vpop.f32.mrf.mxu1  ;;  %v11364_v1 = vor.u32 %v13720_v58, %v11363_v21  ;;  %v11220_v30 = vor.u32 %v13684_v36, %v11219_v44  ;;  %8338 = vmatpush.bf16.msra.mxu3 %v11556_v33  ;;  %v13760_v57 = vld [vmem:[#allocation9 + $0x374] sm:$0xf0] }
 0x3a3   :  { %8322 = vmatpush.bf16.msra.mxu2 %v11380_v47  ;;  %v7816_v47 = vadd.f32 %v14919_v9, %v7797_v13  ;;  %v13804_v58 = vld [vmem:[#allocation9 + $0x4d4] sm:$0xf0] }
 0x3a4   :  { %8284 = vmatpush.bf16.msra.mxu0 %v11124_v10  ;;  %v13764_v10 = vld [vmem:[#allocation9 + $0x394] sm:$0xf0]  ;;  %v14990_v63 = vpop.f32.mrf.mxu0 }
 0x3a5   :  { %8197 = vmatmul.bf16.gmra.mxu3 %v15495_v20  ;;  %v11540_v0 = vor.u32 %v13764_v10, %v11539_v37  ;;  %v11523_v20 = vld [vmem:[#allocation9 + $0x368] sm:$0xf]  ;;  %v13836_v36 = vld [vmem:[#allocation9 + $0x5d4] sm:$0xf0] }
 0x3a6   :  { %8303 = vmatpush.bf16.msra.mxu1 %v11252_v7  ;;  %v7833_v7 = vadd.f32 %v14930_v34, %v7814_v32  ;;  %v11347_v34 = vld [vmem:[#allocation9 + $0x208] sm:$0xf]  ;;  %v13868_v9 = vld [vmem:[#allocation9 + $0x6d4] sm:$0xf0] }
 0x3a7   :  { %v11971_v32 = vld [vmem:[#allocation9 + $0x6e8] sm:$0xf]  ;;  %8323 = vmatpush.bf16.msra.mxu2 %v11364_v1  ;;  %v11348_v21 = vor.u32 %v13716_v38, %v11347_v34  ;;  %8339 = vmatpush.bf16.msra.mxu3 %v11540_v0  ;;  %v13756_v12 = vld [vmem:[#allocation9 + $0x354] sm:$0xf0] }
 0x3a8   :  { %8285 = vmatpush.bf16.msra.mxu0 %v11108_v59  ;;  %v7762_v59 = vadd.f32 %v14912_v53, %v14888_v26  ;;  %v7852_v50 = vadd.f32 %v14932_v23, %v7833_v7  ;;  %v11972_v44 = vor.u32 %v13872_v46, %v11971_v32  ;;  %v11524_v26 = vor.u32 %v13760_v57, %v11523_v20  ;;  %v11827_v53 = vld [vmem:[#allocation9 + $0x5c8] sm:$0xf]  ;;  %v15004_v10 = vpop.f32.mrf.mxu2  ;;  %v13832_v34 = vld [vmem:[#allocation9 + $0x5b4] sm:$0xf0] }
 0x3a9   :  { %v11955_v37 = vld [vmem:[#allocation9 + $0x6c8] sm:$0xf]  ;;  %v7835_v23 = vadd.f32 %v14942_v43, %v7816_v47  ;;  %v7745_v57 = vadd.f32 %v14896_v24, %v14890_v8  ;;  %v13800_v43 = vld [vmem:[#allocation9 + $0x4b4] sm:$0xf0]  ;;  %v11508_v1 = vor.u32 %v13756_v12, %v11507_v55  ;;  %v15016_v8 = vpop.f32.mrf.mxu3  ;;  %8216 = vmatmul.bf16.gmra.mxu0 %v14738_v41 }
 0x3aa   :  { %8304 = vmatpush.bf16.msra.mxu1 %v11236_v6  ;;  %v11699_v6 = vld [vmem:[#allocation9 + $0x4c8] sm:$0xf]  ;;  %v7871_v33 = vadd.f32 %v14939_v42, %v7852_v50  ;;  %v7781_v19 = vadd.f32 %v14914_v51, %v7762_v59  ;;  %v15008_v42 = vpop.f32.mrf.mxu1  ;;  %v11828_v51 = vor.u32 %v13836_v36, %v11827_v53  ;;  %v11956_v13 = vor.u32 %v13868_v9, %v11955_v37  ;;  %v13864_v24 = vld [vmem:[#allocation9 + $0x6b4] sm:$0xf0] }
 0x3ab   :  { %8324 = vmatpush.bf16.msra.mxu2 %v11348_v21  ;;  %8340 = vmatpush.bf16.msra.mxu3 %v11524_v26  ;;  %v11939_v38 = vld [vmem:[#allocation9 + $0x6a8] sm:$0xf]  ;;  %v7764_v0 = vadd.f32 %v14924_v27, %v7745_v57  ;;  %v11684_v59 = vor.u32 %v13800_v43, %v11683_v15  ;;  %v8938_v27 = vld [vmem:[#allocation11] sm:$0xf]  ;;  %v13796_v50 = vld [vmem:[#allocation9 + $0x494] sm:$0xf0] }
 0x3ac   :  { %8286 = vmatpush.bf16.msra.mxu0 %v11092_v40  ;;  %v15006_v7 = vpop.f32.mrf.mxu0  ;;  %v11700_v40 = vor.u32 %v13804_v58, %v11699_v6  ;;  %v7800_v20 = vadd.f32 %v14921_v48, %v7781_v19  ;;  %v7890_v14 = vadd.f32 %v14957_v52, %v7871_v33  ;;  %v11491_v48 = vld [vmem:[#allocation9 + $0x328] sm:$0xf]  ;;  %v13752_v52 = vld [vmem:[#allocation9 + $0x334] sm:$0xf0]  ;;  %8254 = vmatmul.bf16.gmra.mxu2 %v14862_v62 }
 0x3ad   :  { %8235 = vmatmul.bf16.gmra.mxu1 %v14860_v18  ;;  %v11667_v46 = vld [vmem:[#allocation9 + $0x488] sm:$0xf]  ;;  %v11940_v21 = vor.u32 %v13864_v24, %v11939_v38  ;;  %v11492_v6 = vor.u32 %v13752_v52, %v11491_v48  ;;  %v13828_v33 = vld [vmem:[#allocation9 + $0x594] sm:$0xf0] }
 0x3ae   :  { %8305 = vmatpush.bf16.msra.mxu1 %v11220_v30  ;;  %v11811_v30 = vld [vmem:[#allocation9 + $0x5a8] sm:$0xf]  ;;  %v7909_v32 = vadd.f32 %v14973_v2, %v7890_v14  ;;  %v7819_v47 = vadd.f32 %v14934_v16, %v7800_v20  ;;  %v13860_v53 = vld [vmem:[#allocation9 + $0x694] sm:$0xf0]  ;;  %v11668_v9 = vor.u32 %v13796_v50, %v11667_v46 }
 0x3af   :  { %8393 = vmatpush.bf16.msrb.mxu2 %v11972_v44  ;;  %8341 = vmatpush.bf16.msra.mxu3 %v11508_v1  ;;  %v11795_v58 = vld [vmem:[#allocation9 + $0x588] sm:$0xf]  ;;  %v7783_v44 = vadd.f32 %v14926_v35, %v7764_v0  ;;  %v13748_v36 = vld [vmem:[#allocation9 + $0x314] sm:$0xf0] }
 0x3b0   :  { %8355 = vmatpush.bf16.msrb.mxu0 %v11716_v56  ;;  %v7854_v56 = vadd.f32 %v14944_v22, %v7835_v23  ;;  %v11812_v22 = vor.u32 %v13832_v34, %v11811_v30  ;;  %v11923_v2 = vld [vmem:[#allocation9 + $0x688] sm:$0xf]  ;;  %v15025_v26 = vpop.f32.mrf.mxu2  ;;  %v7838_v37 = vadd.f32 %v14950_v49, %v7819_v47  ;;  %v7928_v19 = vadd.f32 %v14975_v5, %v7909_v32  ;;  %v13904_v12 = vld [vmem:[#allocation9 + $0x7f4] sm:$0xf0] }
 0x3b1   :  { %v12099_v55 = vld [vmem:[#allocation9 + $0x7e8] sm:$0xf]  ;;  %v7802_v35 = vadd.f32 %v14928_v61, %v7783_v44  ;;  %v11796_v57 = vor.u32 %v13828_v33, %v11795_v58  ;;  %v13792_v49 = vld [vmem:[#allocation9 + $0x474] sm:$0xf0]  ;;  %v11924_v15 = vor.u32 %v13860_v53, %v11923_v2  ;;  %v7965_v1 = vpop.f32.mrf.mxu3 }
 0x3b2   :  { %8374 = vmatpush.bf16.msrb.mxu1 %v11844_v45  ;;  %v7873_v45 = vadd.f32 %v14948_v11, %v7854_v56  ;;  %v11475_v11 = vld [vmem:[#allocation9 + $0x308] sm:$0xf]  ;;  %v15032_v23 = vpop.f32.mrf.mxu1  ;;  %v7947_v5 = vadd.f32 %v14986_v39, %v7928_v19  ;;  %v13856_v34 = vld [vmem:[#allocation9 + $0x674] sm:$0xf0]  ;;  %v12100_v61 = vor.u32 %v13904_v12, %v12099_v55 }
 0x3b3   :  { %8394 = vmatpush.bf16.msrb.mxu2 %v11956_v13  ;;  %v11651_v20 = vld [vmem:[#allocation9 + $0x468] sm:$0xf]  ;;  %8342 = vmatpush.bf16.msra.mxu3 %v11492_v6  ;;  %v11476_v43 = vor.u32 %v13748_v36, %v11475_v11  ;;  %v13824_v13 = vld [vmem:[#allocation9 + $0x574] sm:$0xf0] }
 0x3b4   :  { %8356 = vmatpush.bf16.msrb.mxu0 %v11700_v40  ;;  %v15030_v16 = vpop.f32.mrf.mxu0  ;;  %v7892_v40 = vadd.f32 %v14968_v29, %v7873_v45  ;;  %v11779_v14 = vld [vmem:[#allocation9 + $0x568] sm:$0xf]  ;;  %v7857_v29 = vadd.f32 %v14952_v31, %v7838_v37  ;;  %v7966_v0 = vadd.f32 %v7965_v1, %v7947_v5  ;;  %v11652_v56 = vor.u32 %v13792_v49, %v11651_v20  ;;  %v13788_v32 = vld [vmem:[#allocation9 + $0x454] sm:$0xf0]  ;;  %v15497_v45 = vld [vmem:[#allocation46_spill] sm:$0xff] }
 0x3b5   :  { %8268 = vmatmul.bf16.vlgmr.msrb.gmra.mxu3 %v14868_v60  ;;  %v11907_v30 = vld [vmem:[#allocation9 + $0x668] sm:$0xf]  ;;  %v11780_v48 = vor.u32 %v13824_v13, %v11779_v14  ;;  %v13820_v31 = vld [vmem:[#allocation9 + $0x554] sm:$0xf0] }
 0x3b6   :  { %8375 = vmatpush.bf16.msrb.mxu1 %v11828_v51  ;;  %v15037_v51 = vperm.slane %v8938_v27, 0  ;;  %v7911_v38 = vadd.f32 %v14990_v63, %v7892_v40  ;;  %v15496_v39 = vld [vmem:[#allocation45_spill] sm:$0xff]  ;;  %v7876_v27 = vadd.f32 %v15497_v45, %v7857_v29  ;;  %v11908_v46 = vor.u32 %v13856_v34, %v11907_v30  ;;  %v13900_v63 = vld [vmem:[#allocation9 + $0x7d4] sm:$0xf0] }
 0x3b7   :  { %8395 = vmatpush.bf16.msrb.mxu2 %v11940_v21  ;;  %v7821_v24 = vadd.f32 %v15496_v39, %v7802_v35  ;;  %v11635_v52 = vld [vmem:[#allocation9 + $0x448] sm:$0xf]  ;;  %8343 = vmatpush.bf16.msra.mxu3 %v11476_v43  ;;  %v13852_v58 = vld [vmem:[#allocation9 + $0x654] sm:$0xf0] }
 0x3b8   :  { %8357 = vmatpush.bf16.msrb.mxu0 %v11684_v59  ;;  %v11763_v59 = vld [vmem:[#allocation9 + $0x548] sm:$0xf]  ;;  %v15045_v21 = vpop.f32.mrf.mxu2  ;;  %v7930_v33 = vadd.f32 %v14992_v3, %v7911_v38  ;;  %v11636_v53 = vor.u32 %v13788_v32, %v11635_v52  ;;  %v13816_v40 = vld [vmem:[#allocation9 + $0x534] sm:$0xf0] }
 0x3b9   :  { %v12083_v50 = vld [vmem:[#allocation9 + $0x7c8] sm:$0xf]  ;;  %v7840_v47 = vadd.f32 %v14962_v28, %v7821_v24  ;;  %v11764_v36 = vor.u32 %v13820_v31, %v11763_v59  ;;  %v7895_v28 = vadd.f32 %v14995_v4, %v7876_v27  ;;  %v15498_v20 = vld [vmem:[#allocation47_spill] sm:$0xff]  ;;  %v7967_v5 = vpop.f32.mrf.mxu3 }
 0x3ba   :  { %8376 = vmatpush.bf16.msrb.mxu1 %v11812_v22  ;;  %v8948_v22 = vadd.f32 %v15037_v51, %v7966_v0  ;;  %v11891_v6 = vld [vmem:[#allocation9 + $0x648] sm:$0xf]  ;;  %v8003_v44 = vpop.f32.mrf.mxu1  ;;  %v12084_v37 = vor.u32 %v13900_v63, %v12083_v50  ;;  %v7949_v12 = vadd.f32 %v15004_v10, %v7930_v33  ;;  %v15500_v43 = vld [vmem:[#allocation19_spill] sm:$0xff] }
 0x3bb   :  { %8396 = vmatpush.bf16.msrb.mxu2 %v11924_v15  ;;  %8412 = vmatpush.bf16.msrb.mxu3 %v12100_v61  ;;  %v11619_v19 = vld [vmem:[#allocation9 + $0x428] sm:$0xf]  ;;  %v11892_v35 = vor.u32 %v13852_v58, %v11891_v6  ;;  %v7859_v49 = vadd.f32 %v15498_v20, %v7840_v47  ;;  %v13848_v13 = vld [vmem:[#allocation9 + $0x634] sm:$0xf0]  ;;  %v7914_v1 = vadd.f32 %v15006_v7, %v7895_v28  ;;  %v15502_v47 = vld [vmem:[#allocation44_spill] sm:$0xff] }
 0x3bc   :  { %8358 = vmatpush.bf16.msrb.mxu0 %v11668_v9  ;;  %8964 = vst [vmem:[#allocation12] sm:$0xff] %v8948_v22  ;;  %v7984_v2 = vpop.f32.mrf.mxu0  ;;  %v13784_v9 = vld [vmem:[#allocation9 + $0x434] sm:$0xf0]  ;;  %v11747_v55 = vld [vmem:[#allocation9 + $0x528] sm:$0xf]  ;;  %v7968_v30 = vadd.f32 %v7967_v5, %v7949_v12 }
 0x3bd   :  { %v8004_v11 = vadd.f32 %v8003_v44, %v7984_v2  ;;  %v12067_v3 = vld [vmem:[#allocation9 + $0x7a8] sm:$0xf]  ;;  %8306 = vmatmul.bf16.vlgmr.msra.gmra.mxu1 %v15500_v43  ;;  %v11620_v10 = vor.u32 %v13784_v9, %v11619_v19  ;;  %v13780_v61 = vld [vmem:[#allocation9 + $0x414] sm:$0xf0]  ;;  %v11748_v38 = vor.u32 %v13816_v40, %v11747_v55  ;;  %v7933_v50 = vadd.f32 %v15008_v42, %v7914_v1 }
 0x3be   :  { %8377 = vmatpush.bf16.msrb.mxu1 %v11796_v57  ;;  %v13896_v57 = vld [vmem:[#allocation9 + $0x7b4] sm:$0xf0]  ;;  %v15499_v15 = vld [vmem:[#allocation17_spill] sm:$0xff]  ;;  %v8952_v52 = vadd.f32 %v15037_v51, %v7968_v30 }
 0x3bf   :  { %8397 = vmatpush.bf16.msrb.mxu2 %v11908_v46  ;;  %8287 = vmatmul.bf16.vlgmr.msra.gmra.mxu0 %v15499_v15  ;;  %v11875_v14 = vld [vmem:[#allocation9 + $0x628] sm:$0xf]  ;;  %v12068_v0 = vor.u32 %v13896_v57, %v12067_v3  ;;  %v13844_v24 = vld [vmem:[#allocation9 + $0x614] sm:$0xf0]  ;;  %v7952_v42 = vadd.f32 %v15025_v26, %v7933_v50  ;;  %v15503_v50 = vld [vmem:[#allocation18_spill] sm:$0xff] }
 0x3c0   :  { %8359 = vmatpush.bf16.msrb.mxu0 %v11652_v56  ;;  %v15501_v4 = vld [vmem:[#allocation21_spill] sm:$0xff]  ;;  %8413 = vmatpush.bf16.msrb.mxu3 %v12084_v37  ;;  %v13812_v56 = vld [vmem:[#allocation9 + $0x514] sm:$0xf0]  ;;  %v11876_v7 = vor.u32 %v13848_v13, %v11875_v14  ;;  %v8022_v27 = vpop.f32.mrf.mxu2  ;;  %8968 = vst [vmem:[#allocation12 + $0x20] sm:$0xff] %v8952_v52 }
 0x3c1   :  { %8325 = vmatmul.bf16.vlgmr.msra.gmra.mxu2 %v15501_v4  ;;  %v11603_v34 = vld [vmem:[#allocation9 + $0x408] sm:$0xf]  ;;  %v13892_v59 = vld [vmem:[#allocation9 + $0x794] sm:$0xf0]  ;;  %v15058_v63 = vadd.f32 %v8022_v27, %v8004_v11  ;;  %v7970_v28 = vpop.f32.mrf.mxu3  ;;  %v13802_v4 = vld [vmem:[#allocation9 + $0x4cc] sm:$0xf] }
 0x3c2   :  { %8378 = vmatpush.bf16.msrb.mxu1 %v11780_v48  ;;  %v11731_v29 = vld [vmem:[#allocation9 + $0x508] sm:$0xf]  ;;  %v7878_v48 = vadd.f32 %v14970_v17, %v7859_v49  ;;  %v13936_v22 = vld [vmem:[#allocation9 + $0x8f4] sm:$0xf0]  ;;  %v8005_v17 = vpop.f32.mrf.mxu1  ;;  %v11604_v58 = vor.u32 %v13780_v61, %v11603_v34  ;;  %v7971_v20 = vadd.f32 %v7970_v28, %v7952_v42 }
 0x3c3   :  { %v11859_v39 = vld [vmem:[#allocation9 + $0x608] sm:$0xf]  ;;  %8398 = vmatpush.bf16.msrb.mxu2 %v11892_v35  ;;  %v13968_v31 = vld [vmem:[#allocation9 + $0x9f4] sm:$0xf0] }
 0x3c4   :  { %8360 = vmatpush.bf16.msrb.mxu0 %v11636_v53  ;;  %v12051_v32 = vld [vmem:[#allocation9 + $0x788] sm:$0xf]  ;;  %v7986_v6 = vpop.f32.mrf.mxu0  ;;  %v14000_v2 = vld [vmem:[#allocation9 + $0xaf4] sm:$0xf0]  ;;  %8414 = vmatpush.bf16.msrb.mxu3 %v12068_v0  ;;  %v11732_v53 = vor.u32 %v13812_v56, %v11731_v29  ;;  %v7897_v37 = vadd.f32 %v15016_v8, %v7878_v48  ;;  %v11860_v11 = vor.u32 %v13844_v24, %v11859_v39 }
 0x3c5   :  { %v12227_v45 = vld [vmem:[#allocation9 + $0x8e8] sm:$0xf]  ;;  %8273 = vmatmul.bf16.gmra.mxu3 %v15502_v47  ;;  %v8006_v44 = vadd.f32 %v8005_v17, %v7986_v6  ;;  %v13888_v55 = vld [vmem:[#allocation9 + $0x774] sm:$0xf0]  ;;  %v8956_v14 = vadd.f32 %v15037_v51, %v7971_v20  ;;  %v15504_v6 = vld [vmem:[#allocation20_spill] sm:$0xff] }
 0x3c6   :  { %8379 = vmatpush.bf16.msrb.mxu1 %v11764_v36  ;;  %v12355_v46 = vld [vmem:[#allocation9 + $0x9e8] sm:$0xf]  ;;  %v12052_v36 = vor.u32 %v13892_v59, %v12051_v32  ;;  %v12228_v19 = vor.u32 %v13936_v22, %v12227_v45  ;;  %v13932_v3 = vld [vmem:[#allocation9 + $0x8d4] sm:$0xf0]  ;;  %v7916_v57 = vadd.f32 %v15030_v16, %v7897_v37  ;;  %v11125_v47 = vld [vmem:[#allocation9 + $0x58] sm:$0xf0] }
 0x3c7   :  { %v12483_v33 = vld [vmem:[#allocation9 + $0xae8] sm:$0xf]  ;;  %8399 = vmatpush.bf16.msrb.mxu2 %v11876_v7  ;;  %v12356_v12 = vor.u32 %v13968_v31, %v12355_v46  ;;  %v13964_v5 = vld [vmem:[#allocation9 + $0x9d4] sm:$0xf0]  ;;  %8972 = vst [vmem:[#allocation12 + $0x40] sm:$0xff] %v8956_v14 }
 0x3c8   :  { %8361 = vmatpush.bf16.msrb.mxu0 %v11620_v10  ;;  %v12035_v9 = vld [vmem:[#allocation9 + $0x768] sm:$0xf]  ;;  %v12484_v35 = vor.u32 %v14000_v2, %v12483_v33  ;;  %8415 = vmatpush.bf16.msrb.mxu3 %v12052_v36  ;;  %v13996_v1 = vld [vmem:[#allocation9 + $0xad4] sm:$0xf0]  ;;  %v8024_v34 = vpop.f32.mrf.mxu2  ;;  %v7935_v29 = vadd.f32 %v15032_v23, %v7916_v57  ;;  %v15505_v2 = vld [vmem:[#allocation22_spill] sm:$0xff] }
 0x3c9   :  { %v12211_v40 = vld [vmem:[#allocation9 + $0x8c8] sm:$0xf]  ;;  %v12036_v49 = vor.u32 %v13888_v55, %v12035_v9  ;;  %v13884_v10 = vld [vmem:[#allocation9 + $0x754] sm:$0xf0]  ;;  %v7972_v31 = vpop.f32.mrf.mxu3 }
 0x3ca   :  { %8380 = vmatpush.bf16.msrb.mxu1 %v11748_v38  ;;  %v12339_v8 = vld [vmem:[#allocation9 + $0x9c8] sm:$0xf]  ;;  %v12212_v13 = vor.u32 %v13932_v3, %v12211_v40  ;;  %v13928_v61 = vld [vmem:[#allocation9 + $0x8b4] sm:$0xf0]  ;;  %v15066_v38 = vadd.f32 %v8024_v34, %v8006_v44  ;;  %v8008_v56 = vpop.f32.mrf.mxu1  ;;  %v7954_v45 = vadd.f32 %v15045_v21, %v7935_v29 }
 0x3cb   :  { %v12467_v26 = vld [vmem:[#allocation9 + $0xac8] sm:$0xf]  ;;  %8400 = vmatpush.bf16.msrb.mxu2 %v11860_v11  ;;  %v12340_v39 = vor.u32 %v13964_v5, %v12339_v8  ;;  %v13960_v32 = vld [vmem:[#allocation9 + $0x9b4] sm:$0xf0] }
 0x3cc   :  { %8362 = vmatpush.bf16.msrb.mxu0 %v11604_v58  ;;  %v12019_v30 = vld [vmem:[#allocation9 + $0x748] sm:$0xf]  ;;  %v7989_v0 = vpop.f32.mrf.mxu0  ;;  %8416 = vmatpush.bf16.msrb.mxu3 %v12036_v49  ;;  %v12468_v48 = vor.u32 %v13996_v1, %v12467_v26  ;;  %v13992_v22 = vld [vmem:[#allocation9 + $0xab4] sm:$0xf0]  ;;  %v7973_v33 = vadd.f32 %v7972_v31, %v7954_v45 }
 0x3cd   :  { %v12195_v16 = vld [vmem:[#allocation9 + $0x8a8] sm:$0xf]  ;;  %v8009_v24 = vadd.f32 %v8008_v56, %v7989_v0  ;;  %v12020_v52 = vor.u32 %v13884_v10, %v12019_v30  ;;  %v13880_v23 = vld [vmem:[#allocation9 + $0x734] sm:$0xf0]  ;;  %8311 = vmatmul.bf16.gmra.mxu1 %v15504_v6 }
 0x3ce   :  { %8381 = vmatpush.bf16.msrb.mxu1 %v11732_v53  ;;  %v12323_v7 = vld [vmem:[#allocation9 + $0x9a8] sm:$0xf]  ;;  %v12196_v27 = vor.u32 %v13928_v61, %v12195_v16  ;;  %v13924_v58 = vld [vmem:[#allocation9 + $0x894] sm:$0xf0] }
 0x3cf   :  { %8469 = vmatpush.bf16.msra.mxu2 %v12484_v35  ;;  %v12451_v59 = vld [vmem:[#allocation9 + $0xaa8] sm:$0xf]  ;;  %8292 = vmatmul.bf16.gmra.mxu0 %v15503_v50  ;;  %v12324_v44 = vor.u32 %v13960_v32, %v12323_v7  ;;  %v13956_v37 = vld [vmem:[#allocation9 + $0x994] sm:$0xf0]  ;;  %v13658_v50 = vld [vmem:[#allocation9 + $0x4c] sm:$0xf] }
 0x3d0   :  { %8431 = vmatpush.bf16.msra.mxu0 %v12228_v19  ;;  %v12003_v46 = vld [vmem:[#allocation9 + $0x728] sm:$0xf]  ;;  %8417 = vmatpush.bf16.msrb.mxu3 %v12020_v52  ;;  %v12452_v21 = vor.u32 %v13992_v22, %v12451_v59  ;;  %v13988_v11 = vld [vmem:[#allocation9 + $0xa94] sm:$0xf0]  ;;  %v8960_v19 = vadd.f32 %v15037_v51, %v7973_v33  ;;  %v8027_v35 = vpop.f32.mrf.mxu2 }
 0x3d1   :  { %v12179_v17 = vld [vmem:[#allocation9 + $0x888] sm:$0xf]  ;;  %8330 = vmatmul.bf16.gmra.mxu2 %v15505_v2  ;;  %v12004_v36 = vor.u32 %v13880_v23, %v12003_v46  ;;  %v13876_v28 = vld [vmem:[#allocation9 + $0x714] sm:$0xf0]  ;;  %v15073_v20 = vadd.f32 %v8027_v35, %v8009_v24  ;;  %v8041_v0 = vpop.f32.mrf.mxu3  ;;  %v11141_v2 = vld [vmem:[#allocation9 + $0x78] sm:$0xf0] }
 0x3d2   :  { %8450 = vmatpush.bf16.msra.mxu1 %v12356_v12  ;;  %v12307_v53 = vld [vmem:[#allocation9 + $0x988] sm:$0xf]  ;;  %v12180_v9 = vor.u32 %v13924_v58, %v12179_v17  ;;  %v13920_v40 = vld [vmem:[#allocation9 + $0x874] sm:$0xf0]  ;;  %8976 = vst [vmem:[#allocation12 + $0x60] sm:$0xff] %v8960_v19  ;;  %v8010_v5 = vpop.f32.mrf.mxu1 }
 0x3d3   :  { %8470 = vmatpush.bf16.msra.mxu2 %v12468_v48  ;;  %v12435_v42 = vld [vmem:[#allocation9 + $0xa88] sm:$0xf]  ;;  %v14032_v57 = vld [vmem:[#allocation9 + $0xbf4] sm:$0xf0]  ;;  %v12308_v26 = vor.u32 %v13956_v37, %v12307_v53  ;;  %v15077_v48 = vadd.f32 %v8041_v0, %v15058_v63 }
 0x3d4   :  { %8432 = vmatpush.bf16.msra.mxu0 %v12212_v13  ;;  %v11987_v55 = vld [vmem:[#allocation9 + $0x708] sm:$0xf]  ;;  %v15506_v49 = vld [vmem:[#allocation23_spill] sm:$0xff]  ;;  %v7991_v8 = vpop.f32.mrf.mxu0  ;;  %8418 = vmatpush.bf16.msrb.mxu3 %v12004_v36  ;;  %v12436_v51 = vor.u32 %v13988_v11, %v12435_v42 }
 0x3d5   :  { %v12163_v12 = vld [vmem:[#allocation9 + $0x868] sm:$0xf]  ;;  %8344 = vmatmul.bf16.vlgmr.msra.gmra.mxu3 %v15506_v49  ;;  %v8011_v14 = vadd.f32 %v8010_v5, %v7991_v8  ;;  %v11988_v13 = vor.u32 %v13876_v28, %v11987_v55  ;;  %v13952_v30 = vld [vmem:[#allocation9 + $0x974] sm:$0xf0]  ;;  %v13662_v49 = vld [vmem:[#allocation9 + $0x6c] sm:$0xf] }
 0x3d6   :  { %8451 = vmatpush.bf16.msra.mxu1 %v12340_v39  ;;  %v12611_v3 = vld [vmem:[#allocation9 + $0xbe8] sm:$0xf]  ;;  %v12164_v10 = vor.u32 %v13920_v40, %v12163_v12  ;;  %v13984_v16 = vld [vmem:[#allocation9 + $0xa74] sm:$0xf0] }
 0x3d7   :  { %8471 = vmatpush.bf16.msra.mxu2 %v12452_v21  ;;  %v12291_v1 = vld [vmem:[#allocation9 + $0x968] sm:$0xf]  ;;  %v12612_v61 = vor.u32 %v14032_v57, %v12611_v3  ;;  %v13916_v56 = vld [vmem:[#allocation9 + $0x854] sm:$0xf0] }
 0x3d8   :  { %8433 = vmatpush.bf16.msra.mxu0 %v12196_v27  ;;  %v12419_v34 = vld [vmem:[#allocation9 + $0xa68] sm:$0xf]  ;;  %v14028_v24 = vld [vmem:[#allocation9 + $0xbd4] sm:$0xf0]  ;;  %v12292_v52 = vor.u32 %v13952_v30, %v12291_v1  ;;  %8419 = vmatpush.bf16.msrb.mxu3 %v11988_v13  ;;  %v8029_v31 = vpop.f32.mrf.mxu2 }
 0x3d9   :  { %v12147_v29 = vld [vmem:[#allocation9 + $0x848] sm:$0xf]  ;;  %v12420_v7 = vor.u32 %v13984_v16, %v12419_v34  ;;  %v13948_v59 = vld [vmem:[#allocation9 + $0x954] sm:$0xf0]  ;;  %v15079_v63 = vadd.f32 %v8029_v31, %v8011_v14  ;;  %v8043_v12 = vpop.f32.mrf.mxu3 }
 0x3da   :  { %8452 = vmatpush.bf16.msra.mxu1 %v12324_v44  ;;  %v12595_v39 = vld [vmem:[#allocation9 + $0xbc8] sm:$0xf]  ;;  %v12148_v45 = vor.u32 %v13916_v56, %v12147_v29  ;;  %v13980_v22 = vld [vmem:[#allocation9 + $0xa54] sm:$0xf0]  ;;  %v15083_v53 = vpop.f32.mrf.mxu1  ;;  %v15088_v5 = vadd.f32 %v8043_v12, %v15066_v38 }
 0x3db   :  { %8472 = vmatpush.bf16.msra.mxu2 %v12436_v51  ;;  %v12275_v32 = vld [vmem:[#allocation9 + $0x948] sm:$0xf]  ;;  %v12596_v46 = vor.u32 %v14028_v24, %v12595_v39  ;;  %v13912_v17 = vld [vmem:[#allocation9 + $0x834] sm:$0xf0] }
 0x3dc   :  { %8434 = vmatpush.bf16.msra.mxu0 %v12180_v9  ;;  %8488 = vmatpush.bf16.msra.mxu3 %v12612_v61  ;;  %v12403_v27 = vld [vmem:[#allocation9 + $0xa48] sm:$0xf]  ;;  %v14024_v33 = vld [vmem:[#allocation9 + $0xbb4] sm:$0xf0]  ;;  %v15081_v44 = vpop.f32.mrf.mxu0  ;;  %v12276_v21 = vor.u32 %v13948_v59, %v12275_v32  ;;  %v15510_v59 = vld [vmem:[#allocation24_spill] sm:$0xff] }
 0x3dd   :  { %v12131_v23 = vld [vmem:[#allocation9 + $0x828] sm:$0xf]  ;;  %v12404_v36 = vor.u32 %v13980_v22, %v12403_v27  ;;  %v13944_v42 = vld [vmem:[#allocation9 + $0x934] sm:$0xf0] }
 0x3de   :  { %8453 = vmatpush.bf16.msra.mxu1 %v12308_v26  ;;  %v12579_v58 = vld [vmem:[#allocation9 + $0xba8] sm:$0xf]  ;;  %v12132_v11 = vor.u32 %v13912_v17, %v12131_v23  ;;  %v13976_v9 = vld [vmem:[#allocation9 + $0xa34] sm:$0xf0] }
 0x3df   :  { %8473 = vmatpush.bf16.msra.mxu2 %v12420_v7  ;;  %v12259_v37 = vld [vmem:[#allocation9 + $0x928] sm:$0xf]  ;;  %v12580_v55 = vor.u32 %v14024_v33, %v12579_v58  ;;  %v15508_v40 = vld [vmem:[#allocation27_spill] sm:$0xff] }
 0x3e0   :  { %8435 = vmatpush.bf16.msra.mxu0 %v12164_v10  ;;  %8489 = vmatpush.bf16.msra.mxu3 %v12596_v46  ;;  %v12387_v19 = vld [vmem:[#allocation9 + $0xa28] sm:$0xf]  ;;  %v13908_v3 = vld [vmem:[#allocation9 + $0x814] sm:$0xf0]  ;;  %v12260_v14 = vor.u32 %v13944_v42, %v12259_v37  ;;  %v15091_v39 = vpop.f32.mrf.mxu2 }
 0x3e1   :  { %v12115_v28 = vld [vmem:[#allocation9 + $0x808] sm:$0xf]  ;;  %8382 = vmatmul.bf16.vlgmr.msrb.gmra.mxu1 %v15508_v40  ;;  %v14020_v8 = vld [vmem:[#allocation9 + $0xb94] sm:$0xf0]  ;;  %v12388_v30 = vor.u32 %v13976_v9, %v12387_v19  ;;  %v8046_v42 = vpop.f32.mrf.mxu3 }
 0x3e2   :  { %8454 = vmatpush.bf16.msra.mxu1 %v12292_v52  ;;  %v15507_v35 = vld [vmem:[#allocation25_spill] sm:$0xff]  ;;  %v14064_v1 = vld [vmem:[#allocation9 + $0xcf4] sm:$0xf0]  ;;  %v12116_v61 = vor.u32 %v13908_v3, %v12115_v28  ;;  %v15096_v27 = vpop.f32.mrf.mxu1  ;;  %v15099_v28 = vadd.f32 %v8046_v42, %v15073_v20 }
 0x3e3   :  { %8363 = vmatmul.bf16.vlgmr.msrb.gmra.mxu0 %v15507_v35  ;;  %v12563_v57 = vld [vmem:[#allocation9 + $0xb88] sm:$0xf]  ;;  %8474 = vmatpush.bf16.msra.mxu2 %v12404_v36  ;;  %v13940_v10 = vld [vmem:[#allocation9 + $0x914] sm:$0xf0]  ;;  %v13674_v35 = vld [vmem:[#allocation9 + $0xcc] sm:$0xf] }
 0x3e4   :  { %8436 = vmatpush.bf16.msra.mxu0 %v12148_v45  ;;  %v15509_v26 = vld [vmem:[#allocation29_spill] sm:$0xff]  ;;  %v13972_v16 = vld [vmem:[#allocation9 + $0xa14] sm:$0xf0]  ;;  %8490 = vmatpush.bf16.msra.mxu3 %v12580_v55  ;;  %v12564_v29 = vor.u32 %v14020_v8, %v12563_v57  ;;  %v15094_v45 = vpop.f32.mrf.mxu0 }
 0x3e5   :  { %8401 = vmatmul.bf16.vlgmr.msrb.gmra.mxu2 %v15509_v26  ;;  %v12243_v51 = vld [vmem:[#allocation9 + $0x908] sm:$0xf]  ;;  %v14096_v56 = vld [vmem:[#allocation9 + $0xdf4] sm:$0xf0]  ;;  %8349 = vmatmul.bf16.gmra.mxu3 %v15510_v59 }
 0x3e6   :  { %8455 = vmatpush.bf16.msra.mxu1 %v12276_v21  ;;  %v12739_v13 = vld [vmem:[#allocation9 + $0xce8] sm:$0xf]  ;;  %v14128_v52 = vld [vmem:[#allocation9 + $0xef4] sm:$0xf0]  ;;  %v12244_v22 = vor.u32 %v13940_v10, %v12243_v51 }
 0x3e7   :  { %v12371_v34 = vld [vmem:[#allocation9 + $0xa08] sm:$0xf]  ;;  %v12740_v24 = vor.u32 %v14064_v1, %v12739_v13  ;;  %v14016_v32 = vld [vmem:[#allocation9 + $0xb74] sm:$0xf0]  ;;  %8475 = vmatpush.bf16.msra.mxu2 %v12388_v30 }
 0x3e8   :  { %8437 = vmatpush.bf16.msra.mxu0 %v12132_v11  ;;  %v12867_v0 = vld [vmem:[#allocation9 + $0xde8] sm:$0xf]  ;;  %v14060_v23 = vld [vmem:[#allocation9 + $0xcd4] sm:$0xf0]  ;;  %v12372_v31 = vor.u32 %v13972_v16, %v12371_v34  ;;  %8491 = vmatpush.bf16.msra.mxu3 %v12564_v29  ;;  %v15101_v30 = vpop.f32.mrf.mxu2 }
 0x3e9   :  { %v12995_v38 = vld [vmem:[#allocation9 + $0xee8] sm:$0xf]  ;;  %v12868_v17 = vor.u32 %v14096_v56, %v12867_v0  ;;  %v14092_v36 = vld [vmem:[#allocation9 + $0xdd4] sm:$0xf0] }
 0x3ea   :  { %v12547_v7 = vld [vmem:[#allocation9 + $0xb68] sm:$0xf]  ;;  %8456 = vmatpush.bf16.msra.mxu1 %v12260_v14  ;;  %v12996_v58 = vor.u32 %v14128_v52, %v12995_v38  ;;  %v14124_v19 = vld [vmem:[#allocation9 + $0xed4] sm:$0xf0] }
 0x3eb   :  { %v12723_v46 = vld [vmem:[#allocation9 + $0xcc8] sm:$0xf]  ;;  %v12548_v33 = vor.u32 %v14016_v32, %v12547_v7  ;;  %v14012_v55 = vld [vmem:[#allocation9 + $0xb54] sm:$0xf0]  ;;  %8476 = vmatpush.bf16.msra.mxu2 %v12372_v31  ;;  %v15512_v31 = vld [vmem:[#allocation28_spill] sm:$0xff] }
 0x3ec   :  { %8438 = vmatpush.bf16.msra.mxu0 %v12116_v61  ;;  %v12851_v21 = vld [vmem:[#allocation9 + $0xdc8] sm:$0xf]  ;;  %v12724_v11 = vor.u32 %v14060_v23, %v12723_v46  ;;  %v14056_v57 = vld [vmem:[#allocation9 + $0xcb4] sm:$0xf0]  ;;  %v15103_v16 = vpop.f32.mrf.mxu0  ;;  %v15105_v61 = vpop.f32.mrf.mxu1  ;;  %v15511_v23 = vld [vmem:[#allocation26_spill] sm:$0xff] }
 0x3ed   :  { %v12979_v37 = vld [vmem:[#allocation9 + $0xec8] sm:$0xf]  ;;  %v12852_v12 = vor.u32 %v14092_v36, %v12851_v21  ;;  %8492 = vmatpush.bf16.msra.mxu3 %v12548_v33  ;;  %v14088_v13 = vld [vmem:[#allocation9 + $0xdb4] sm:$0xf0]  ;;  %v8048_v46 = vpop.f32.mrf.mxu3  ;;  %v15513_v36 = vld [vmem:[#allocation30_spill] sm:$0xff] }
 0x3ee   :  { %v12531_v9 = vld [vmem:[#allocation9 + $0xb48] sm:$0xf]  ;;  %8457 = vmatpush.bf16.msra.mxu1 %v12244_v22  ;;  %v12980_v8 = vor.u32 %v14124_v19, %v12979_v37  ;;  %v14120_v10 = vld [vmem:[#allocation9 + $0xeb4] sm:$0xf0]  ;;  %v15110_v21 = vadd.f32 %v8048_v46, %v15079_v63 }
 0x3ef   :  { %v12707_v3 = vld [vmem:[#allocation9 + $0xca8] sm:$0xf]  ;;  %8545 = vmatpush.bf16.msrb.mxu2 %v12996_v58  ;;  %v12532_v14 = vor.u32 %v14012_v55, %v12531_v9  ;;  %v14008_v20 = vld [vmem:[#allocation9 + $0xb34] sm:$0xf0] }
 0x3f0   :  { %8507 = vmatpush.bf16.msrb.mxu0 %v12740_v24  ;;  %v12835_v51 = vld [vmem:[#allocation9 + $0xda8] sm:$0xf]  ;;  %v12708_v29 = vor.u32 %v14056_v57, %v12707_v3  ;;  %v14052_v38 = vld [vmem:[#allocation9 + $0xc94] sm:$0xf0] }
 0x3f1   :  { %v12963_v1 = vld [vmem:[#allocation9 + $0xea8] sm:$0xf]  ;;  %v12836_v0 = vor.u32 %v14088_v13, %v12835_v51  ;;  %8493 = vmatpush.bf16.msra.mxu3 %v12532_v14  ;;  %v14084_v32 = vld [vmem:[#allocation9 + $0xd94] sm:$0xf0]  ;;  %8387 = vmatmul.bf16.gmra.mxu1 %v15512_v31  ;;  %v15113_v14 = vpop.f32.mrf.mxu2 }
 0x3f2   :  { %8526 = vmatpush.bf16.msrb.mxu1 %v12868_v17  ;;  %v12515_v34 = vld [vmem:[#allocation9 + $0xb28] sm:$0xf]  ;;  %v12964_v24 = vor.u32 %v14120_v10, %v12963_v1  ;;  %v14116_v17 = vld [vmem:[#allocation9 + $0xe94] sm:$0xf0] }
 0x3f3   :  { %v12691_v56 = vld [vmem:[#allocation9 + $0xc88] sm:$0xf]  ;;  %8546 = vmatpush.bf16.msrb.mxu2 %v12980_v8  ;;  %v12516_v52 = vor.u32 %v14008_v20, %v12515_v34  ;;  %8368 = vmatmul.bf16.gmra.mxu0 %v15511_v23  ;;  %v14004_v33 = vld [vmem:[#allocation9 + $0xb14] sm:$0xf0] }
 0x3f4   :  { %8508 = vmatpush.bf16.msrb.mxu0 %v12724_v11  ;;  %v12819_v7 = vld [vmem:[#allocation9 + $0xd88] sm:$0xf]  ;;  %v12692_v37 = vor.u32 %v14052_v38, %v12691_v56  ;;  %v14048_v19 = vld [vmem:[#allocation9 + $0xc74] sm:$0xf0]  ;;  %v15116_v10 = vpop.f32.mrf.mxu0  ;;  %v15118_v34 = vpop.f32.mrf.mxu1 }
 0x3f5   :  { %v12947_v22 = vld [vmem:[#allocation9 + $0xe88] sm:$0xf]  ;;  %8406 = vmatmul.bf16.gmra.mxu2 %v15513_v36  ;;  %v12820_v42 = vor.u32 %v14084_v32, %v12819_v7  ;;  %8494 = vmatpush.bf16.msra.mxu3 %v12516_v52  ;;  %v14080_v3 = vld [vmem:[#allocation9 + $0xd74] sm:$0xf0] }
 0x3f6   :  { %8527 = vmatpush.bf16.msrb.mxu1 %v12852_v12  ;;  %v12499_v58 = vld [vmem:[#allocation9 + $0xb08] sm:$0xf]  ;;  %v12948_v55 = vor.u32 %v14116_v17, %v12947_v22  ;;  %v14160_v8 = vld [vmem:[#allocation9 + $0xff4] sm:$0xf0]  ;;  %v15120_v22 = vpop.f32.mrf.mxu3 }
 0x3f7   :  { %v12675_v11 = vld [vmem:[#allocation9 + $0xc68] sm:$0xf]  ;;  %8547 = vmatpush.bf16.msrb.mxu2 %v12964_v24  ;;  %v12500_v12 = vor.u32 %v14004_v33, %v12499_v58  ;;  %v14112_v51 = vld [vmem:[#allocation9 + $0xe74] sm:$0xf0] }
 0x3f8   :  { %8509 = vmatpush.bf16.msrb.mxu0 %v12708_v29  ;;  %v12803_v9 = vld [vmem:[#allocation9 + $0xd68] sm:$0xf]  ;;  %v15514_v1 = vld [vmem:[#allocation31_spill] sm:$0xff]  ;;  %v12676_v20 = vor.u32 %v14048_v19, %v12675_v11 }
 0x3f9   :  { %v13123_v57 = vld [vmem:[#allocation9 + $0xfe8] sm:$0xf]  ;;  %8420 = vmatmul.bf16.vlgmr.msrb.gmra.mxu3 %v15514_v1  ;;  %v12804_v29 = vor.u32 %v14080_v3, %v12803_v9  ;;  %v14044_v56 = vld [vmem:[#allocation9 + $0xc54] sm:$0xf0] }
 0x3fa   :  { %8528 = vmatpush.bf16.msrb.mxu1 %v12836_v0  ;;  %v12931_v63 = vld [vmem:[#allocation9 + $0xe68] sm:$0xf]  ;;  %v13124_v13 = vor.u32 %v14160_v8, %v13123_v57  ;;  %8495 = vmatpush.bf16.msra.mxu3 %v12500_v12  ;;  %v14076_v52 = vld [vmem:[#allocation9 + $0xd54] sm:$0xf0]  ;;  %v15122_v57 = vpop.f32.mrf.mxu2 }
 0x3fb   :  { %v12659_v0 = vld [vmem:[#allocation9 + $0xc48] sm:$0xf]  ;;  %8548 = vmatpush.bf16.msrb.mxu2 %v12948_v55  ;;  %v12932_v24 = vor.u32 %v14112_v51, %v12931_v63  ;;  %v14156_v32 = vld [vmem:[#allocation9 + $0xfd4] sm:$0xf0] }
 0x3fc   :  { %8510 = vmatpush.bf16.msrb.mxu0 %v12692_v37  ;;  %v12787_v38 = vld [vmem:[#allocation9 + $0xd48] sm:$0xf]  ;;  %v14108_v17 = vld [vmem:[#allocation9 + $0xe54] sm:$0xf0]  ;;  %v12660_v33 = vor.u32 %v14044_v56, %v12659_v0  ;;  %v15124_v51 = vpop.f32.mrf.mxu0 }
 0x3fd   :  { %v13107_v7 = vld [vmem:[#allocation9 + $0xfc8] sm:$0xf]  ;;  %v12788_v37 = vor.u32 %v14076_v52, %v12787_v38  ;;  %v14040_v11 = vld [vmem:[#allocation9 + $0xc34] sm:$0xf0] }
 0x3fe   :  { %8529 = vmatpush.bf16.msrb.mxu1 %v12820_v42  ;;  %8564 = vmatpush.bf16.msrb.mxu3 %v13124_v13  ;;  %v12915_v46 = vld [vmem:[#allocation9 + $0xe48] sm:$0xf]  ;;  %v13108_v58 = vor.u32 %v14156_v32, %v13107_v7  ;;  %v14072_v55 = vld [vmem:[#allocation9 + $0xd34] sm:$0xf0]  ;;  %v15126_v13 = vpop.f32.mrf.mxu1  ;;  %v15128_v1 = vpop.f32.mrf.mxu3 }
 0x3ff   :  { %v12643_v42 = vld [vmem:[#allocation9 + $0xc28] sm:$0xf]  ;;  %8549 = vmatpush.bf16.msrb.mxu2 %v12932_v24  ;;  %v12916_v9 = vor.u32 %v14108_v17, %v12915_v46  ;;  %v14152_v3 = vld [vmem:[#allocation9 + $0xfb4] sm:$0xf0] }
 0x400   :  { %8511 = vmatpush.bf16.msrb.mxu0 %v12676_v20  ;;  %v12771_v19 = vld [vmem:[#allocation9 + $0xd28] sm:$0xf]  ;;  %v14104_v63 = vld [vmem:[#allocation9 + $0xe34] sm:$0xf0]  ;;  %v12644_v20 = vor.u32 %v14040_v11, %v12643_v42  ;;  %v11205_v42 = vld [vmem:[#allocation9 + $0xf8] sm:$0xf0] }
 0x401   :  { %v13091_v12 = vld [vmem:[#allocation9 + $0xfa8] sm:$0xf]  ;;  %v14036_v0 = vld [vmem:[#allocation9 + $0xc14] sm:$0xf0]  ;;  %v12772_v56 = vor.u32 %v14072_v55, %v12771_v19  ;;  %v13710_v11 = vld [vmem:[#allocation9 + $0x1ec] sm:$0xf] }
 0x402   :  { %8530 = vmatpush.bf16.msrb.mxu1 %v12804_v29  ;;  %8565 = vmatpush.bf16.msrb.mxu3 %v13108_v58  ;;  %v12899_v8 = vld [vmem:[#allocation9 + $0xe28] sm:$0xf]  ;;  %v13092_v38 = vor.u32 %v14152_v3, %v13091_v12  ;;  %v14068_v52 = vld [vmem:[#allocation9 + $0xd14] sm:$0xf0]  ;;  %v11333_v55 = vld [vmem:[#allocation9 + $0x1f8] sm:$0xf0] }
 0x403   :  { %v12627_v29 = vld [vmem:[#allocation9 + $0xc08] sm:$0xf]  ;;  %8550 = vmatpush.bf16.msrb.mxu2 %v12916_v9  ;;  %v12900_v32 = vor.u32 %v14104_v63, %v12899_v8  ;;  %v14100_v46 = vld [vmem:[#allocation9 + $0xe14] sm:$0xf0]  ;;  %v13742_v12 = vld [vmem:[#allocation9 + $0x2ec] sm:$0xf]  ;;  %v11336_v26 = vor.u32 %v13710_v11, %v11333_v55 }
 0x404   :  { %8512 = vmatpush.bf16.msrb.mxu0 %v12660_v33  ;;  %v12755_v24 = vld [vmem:[#allocation9 + $0xd08] sm:$0xf]  ;;  %v14148_v58 = vld [vmem:[#allocation9 + $0xf94] sm:$0xf0]  ;;  %v13678_v33 = vld [vmem:[#allocation9 + $0xec] sm:$0xf]  ;;  %v12628_v19 = vor.u32 %v14036_v0, %v12627_v29  ;;  %v15136_v0 = vpop.f32.mrf.mxu0 }
 0x405   :  { %v12883_v7 = vld [vmem:[#allocation9 + $0xe08] sm:$0xf]  ;;  %v15516_v31 = vld [vmem:[#allocation35_spill] sm:$0xff]  ;;  %v11461_v9 = vld [vmem:[#allocation9 + $0x2f8] sm:$0xf0]  ;;  %v12756_v3 = vor.u32 %v14068_v52, %v12755_v24  ;;  %v11208_v23 = vor.u32 %v13678_v33, %v11205_v42 }
 0x406   :  { %8531 = vmatpush.bf16.msrb.mxu1 %v12788_v37  ;;  %v13075_v17 = vld [vmem:[#allocation9 + $0xf88] sm:$0xf]  ;;  %8566 = vmatpush.bf16.msrb.mxu3 %v13092_v38  ;;  %v12884_v63 = vor.u32 %v14100_v46, %v12883_v7  ;;  %v14144_v59 = vld [vmem:[#allocation9 + $0xf74] sm:$0xf0]  ;;  %v11464_v40 = vor.u32 %v13742_v12, %v11461_v9  ;;  %v15518_v29 = vld [vmem:[#allocation32_spill] sm:$0xff] }
 0x407   :  { %v15515_v36 = vld [vmem:[#allocation33_spill] sm:$0xff]  ;;  %8458 = vmatmul.bf16.vlgmr.msra.gmra.mxu1 %v15516_v31  ;;  %v13076_v8 = vor.u32 %v14148_v58, %v13075_v17  ;;  %8551 = vmatpush.bf16.msrb.mxu2 %v12900_v32  ;;  %v15133_v31 = vpop.f32.mrf.mxu2  ;;  %v11317_v38 = vld [vmem:[#allocation9 + $0x1d8] sm:$0xf0]  ;;  %v13738_v24 = vld [vmem:[#allocation9 + $0x2cc] sm:$0xf]  ;;  %v15140_v58 = vpop.f32.mrf.mxu3 }
 0x408   :  { %8439 = vmatmul.bf16.vlgmr.msra.gmra.mxu0 %v15515_v36  ;;  %v15517_v37 = vld [vmem:[#allocation37_spill] sm:$0xff]  ;;  %v11445_v52 = vld [vmem:[#allocation9 + $0x2d8] sm:$0xf0]  ;;  %v14140_v17 = vld [vmem:[#allocation9 + $0xf54] sm:$0xf0] }
 0x409   :  { %8477 = vmatmul.bf16.vlgmr.msra.gmra.mxu2 %v15517_v37  ;;  %8513 = vmatpush.bf16.msrb.mxu0 %v12644_v20  ;;  %v13059_v36 = vld [vmem:[#allocation9 + $0xf68] sm:$0xf]  ;;  %v11189_v37 = vld [vmem:[#allocation9 + $0xd8] sm:$0xf0]  ;;  %v13706_v20 = vld [vmem:[#allocation9 + $0x1cc] sm:$0xf]  ;;  %v11448_v42 = vor.u32 %v13738_v24, %v11445_v52 }
 0x40a   :  { %8532 = vmatpush.bf16.msrb.mxu1 %v12772_v56  ;;  %8425 = vmatmul.bf16.gmra.mxu3 %v15518_v29  ;;  %v15138_v56 = vpop.f32.mrf.mxu1  ;;  %v13060_v7 = vor.u32 %v14144_v59, %v13059_v36  ;;  %v11192_v32 = vor.u32 %v13674_v35, %v11189_v37  ;;  %v13043_v46 = vld [vmem:[#allocation9 + $0xf48] sm:$0xf]  ;;  %v11320_v33 = vor.u32 %v13706_v20, %v11317_v38  ;;  %v13670_v11 = vld [vmem:[#allocation9 + $0xac] sm:$0xf]  ;;  %v11173_v55 = vld [vmem:[#allocation9 + $0xb8] sm:$0xf0] }
 0x40b   :  { %8567 = vmatpush.bf16.msrb.mxu3 %v13076_v8  ;;  %8552 = vmatpush.bf16.msrb.mxu2 %v12884_v63  ;;  %v13702_v12 = vld [vmem:[#allocation9 + $0x1ac] sm:$0xf]  ;;  %v11301_v9 = vld [vmem:[#allocation9 + $0x1b8] sm:$0xf0]  ;;  %v11176_v59 = vor.u32 %v13670_v11, %v11173_v55  ;;  %v14136_v35 = vld [vmem:[#allocation9 + $0xf34] sm:$0xf0] }
 0x40c   :  { %v11429_v36 = vld [vmem:[#allocation9 + $0x2b8] sm:$0xf0]  ;;  %v15144_v8 = vpop.f32.mrf.mxu0  ;;  %v11304_v20 = vor.u32 %v13702_v12, %v11301_v9  ;;  %v13698_v52 = vld [vmem:[#allocation9 + $0x18c] sm:$0xf]  ;;  %v13011_v11 = vld [vmem:[#allocation9 + $0xf08] sm:$0xf] }
 0x40d   :  { %8514 = vmatpush.bf16.msrb.mxu0 %v12628_v19  ;;  %v13044_v19 = vor.u32 %v14140_v17, %v13043_v46  ;;  %v11413_v17 = vld [vmem:[#allocation9 + $0x298] sm:$0xf0]  ;;  %v14132_v55 = vld [vmem:[#allocation9 + $0xf14] sm:$0xf0]  ;;  %v15521_v12 = vld [vmem:[#allocation38_spill] sm:$0xff] }
 0x40e   :  { %8533 = vmatpush.bf16.msrb.mxu1 %v12756_v3  ;;  %v13734_v3 = vld [vmem:[#allocation9 + $0x2ac] sm:$0xf]  ;;  %v15520_v29 = vld [vmem:[#allocation36_spill] sm:$0xff] }
 0x40f   :  { %8621 = vmatpush.bf16.msra.mxu2 %v11464_v40  ;;  %8568 = vmatpush.bf16.msrb.mxu3 %v13060_v7  ;;  %v15142_v37 = vpop.f32.mrf.mxu2  ;;  %v11157_v40 = vld [vmem:[#allocation9 + $0x98] sm:$0xf0]  ;;  %v11432_v38 = vor.u32 %v13734_v3, %v11429_v36  ;;  %v13012_v3 = vor.u32 %v14132_v55, %v13011_v11 }
 0x410   :  { %v11285_v7 = vld [vmem:[#allocation9 + $0x198] sm:$0xf0] }
 0x411   :  { %8583 = vmatpush.bf16.msra.mxu0 %v11208_v23  ;;  %v13027_v23 = vld [vmem:[#allocation9 + $0xf28] sm:$0xf]  ;;  %v11269_v36 = vld [vmem:[#allocation9 + $0x178] sm:$0xf0] }
 0x412   :  { %8602 = vmatpush.bf16.msra.mxu1 %v11336_v26  ;;  %v13666_v26 = vld [vmem:[#allocation9 + $0x8c] sm:$0xf]  ;;  %v15146_v63 = vpop.f32.mrf.mxu1  ;;  %v13028_v24 = vor.u32 %v14136_v35, %v13027_v23  ;;  %v11144_v35 = vor.u32 %v13662_v49, %v11141_v2  ;;  %v11253_v49 = vld [vmem:[#allocation9 + $0x158] sm:$0xf0] }
 0x413   :  { %8622 = vmatpush.bf16.msra.mxu2 %v11448_v42  ;;  %8569 = vmatpush.bf16.msrb.mxu3 %v13044_v19  ;;  %v11160_v46 = vor.u32 %v13666_v26, %v11157_v40  ;;  %v15519_v42 = vld [vmem:[#allocation34_spill] sm:$0xff]  ;;  %v11288_v19 = vor.u32 %v13698_v52, %v11285_v7  ;;  %v11397_v26 = vld [vmem:[#allocation9 + $0x278] sm:$0xf0] }
 0x414   :  { %v13726_v23 = vld [vmem:[#allocation9 + $0x26c] sm:$0xf]  ;;  %v11573_v11 = vld [vmem:[#allocation9 + $0x3d8] sm:$0xf0] }
 0x415   :  { %8584 = vmatpush.bf16.msra.mxu0 %v11192_v32  ;;  %v13730_v32 = vld [vmem:[#allocation9 + $0x28c] sm:$0xf]  ;;  %v11400_v52 = vor.u32 %v13726_v23, %v11397_v26 }
 0x416   :  { %8603 = vmatpush.bf16.msra.mxu1 %v11320_v33  ;;  %v15148_v33 = vpop.f32.mrf.mxu3  ;;  %v11416_v9 = vor.u32 %v13730_v32, %v11413_v17  ;;  %v13774_v40 = vld [vmem:[#allocation9 + $0x3ec] sm:$0xf]  ;;  %v11128_v32 = vor.u32 %v13658_v50, %v11125_v47  ;;  %v11557_v50 = vld [vmem:[#allocation9 + $0x3b8] sm:$0xf0] }
 0x417   :  { %8463 = vmatmul.bf16.gmra.mxu1 %v15520_v29  ;;  %8623 = vmatpush.bf16.msra.mxu2 %v11432_v38  ;;  %v15153_v6 = vpop.f32.mrf.mxu2  ;;  %v13690_v2 = vld [vmem:[#allocation9 + $0x14c] sm:$0xf] }
 0x418   :  { %8444 = vmatmul.bf16.gmra.mxu0 %v15519_v42  ;;  %8570 = vmatpush.bf16.msrb.mxu3 %v13028_v24  ;;  %v11589_v42 = vld [vmem:[#allocation9 + $0x3f8] sm:$0xf0]  ;;  %v13722_v7 = vld [vmem:[#allocation9 + $0x24c] sm:$0xf] }
 0x419   :  { %8585 = vmatpush.bf16.msra.mxu0 %v11176_v59  ;;  %8482 = vmatmul.bf16.gmra.mxu2 %v15521_v12  ;;  %v13694_v59 = vld [vmem:[#allocation9 + $0x16c] sm:$0xf]  ;;  %v11592_v29 = vor.u32 %v13774_v40, %v11589_v42  ;;  %v15522_v12 = vld [vmem:[#allocation39_spill] sm:$0xff] }
 0x41a   :  { %8604 = vmatpush.bf16.msra.mxu1 %v11304_v20  ;;  %8496 = vmatmul.bf16.vlgmr.msra.gmra.mxu3 %v15522_v12  ;;  %v15156_v20 = vpop.f32.mrf.mxu0  ;;  %v15158_v38 = vpop.f32.mrf.mxu1  ;;  %v11272_v24 = vor.u32 %v13694_v59, %v11269_v36  ;;  %v13770_v17 = vld [vmem:[#allocation9 + $0x3cc] sm:$0xf]  ;;  %v11109_v12 = vld [vmem:[#allocation9 + $0x38] sm:$0xf0] }
 0x41b   :  { %15523 = vst [vmem:[#allocation45_spill] sm:$0xff] %v15158_v38  ;;  %8624 = vmatpush.bf16.msra.mxu2 %v11416_v9  ;;  %v11576_v42 = vor.u32 %v13770_v17, %v11573_v11  ;;  %v13654_v40 = vld [vmem:[#allocation9 + $0x2c] sm:$0xf]  ;;  %v11237_v59 = vld [vmem:[#allocation9 + $0x138] sm:$0xf0] }
 0x41c   :  { %8571 = vmatpush.bf16.msrb.mxu3 %v13012_v3  ;;  %v13686_v3 = vld [vmem:[#allocation9 + $0x12c] sm:$0xf]  ;;  %v11112_v23 = vor.u32 %v13654_v40, %v11109_v12  ;;  %v11093_v17 = vld [vmem:[#allocation9 + $0x18] sm:$0xf0] }
 0x41d   :  { %8586 = vmatpush.bf16.msra.mxu0 %v11160_v46  ;;  %v11381_v46 = vld [vmem:[#allocation9 + $0x258] sm:$0xf0]  ;;  %v13718_v36 = vld [vmem:[#allocation9 + $0x22c] sm:$0xf] }
 0x41e   :  { %8605 = vmatpush.bf16.msra.mxu1 %v11288_v19  ;;  %v15160_v55 = vpop.f32.mrf.mxu3  ;;  %v11256_v19 = vor.u32 %v13690_v2, %v11253_v49  ;;  %v11384_v9 = vor.u32 %v13722_v7, %v11381_v46  ;;  %v13766_v47 = vld [vmem:[#allocation9 + $0x3ac] sm:$0xf]  ;;  %v11240_v49 = vor.u32 %v13686_v3, %v11237_v59  ;;  %v11349_v11 = vld [vmem:[#allocation9 + $0x218] sm:$0xf0]  ;;  %v15525_v59 = vld [vmem:[#allocation43_spill] sm:$0xff] }
 0x41f   :  { %8625 = vmatpush.bf16.msra.mxu2 %v11400_v52  ;;  %v11560_v26 = vor.u32 %v13766_v47, %v11557_v50  ;;  %v13650_v38 = vld [vmem:[#allocation9 + $0xc] sm:$0xf]  ;;  %v11541_v47 = vld [vmem:[#allocation9 + $0x398] sm:$0xf0] }
 0x420   :  { %8640 = vmatpush.bf16.msra.mxu3 %v11592_v29  ;;  %v11365_v29 = vld [vmem:[#allocation9 + $0x238] sm:$0xf0]  ;;  %v13682_v7 = vld [vmem:[#allocation9 + $0x10c] sm:$0xf] }
 0x421   :  { %8587 = vmatpush.bf16.msra.mxu0 %v11144_v35  ;;  %v15162_v35 = vpop.f32.mrf.mxu2  ;;  %v11368_v12 = vor.u32 %v13718_v36, %v11365_v29  ;;  %v13714_v46 = vld [vmem:[#allocation9 + $0x20c] sm:$0xf]  ;;  %v11973_v29 = vld [vmem:[#allocation9 + $0x6f8] sm:$0xf0] }
 0x422   :  { %8606 = vmatpush.bf16.msra.mxu1 %v11272_v24  ;;  %15524 = vst [vmem:[#allocation46_spill] sm:$0xff] %v15162_v35  ;;  %v8061_v24 = vadd.f32 %v15081_v44, %v15077_v48  ;;  %v15166_v2 = vpop.f32.mrf.mxu0  ;;  %v15168_v52 = vpop.f32.mrf.mxu1  ;;  %v13762_v40 = vld [vmem:[#allocation9 + $0x38c] sm:$0xf]  ;;  %v11717_v44 = vld [vmem:[#allocation9 + $0x4f8] sm:$0xf0] }
 0x423   :  { %8626 = vmatpush.bf16.msra.mxu2 %v11384_v9  ;;  %v13806_v50 = vld [vmem:[#allocation9 + $0x4ec] sm:$0xf]  ;;  %v11544_v48 = vor.u32 %v13762_v40, %v11541_v47  ;;  %v11845_v9 = vld [vmem:[#allocation9 + $0x5f8] sm:$0xf0] }
 0x424   :  { %8641 = vmatpush.bf16.msra.mxu3 %v11576_v42  ;;  %v11096_v42 = vor.u32 %v13650_v38, %v11093_v17  ;;  %v8080_v3 = vadd.f32 %v15083_v53, %v8061_v24  ;;  %v11720_v38 = vor.u32 %v13806_v50, %v11717_v44  ;;  %v13758_v47 = vld [vmem:[#allocation9 + $0x36c] sm:$0xf]  ;;  %v11701_v24 = vld [vmem:[#allocation9 + $0x4d8] sm:$0xf0] }
 0x425   :  { %8588 = vmatpush.bf16.msra.mxu0 %v11128_v32  ;;  %v11221_v32 = vld [vmem:[#allocation9 + $0x118] sm:$0xf0]  ;;  %v13866_v50 = vld [vmem:[#allocation9 + $0x6cc] sm:$0xf] }
 0x426   :  { %8607 = vmatpush.bf16.msra.mxu1 %v11256_v19  ;;  %v15170_v35 = vpop.f32.mrf.mxu3  ;;  %v13838_v19 = vld [vmem:[#allocation9 + $0x5ec] sm:$0xf]  ;;  %v11224_v36 = vor.u32 %v13682_v7, %v11221_v32  ;;  %v11829_v7 = vld [vmem:[#allocation9 + $0x5d8] sm:$0xf0] }
 0x427   :  { %8534 = vmatmul.bf16.vlgmr.msrb.gmra.mxu1 %v14840_v25  ;;  %8627 = vmatpush.bf16.msra.mxu2 %v11368_v12  ;;  %v11848_v17 = vor.u32 %v13838_v19, %v11845_v9  ;;  %v11525_v25 = vld [vmem:[#allocation9 + $0x378] sm:$0xf0]  ;;  %v8063_v12 = vadd.f32 %v15094_v45, %v15088_v5  ;;  %v13754_v45 = vld [vmem:[#allocation9 + $0x34c] sm:$0xf] }
 0x428   :  { %8642 = vmatpush.bf16.msra.mxu3 %v11560_v26  ;;  %8515 = vmatmul.bf16.vlgmr.msrb.gmra.mxu0 %v14727_v54  ;;  %v11352_v26 = vor.u32 %v13714_v46, %v11349_v11  ;;  %v8099_v54 = vadd.f32 %v15091_v39, %v8080_v3  ;;  %v11528_v53 = vor.u32 %v13758_v47, %v11525_v25  ;;  %v15526_v46 = vld [vmem:[#allocation40_spill] sm:$0xff] }
 0x429   :  { %8589 = vmatpush.bf16.msra.mxu0 %v11112_v23  ;;  %8553 = vmatmul.bf16.vlgmr.msrb.gmra.mxu2 %v15525_v59  ;;  %v13870_v23 = vld [vmem:[#allocation9 + $0x6ec] sm:$0xf]  ;;  %v15177_v43 = vpop.f32.mrf.mxu2  ;;  %v11685_v3 = vld [vmem:[#allocation9 + $0x4b8] sm:$0xf0] }
 0x42a   :  { %8608 = vmatpush.bf16.msra.mxu1 %v11240_v49  ;;  %v11976_v40 = vor.u32 %v13870_v23, %v11973_v29  ;;  %v13834_v49 = vld [vmem:[#allocation9 + $0x5cc] sm:$0xf]  ;;  %v8118_v32 = vadd.f32 %v15120_v22, %v8099_v54  ;;  %8501 = vmatmul.bf16.gmra.mxu3 %v15526_v46  ;;  %v15183_v39 = vpop.f32.mrf.mxu0  ;;  %v15185_v11 = vpop.f32.mrf.mxu1  ;;  %v11509_v54 = vld [vmem:[#allocation9 + $0x358] sm:$0xf0] }
 0x42b   :  { %8628 = vmatpush.bf16.msra.mxu2 %v11352_v26  ;;  %v11832_v25 = vor.u32 %v13834_v49, %v11829_v7  ;;  %v13798_v22 = vld [vmem:[#allocation9 + $0x4ac] sm:$0xf]  ;;  %v11512_v9 = vor.u32 %v13754_v45, %v11509_v54  ;;  %v11941_v26 = vld [vmem:[#allocation9 + $0x6b8] sm:$0xf0]  ;;  %v8066_v7 = vadd.f32 %v15103_v16, %v15099_v28 }
 0x42c   :  { %8643 = vmatpush.bf16.msra.mxu3 %v11544_v48  ;;  %v11957_v48 = vld [vmem:[#allocation9 + $0x6d8] sm:$0xf0]  ;;  %v8137_v44 = vadd.f32 %v15124_v51, %v8118_v32  ;;  %v11688_v23 = vor.u32 %v13798_v22, %v11685_v3  ;;  %v13862_v29 = vld [vmem:[#allocation9 + $0x6ac] sm:$0xf] }
 0x42d   :  { %8590 = vmatpush.bf16.msra.mxu0 %v11096_v42  ;;  %v11704_v42 = vor.u32 %v13802_v4, %v11701_v24  ;;  %v11960_v5 = vor.u32 %v13866_v50, %v11957_v48  ;;  %v11813_v4 = vld [vmem:[#allocation9 + $0x5b8] sm:$0xf0]  ;;  %v11944_v47 = vor.u32 %v13862_v29, %v11941_v26  ;;  %v13794_v49 = vld [vmem:[#allocation9 + $0x48c] sm:$0xf] }
 0x42e   :  { %8609 = vmatpush.bf16.msra.mxu1 %v11224_v36  ;;  %v15188_v19 = vpop.f32.mrf.mxu3  ;;  %v13830_v36 = vld [vmem:[#allocation9 + $0x5ac] sm:$0xf]  ;;  %v11493_v24 = vld [vmem:[#allocation9 + $0x338] sm:$0xf0] }
 0x42f   :  { %8697 = vmatpush.bf16.msrb.mxu2 %v11976_v40  ;;  %v11816_v51 = vor.u32 %v13830_v36, %v11813_v4  ;;  %v8156_v40 = vadd.f32 %v15126_v13, %v8137_v44  ;;  %v11797_v50 = vld [vmem:[#allocation9 + $0x598] sm:$0xf0]  ;;  %v13790_v3 = vld [vmem:[#allocation9 + $0x46c] sm:$0xf] }
 0x430   :  { %8644 = vmatpush.bf16.msra.mxu3 %v11528_v53  ;;  %v13750_v53 = vld [vmem:[#allocation9 + $0x32c] sm:$0xf]  ;;  %v11925_v45 = vld [vmem:[#allocation9 + $0x698] sm:$0xf0] }
 0x431   :  { %8659 = vmatpush.bf16.msrb.mxu0 %v11720_v38  ;;  %v8082_v38 = vadd.f32 %v15096_v27, %v8063_v12  ;;  %v15195_v32 = vpop.f32.mrf.mxu2  ;;  %v11496_v27 = vor.u32 %v13750_v53, %v11493_v24  ;;  %v11669_v12 = vld [vmem:[#allocation9 + $0x498] sm:$0xf0]  ;;  %v8175_v13 = vadd.f32 %v15133_v31, %v8156_v40  ;;  %v8085_v31 = vadd.f32 %v15105_v61, %v8066_v7  ;;  %v13854_v26 = vld [vmem:[#allocation9 + $0x66c] sm:$0xf] }
 0x432   :  { %8678 = vmatpush.bf16.msrb.mxu1 %v11848_v17  ;;  %v15199_v48 = vpop.f32.mrf.mxu0  ;;  %v11672_v44 = vor.u32 %v13794_v49, %v11669_v12  ;;  %v8068_v40 = vadd.f32 %v15116_v10, %v15110_v21  ;;  %v13902_v24 = vld [vmem:[#allocation9 + $0x7ec] sm:$0xf] }
 0x433   :  { %v8101_v17 = vadd.f32 %v15101_v30, %v8082_v38  ;;  %8698 = vmatpush.bf16.msrb.mxu2 %v11960_v5  ;;  %v13858_v5 = vld [vmem:[#allocation9 + $0x68c] sm:$0xf]  ;;  %v8194_v54 = vadd.f32 %v15160_v55, %v8175_v13  ;;  %v11653_v38 = vld [vmem:[#allocation9 + $0x478] sm:$0xf0]  ;;  %v8104_v61 = vadd.f32 %v15113_v14, %v8085_v31 }
 0x434   :  { %8645 = vmatpush.bf16.msra.mxu3 %v11512_v9  ;;  %v11928_v22 = vor.u32 %v13858_v5, %v11925_v45  ;;  %v13746_v9 = vld [vmem:[#allocation9 + $0x30c] sm:$0xf]  ;;  %v11656_v29 = vor.u32 %v13790_v3, %v11653_v38  ;;  %v15227_v45 = vld [vmem:[#allocation11] sm:$0xf] }
 0x435   :  { %8660 = vmatpush.bf16.msrb.mxu0 %v11704_v42  ;;  %v13826_v42 = vld [vmem:[#allocation9 + $0x58c] sm:$0xf]  ;;  %v8120_v30 = vadd.f32 %v15128_v1, %v8101_v17  ;;  %v11477_v1 = vld [vmem:[#allocation9 + $0x318] sm:$0xf0]  ;;  %v8213_v55 = vadd.f32 %v15166_v2, %v8194_v54  ;;  %v8123_v7 = vadd.f32 %v15140_v58, %v8104_v61 }
 0x436   :  { %8679 = vmatpush.bf16.msrb.mxu1 %v11832_v25  ;;  %v15201_v25 = vpop.f32.mrf.mxu1  ;;  %v11800_v28 = vor.u32 %v13826_v42, %v11797_v50  ;;  %v15206_v36 = vpop.f32.mrf.mxu3  ;;  %v11480_v4 = vor.u32 %v13746_v9, %v11477_v1  ;;  %v12101_v2 = vld [vmem:[#allocation9 + $0x7f8] sm:$0xf0]  ;;  %v13786_v49 = vld [vmem:[#allocation9 + $0x44c] sm:$0xf] }
 0x437   :  { %v8139_v16 = vadd.f32 %v15136_v0, %v8120_v30  ;;  %8699 = vmatpush.bf16.msrb.mxu2 %v11944_v47  ;;  %8539 = vmatmul.bf16.gmra.mxu1 %v14860_v18  ;;  %v11781_v0 = vld [vmem:[#allocation9 + $0x578] sm:$0xf0]  ;;  %v12104_v12 = vor.u32 %v13902_v24, %v12101_v2  ;;  %v13818_v14 = vld [vmem:[#allocation9 + $0x54c] sm:$0xf]  ;;  %v8232_v21 = vadd.f32 %v15168_v52, %v8213_v55 }
 0x438   :  { %8646 = vmatpush.bf16.msra.mxu3 %v11496_v27  ;;  %8520 = vmatmul.bf16.gmra.mxu0 %v14738_v41  ;;  %v11637_v42 = vld [vmem:[#allocation9 + $0x458] sm:$0xf0]  ;;  %v8142_v5 = vadd.f32 %v15144_v8, %v8123_v7  ;;  %v8087_v52 = vadd.f32 %v15118_v34, %v8068_v40  ;;  %v13898_v9 = vld [vmem:[#allocation9 + $0x7cc] sm:$0xf] }
 0x439   :  { %8661 = vmatpush.bf16.msrb.mxu0 %v11688_v23  ;;  %v13822_v23 = vld [vmem:[#allocation9 + $0x56c] sm:$0xf]  ;;  %8558 = vmatmul.bf16.gmra.mxu2 %v14862_v62  ;;  %v8158_v47 = vadd.f32 %v15138_v56, %v8139_v16  ;;  %v15217_v27 = vpop.f32.mrf.mxu2  ;;  %v11765_v50 = vld [vmem:[#allocation9 + $0x558] sm:$0xf0]  ;;  %v11640_v13 = vor.u32 %v13786_v49, %v11637_v42  ;;  %v8251_v54 = vadd.f32 %v15177_v43, %v8232_v21 }
 0x43a   :  { %8680 = vmatpush.bf16.msrb.mxu1 %v11816_v51  ;;  %v11909_v51 = vld [vmem:[#allocation9 + $0x678] sm:$0xf0]  ;;  %v11784_v17 = vor.u32 %v13822_v23, %v11781_v0  ;;  %8572 = vmatmul.bf16.vlgmr.msrb.gmra.mxu3 %v14868_v60  ;;  %v15222_v10 = vpop.f32.mrf.mxu0  ;;  %v13782_v3 = vld [vmem:[#allocation9 + $0x42c] sm:$0xf]  ;;  %v8106_v0 = vadd.f32 %v15122_v57, %v8087_v52  ;;  %v8161_v43 = vadd.f32 %v15146_v63, %v8142_v5 }
 0x43b   :  { %8700 = vmatpush.bf16.msrb.mxu2 %v11928_v22  ;;  %v11912_v53 = vor.u32 %v13854_v26, %v11909_v51  ;;  %v8177_v30 = vadd.f32 %v15142_v37, %v8158_v47  ;;  %v11893_v58 = vld [vmem:[#allocation9 + $0x658] sm:$0xf0]  ;;  %v11768_v37 = vor.u32 %v13818_v14, %v11765_v50  ;;  %v13814_v38 = vld [vmem:[#allocation9 + $0x52c] sm:$0xf] }
 0x43c   :  { %8647 = vmatpush.bf16.msra.mxu3 %v11480_v4  ;;  %v12085_v1 = vld [vmem:[#allocation9 + $0x7d8] sm:$0xf0]  ;;  %v8125_v61 = vadd.f32 %v15148_v33, %v8106_v0  ;;  %v13894_v47 = vld [vmem:[#allocation9 + $0x7ac] sm:$0xf] }
 0x43d   :  { %8662 = vmatpush.bf16.msrb.mxu0 %v11672_v44  ;;  %v13850_v44 = vld [vmem:[#allocation9 + $0x64c] sm:$0xf]  ;;  %v8196_v16 = vadd.f32 %v15170_v35, %v8177_v30  ;;  %v12088_v31 = vor.u32 %v13898_v9, %v12085_v1  ;;  %v11621_v4 = vld [vmem:[#allocation9 + $0x438] sm:$0xf0] }
 0x43e   :  { %8681 = vmatpush.bf16.msrb.mxu1 %v11800_v28  ;;  %v15224_v56 = vpop.f32.mrf.mxu1  ;;  %v15230_v28 = vperm.slane %v15227_v45, 1  ;;  %v11896_v22 = vor.u32 %v13850_v44, %v11893_v58  ;;  %v8269_v8 = vpop.f32.mrf.mxu3  ;;  %v11749_v23 = vld [vmem:[#allocation9 + $0x538] sm:$0xf0]  ;;  %v11624_v34 = vor.u32 %v13782_v3, %v11621_v4  ;;  %v13846_v35 = vld [vmem:[#allocation9 + $0x62c] sm:$0xf] }
 0x43f   :  { %8701 = vmatpush.bf16.msrb.mxu2 %v11912_v53  ;;  %v8215_v55 = vadd.f32 %v15183_v39, %v8196_v16  ;;  %v11877_v26 = vld [vmem:[#allocation9 + $0x638] sm:$0xf0]  ;;  %v11752_v51 = vor.u32 %v13814_v38, %v11749_v23  ;;  %v13778_v53 = vld [vmem:[#allocation9 + $0x40c] sm:$0xf]  ;;  %v8180_v39 = vadd.f32 %v15153_v6, %v8161_v43  ;;  %v15529_v23 = vld [vmem:[#allocation45_spill] sm:$0xff] }
 0x440   :  { %8716 = vmatpush.bf16.msrb.mxu3 %v12104_v12  ;;  %v11880_v40 = vor.u32 %v13846_v35, %v11877_v26  ;;  %v12069_v57 = vld [vmem:[#allocation9 + $0x7b8] sm:$0xf0]  ;;  %v13810_v7 = vld [vmem:[#allocation9 + $0x50c] sm:$0xf]  ;;  %v8144_v12 = vadd.f32 %v15156_v20, %v8125_v61 }
 0x441   :  { %8663 = vmatpush.bf16.msrb.mxu0 %v11656_v29  ;;  %v8270_v29 = vadd.f32 %v8269_v8, %v8251_v54  ;;  %v15241_v24 = vpop.f32.mrf.mxu2  ;;  %v12072_v2 = vor.u32 %v13894_v47, %v12069_v57  ;;  %v11605_v49 = vld [vmem:[#allocation9 + $0x418] sm:$0xf0]  ;;  %v8234_v42 = vadd.f32 %v15185_v11, %v8215_v55  ;;  %v13842_v30 = vld [vmem:[#allocation9 + $0x60c] sm:$0xf]  ;;  %v15527_v54 = vld [vmem:[#allocation19_spill] sm:$0xff] }
 0x442   :  { %8682 = vmatpush.bf16.msrb.mxu1 %v11784_v17  ;;  %v11733_v63 = vld [vmem:[#allocation9 + $0x518] sm:$0xf0]  ;;  %v8288_v33 = vpop.f32.mrf.mxu0  ;;  %v11608_v50 = vor.u32 %v13778_v53, %v11605_v49  ;;  %v13890_v20 = vld [vmem:[#allocation9 + $0x78c] sm:$0xf]  ;;  %v15528_v8 = vld [vmem:[#allocation21_spill] sm:$0xff]  ;;  %v8163_v0 = vadd.f32 %v15529_v23, %v8144_v12 }
 0x443   :  { %v8949_v17 = vadd.f32 %v15230_v28, %v8270_v29  ;;  %8702 = vmatpush.bf16.msrb.mxu2 %v11896_v22  ;;  %v11861_v21 = vld [vmem:[#allocation9 + $0x618] sm:$0xf0]  ;;  %v11736_v44 = vor.u32 %v13810_v7, %v11733_v63  ;;  %v8253_v58 = vadd.f32 %v15195_v32, %v8234_v42  ;;  %v13934_v11 = vld [vmem:[#allocation9 + $0x8ec] sm:$0xf] }
 0x444   :  { %8717 = vmatpush.bf16.msrb.mxu3 %v12088_v31  ;;  %v11864_v5 = vor.u32 %v13842_v30, %v11861_v21  ;;  %v13966_v9 = vld [vmem:[#allocation9 + $0x9ec] sm:$0xf]  ;;  %v12357_v1 = vld [vmem:[#allocation9 + $0x9f8] sm:$0xf0] }
 0x445   :  { %8664 = vmatpush.bf16.msrb.mxu0 %v11640_v13  ;;  %8965 = vst [vmem:[#allocation12 + $0x8] sm:$0xff] %v8949_v17  ;;  %v8199_v13 = vadd.f32 %v15188_v19, %v8180_v39  ;;  %v12229_v19 = vld [vmem:[#allocation9 + $0x8f8] sm:$0xf0]  ;;  %v12360_v31 = vor.u32 %v13966_v9, %v12357_v1  ;;  %v13998_v4 = vld [vmem:[#allocation9 + $0xaec] sm:$0xf] }
 0x446   :  { %8683 = vmatpush.bf16.msrb.mxu1 %v11768_v37  ;;  %v8307_v14 = vpop.f32.mrf.mxu1  ;;  %v12053_v37 = vld [vmem:[#allocation9 + $0x798] sm:$0xf0]  ;;  %v8271_v16 = vpop.f32.mrf.mxu3  ;;  %v12232_v32 = vor.u32 %v13934_v11, %v12229_v19  ;;  %v13886_v55 = vld [vmem:[#allocation9 + $0x76c] sm:$0xf] }
 0x447   :  { %v8308_v6 = vadd.f32 %v8307_v14, %v8288_v33  ;;  %8703 = vmatpush.bf16.msrb.mxu2 %v11880_v40  ;;  %v8218_v52 = vadd.f32 %v15199_v48, %v8199_v13  ;;  %8610 = vmatmul.bf16.vlgmr.msra.gmra.mxu1 %v15527_v54  ;;  %v12056_v22 = vor.u32 %v13890_v20, %v12053_v37  ;;  %v12485_v38 = vld [vmem:[#allocation9 + $0xaf8] sm:$0xf0]  ;;  %v15530_v35 = vld [vmem:[#allocation46_spill] sm:$0xff] }
 0x448   :  { %8718 = vmatpush.bf16.msrb.mxu3 %v12072_v2  ;;  %8591 = vmatmul.bf16.vlgmr.msra.gmra.mxu0 %v15499_v15  ;;  %v8272_v3 = vadd.f32 %v8271_v16, %v8253_v58  ;;  %v12488_v48 = vor.u32 %v13998_v4, %v12485_v38  ;;  %v12037_v29 = vld [vmem:[#allocation9 + $0x778] sm:$0xf0]  ;;  %v8182_v26 = vadd.f32 %v15530_v35, %v8163_v0  ;;  %v13962_v40 = vld [vmem:[#allocation9 + $0x9cc] sm:$0xf] }
 0x449   :  { %8665 = vmatpush.bf16.msrb.mxu0 %v11624_v34  ;;  %8629 = vmatmul.bf16.vlgmr.msra.gmra.mxu2 %v15528_v8  ;;  %v13930_v34 = vld [vmem:[#allocation9 + $0x8cc] sm:$0xf]  ;;  %v8237_v43 = vadd.f32 %v15201_v25, %v8218_v52  ;;  %v12040_v61 = vor.u32 %v13886_v55, %v12037_v29  ;;  %v12213_v17 = vld [vmem:[#allocation9 + $0x8d8] sm:$0xf0] }
 0x44a   :  { %8684 = vmatpush.bf16.msrb.mxu1 %v11752_v51  ;;  %v8953_v15 = vadd.f32 %v15230_v28, %v8272_v3  ;;  %v8326_v51 = vpop.f32.mrf.mxu2  ;;  %v12341_v47 = vld [vmem:[#allocation9 + $0x9d8] sm:$0xf0]  ;;  %v8290_v39 = vpop.f32.mrf.mxu0  ;;  %v12216_v49 = vor.u32 %v13930_v34, %v12213_v17  ;;  %v13994_v63 = vld [vmem:[#allocation9 + $0xacc] sm:$0xf]  ;;  %v8201_v33 = vadd.f32 %v15206_v36, %v8182_v26 }
 0x44b   :  { %8704 = vmatpush.bf16.msrb.mxu2 %v11864_v5  ;;  %v15255_v57 = vadd.f32 %v8326_v51, %v8308_v6  ;;  %v15531_v53 = vld [vmem:[#allocation44_spill] sm:$0xff]  ;;  %v12344_v7 = vor.u32 %v13962_v40, %v12341_v47  ;;  %v8256_v14 = vadd.f32 %v15217_v27, %v8237_v43  ;;  %v13926_v21 = vld [vmem:[#allocation9 + $0x8ac] sm:$0xf] }
 0x44c   :  { %8719 = vmatpush.bf16.msrb.mxu3 %v12056_v22  ;;  %8969 = vst [vmem:[#allocation12 + $0x28] sm:$0xff] %v8953_v15  ;;  %v12469_v12 = vld [vmem:[#allocation9 + $0xad8] sm:$0xf0]  ;;  %v13958_v58 = vld [vmem:[#allocation9 + $0x9ac] sm:$0xf]  ;;  %v8220_v20 = vadd.f32 %v15222_v10, %v8201_v33 }
 0x44d   :  { %8666 = vmatpush.bf16.msrb.mxu0 %v11608_v50  ;;  %8577 = vmatmul.bf16.gmra.mxu3 %v15531_v53  ;;  %v12472_v25 = vor.u32 %v13994_v63, %v12469_v12  ;;  %v13882_v50 = vld [vmem:[#allocation9 + $0x74c] sm:$0xf]  ;;  %v12021_v30 = vld [vmem:[#allocation9 + $0x758] sm:$0xf0] }
 0x44e   :  { %8685 = vmatpush.bf16.msrb.mxu1 %v11736_v44  ;;  %v8309_v2 = vpop.f32.mrf.mxu1  ;;  %v8274_v13 = vpop.f32.mrf.mxu3  ;;  %v12024_v6 = vor.u32 %v13882_v50, %v12021_v30  ;;  %v12197_v44 = vld [vmem:[#allocation9 + $0x8b8] sm:$0xf0]  ;;  %v13990_v16 = vld [vmem:[#allocation9 + $0xaac] sm:$0xf] }
 0x44f   :  { %8773 = vmatpush.bf16.msra.mxu2 %v12488_v48  ;;  %v8310_v42 = vadd.f32 %v8309_v2, %v8290_v39  ;;  %v12325_v5 = vld [vmem:[#allocation9 + $0x9b8] sm:$0xf0]  ;;  %v8275_v37 = vadd.f32 %v8274_v13, %v8256_v14  ;;  %v12200_v11 = vor.u32 %v13926_v21, %v12197_v44  ;;  %v13878_v22 = vld [vmem:[#allocation9 + $0x72c] sm:$0xf] }
 0x450   :  { %8720 = vmatpush.bf16.msrb.mxu3 %v12040_v61  ;;  %v12328_v52 = vor.u32 %v13958_v58, %v12325_v5  ;;  %v12453_v36 = vld [vmem:[#allocation9 + $0xab8] sm:$0xf0]  ;;  %v13922_v9 = vld [vmem:[#allocation9 + $0x88c] sm:$0xf] }
 0x451   :  { %8735 = vmatpush.bf16.msra.mxu0 %v12232_v32  ;;  %v12456_v27 = vor.u32 %v13990_v16, %v12453_v36  ;;  %v8957_v54 = vadd.f32 %v15230_v28, %v8275_v37  ;;  %v12005_v19 = vld [vmem:[#allocation9 + $0x738] sm:$0xf0]  ;;  %v13954_v32 = vld [vmem:[#allocation9 + $0x98c] sm:$0xf] }
 0x452   :  { %8754 = vmatpush.bf16.msra.mxu1 %v12360_v31  ;;  %v8328_v1 = vpop.f32.mrf.mxu2  ;;  %v12008_v3 = vor.u32 %v13878_v22, %v12005_v19  ;;  %v12181_v8 = vld [vmem:[#allocation9 + $0x898] sm:$0xf0]  ;;  %v8239_v31 = vadd.f32 %v15224_v56, %v8220_v20  ;;  %v8293_v38 = vpop.f32.mrf.mxu0  ;;  %v13986_v15 = vld [vmem:[#allocation9 + $0xa8c] sm:$0xf]  ;;  %v15535_v20 = vld [vmem:[#allocation23_spill] sm:$0xff] }
 0x453   :  { %8774 = vmatpush.bf16.msra.mxu2 %v12472_v25  ;;  %v12309_v10 = vld [vmem:[#allocation9 + $0x998] sm:$0xf0]  ;;  %8973 = vst [vmem:[#allocation12 + $0x48] sm:$0xff] %v8957_v54  ;;  %v15263_v4 = vadd.f32 %v8328_v1, %v8310_v42  ;;  %v12184_v0 = vor.u32 %v13922_v9, %v12181_v8  ;;  %v13874_v26 = vld [vmem:[#allocation9 + $0x70c] sm:$0xf] }
 0x454   :  { %8721 = vmatpush.bf16.msrb.mxu3 %v12024_v6  ;;  %v12312_v48 = vor.u32 %v13954_v32, %v12309_v10  ;;  %v12437_v55 = vld [vmem:[#allocation9 + $0xa98] sm:$0xf0]  ;;  %v8258_v35 = vadd.f32 %v15241_v24, %v8239_v31  ;;  %v13918_v51 = vld [vmem:[#allocation9 + $0x86c] sm:$0xf] }
 0x455   :  { %8736 = vmatpush.bf16.msra.mxu0 %v12216_v49  ;;  %v12440_v34 = vor.u32 %v13986_v15, %v12437_v55  ;;  %v11989_v43 = vld [vmem:[#allocation9 + $0x718] sm:$0xf0]  ;;  %v15532_v56 = vld [vmem:[#allocation18_spill] sm:$0xff] }
 0x456   :  { %8755 = vmatpush.bf16.msra.mxu1 %v12344_v7  ;;  %v8312_v23 = vpop.f32.mrf.mxu1  ;;  %v8276_v61 = vpop.f32.mrf.mxu3  ;;  %v15533_v17 = vld [vmem:[#allocation20_spill] sm:$0xff]  ;;  %v11992_v40 = vor.u32 %v13874_v26, %v11989_v43  ;;  %v13950_v39 = vld [vmem:[#allocation9 + $0x96c] sm:$0xf] }
 0x457   :  { %8775 = vmatpush.bf16.msra.mxu2 %v12456_v27  ;;  %v8313_v29 = vadd.f32 %v8312_v23, %v8293_v38  ;;  %8615 = vmatmul.bf16.gmra.mxu1 %v15533_v17  ;;  %v12165_v47 = vld [vmem:[#allocation9 + $0x878] sm:$0xf0]  ;;  %v8277_v49 = vadd.f32 %v8276_v61, %v8258_v35  ;;  %v15534_v7 = vld [vmem:[#allocation22_spill] sm:$0xff] }
 0x458   :  { %8722 = vmatpush.bf16.msrb.mxu3 %v12008_v3  ;;  %8596 = vmatmul.bf16.gmra.mxu0 %v15532_v56  ;;  %v12293_v2 = vld [vmem:[#allocation9 + $0x978] sm:$0xf0]  ;;  %v12168_v63 = vor.u32 %v13918_v51, %v12165_v47  ;;  %v13982_v24 = vld [vmem:[#allocation9 + $0xa6c] sm:$0xf] }
 0x459   :  { %8737 = vmatpush.bf16.msra.mxu0 %v12200_v11  ;;  %8634 = vmatmul.bf16.gmra.mxu2 %v15534_v7  ;;  %v12296_v12 = vor.u32 %v13950_v39, %v12293_v2  ;;  %v12421_v42 = vld [vmem:[#allocation9 + $0xa78] sm:$0xf0]  ;;  %v8961_v33 = vadd.f32 %v15230_v28, %v8277_v49  ;;  %v14030_v14 = vld [vmem:[#allocation9 + $0xbec] sm:$0xf] }
 0x45a   :  { %8756 = vmatpush.bf16.msra.mxu1 %v12328_v52  ;;  %v12424_v25 = vor.u32 %v13982_v24, %v12421_v42  ;;  %v12613_v50 = vld [vmem:[#allocation9 + $0xbf8] sm:$0xf0]  ;;  %v13914_v30 = vld [vmem:[#allocation9 + $0x84c] sm:$0xf]  ;;  %v8331_v21 = vpop.f32.mrf.mxu2  ;;  %v8295_v37 = vpop.f32.mrf.mxu0  ;;  %v15536_v42 = vld [vmem:[#allocation25_spill] sm:$0xff] }
 0x45b   :  { %8776 = vmatpush.bf16.msra.mxu2 %v12440_v34  ;;  %v12616_v13 = vor.u32 %v14030_v14, %v12613_v50  ;;  %v12149_v6 = vld [vmem:[#allocation9 + $0x858] sm:$0xf0]  ;;  %v13946_v44 = vld [vmem:[#allocation9 + $0x94c] sm:$0xf]  ;;  %8977 = vst [vmem:[#allocation12 + $0x68] sm:$0xff] %v8961_v33  ;;  %v15270_v5 = vadd.f32 %v8331_v21, %v8313_v29 }
 0x45c   :  { %8723 = vmatpush.bf16.msrb.mxu3 %v11992_v40  ;;  %v12277_v58 = vld [vmem:[#allocation9 + $0x958] sm:$0xf0]  ;;  %v12152_v52 = vor.u32 %v13914_v30, %v12149_v6  ;;  %v13978_v28 = vld [vmem:[#allocation9 + $0xa4c] sm:$0xf] }
 0x45d   :  { %8738 = vmatpush.bf16.msra.mxu0 %v12184_v0  ;;  %8648 = vmatmul.bf16.vlgmr.msra.gmra.mxu3 %v15535_v20  ;;  %v12280_v16 = vor.u32 %v13946_v44, %v12277_v58  ;;  %v12405_v36 = vld [vmem:[#allocation9 + $0xa58] sm:$0xf0]  ;;  %v14026_v22 = vld [vmem:[#allocation9 + $0xbcc] sm:$0xf] }
 0x45e   :  { %8757 = vmatpush.bf16.msra.mxu1 %v12312_v48  ;;  %v8314_v11 = vpop.f32.mrf.mxu1  ;;  %v12408_v54 = vor.u32 %v13978_v28, %v12405_v36  ;;  %v12597_v19 = vld [vmem:[#allocation9 + $0xbd8] sm:$0xf0]  ;;  %v13910_v9 = vld [vmem:[#allocation9 + $0x82c] sm:$0xf]  ;;  %v8345_v1 = vpop.f32.mrf.mxu3 }
 0x45f   :  { %v8315_v27 = vadd.f32 %v8314_v11, %v8295_v37  ;;  %8777 = vmatpush.bf16.msra.mxu2 %v12424_v25  ;;  %v12600_v3 = vor.u32 %v14026_v22, %v12597_v19  ;;  %v12133_v8 = vld [vmem:[#allocation9 + $0x838] sm:$0xf0]  ;;  %v13942_v32 = vld [vmem:[#allocation9 + $0x92c] sm:$0xf]  ;;  %v15274_v31 = vadd.f32 %v8345_v1, %v15255_v57  ;;  %v15537_v25 = vld [vmem:[#allocation27_spill] sm:$0xff] }
 0x460   :  { %8792 = vmatpush.bf16.msra.mxu3 %v12616_v13  ;;  %v12261_v10 = vld [vmem:[#allocation9 + $0x938] sm:$0xf0]  ;;  %v12136_v38 = vor.u32 %v13910_v9, %v12133_v8  ;;  %v13974_v0 = vld [vmem:[#allocation9 + $0xa2c] sm:$0xf]  ;;  %v15538_v13 = vld [vmem:[#allocation29_spill] sm:$0xff] }
 0x461   :  { %8739 = vmatpush.bf16.msra.mxu0 %v12168_v63  ;;  %v12264_v23 = vor.u32 %v13942_v32, %v12261_v10  ;;  %v12389_v48 = vld [vmem:[#allocation9 + $0xa38] sm:$0xf0]  ;;  %v14022_v55 = vld [vmem:[#allocation9 + $0xbac] sm:$0xf] }
 0x462   :  { %8758 = vmatpush.bf16.msra.mxu1 %v12296_v12  ;;  %v12392_v15 = vor.u32 %v13974_v0, %v12389_v48  ;;  %v12581_v29 = vld [vmem:[#allocation9 + $0xbb8] sm:$0xf0]  ;;  %v13906_v34 = vld [vmem:[#allocation9 + $0x80c] sm:$0xf]  ;;  %v8333_v35 = vpop.f32.mrf.mxu2  ;;  %v15278_v57 = vpop.f32.mrf.mxu0 }
 0x463   :  { %8778 = vmatpush.bf16.msra.mxu2 %v12408_v54  ;;  %v12584_v26 = vor.u32 %v14022_v55, %v12581_v29  ;;  %v12117_v43 = vld [vmem:[#allocation9 + $0x818] sm:$0xf0]  ;;  %v13938_v51 = vld [vmem:[#allocation9 + $0x90c] sm:$0xf]  ;;  %v15276_v56 = vadd.f32 %v8333_v35, %v8315_v27 }
 0x464   :  { %8793 = vmatpush.bf16.msra.mxu3 %v12600_v3  ;;  %v12245_v61 = vld [vmem:[#allocation9 + $0x918] sm:$0xf0]  ;;  %v12120_v40 = vor.u32 %v13906_v34, %v12117_v43  ;;  %v13970_v39 = vld [vmem:[#allocation9 + $0xa0c] sm:$0xf] }
 0x465   :  { %8740 = vmatpush.bf16.msra.mxu0 %v12152_v52  ;;  %v12248_v47 = vor.u32 %v13938_v51, %v12245_v61  ;;  %v12373_v2 = vld [vmem:[#allocation9 + $0xa18] sm:$0xf0]  ;;  %v14018_v7 = vld [vmem:[#allocation9 + $0xb8c] sm:$0xf] }
 0x466   :  { %8759 = vmatpush.bf16.msra.mxu1 %v12280_v16  ;;  %v15280_v17 = vpop.f32.mrf.mxu1  ;;  %v12376_v49 = vor.u32 %v13970_v39, %v12373_v2  ;;  %v12565_v63 = vld [vmem:[#allocation9 + $0xb98] sm:$0xf0]  ;;  %v14062_v12 = vld [vmem:[#allocation9 + $0xcec] sm:$0xf]  ;;  %v8347_v24 = vpop.f32.mrf.mxu3 }
 0x467   :  { %8779 = vmatpush.bf16.msra.mxu2 %v12392_v15  ;;  %8686 = vmatmul.bf16.vlgmr.msrb.gmra.mxu1 %v15537_v25  ;;  %v12568_v33 = vor.u32 %v14018_v7, %v12565_v63  ;;  %v12741_v14 = vld [vmem:[#allocation9 + $0xcf8] sm:$0xf0]  ;;  %v14094_v50 = vld [vmem:[#allocation9 + $0xdec] sm:$0xf]  ;;  %v15285_v21 = vadd.f32 %v8347_v24, %v15263_v4 }
 0x468   :  { %8794 = vmatpush.bf16.msra.mxu3 %v12584_v26  ;;  %8667 = vmatmul.bf16.vlgmr.msrb.gmra.mxu0 %v15536_v42  ;;  %v12869_v30 = vld [vmem:[#allocation9 + $0xdf8] sm:$0xf0]  ;;  %v12744_v6 = vor.u32 %v14062_v12, %v12741_v14  ;;  %v14126_v58 = vld [vmem:[#allocation9 + $0xeec] sm:$0xf] }
 0x469   :  { %8741 = vmatpush.bf16.msra.mxu0 %v12136_v38  ;;  %8705 = vmatmul.bf16.vlgmr.msrb.gmra.mxu2 %v15538_v13  ;;  %v12872_v44 = vor.u32 %v14094_v50, %v12869_v30  ;;  %v12997_v20 = vld [vmem:[#allocation9 + $0xef8] sm:$0xf0]  ;;  %v14014_v11 = vld [vmem:[#allocation9 + $0xb6c] sm:$0xf] }
 0x46a   :  { %8760 = vmatpush.bf16.msra.mxu1 %v12264_v23  ;;  %v13000_v37 = vor.u32 %v14126_v58, %v12997_v20  ;;  %v12549_v52 = vld [vmem:[#allocation9 + $0xb78] sm:$0xf0]  ;;  %v14058_v16 = vld [vmem:[#allocation9 + $0xccc] sm:$0xf]  ;;  %v15288_v28 = vpop.f32.mrf.mxu2  ;;  %v15291_v19 = vpop.f32.mrf.mxu0 }
 0x46b   :  { %8780 = vmatpush.bf16.msra.mxu2 %v12376_v49  ;;  %v12552_v4 = vor.u32 %v14014_v11, %v12549_v52  ;;  %v12725_v36 = vld [vmem:[#allocation9 + $0xcd8] sm:$0xf0]  ;;  %v14090_v27 = vld [vmem:[#allocation9 + $0xdcc] sm:$0xf] }
 0x46c   :  { %8795 = vmatpush.bf16.msra.mxu3 %v12568_v33  ;;  %v12853_v54 = vld [vmem:[#allocation9 + $0xdd8] sm:$0xf0]  ;;  %v12728_v1 = vor.u32 %v14058_v16, %v12725_v36  ;;  %v14122_v8 = vld [vmem:[#allocation9 + $0xecc] sm:$0xf] }
 0x46d   :  { %8742 = vmatpush.bf16.msra.mxu0 %v12120_v40  ;;  %v15539_v22 = vld [vmem:[#allocation24_spill] sm:$0xff]  ;;  %v12856_v3 = vor.u32 %v14090_v27, %v12853_v54  ;;  %v14010_v38 = vld [vmem:[#allocation9 + $0xb4c] sm:$0xf] }
 0x46e   :  { %8761 = vmatpush.bf16.msra.mxu1 %v12248_v47  ;;  %8653 = vmatmul.bf16.gmra.mxu3 %v15539_v22  ;;  %v15293_v9 = vpop.f32.mrf.mxu1  ;;  %v12981_v32 = vld [vmem:[#allocation9 + $0xed8] sm:$0xf0]  ;;  %v14054_v0 = vld [vmem:[#allocation9 + $0xcac] sm:$0xf]  ;;  %v8350_v48 = vpop.f32.mrf.mxu3 }
 0x46f   :  { %8849 = vmatpush.bf16.msrb.mxu2 %v13000_v37  ;;  %v12984_v10 = vor.u32 %v14122_v8, %v12981_v32  ;;  %v12533_v23 = vld [vmem:[#allocation9 + $0xb58] sm:$0xf0]  ;;  %v14086_v29 = vld [vmem:[#allocation9 + $0xdac] sm:$0xf]  ;;  %v15296_v35 = vadd.f32 %v8350_v48, %v15270_v5 }
 0x470   :  { %8796 = vmatpush.bf16.msra.mxu3 %v12552_v4  ;;  %v12536_v15 = vor.u32 %v14010_v38, %v12533_v23  ;;  %v12709_v55 = vld [vmem:[#allocation9 + $0xcb8] sm:$0xf0]  ;;  %v14118_v51 = vld [vmem:[#allocation9 + $0xeac] sm:$0xf] }
 0x471   :  { %8811 = vmatpush.bf16.msrb.mxu0 %v12744_v6  ;;  %v12837_v34 = vld [vmem:[#allocation9 + $0xdb8] sm:$0xf0]  ;;  %v12712_v26 = vor.u32 %v14054_v0, %v12709_v55  ;;  %v14006_v47 = vld [vmem:[#allocation9 + $0xb2c] sm:$0xf]  ;;  %v15543_v55 = vld [vmem:[#allocation31_spill] sm:$0xff] }
 0x472   :  { %8830 = vmatpush.bf16.msrb.mxu1 %v12872_v44  ;;  %v12840_v43 = vor.u32 %v14086_v29, %v12837_v34  ;;  %v12965_v61 = vld [vmem:[#allocation9 + $0xeb8] sm:$0xf0]  ;;  %v14050_v2 = vld [vmem:[#allocation9 + $0xc8c] sm:$0xf]  ;;  %v15298_v49 = vpop.f32.mrf.mxu2  ;;  %v15300_v5 = vpop.f32.mrf.mxu0 }
 0x473   :  { %8850 = vmatpush.bf16.msrb.mxu2 %v12984_v10  ;;  %v12968_v40 = vor.u32 %v14118_v51, %v12965_v61  ;;  %v12517_v39 = vld [vmem:[#allocation9 + $0xb38] sm:$0xf0]  ;;  %v14082_v12 = vld [vmem:[#allocation9 + $0xd8c] sm:$0xf] }
 0x474   :  { %8797 = vmatpush.bf16.msra.mxu3 %v12536_v15  ;;  %v12520_v7 = vor.u32 %v14006_v47, %v12517_v39  ;;  %v12693_v63 = vld [vmem:[#allocation9 + $0xc98] sm:$0xf0]  ;;  %v14114_v14 = vld [vmem:[#allocation9 + $0xe8c] sm:$0xf] }
 0x475   :  { %8812 = vmatpush.bf16.msrb.mxu0 %v12728_v1  ;;  %v12821_v24 = vld [vmem:[#allocation9 + $0xd98] sm:$0xf0]  ;;  %v12696_v25 = vor.u32 %v14050_v2, %v12693_v63  ;;  %v14002_v13 = vld [vmem:[#allocation9 + $0xb0c] sm:$0xf] }
 0x476   :  { %8831 = vmatpush.bf16.msrb.mxu1 %v12856_v3  ;;  %v15302_v42 = vpop.f32.mrf.mxu1  ;;  %v12824_v33 = vor.u32 %v14082_v12, %v12821_v24  ;;  %v12949_v50 = vld [vmem:[#allocation9 + $0xe98] sm:$0xf0]  ;;  %v14046_v44 = vld [vmem:[#allocation9 + $0xc6c] sm:$0xf]  ;;  %v8352_v58 = vpop.f32.mrf.mxu3 }
 0x477   :  { %8851 = vmatpush.bf16.msrb.mxu2 %v12968_v40  ;;  %v12952_v30 = vor.u32 %v14114_v14, %v12949_v50  ;;  %v12501_v6 = vld [vmem:[#allocation9 + $0xb18] sm:$0xf0]  ;;  %v15540_v20 = vld [vmem:[#allocation26_spill] sm:$0xff]  ;;  %v15307_v36 = vadd.f32 %v8352_v58, %v15276_v56 }
 0x478   :  { %8798 = vmatpush.bf16.msra.mxu3 %v12520_v7  ;;  %8672 = vmatmul.bf16.gmra.mxu0 %v15540_v20  ;;  %v15541_v37 = vld [vmem:[#allocation28_spill] sm:$0xff]  ;;  %v12504_v11 = vor.u32 %v14002_v13, %v12501_v6  ;;  %v14078_v16 = vld [vmem:[#allocation9 + $0xd6c] sm:$0xf] }
 0x479   :  { %8813 = vmatpush.bf16.msrb.mxu0 %v12712_v26  ;;  %8691 = vmatmul.bf16.gmra.mxu1 %v15541_v37  ;;  %v12677_v52 = vld [vmem:[#allocation9 + $0xc78] sm:$0xf0]  ;;  %v15542_v27 = vld [vmem:[#allocation30_spill] sm:$0xff] }
 0x47a   :  { %8832 = vmatpush.bf16.msrb.mxu1 %v12840_v43  ;;  %v12805_v4 = vld [vmem:[#allocation9 + $0xd78] sm:$0xf0]  ;;  %8710 = vmatmul.bf16.gmra.mxu2 %v15542_v27  ;;  %v12680_v54 = vor.u32 %v14046_v44, %v12677_v52  ;;  %v14110_v1 = vld [vmem:[#allocation9 + $0xe6c] sm:$0xf]  ;;  %v15310_v23 = vpop.f32.mrf.mxu2  ;;  %v15313_v29 = vpop.f32.mrf.mxu0 }
 0x47b   :  { %v12808_v22 = vor.u32 %v14078_v16, %v12805_v4  ;;  %v12933_v3 = vld [vmem:[#allocation9 + $0xe78] sm:$0xf0]  ;;  %8852 = vmatpush.bf16.msrb.mxu2 %v12952_v30  ;;  %v14158_v32 = vld [vmem:[#allocation9 + $0xfec] sm:$0xf] }
 0x47c   :  { %8799 = vmatpush.bf16.msra.mxu3 %v12504_v11  ;;  %v12936_v8 = vor.u32 %v14110_v1, %v12933_v3  ;;  %v13125_v10 = vld [vmem:[#allocation9 + $0xff8] sm:$0xf0]  ;;  %v14042_v38 = vld [vmem:[#allocation9 + $0xc4c] sm:$0xf] }
 0x47d   :  { %8814 = vmatpush.bf16.msrb.mxu0 %v12696_v25  ;;  %v13128_v0 = vor.u32 %v14158_v32, %v13125_v10  ;;  %v12661_v48 = vld [vmem:[#allocation9 + $0xc58] sm:$0xf0]  ;;  %v14074_v56 = vld [vmem:[#allocation9 + $0xd4c] sm:$0xf] }
 0x47e   :  { %8833 = vmatpush.bf16.msrb.mxu1 %v12824_v33  ;;  %v12789_v15 = vld [vmem:[#allocation9 + $0xd58] sm:$0xf0]  ;;  %8724 = vmatmul.bf16.vlgmr.msrb.gmra.mxu3 %v15543_v55  ;;  %v15315_v34 = vpop.f32.mrf.mxu1  ;;  %v12664_v26 = vor.u32 %v14042_v38, %v12661_v48  ;;  %v14106_v51 = vld [vmem:[#allocation9 + $0xe4c] sm:$0xf]  ;;  %v15317_v7 = vpop.f32.mrf.mxu3  ;;  %v15545_v48 = vld [vmem:[#allocation35_spill] sm:$0xff] }
 0x47f   :  { %v12792_v43 = vor.u32 %v14074_v56, %v12789_v15  ;;  %v12917_v61 = vld [vmem:[#allocation9 + $0xe58] sm:$0xf0]  ;;  %8853 = vmatpush.bf16.msrb.mxu2 %v12936_v8  ;;  %v14154_v47 = vld [vmem:[#allocation9 + $0xfcc] sm:$0xf]  ;;  %v15546_v15 = vld [vmem:[#allocation37_spill] sm:$0xff] }
 0x480   :  { %8868 = vmatpush.bf16.msrb.mxu3 %v13128_v0  ;;  %v12920_v40 = vor.u32 %v14106_v51, %v12917_v61  ;;  %v13109_v39 = vld [vmem:[#allocation9 + $0xfd8] sm:$0xf0]  ;;  %v14038_v2 = vld [vmem:[#allocation9 + $0xc2c] sm:$0xf]  ;;  %v15544_v0 = vld [vmem:[#allocation33_spill] sm:$0xff] }
 0x481   :  { %8815 = vmatpush.bf16.msrb.mxu0 %v12680_v54  ;;  %v13112_v63 = vor.u32 %v14154_v47, %v13109_v39  ;;  %v12645_v12 = vld [vmem:[#allocation9 + $0xc38] sm:$0xf0]  ;;  %v14070_v24 = vld [vmem:[#allocation9 + $0xd2c] sm:$0xf] }
 0x482   :  { %8834 = vmatpush.bf16.msrb.mxu1 %v12808_v22  ;;  %v12773_v25 = vld [vmem:[#allocation9 + $0xd38] sm:$0xf0]  ;;  %v12648_v33 = vor.u32 %v14038_v2, %v12645_v12  ;;  %v14102_v50 = vld [vmem:[#allocation9 + $0xe2c] sm:$0xf]  ;;  %v15319_v20 = vpop.f32.mrf.mxu2 }
 0x483   :  { %v12776_v14 = vor.u32 %v14070_v24, %v12773_v25  ;;  %v12901_v30 = vld [vmem:[#allocation9 + $0xe38] sm:$0xf0]  ;;  %8854 = vmatpush.bf16.msrb.mxu2 %v12920_v40  ;;  %v14150_v6 = vld [vmem:[#allocation9 + $0xfac] sm:$0xf] }
 0x484   :  { %8869 = vmatpush.bf16.msrb.mxu3 %v13112_v63  ;;  %v12904_v13 = vor.u32 %v14102_v50, %v12901_v30  ;;  %v13093_v44 = vld [vmem:[#allocation9 + $0xfb8] sm:$0xf0]  ;;  %v14034_v58 = vld [vmem:[#allocation9 + $0xc0c] sm:$0xf] }
 0x485   :  { %8816 = vmatpush.bf16.msrb.mxu0 %v12664_v26  ;;  %v13096_v37 = vor.u32 %v14150_v6, %v13093_v44  ;;  %v12629_v11 = vld [vmem:[#allocation9 + $0xc18] sm:$0xf0]  ;;  %v14066_v52 = vld [vmem:[#allocation9 + $0xd0c] sm:$0xf]  ;;  %v15321_v4 = vpop.f32.mrf.mxu0 }
 0x486   :  { %8835 = vmatpush.bf16.msrb.mxu1 %v12792_v43  ;;  %v12757_v16 = vld [vmem:[#allocation9 + $0xd18] sm:$0xf0]  ;;  %v15323_v27 = vpop.f32.mrf.mxu1  ;;  %v12632_v54 = vor.u32 %v14034_v58, %v12629_v11  ;;  %v14098_v1 = vld [vmem:[#allocation9 + $0xe0c] sm:$0xf]  ;;  %v15325_v38 = vpop.f32.mrf.mxu3 }
 0x487   :  { %v12760_v22 = vor.u32 %v14066_v52, %v12757_v16  ;;  %v12885_v3 = vld [vmem:[#allocation9 + $0xe18] sm:$0xf0]  ;;  %8855 = vmatpush.bf16.msrb.mxu2 %v12904_v13  ;;  %v14146_v32 = vld [vmem:[#allocation9 + $0xf8c] sm:$0xf] }
 0x488   :  { %8870 = vmatpush.bf16.msrb.mxu3 %v13096_v37  ;;  %v12888_v8 = vor.u32 %v14098_v1, %v12885_v3  ;;  %v13077_v10 = vld [vmem:[#allocation9 + $0xf98] sm:$0xf0]  ;;  %8743 = vmatmul.bf16.vlgmr.msra.gmra.mxu0 %v15544_v0  ;;  %v14142_v55 = vld [vmem:[#allocation9 + $0xf6c] sm:$0xf] }
 0x489   :  { %8817 = vmatpush.bf16.msrb.mxu0 %v12648_v33  ;;  %8762 = vmatmul.bf16.vlgmr.msra.gmra.mxu1 %v15545_v48  ;;  %v13080_v56 = vor.u32 %v14146_v32, %v13077_v10  ;;  %v13061_v26 = vld [vmem:[#allocation9 + $0xf78] sm:$0xf0]  ;;  %v14138_v39 = vld [vmem:[#allocation9 + $0xf4c] sm:$0xf]  ;;  %v8365_v32 = vadd.f32 %v15278_v57, %v15274_v31 }
 0x48a   :  { %8836 = vmatpush.bf16.msrb.mxu1 %v12776_v14  ;;  %8781 = vmatmul.bf16.vlgmr.msra.gmra.mxu2 %v15546_v15  ;;  %v13064_v51 = vor.u32 %v14142_v55, %v13061_v26  ;;  %v15547_v61 = vld [vmem:[#allocation32_spill] sm:$0xff]  ;;  %v14134_v24 = vld [vmem:[#allocation9 + $0xf2c] sm:$0xf] }
 0x48b   :  { %8856 = vmatpush.bf16.msrb.mxu2 %v12888_v8  ;;  %v13045_v2 = vld [vmem:[#allocation9 + $0xf58] sm:$0xf0]  ;;  %v14130_v13 = vld [vmem:[#allocation9 + $0xf0c] sm:$0xf]  ;;  %v8384_v55 = vadd.f32 %v15280_v17, %v8365_v32 }
 0x48c   :  { %8871 = vmatpush.bf16.msrb.mxu3 %v13080_v56  ;;  %v8478_v43 = vpop.f32.mrf.mxu2  ;;  %v13048_v12 = vor.u32 %v14138_v39, %v13045_v2  ;;  %v13029_v25 = vld [vmem:[#allocation9 + $0xf38] sm:$0xf0]  ;;  %v15548_v58 = vld [vmem:[#allocation34_spill] sm:$0xff]  ;;  %v15552_v56 = vld [vmem:[#allocation41_spill] sm:$0xff] }
 0x48d   :  { %8818 = vmatpush.bf16.msrb.mxu0 %v12632_v54  ;;  %v8442_v40 = vpop.f32.mrf.mxu0  ;;  %v13032_v14 = vor.u32 %v14134_v24, %v13029_v25  ;;  %v13013_v6 = vld [vmem:[#allocation9 + $0xf18] sm:$0xf0]  ;;  %v15550_v52 = vld [vmem:[#allocation38_spill] sm:$0xff]  ;;  %v15551_v54 = vld [vmem:[#allocation39_spill] sm:$0xff]  ;;  %v8403_v26 = vadd.f32 %v15288_v28, %v8384_v55  ;;  %v8370_v25 = vadd.f32 %v15300_v5, %v15296_v35 }
 0x48e   :  { %8837 = vmatpush.bf16.msrb.mxu1 %v12760_v22  ;;  %8729 = vmatmul.bf16.gmra.mxu3 %v15547_v61  ;;  %v15331_v47 = vpop.f32.mrf.mxu1  ;;  %v8426_v63 = vpop.f32.mrf.mxu3  ;;  %v15549_v37 = vld [vmem:[#allocation36_spill] sm:$0xff]  ;;  %v13016_v11 = vor.u32 %v14130_v13, %v13013_v6  ;;  %v15553_v15 = vld [vmem:[#allocation42_spill] sm:$0xff]  ;;  %v8367_v61 = vadd.f32 %v15291_v19, %v15285_v21 }
 0x48f   :  { %v8422_v39 = vadd.f32 %v15317_v7, %v8403_v26 }
 0x490   :  { %8872 = vmatpush.bf16.msrb.mxu3 %v13064_v51  ;;  %v8386_v24 = vadd.f32 %v15293_v9, %v8367_v61  ;;  %v8389_v9 = vadd.f32 %v15302_v42, %v8370_v25 }
 0x491   :  { %v8441_v2 = vadd.f32 %v15321_v4, %v8422_v39 }
 0x492   :  { %v8405_v17 = vadd.f32 %v15298_v49, %v8386_v24  ;;  %v8408_v4 = vadd.f32 %v15310_v23, %v8389_v9 }
 0x494   :  { %8873 = vmatpush.bf16.msrb.mxu3 %v13048_v12  ;;  %v8480_v33 = vpop.f32.mrf.mxu2  ;;  %v8424_v21 = vadd.f32 %v15325_v38, %v8405_v17  ;;  %v8427_v38 = vadd.f32 %v8426_v63, %v8408_v4 }
 0x495   :  { %v8445_v50 = vpop.f32.mrf.mxu0 }
 0x496   :  { %v15333_v30 = vpop.f32.mrf.mxu1  ;;  %v15335_v44 = vpop.f32.mrf.mxu3 }
 0x498   :  { %8874 = vmatpush.bf16.msrb.mxu3 %v13032_v14  ;;  %8748 = vmatmul.bf16.gmra.mxu0 %v15548_v58  ;;  %v8443_v14 = vadd.f32 %v8442_v40, %v8424_v21  ;;  %v8446_v58 = vadd.f32 %v8445_v50, %v8427_v38 }
 0x499   :  { %8767 = vmatmul.bf16.gmra.mxu1 %v15549_v37 }
 0x49a   :  { %8786 = vmatmul.bf16.gmra.mxu2 %v15550_v52  ;;  %v8462_v35 = vadd.f32 %v15331_v47, %v8443_v14 }
 0x49c   :  { %8875 = vmatpush.bf16.msrb.mxu3 %v13016_v11  ;;  %v15340_v16 = vpop.f32.mrf.mxu2 }
 0x49d   :  { %v15343_v22 = vpop.f32.mrf.mxu0 }
 0x49e   :  { %8800 = vmatmul.bf16.vlgmr.msra.gmra.mxu3 %v15551_v54  ;;  %v15345_v1 = vpop.f32.mrf.mxu1  ;;  %v8497_v3 = vpop.f32.mrf.mxu3 }
 0x4a4   :  { %v15347_v8 = vpop.f32.mrf.mxu2 }
 0x4a5   :  { %v8516_v10 = vpop.f32.mrf.mxu0 }
 0x4a6   :  { %v8535_v0 = vpop.f32.mrf.mxu1  ;;  %v8499_v48 = vpop.f32.mrf.mxu3 }
 0x4a8   :  { %8819 = vmatmul.bf16.vlgmr.msrb.gmra.mxu0 %v15552_v56 }
 0x4a9   :  { %8838 = vmatmul.bf16.vlgmr.msrb.gmra.mxu1 %v15553_v15 }
 0x4aa   :  { %8857 = vmatmul.bf16.vlgmr.msrb.gmra.mxu2 %v15525_v59  ;;  %v8460_v59 = vadd.f32 %v15323_v27, %v8441_v2  ;;  %v8372_v27 = vadd.f32 %v15313_v29, %v15307_v36  ;;  %v8465_v36 = vadd.f32 %v15333_v30, %v8446_v58 }
 0x4ac   :  { %v8554_v51 = vpop.f32.mrf.mxu2  ;;  %v8479_v19 = vadd.f32 %v8478_v43, %v8460_v59  ;;  %v8481_v43 = vadd.f32 %v8480_v33, %v8462_v35  ;;  %v8391_v23 = vadd.f32 %v15315_v34, %v8372_v27  ;;  %v8484_v33 = vadd.f32 %v15340_v16, %v8465_v36 }
 0x4ad   :  { %v8518_v31 = vpop.f32.mrf.mxu0 }
 0x4ae   :  { %8805 = vmatmul.bf16.gmra.mxu3 %v15526_v46  ;;  %v8537_v57 = vpop.f32.mrf.mxu1  ;;  %v8502_v12 = vpop.f32.mrf.mxu3  ;;  %v8498_v13 = vadd.f32 %v8497_v3, %v8479_v19  ;;  %v8500_v42 = vadd.f32 %v8499_v48, %v8481_v43  ;;  %v8410_v54 = vadd.f32 %v15319_v20, %v8391_v23 }
 0x4af   :  { %v8503_v34 = vadd.f32 %v8502_v12, %v8484_v33 }
 0x4b0   :  { %v8517_v49 = vadd.f32 %v8516_v10, %v8498_v13  ;;  %v8519_v47 = vadd.f32 %v8518_v31, %v8500_v42 }
 0x4b2   :  { %v8536_v40 = vadd.f32 %v8535_v0, %v8517_v49  ;;  %v8538_v50 = vadd.f32 %v8537_v57, %v8519_v47 }
 0x4b4   :  { %v8556_v28 = vpop.f32.mrf.mxu2  ;;  %v8555_v37 = vadd.f32 %v8554_v51, %v8536_v40 }
 0x4b5   :  { %v8521_v7 = vpop.f32.mrf.mxu0  ;;  %v8557_v0 = vadd.f32 %v8556_v28, %v8538_v50 }
 0x4b6   :  { %v8540_v46 = vpop.f32.mrf.mxu1  ;;  %v8504_v6 = vpop.f32.mrf.mxu3  ;;  %v8522_v56 = vadd.f32 %v8521_v7, %v8503_v34 }
 0x4b8   :  { %8824 = vmatmul.bf16.gmra.mxu0 %v14738_v41  ;;  %v8541_v26 = vadd.f32 %v8540_v46, %v8522_v56 }
 0x4b9   :  { %8843 = vmatmul.bf16.gmra.mxu1 %v14860_v18 }
 0x4ba   :  { %8862 = vmatmul.bf16.gmra.mxu2 %v14862_v62  ;;  %v8942_v62 = vperm.slane %v15227_v45, 2 }
 0x4bc   :  { %v8559_v5 = vpop.f32.mrf.mxu2 }
 0x4bd   :  { %v8523_v41 = vpop.f32.mrf.mxu0  ;;  %v8560_v31 = vadd.f32 %v8559_v5, %v8541_v26 }
 0x4be   :  { %8876 = vmatmul.bf16.vlgmr.msrb.gmra.mxu3 %v14868_v60  ;;  %v8542_v18 = vpop.f32.mrf.mxu1  ;;  %v8573_v11 = vpop.f32.mrf.mxu3  ;;  %v8429_v60 = vadd.f32 %v15335_v44, %v8410_v54 }
 0x4bf   :  { %v8574_v52 = vadd.f32 %v8573_v11, %v8555_v37 }
 0x4c0   :  { %v8448_v10 = vadd.f32 %v15343_v22, %v8429_v60 }
 0x4c1   :  { %v8950_v29 = vadd.f32 %v8942_v62, %v8574_v52 }
 0x4c2   :  { %v8467_v30 = vadd.f32 %v15345_v1, %v8448_v10 }
 0x4c3   :  { %8966 = vst [vmem:[#allocation12 + $0x10] sm:$0xff] %v8950_v29 }
 0x4c4   :  { %v8561_v63 = vpop.f32.mrf.mxu2  ;;  %v8486_v44 = vadd.f32 %v15347_v8, %v8467_v30 }
 0x4c5   :  { %v8592_v3 = vpop.f32.mrf.mxu0 }
 0x4c6   :  { %v8611_v32 = vpop.f32.mrf.mxu1  ;;  %v8575_v48 = vpop.f32.mrf.mxu3  ;;  %v8505_v22 = vadd.f32 %v8504_v6, %v8486_v44 }
 0x4c7   :  { %v8612_v45 = vadd.f32 %v8611_v32, %v8592_v3  ;;  %v8576_v20 = vadd.f32 %v8575_v48, %v8557_v0 }
 0x4c8   :  { %v8524_v2 = vadd.f32 %v8523_v41, %v8505_v22 }
 0x4c9   :  { %v8954_v15 = vadd.f32 %v8942_v62, %v8576_v20 }
 0x4ca   :  { %v8543_v1 = vadd.f32 %v8542_v18, %v8524_v2 }
 0x4cb   :  { %8970 = vst [vmem:[#allocation12 + $0x30] sm:$0xff] %v8954_v15 }
 0x4cc   :  { %v8630_v55 = vpop.f32.mrf.mxu2  ;;  %v8562_v21 = vadd.f32 %v8561_v63, %v8543_v1 }
 0x4cd   :  { %v8631_v16 = vadd.f32 %v8630_v55, %v8612_v45  ;;  %v8594_v51 = vpop.f32.mrf.mxu0 }
 0x4ce   :  { %8881 = vmatmul.bf16.gmra.mxu3 %v15531_v53  ;;  %v8613_v61 = vpop.f32.mrf.mxu1 }
 0x4cf   :  { %v8614_v39 = vadd.f32 %v8613_v61, %v8594_v51 }
 0x4d0   :  { %v8578_v57 = vpop.f32.mrf.mxu3 }
 0x4d1   :  { %v8579_v12 = vadd.f32 %v8578_v57, %v8560_v31 }
 0x4d3   :  { %v8958_v24 = vadd.f32 %v8942_v62, %v8579_v12 }
 0x4d4   :  { %v8632_v17 = vpop.f32.mrf.mxu2 }
 0x4d5   :  { %8974 = vst [vmem:[#allocation12 + $0x50] sm:$0xff] %v8958_v24  ;;  %v8633_v59 = vadd.f32 %v8632_v17, %v8614_v39  ;;  %v8597_v28 = vpop.f32.mrf.mxu0 }
 0x4d6   :  { %v8616_v8 = vpop.f32.mrf.mxu1 }
 0x4d7   :  { %v8617_v25 = vadd.f32 %v8616_v8, %v8597_v28 }
 0x4d8   :  { %v8580_v19 = vpop.f32.mrf.mxu3 }
 0x4d9   :  { %v8581_v7 = vadd.f32 %v8580_v19, %v8562_v21 }
 0x4db   :  { %v8962_v53 = vadd.f32 %v8942_v62, %v8581_v7 }
 0x4dc   :  { %v8635_v46 = vpop.f32.mrf.mxu2 }
 0x4dd   :  { %8978 = vst [vmem:[#allocation12 + $0x70] sm:$0xff] %v8962_v53  ;;  %v8636_v14 = vadd.f32 %v8635_v46, %v8617_v25  ;;  %v8599_v13 = vpop.f32.mrf.mxu0 }
 0x4de   :  { %v8618_v6 = vpop.f32.mrf.mxu1 }
 0x4df   :  { %v8619_v9 = vadd.f32 %v8618_v6, %v8599_v13 }
 0x4e0   :  { %v8649_v49 = vpop.f32.mrf.mxu3 }
 0x4e1   :  { %v8650_v4 = vadd.f32 %v8649_v49, %v8631_v16 }
 0x4e4   :  { %v8637_v35 = vpop.f32.mrf.mxu2 }
 0x4e5   :  { %v8638_v5 = vadd.f32 %v8637_v35, %v8619_v9  ;;  %v8668_v27 = vpop.f32.mrf.mxu0 }
 0x4e6   :  { %v8687_v38 = vpop.f32.mrf.mxu1  ;;  %v8669_v55 = vadd.f32 %v8668_v27, %v8650_v4 }
 0x4e8   :  { %v8651_v43 = vpop.f32.mrf.mxu3  ;;  %v8688_v16 = vadd.f32 %v8687_v38, %v8669_v55 }
 0x4e9   :  { %v8652_v40 = vadd.f32 %v8651_v43, %v8633_v59 }
 0x4ec   :  { %v8706_v41 = vpop.f32.mrf.mxu2 }
 0x4ed   :  { %v8670_v18 = vpop.f32.mrf.mxu0  ;;  %v8707_v51 = vadd.f32 %v8706_v41, %v8688_v16  ;;  %v14178_v41 = vld [vmem:[#allocation11] sm:$0xf] }
 0x4ee   :  { %v8689_v58 = vpop.f32.mrf.mxu1  ;;  %v8671_v22 = vadd.f32 %v8670_v18, %v8652_v40  ;;  %v8943_v18 = vperm.slane %v14178_v41, 3 }
 0x4f0   :  { %v8690_v24 = vadd.f32 %v8689_v58, %v8671_v22 }
 0x4f1   :  { %v8654_v42 = vpop.f32.mrf.mxu3 }
 0x4f2   :  { %v8655_v37 = vadd.f32 %v8654_v42, %v8636_v14 }
 0x4f4   :  { %v8708_v62 = vpop.f32.mrf.mxu2 }
 0x4f5   :  { %v8673_v11 = vpop.f32.mrf.mxu0  ;;  %v8709_v17 = vadd.f32 %v8708_v62, %v8690_v24 }
 0x4f6   :  { %v8692_v47 = vpop.f32.mrf.mxu1  ;;  %v8674_v59 = vadd.f32 %v8673_v11, %v8655_v37 }
 0x4f8   :  { %v8693_v46 = vadd.f32 %v8692_v47, %v8674_v59 }
 0x4f9   :  { %v8656_v23 = vpop.f32.mrf.mxu3 }
 0x4fa   :  { %v8657_v52 = vadd.f32 %v8656_v23, %v8638_v5 }
 0x4fd   :  { %v8711_v54 = vpop.f32.mrf.mxu2  ;;  %v8675_v36 = vpop.f32.mrf.mxu0 }
 0x4fe   :  { %v8694_v63 = vpop.f32.mrf.mxu1  ;;  %v8712_v6 = vadd.f32 %v8711_v54, %v8693_v46  ;;  %v8676_v49 = vadd.f32 %v8675_v36, %v8657_v52 }
 0x500   :  { %v8695_v37 = vadd.f32 %v8694_v63, %v8676_v49 }
 0x501   :  { %v8725_v29 = vpop.f32.mrf.mxu3 }
 0x502   :  { %v8726_v31 = vadd.f32 %v8725_v29, %v8707_v51 }
 0x505   :  { %v8713_v60 = vpop.f32.mrf.mxu2  ;;  %v8744_v33 = vpop.f32.mrf.mxu0 }
 0x506   :  { %v8763_v3 = vpop.f32.mrf.mxu1  ;;  %v8745_v57 = vadd.f32 %v8744_v33, %v8726_v31  ;;  %v8714_v23 = vadd.f32 %v8713_v60, %v8695_v37 }
 0x508   :  { %v8764_v1 = vadd.f32 %v8763_v3, %v8745_v57 }
 0x509   :  { %v8727_v50 = vpop.f32.mrf.mxu3 }
 0x50a   :  { %v8728_v28 = vadd.f32 %v8727_v50, %v8709_v17 }
 0x50d   :  { %v8782_v32 = vpop.f32.mrf.mxu2  ;;  %v8746_v10 = vpop.f32.mrf.mxu0 }
 0x50e   :  { %v8765_v34 = vpop.f32.mrf.mxu1  ;;  %v8783_v8 = vadd.f32 %v8782_v32, %v8764_v1  ;;  %v8747_v19 = vadd.f32 %v8746_v10, %v8728_v28 }
 0x510   :  { %v8766_v9 = vadd.f32 %v8765_v34, %v8747_v19 }
 0x511   :  { %v8730_v45 = vpop.f32.mrf.mxu3 }
 0x512   :  { %v8731_v4 = vadd.f32 %v8730_v45, %v8712_v6 }
 0x515   :  { %v8784_v0 = vpop.f32.mrf.mxu2  ;;  %v8749_v56 = vpop.f32.mrf.mxu0 }
 0x516   :  { %v8768_v30 = vpop.f32.mrf.mxu1  ;;  %v8785_v35 = vadd.f32 %v8784_v0, %v8766_v9  ;;  %v8750_v27 = vadd.f32 %v8749_v56, %v8731_v4 }
 0x518   :  { %v8769_v47 = vadd.f32 %v8768_v30, %v8750_v27 }
 0x519   :  { %v8732_v48 = vpop.f32.mrf.mxu3 }
 0x51a   :  { %v8733_v33 = vadd.f32 %v8732_v48, %v8714_v23 }
 0x51d   :  { %v8787_v15 = vpop.f32.mrf.mxu2  ;;  %v8751_v44 = vpop.f32.mrf.mxu0 }
 0x51e   :  { %v8770_v61 = vpop.f32.mrf.mxu1  ;;  %v8788_v52 = vadd.f32 %v8787_v15, %v8769_v47  ;;  %v8752_v50 = vadd.f32 %v8751_v44, %v8733_v33 }
 0x521   :  { %v8801_v20 = vpop.f32.mrf.mxu3 }
 0x522   :  { %v8802_v7 = vadd.f32 %v8801_v20, %v8783_v8  ;;  %v8771_v20 = vadd.f32 %v8770_v61, %v8752_v50 }
 0x525   :  { %v8789_v39 = vpop.f32.mrf.mxu2  ;;  %v8820_v2 = vpop.f32.mrf.mxu0 }
 0x526   :  { %v8839_v25 = vpop.f32.mrf.mxu1  ;;  %v8821_v14 = vadd.f32 %v8820_v2, %v8802_v7  ;;  %v8790_v55 = vadd.f32 %v8789_v39, %v8771_v20 }
 0x528   :  { %v8840_v5 = vadd.f32 %v8839_v25, %v8821_v14 }
 0x529   :  { %v8803_v26 = vpop.f32.mrf.mxu3 }
 0x52a   :  { %v8804_v38 = vadd.f32 %v8803_v26, %v8785_v35 }
 0x52d   :  { %v8858_v21 = vpop.f32.mrf.mxu2  ;;  %v8822_v13 = vpop.f32.mrf.mxu0 }
 0x52e   :  { %v8859_v43 = vadd.f32 %v8858_v21, %v8840_v5  ;;  %v8841_v40 = vpop.f32.mrf.mxu1  ;;  %v8823_v62 = vadd.f32 %v8822_v13, %v8804_v38 }
 0x530   :  { %v8842_v36 = vadd.f32 %v8841_v40, %v8823_v62 }
 0x531   :  { %v8806_v12 = vpop.f32.mrf.mxu3 }
 0x532   :  { %v8807_v3 = vadd.f32 %v8806_v12, %v8788_v52 }
 0x535   :  { %v8860_v58 = vpop.f32.mrf.mxu2  ;;  %v8825_v54 = vpop.f32.mrf.mxu0 }
 0x536   :  { %v8861_v32 = vadd.f32 %v8860_v58, %v8842_v36  ;;  %v8826_v10 = vadd.f32 %v8825_v54, %v8807_v3  ;;  %v8844_v0 = vpop.f32.mrf.mxu1 }
 0x538   :  { %v8845_v26 = vadd.f32 %v8844_v0, %v8826_v10 }
 0x539   :  { %v8808_v53 = vpop.f32.mrf.mxu3 }
 0x53a   :  { %v8809_v30 = vadd.f32 %v8808_v53, %v8790_v55 }
 0x53d   :  { %v8863_v56 = vpop.f32.mrf.mxu2  ;;  %v8827_v60 = vpop.f32.mrf.mxu0 }
 0x53e   :  { %v8864_v16 = vadd.f32 %v8863_v56, %v8845_v26  ;;  %v8828_v15 = vadd.f32 %v8827_v60, %v8809_v30  ;;  %v8846_v44 = vpop.f32.mrf.mxu1 }
 0x540   :  { %v8847_v57 = vadd.f32 %v8846_v44, %v8828_v15 }
 0x541   :  { %v8877_v42 = vpop.f32.mrf.mxu3 }
 0x542   :  { %v8878_v11 = vadd.f32 %v8877_v42, %v8859_v43 }
 0x544   :  { %v8951_v29 = vadd.f32 %v8943_v18, %v8878_v11 }
 0x545   :  { %v8865_v31 = vpop.f32.mrf.mxu2 }
 0x546   :  { %8967 = vst [vmem:[#allocation12 + $0x18] sm:$0xff] %v8951_v29  ;;  %v8866_v2 = vadd.f32 %v8865_v31, %v8847_v57 }
 0x549   :  { %v8879_v45 = vpop.f32.mrf.mxu3 }
 0x54a   :  { %v8880_v34 = vadd.f32 %v8879_v45, %v8861_v32 }
 0x54c   :  { %v8955_v63 = vadd.f32 %v8943_v18, %v8880_v34 }
 0x54e   :  { %8971 = vst [vmem:[#allocation12 + $0x38] sm:$0xff] %v8955_v63 }
 0x551   :  { %v8882_v48 = vpop.f32.mrf.mxu3 }
 0x552   :  { %v8883_v51 = vadd.f32 %v8882_v48, %v8864_v16 }
 0x554   :  { %v8959_v22 = vadd.f32 %v8943_v18, %v8883_v51 }
 0x556   :  { %8975 = vst [vmem:[#allocation12 + $0x58] sm:$0xff] %v8959_v22 }
 0x559   :  { %v8884_v61 = vpop.f32.mrf.mxu3 }
 0x55a   :  { %v8885_v39 = vadd.f32 %v8884_v61, %v8866_v2 }
 0x55c   :  { %v8963_v12 = vadd.f32 %v8943_v18, %v8885_v39 }
 0x55e   :  { %8979 = vst [vmem:[#allocation12 + $0x78] sm:$0xff] %v8963_v12 }
 0x55f   :  { %8992 = dma.vmem_to_hbm [thread:$0]  %s8985_s4, 2048, %s8987_s21, [#allocation5], %s14341_s22, %s14341_s22, %s14342_s23  }
 0x560   :  { %14329 = dma.done.wait [#allocation5], 2048  }
 0x561   :  { %14330 = vsyncadd [#allocation5], 4294965248 }
 0x562   :  { %8997 = vsyncpa [#allocation4], 1 }
 0x563   :  { %8998 = vsyncpa [#allocation7], 1 }
 0x564   :  { %8999 = vsyncpa [#allocation10], 1 }
 0x565   :  { %9000 = vsyncpa [#allocation5], 1 }

</bundles_post_ra>
